<compile_context>
chip_gen: v7x
topology: tpu7x:2x2x1
jax: 0.10.0
libtpu: 0.0.40
codegen_flags: <defaults>
</compile_context>

<pallas_src>
import functools

import jax
import jax.numpy as jnp
from jax import lax
from jax.experimental import pallas as pl
from jax.experimental.pallas import tpu as pltpu


FILTER_SIZE = 128                                   # trunk channel width
FEATURE_DIM = 64                                    # ConvBlock bottleneck width
PREP_K = 5                                          # prepare Conv1d kernel size
N_CLASSES = 20                                      # int(400 // int(0.2 * 100))
BLOCK_CFGS = ((4, 64), (4, 32), (2, 16), (2, 8))    # (pool_size, dilation) x 4


# ------------------------------ Pallas kernel ------------------------------ #
def _cnn_kernel(block_cfgs, *refs):
    """One batch element through the whole network.

    refs layout:
      [x_ref, wp, bp, (w1, b1, w2, b2, w3, b3) * n_blocks, wh, bh, out_ref]
    x_ref: (L0, 257) f32; out_ref: (1, N_CLASSES) f32 (softmax scores).
    """
    n_blk = len(block_cfgs)
    x_ref = refs[0]
    wp_ref, bp_ref = refs[1], refs[2]
    blk_refs = refs[3:3 + 6 * n_blk]
    wh_ref, bh_ref = refs[3 + 6 * n_blk], refs[4 + 6 * n_blk]
    out_ref = refs[-1]

    f32 = jnp.float32
    x = x_ref[...]                                    # (L0, 257)
    L0 = x.shape[0]
    ktaps = wp_ref.shape[0]                           # 5
    L = L0 - (ktaps - 1)
    C = wp_ref.shape[2]                               # 128

    # --- prepare: Conv1d(257 -> 128, k=5, valid) + ELU -------------------- #
    # out[l] = sum_t x[l + t] @ wp[t]  (shift the narrow products, not x).
    acc = jnp.zeros((L, C), f32)
    for t in range(ktaps):                            # 5 matmuls, K=257, N=128
        p_t = jnp.dot(x, wp_ref[t], preferred_element_type=f32)   # (L0, 128)
        acc = acc + p_t[t:t + L, :]
    h = acc + bp_ref[...]
    h = jnp.where(h > 0, h, jnp.exp(h) - 1.0)         # ELU(alpha=1)

    # --- ConvBlocks -------------------------------------------------------- #
    for i, (pool, d) in enumerate(block_cfgs):
        w1, b1, w2, b2, w3, b3 = blk_refs[6 * i:6 * i + 6]
        res = h
        Lc = h.shape[0]

        # conv1: 1x1 (C -> F)
        y1 = jnp.dot(h, w1[...], preferred_element_type=f32) + b1[...]
        F = y1.shape[1]

        # conv2: k=3, dilation d, padding='same' -> taps at l-d, l, l+d.
        y2 = jnp.dot(y1, w2[1], preferred_element_type=f32) + b2[...]
        if d < Lc:   # static: if d >= Lc the side taps only ever see zero pad
            zeros = jnp.zeros((d, F), f32)
            # output rows d..Lc use input row l-d; rows 0..Lc-d use row l+d
            prev = jnp.dot(y1[:Lc - d, :], w2[0], preferred_element_type=f32)
            nxt = jnp.dot(y1[d:, :], w2[2], preferred_element_type=f32)
            y2 = y2 + jnp.concatenate([zeros, prev], axis=0)
            y2 = y2 + jnp.concatenate([nxt, zeros], axis=0)

        # conv3: 1x1 (F -> C)
        y3 = jnp.dot(y2, w3[...], preferred_element_type=f32) + b3[...]

        # residual add -> MaxPool1d(pool) (floor) -> ReLU
        z = res + y3
        Lp = (Lc // pool) * pool
        zp = z[:Lp, :].reshape(Lp // pool, pool, z.shape[1])
        h = jnp.maximum(jnp.max(zp, axis=1), 0.0)

    # --- head: AdaptiveAvgPool1d(1) -> Linear(128 -> 20) -> Softmax -------- #
    pooled = jnp.mean(h, axis=0, keepdims=True)                       # (1, 128)
    logits = jnp.dot(pooled, wh_ref[...],
                     preferred_element_type=f32) + bh_ref[...]        # (1, 20)
    m = jnp.max(logits, axis=-1, keepdims=True)
    e = jnp.exp(logits - m)
    probs = e / jnp.sum(e, axis=-1, keepdims=True)
    out_ref[...] = probs.astype(out_ref.dtype)


# --------------------------------- wrapper --------------------------------- #
def cnn_class_forward(x_nlc, params):
    """x_nlc: (N, L, 257) f32 -> (scalar 0, (N, 20) softmax scores)."""
    N, L0, C_in = x_nlc.shape
    n_out = params["wh"].shape[0]

    # Pre-transpose weights so the kernel computes row-major (L, Cin) @ (Cin, Cout).
    weights = [jnp.transpose(params["wp"], (2, 1, 0)),        # (5, 257, 128)
               params["bp"].reshape(1, -1)]
    for i in range(len(BLOCK_CFGS)):
        p = params[f"blk{i}"]
        weights += [
            p["w1"][:, :, 0].T, p["b1"].reshape(1, -1),       # (128, 64), (1, 64)
            jnp.transpose(p["w2"], (2, 1, 0)),                # (3, 64, 64)
            p["b2"].reshape(1, -1),
            p["w3"][:, :, 0].T, p["b3"].reshape(1, -1),       # (64, 128), (1, 128)
        ]
    weights += [params["wh"].T, params["bh"].reshape(1, -1)]  # (128, 20), (1, 20)

    def full_spec(arr):
        # Constant index_map -> weight block stays resident in VMEM across grid.
        return pl.BlockSpec(arr.shape, lambda n, _nd=arr.ndim: (0,) * _nd)

    out = pl.pallas_call(
        functools.partial(_cnn_kernel, BLOCK_CFGS),
        out_shape=jax.ShapeDtypeStruct((N, 1, n_out), jnp.float32),
        grid_spec=pltpu.PrefetchScalarGridSpec(
            num_scalar_prefetch=0,
            grid=(N,),                                        # one sample per step
            in_specs=[pl.BlockSpec((None, L0, C_in), lambda n: (n, 0, 0))]
                     + [full_spec(w) for w in weights],
            out_specs=pl.BlockSpec((None, 1, n_out), lambda n: (n, 0, 0)),
        ),
        compiler_params=pltpu.CompilerParams(
            dimension_semantics=("parallel",)),
    )(x_nlc, *weights)

    return jnp.zeros((), jnp.int32), out[:, 0, :]


# ----------------------------- pure-JAX reference --------------------------- #
def _conv1d_ref(x, w, b, *, dilation=1, same=False):
    """x: (N, Cin, L); w: (Cout, Cin, K); b: (Cout,). PyTorch Conv1d semantics."""
    k = w.shape[2]
    pad = [(((k - 1) // 2) * dilation,) * 2] if same else [(0, 0)]
    y = lax.conv_general_dilated(
        x, w, window_strides=(1,), padding=pad, rhs_dilation=(dilation,),
        dimension_numbers=("NCH", "OIH", "NCH"))
    return y + b[None, :, None]


def cnn_class_reference(x_nlc, params):
    x = jnp.transpose(x_nlc, (0, 2, 1))                       # (N, 257, L)
    h = jax.nn.elu(_conv1d_ref(x, params["wp"], params["bp"]))
    for i, (pool, d) in enumerate(BLOCK_CFGS):
        p = params[f"blk{i}"]
        res = h
        a = _conv1d_ref(h, p["w1"], p["b1"])
        a = _conv1d_ref(a, p["w2"], p["b2"], dilation=d, same=True)
        a = _conv1d_ref(a, p["w3"], p["b3"])
        z = res + a
        z = lax.reduce_window(z, -jnp.inf, lax.max,
                              (1, 1, pool), (1, 1, pool), "VALID")
        h = jax.nn.relu(z)
    pooled = jnp.mean(h, axis=2)                              # (N, 128)
    logits = pooled @ params["wh"].T + params["bh"]
    return jax.nn.softmax(logits, axis=-1)


# ----------------------------------- main ----------------------------------- #
if __name__ == "__main__":
    # Small but valid shapes: L shrinks 260 -> 256 -> 64 -> 16 -> 8 -> 4.
    N, L_IN, C_IN = 2, 260, 257

    key = jax.random.PRNGKey(0)
    keys = iter(jax.random.split(key, 40))

    def uinit(k, shape, fan_in):
        b = 1.0 / (fan_in ** 0.5)
        return jax.random.uniform(k, shape, jnp.float32, -b, b)

    params = {
        "wp": uinit(next(keys), (FILTER_SIZE, C_IN, PREP_K), C_IN * PREP_K),
        "bp": uinit(next(keys), (FILTER_SIZE,), C_IN * PREP_K),
    }
    for i in range(len(BLOCK_CFGS)):
        params[f"blk{i}"] = {
            "w1": uinit(next(keys), (FEATURE_DIM, FILTER_SIZE, 1), FILTER_SIZE),
            "b1": uinit(next(keys), (FEATURE_DIM,), FILTER_SIZE),
            "w2": uinit(next(keys), (FEATURE_DIM, FEATURE_DIM, 3), FEATURE_DIM * 3),
            "b2": uinit(next(keys), (FEATURE_DIM,), FEATURE_DIM * 3),
            "w3": uinit(next(keys), (FILTER_SIZE, FEATURE_DIM, 1), FEATURE_DIM),
            "b3": uinit(next(keys), (FILTER_SIZE,), FEATURE_DIM),
        }
    params["wh"] = uinit(next(keys), (N_CLASSES, FILTER_SIZE), FILTER_SIZE)
    params["bh"] = uinit(next(keys), (N_CLASSES,), FILTER_SIZE)

    x = jax.random.normal(next(keys), (N, L_IN, C_IN), jnp.float32)

    _zero, scores = cnn_class_forward(x, params)
    scores = jax.block_until_ready(scores)

    ref = cnn_class_reference(x, params)
    assert scores.shape == (N, N_CLASSES), scores.shape
    assert jnp.allclose(jnp.sum(scores, axis=-1), 1.0, atol=1e-3)
    # Tolerance covers default-precision (single-pass bf16) MXU matmuls.
    assert jnp.allclose(scores, ref, atol=2e-2, rtol=2e-2), \
        float(jnp.max(jnp.abs(scores - ref)))
    print("KERNEL_OK")
</pallas_src>

<mosaic_0001>
module attributes {stable_mosaic.version = 11 : i64} {
  func.func @_cnn_kernel(%arg0: i32, %arg1: memref<1x260x257xf32, #tpu.memory_space<vmem>>, %arg2: memref<5x257x128xf32, #tpu.memory_space<vmem>>, %arg3: memref<1x128xf32, #tpu.memory_space<vmem>>, %arg4: memref<128x64xf32, #tpu.memory_space<vmem>>, %arg5: memref<1x64xf32, #tpu.memory_space<vmem>>, %arg6: memref<3x64x64xf32, #tpu.memory_space<vmem>>, %arg7: memref<1x64xf32, #tpu.memory_space<vmem>>, %arg8: memref<64x128xf32, #tpu.memory_space<vmem>>, %arg9: memref<1x128xf32, #tpu.memory_space<vmem>>, %arg10: memref<128x64xf32, #tpu.memory_space<vmem>>, %arg11: memref<1x64xf32, #tpu.memory_space<vmem>>, %arg12: memref<3x64x64xf32, #tpu.memory_space<vmem>>, %arg13: memref<1x64xf32, #tpu.memory_space<vmem>>, %arg14: memref<64x128xf32, #tpu.memory_space<vmem>>, %arg15: memref<1x128xf32, #tpu.memory_space<vmem>>, %arg16: memref<128x64xf32, #tpu.memory_space<vmem>>, %arg17: memref<1x64xf32, #tpu.memory_space<vmem>>, %arg18: memref<3x64x64xf32, #tpu.memory_space<vmem>>, %arg19: memref<1x64xf32, #tpu.memory_space<vmem>>, %arg20: memref<64x128xf32, #tpu.memory_space<vmem>>, %arg21: memref<1x128xf32, #tpu.memory_space<vmem>>, %arg22: memref<128x64xf32, #tpu.memory_space<vmem>>, %arg23: memref<1x64xf32, #tpu.memory_space<vmem>>, %arg24: memref<3x64x64xf32, #tpu.memory_space<vmem>>, %arg25: memref<1x64xf32, #tpu.memory_space<vmem>>, %arg26: memref<64x128xf32, #tpu.memory_space<vmem>>, %arg27: memref<1x128xf32, #tpu.memory_space<vmem>>, %arg28: memref<128x20xf32, #tpu.memory_space<vmem>>, %arg29: memref<1x20xf32, #tpu.memory_space<vmem>>, %arg30: memref<1x1x20xf32, #tpu.memory_space<vmem>>) attributes {dimension_semantics = [#tpu.dimension_semantics<parallel>], iteration_bounds = array<i64: 2>, scalar_prefetch = 0 : i64, scratch_operands = 0 : i64, tpu.core_type = #tpu.core_type<tc>, window_params = [{transform_indices = @transform_0, window_bounds = array<i64: 1, 260, 257>}, {pipeline_mode = #tpu.pipeline_mode<synchronous>, transform_indices = @transform_1, window_bounds = array<i64: 5, 257, 128>}, {pipeline_mode = #tpu.pipeline_mode<synchronous>, transform_indices = @transform_2, window_bounds = array<i64: 1, 128>}, {pipeline_mode = #tpu.pipeline_mode<synchronous>, transform_indices = @transform_3, window_bounds = array<i64: 128, 64>}, {pipeline_mode = #tpu.pipeline_mode<synchronous>, transform_indices = @transform_4, window_bounds = array<i64: 1, 64>}, {pipeline_mode = #tpu.pipeline_mode<synchronous>, transform_indices = @transform_5, window_bounds = array<i64: 3, 64, 64>}, {pipeline_mode = #tpu.pipeline_mode<synchronous>, transform_indices = @transform_6, window_bounds = array<i64: 1, 64>}, {pipeline_mode = #tpu.pipeline_mode<synchronous>, transform_indices = @transform_7, window_bounds = array<i64: 64, 128>}, {pipeline_mode = #tpu.pipeline_mode<synchronous>, transform_indices = @transform_8, window_bounds = array<i64: 1, 128>}, {pipeline_mode = #tpu.pipeline_mode<synchronous>, transform_indices = @transform_9, window_bounds = array<i64: 128, 64>}, {pipeline_mode = #tpu.pipeline_mode<synchronous>, transform_indices = @transform_10, window_bounds = array<i64: 1, 64>}, {pipeline_mode = #tpu.pipeline_mode<synchronous>, transform_indices = @transform_11, window_bounds = array<i64: 3, 64, 64>}, {pipeline_mode = #tpu.pipeline_mode<synchronous>, transform_indices = @transform_12, window_bounds = array<i64: 1, 64>}, {pipeline_mode = #tpu.pipeline_mode<synchronous>, transform_indices = @transform_13, window_bounds = array<i64: 64, 128>}, {pipeline_mode = #tpu.pipeline_mode<synchronous>, transform_indices = @transform_14, window_bounds = array<i64: 1, 128>}, {pipeline_mode = #tpu.pipeline_mode<synchronous>, transform_indices = @transform_15, window_bounds = array<i64: 128, 64>}, {pipeline_mode = #tpu.pipeline_mode<synchronous>, transform_indices = @transform_16, window_bounds = array<i64: 1, 64>}, {pipeline_mode = #tpu.pipeline_mode<synchronous>, transform_indices = @transform_17, window_bounds = array<i64: 3, 64, 64>}, {pipeline_mode = #tpu.pipeline_mode<synchronous>, transform_indices = @transform_18, window_bounds = array<i64: 1, 64>}, {pipeline_mode = #tpu.pipeline_mode<synchronous>, transform_indices = @transform_19, window_bounds = array<i64: 64, 128>}, {pipeline_mode = #tpu.pipeline_mode<synchronous>, transform_indices = @transform_20, window_bounds = array<i64: 1, 128>}, {pipeline_mode = #tpu.pipeline_mode<synchronous>, transform_indices = @transform_21, window_bounds = array<i64: 128, 64>}, {pipeline_mode = #tpu.pipeline_mode<synchronous>, transform_indices = @transform_22, window_bounds = array<i64: 1, 64>}, {pipeline_mode = #tpu.pipeline_mode<synchronous>, transform_indices = @transform_23, window_bounds = array<i64: 3, 64, 64>}, {pipeline_mode = #tpu.pipeline_mode<synchronous>, transform_indices = @transform_24, window_bounds = array<i64: 1, 64>}, {pipeline_mode = #tpu.pipeline_mode<synchronous>, transform_indices = @transform_25, window_bounds = array<i64: 64, 128>}, {pipeline_mode = #tpu.pipeline_mode<synchronous>, transform_indices = @transform_26, window_bounds = array<i64: 1, 128>}, {pipeline_mode = #tpu.pipeline_mode<synchronous>, transform_indices = @transform_27, window_bounds = array<i64: 128, 20>}, {pipeline_mode = #tpu.pipeline_mode<synchronous>, transform_indices = @transform_28, window_bounds = array<i64: 1, 20>}, {transform_indices = @transform_29, window_bounds = array<i64: 1, 1, 20>}]} {
    %c0 = arith.constant 0 : index
    %c0_0 = arith.constant 0 : index
    %c0_1 = arith.constant 0 : index
    %0 = vector.load %arg1[%c0, %c0_0, %c0_1] : memref<1x260x257xf32, #tpu.memory_space<vmem>>, vector<1x260x257xf32>
    %1 = vector.shape_cast %0 : vector<1x260x257xf32> to vector<260x257xf32>
    %cst = arith.constant 0.000000e+00 : f32
    %2 = vector.broadcast %cst : f32 to vector<256x128xf32>
    %c0_2 = arith.constant 0 : index
    %c0_3 = arith.constant 0 : index
    %c0_4 = arith.constant 0 : index
    %3 = vector.load %arg2[%c0_2, %c0_3, %c0_4] : memref<5x257x128xf32, #tpu.memory_space<vmem>>, vector<1x257x128xf32>
    %4 = vector.shape_cast %3 : vector<1x257x128xf32> to vector<257x128xf32>
    %cst_5 = arith.constant dense<0.000000e+00> : vector<260x128xf32>
    %5 = tpu.matmul %1, %4, %cst_5 {dimension_numbers = #tpu.dot_dimension_numbers<[1], [0], [0], [1], [0, 0, 1, 1], [], []>} : vector<260x257xf32>, vector<257x128xf32>, vector<260x128xf32> -> vector<260x128xf32>
    %6 = vector.extract_strided_slice %5 {offsets = [0, 0], sizes = [256, 128], strides = [1, 1]} : vector<260x128xf32> to vector<256x128xf32>
    %7 = arith.addf %2, %6 : vector<256x128xf32>
    %c1 = arith.constant 1 : index
    %c0_6 = arith.constant 0 : index
    %c0_7 = arith.constant 0 : index
    %8 = vector.load %arg2[%c1, %c0_6, %c0_7] : memref<5x257x128xf32, #tpu.memory_space<vmem>>, vector<1x257x128xf32>
    %9 = vector.shape_cast %8 : vector<1x257x128xf32> to vector<257x128xf32>
    %cst_8 = arith.constant dense<0.000000e+00> : vector<260x128xf32>
    %10 = tpu.matmul %1, %9, %cst_8 {dimension_numbers = #tpu.dot_dimension_numbers<[1], [0], [0], [1], [0, 0, 1, 1], [], []>} : vector<260x257xf32>, vector<257x128xf32>, vector<260x128xf32> -> vector<260x128xf32>
    %11 = vector.extract_strided_slice %10 {offsets = [1, 0], sizes = [256, 128], strides = [1, 1]} : vector<260x128xf32> to vector<256x128xf32>
    %12 = arith.addf %7, %11 : vector<256x128xf32>
    %c2 = arith.constant 2 : index
    %c0_9 = arith.constant 0 : index
    %c0_10 = arith.constant 0 : index
    %13 = vector.load %arg2[%c2, %c0_9, %c0_10] : memref<5x257x128xf32, #tpu.memory_space<vmem>>, vector<1x257x128xf32>
    %14 = vector.shape_cast %13 : vector<1x257x128xf32> to vector<257x128xf32>
    %cst_11 = arith.constant dense<0.000000e+00> : vector<260x128xf32>
    %15 = tpu.matmul %1, %14, %cst_11 {dimension_numbers = #tpu.dot_dimension_numbers<[1], [0], [0], [1], [0, 0, 1, 1], [], []>} : vector<260x257xf32>, vector<257x128xf32>, vector<260x128xf32> -> vector<260x128xf32>
    %16 = vector.extract_strided_slice %15 {offsets = [2, 0], sizes = [256, 128], strides = [1, 1]} : vector<260x128xf32> to vector<256x128xf32>
    %17 = arith.addf %12, %16 : vector<256x128xf32>
    %c3 = arith.constant 3 : index
    %c0_12 = arith.constant 0 : index
    %c0_13 = arith.constant 0 : index
    %18 = vector.load %arg2[%c3, %c0_12, %c0_13] : memref<5x257x128xf32, #tpu.memory_space<vmem>>, vector<1x257x128xf32>
    %19 = vector.shape_cast %18 : vector<1x257x128xf32> to vector<257x128xf32>
    %cst_14 = arith.constant dense<0.000000e+00> : vector<260x128xf32>
    %20 = tpu.matmul %1, %19, %cst_14 {dimension_numbers = #tpu.dot_dimension_numbers<[1], [0], [0], [1], [0, 0, 1, 1], [], []>} : vector<260x257xf32>, vector<257x128xf32>, vector<260x128xf32> -> vector<260x128xf32>
    %21 = vector.extract_strided_slice %20 {offsets = [3, 0], sizes = [256, 128], strides = [1, 1]} : vector<260x128xf32> to vector<256x128xf32>
    %22 = arith.addf %17, %21 : vector<256x128xf32>
    %c4 = arith.constant 4 : index
    %c0_15 = arith.constant 0 : index
    %c0_16 = arith.constant 0 : index
    %23 = vector.load %arg2[%c4, %c0_15, %c0_16] : memref<5x257x128xf32, #tpu.memory_space<vmem>>, vector<1x257x128xf32>
    %24 = vector.shape_cast %23 : vector<1x257x128xf32> to vector<257x128xf32>
    %cst_17 = arith.constant dense<0.000000e+00> : vector<260x128xf32>
    %25 = tpu.matmul %1, %24, %cst_17 {dimension_numbers = #tpu.dot_dimension_numbers<[1], [0], [0], [1], [0, 0, 1, 1], [], []>} : vector<260x257xf32>, vector<257x128xf32>, vector<260x128xf32> -> vector<260x128xf32>
    %26 = vector.extract_strided_slice %25 {offsets = [4, 0], sizes = [256, 128], strides = [1, 1]} : vector<260x128xf32> to vector<256x128xf32>
    %27 = arith.addf %22, %26 : vector<256x128xf32>
    %c0_18 = arith.constant 0 : index
    %c0_19 = arith.constant 0 : index
    %28 = vector.load %arg3[%c0_18, %c0_19] : memref<1x128xf32, #tpu.memory_space<vmem>>, vector<1x128xf32>
    %29 = vector.broadcast %28 : vector<1x128xf32> to vector<256x128xf32>
    %30 = arith.addf %27, %29 : vector<256x128xf32>
    %cst_20 = arith.constant 0.000000e+00 : f32
    %31 = vector.broadcast %cst_20 : f32 to vector<256x128xf32>
    %32 = arith.cmpf ogt, %30, %31 : vector<256x128xf32>
    %33 = math.exp %30 : vector<256x128xf32>
    %cst_21 = arith.constant 1.000000e+00 : f32
    %34 = vector.broadcast %cst_21 : f32 to vector<256x128xf32>
    %35 = arith.subf %33, %34 : vector<256x128xf32>
    %36 = arith.select %32, %30, %35 : vector<256x128xi1>, vector<256x128xf32>
    %c0_22 = arith.constant 0 : index
    %c0_23 = arith.constant 0 : index
    %37 = vector.load %arg4[%c0_22, %c0_23] : memref<128x64xf32, #tpu.memory_space<vmem>>, vector<128x64xf32>
    %cst_24 = arith.constant dense<0.000000e+00> : vector<256x64xf32>
    %38 = tpu.matmul %36, %37, %cst_24 {dimension_numbers = #tpu.dot_dimension_numbers<[1], [0], [0], [1], [0, 0, 1, 1], [], []>} : vector<256x128xf32>, vector<128x64xf32>, vector<256x64xf32> -> vector<256x64xf32>
    %c0_25 = arith.constant 0 : index
    %c0_26 = arith.constant 0 : index
    %39 = vector.load %arg5[%c0_25, %c0_26] : memref<1x64xf32, #tpu.memory_space<vmem>>, vector<1x64xf32>
    %40 = vector.broadcast %39 : vector<1x64xf32> to vector<256x64xf32>
    %41 = arith.addf %38, %40 : vector<256x64xf32>
    %c1_27 = arith.constant 1 : index
    %c0_28 = arith.constant 0 : index
    %c0_29 = arith.constant 0 : index
    %42 = vector.load %arg6[%c1_27, %c0_28, %c0_29] : memref<3x64x64xf32, #tpu.memory_space<vmem>>, vector<1x64x64xf32>
    %43 = vector.shape_cast %42 : vector<1x64x64xf32> to vector<64x64xf32>
    %cst_30 = arith.constant dense<0.000000e+00> : vector<256x64xf32>
    %44 = tpu.matmul %41, %43, %cst_30 {dimension_numbers = #tpu.dot_dimension_numbers<[1], [0], [0], [1], [0, 0, 1, 1], [], []>} : vector<256x64xf32>, vector<64x64xf32>, vector<256x64xf32> -> vector<256x64xf32>
    %c0_31 = arith.constant 0 : index
    %c0_32 = arith.constant 0 : index
    %45 = vector.load %arg7[%c0_31, %c0_32] : memref<1x64xf32, #tpu.memory_space<vmem>>, vector<1x64xf32>
    %46 = vector.broadcast %45 : vector<1x64xf32> to vector<256x64xf32>
    %47 = arith.addf %44, %46 : vector<256x64xf32>
    %cst_33 = arith.constant 0.000000e+00 : f32
    %48 = vector.broadcast %cst_33 : f32 to vector<64x64xf32>
    %49 = vector.extract_strided_slice %41 {offsets = [0, 0], sizes = [192, 64], strides = [1, 1]} : vector<256x64xf32> to vector<192x64xf32>
    %c0_34 = arith.constant 0 : index
    %c0_35 = arith.constant 0 : index
    %c0_36 = arith.constant 0 : index
    %50 = vector.load %arg6[%c0_34, %c0_35, %c0_36] : memref<3x64x64xf32, #tpu.memory_space<vmem>>, vector<1x64x64xf32>
    %51 = vector.shape_cast %50 : vector<1x64x64xf32> to vector<64x64xf32>
    %cst_37 = arith.constant dense<0.000000e+00> : vector<192x64xf32>
    %52 = tpu.matmul %49, %51, %cst_37 {dimension_numbers = #tpu.dot_dimension_numbers<[1], [0], [0], [1], [0, 0, 1, 1], [], []>} : vector<192x64xf32>, vector<64x64xf32>, vector<192x64xf32> -> vector<192x64xf32>
    %53 = vector.extract_strided_slice %41 {offsets = [64, 0], sizes = [192, 64], strides = [1, 1]} : vector<256x64xf32> to vector<192x64xf32>
    %c2_38 = arith.constant 2 : index
    %c0_39 = arith.constant 0 : index
    %c0_40 = arith.constant 0 : index
    %54 = vector.load %arg6[%c2_38, %c0_39, %c0_40] : memref<3x64x64xf32, #tpu.memory_space<vmem>>, vector<1x64x64xf32>
    %55 = vector.shape_cast %54 : vector<1x64x64xf32> to vector<64x64xf32>
    %cst_41 = arith.constant dense<0.000000e+00> : vector<192x64xf32>
    %56 = tpu.matmul %53, %55, %cst_41 {dimension_numbers = #tpu.dot_dimension_numbers<[1], [0], [0], [1], [0, 0, 1, 1], [], []>} : vector<192x64xf32>, vector<64x64xf32>, vector<192x64xf32> -> vector<192x64xf32>
    %57 = tpu.concatenate %48, %52 in 0 : vector<64x64xf32>, vector<192x64xf32> -> vector<256x64xf32>
    %58 = arith.addf %47, %57 : vector<256x64xf32>
    %59 = tpu.concatenate %56, %48 in 0 : vector<192x64xf32>, vector<64x64xf32> -> vector<256x64xf32>
    %60 = arith.addf %58, %59 : vector<256x64xf32>
    %c0_42 = arith.constant 0 : index
    %c0_43 = arith.constant 0 : index
    %61 = vector.load %arg8[%c0_42, %c0_43] : memref<64x128xf32, #tpu.memory_space<vmem>>, vector<64x128xf32>
    %cst_44 = arith.constant dense<0.000000e+00> : vector<256x128xf32>
    %62 = tpu.matmul %60, %61, %cst_44 {dimension_numbers = #tpu.dot_dimension_numbers<[1], [0], [0], [1], [0, 0, 1, 1], [], []>} : vector<256x64xf32>, vector<64x128xf32>, vector<256x128xf32> -> vector<256x128xf32>
    %c0_45 = arith.constant 0 : index
    %c0_46 = arith.constant 0 : index
    %63 = vector.load %arg9[%c0_45, %c0_46] : memref<1x128xf32, #tpu.memory_space<vmem>>, vector<1x128xf32>
    %64 = vector.broadcast %63 : vector<1x128xf32> to vector<256x128xf32>
    %65 = arith.addf %62, %64 : vector<256x128xf32>
    %66 = arith.addf %36, %65 : vector<256x128xf32>
    %67 = vector.shape_cast %66 : vector<256x128xf32> to vector<64x4x128xf32>
    %cst_47 = arith.constant dense<0xFF800000> : vector<64x128xf32>
    %68 = vector.multi_reduction <maximumf>, %67, %cst_47 [1] : vector<64x4x128xf32> to vector<64x128xf32>
    %cst_48 = arith.constant 0.000000e+00 : f32
    %69 = vector.broadcast %cst_48 : f32 to vector<64x128xf32>
    %70 = arith.maximumf %68, %69 : vector<64x128xf32>
    %c0_49 = arith.constant 0 : index
    %c0_50 = arith.constant 0 : index
    %71 = vector.load %arg10[%c0_49, %c0_50] : memref<128x64xf32, #tpu.memory_space<vmem>>, vector<128x64xf32>
    %cst_51 = arith.constant dense<0.000000e+00> : vector<64x64xf32>
    %72 = tpu.matmul %70, %71, %cst_51 {dimension_numbers = #tpu.dot_dimension_numbers<[1], [0], [0], [1], [0, 0, 1, 1], [], []>} : vector<64x128xf32>, vector<128x64xf32>, vector<64x64xf32> -> vector<64x64xf32>
    %c0_52 = arith.constant 0 : index
    %c0_53 = arith.constant 0 : index
    %73 = vector.load %arg11[%c0_52, %c0_53] : memref<1x64xf32, #tpu.memory_space<vmem>>, vector<1x64xf32>
    %74 = vector.broadcast %73 : vector<1x64xf32> to vector<64x64xf32>
    %75 = arith.addf %72, %74 : vector<64x64xf32>
    %c1_54 = arith.constant 1 : index
    %c0_55 = arith.constant 0 : index
    %c0_56 = arith.constant 0 : index
    %76 = vector.load %arg12[%c1_54, %c0_55, %c0_56] : memref<3x64x64xf32, #tpu.memory_space<vmem>>, vector<1x64x64xf32>
    %77 = vector.shape_cast %76 : vector<1x64x64xf32> to vector<64x64xf32>
    %cst_57 = arith.constant dense<0.000000e+00> : vector<64x64xf32>
    %78 = tpu.matmul %75, %77, %cst_57 {dimension_numbers = #tpu.dot_dimension_numbers<[1], [0], [0], [1], [0, 0, 1, 1], [], []>} : vector<64x64xf32>, vector<64x64xf32>, vector<64x64xf32> -> vector<64x64xf32>
    %c0_58 = arith.constant 0 : index
    %c0_59 = arith.constant 0 : index
    %79 = vector.load %arg13[%c0_58, %c0_59] : memref<1x64xf32, #tpu.memory_space<vmem>>, vector<1x64xf32>
    %80 = vector.broadcast %79 : vector<1x64xf32> to vector<64x64xf32>
    %81 = arith.addf %78, %80 : vector<64x64xf32>
    %cst_60 = arith.constant 0.000000e+00 : f32
    %82 = vector.broadcast %cst_60 : f32 to vector<32x64xf32>
    %83 = vector.extract_strided_slice %75 {offsets = [0, 0], sizes = [32, 64], strides = [1, 1]} : vector<64x64xf32> to vector<32x64xf32>
    %c0_61 = arith.constant 0 : index
    %c0_62 = arith.constant 0 : index
    %c0_63 = arith.constant 0 : index
    %84 = vector.load %arg12[%c0_61, %c0_62, %c0_63] : memref<3x64x64xf32, #tpu.memory_space<vmem>>, vector<1x64x64xf32>
    %85 = vector.shape_cast %84 : vector<1x64x64xf32> to vector<64x64xf32>
    %cst_64 = arith.constant dense<0.000000e+00> : vector<32x64xf32>
    %86 = tpu.matmul %83, %85, %cst_64 {dimension_numbers = #tpu.dot_dimension_numbers<[1], [0], [0], [1], [0, 0, 1, 1], [], []>} : vector<32x64xf32>, vector<64x64xf32>, vector<32x64xf32> -> vector<32x64xf32>
    %87 = vector.extract_strided_slice %75 {offsets = [32, 0], sizes = [32, 64], strides = [1, 1]} : vector<64x64xf32> to vector<32x64xf32>
    %c2_65 = arith.constant 2 : index
    %c0_66 = arith.constant 0 : index
    %c0_67 = arith.constant 0 : index
    %88 = vector.load %arg12[%c2_65, %c0_66, %c0_67] : memref<3x64x64xf32, #tpu.memory_space<vmem>>, vector<1x64x64xf32>
    %89 = vector.shape_cast %88 : vector<1x64x64xf32> to vector<64x64xf32>
    %cst_68 = arith.constant dense<0.000000e+00> : vector<32x64xf32>
    %90 = tpu.matmul %87, %89, %cst_68 {dimension_numbers = #tpu.dot_dimension_numbers<[1], [0], [0], [1], [0, 0, 1, 1], [], []>} : vector<32x64xf32>, vector<64x64xf32>, vector<32x64xf32> -> vector<32x64xf32>
    %91 = tpu.concatenate %82, %86 in 0 : vector<32x64xf32>, vector<32x64xf32> -> vector<64x64xf32>
    %92 = arith.addf %81, %91 : vector<64x64xf32>
    %93 = tpu.concatenate %90, %82 in 0 : vector<32x64xf32>, vector<32x64xf32> -> vector<64x64xf32>
    %94 = arith.addf %92, %93 : vector<64x64xf32>
    %c0_69 = arith.constant 0 : index
    %c0_70 = arith.constant 0 : index
    %95 = vector.load %arg14[%c0_69, %c0_70] : memref<64x128xf32, #tpu.memory_space<vmem>>, vector<64x128xf32>
    %cst_71 = arith.constant dense<0.000000e+00> : vector<64x128xf32>
    %96 = tpu.matmul %94, %95, %cst_71 {dimension_numbers = #tpu.dot_dimension_numbers<[1], [0], [0], [1], [0, 0, 1, 1], [], []>} : vector<64x64xf32>, vector<64x128xf32>, vector<64x128xf32> -> vector<64x128xf32>
    %c0_72 = arith.constant 0 : index
    %c0_73 = arith.constant 0 : index
    %97 = vector.load %arg15[%c0_72, %c0_73] : memref<1x128xf32, #tpu.memory_space<vmem>>, vector<1x128xf32>
    %98 = vector.broadcast %97 : vector<1x128xf32> to vector<64x128xf32>
    %99 = arith.addf %96, %98 : vector<64x128xf32>
    %100 = arith.addf %70, %99 : vector<64x128xf32>
    %101 = vector.shape_cast %100 : vector<64x128xf32> to vector<16x4x128xf32>
    %cst_74 = arith.constant dense<0xFF800000> : vector<16x128xf32>
    %102 = vector.multi_reduction <maximumf>, %101, %cst_74 [1] : vector<16x4x128xf32> to vector<16x128xf32>
    %cst_75 = arith.constant 0.000000e+00 : f32
    %103 = vector.broadcast %cst_75 : f32 to vector<16x128xf32>
    %104 = arith.maximumf %102, %103 : vector<16x128xf32>
    %c0_76 = arith.constant 0 : index
    %c0_77 = arith.constant 0 : index
    %105 = vector.load %arg16[%c0_76, %c0_77] : memref<128x64xf32, #tpu.memory_space<vmem>>, vector<128x64xf32>
    %cst_78 = arith.constant dense<0.000000e+00> : vector<16x64xf32>
    %106 = tpu.matmul %104, %105, %cst_78 {dimension_numbers = #tpu.dot_dimension_numbers<[1], [0], [0], [1], [0, 0, 1, 1], [], []>} : vector<16x128xf32>, vector<128x64xf32>, vector<16x64xf32> -> vector<16x64xf32>
    %c0_79 = arith.constant 0 : index
    %c0_80 = arith.constant 0 : index
    %107 = vector.load %arg17[%c0_79, %c0_80] : memref<1x64xf32, #tpu.memory_space<vmem>>, vector<1x64xf32>
    %108 = vector.broadcast %107 : vector<1x64xf32> to vector<16x64xf32>
    %109 = arith.addf %106, %108 : vector<16x64xf32>
    %c1_81 = arith.constant 1 : index
    %c0_82 = arith.constant 0 : index
    %c0_83 = arith.constant 0 : index
    %110 = vector.load %arg18[%c1_81, %c0_82, %c0_83] : memref<3x64x64xf32, #tpu.memory_space<vmem>>, vector<1x64x64xf32>
    %111 = vector.shape_cast %110 : vector<1x64x64xf32> to vector<64x64xf32>
    %cst_84 = arith.constant dense<0.000000e+00> : vector<16x64xf32>
    %112 = tpu.matmul %109, %111, %cst_84 {dimension_numbers = #tpu.dot_dimension_numbers<[1], [0], [0], [1], [0, 0, 1, 1], [], []>} : vector<16x64xf32>, vector<64x64xf32>, vector<16x64xf32> -> vector<16x64xf32>
    %c0_85 = arith.constant 0 : index
    %c0_86 = arith.constant 0 : index
    %113 = vector.load %arg19[%c0_85, %c0_86] : memref<1x64xf32, #tpu.memory_space<vmem>>, vector<1x64xf32>
    %114 = vector.broadcast %113 : vector<1x64xf32> to vector<16x64xf32>
    %115 = arith.addf %112, %114 : vector<16x64xf32>
    %c0_87 = arith.constant 0 : index
    %c0_88 = arith.constant 0 : index
    %116 = vector.load %arg20[%c0_87, %c0_88] : memref<64x128xf32, #tpu.memory_space<vmem>>, vector<64x128xf32>
    %cst_89 = arith.constant dense<0.000000e+00> : vector<16x128xf32>
    %117 = tpu.matmul %115, %116, %cst_89 {dimension_numbers = #tpu.dot_dimension_numbers<[1], [0], [0], [1], [0, 0, 1, 1], [], []>} : vector<16x64xf32>, vector<64x128xf32>, vector<16x128xf32> -> vector<16x128xf32>
    %c0_90 = arith.constant 0 : index
    %c0_91 = arith.constant 0 : index
    %118 = vector.load %arg21[%c0_90, %c0_91] : memref<1x128xf32, #tpu.memory_space<vmem>>, vector<1x128xf32>
    %119 = vector.broadcast %118 : vector<1x128xf32> to vector<16x128xf32>
    %120 = arith.addf %117, %119 : vector<16x128xf32>
    %121 = arith.addf %104, %120 : vector<16x128xf32>
    %122 = vector.shape_cast %121 : vector<16x128xf32> to vector<8x2x128xf32>
    %cst_92 = arith.constant dense<0xFF800000> : vector<8x128xf32>
    %123 = vector.multi_reduction <maximumf>, %122, %cst_92 [1] : vector<8x2x128xf32> to vector<8x128xf32>
    %cst_93 = arith.constant 0.000000e+00 : f32
    %124 = vector.broadcast %cst_93 : f32 to vector<8x128xf32>
    %125 = arith.maximumf %123, %124 : vector<8x128xf32>
    %c0_94 = arith.constant 0 : index
    %c0_95 = arith.constant 0 : index
    %126 = vector.load %arg22[%c0_94, %c0_95] : memref<128x64xf32, #tpu.memory_space<vmem>>, vector<128x64xf32>
    %cst_96 = arith.constant dense<0.000000e+00> : vector<8x64xf32>
    %127 = tpu.matmul %125, %126, %cst_96 {dimension_numbers = #tpu.dot_dimension_numbers<[1], [0], [0], [1], [0, 0, 1, 1], [], []>} : vector<8x128xf32>, vector<128x64xf32>, vector<8x64xf32> -> vector<8x64xf32>
    %c0_97 = arith.constant 0 : index
    %c0_98 = arith.constant 0 : index
    %128 = vector.load %arg23[%c0_97, %c0_98] : memref<1x64xf32, #tpu.memory_space<vmem>>, vector<1x64xf32>
    %129 = vector.broadcast %128 : vector<1x64xf32> to vector<8x64xf32>
    %130 = arith.addf %127, %129 : vector<8x64xf32>
    %c1_99 = arith.constant 1 : index
    %c0_100 = arith.constant 0 : index
    %c0_101 = arith.constant 0 : index
    %131 = vector.load %arg24[%c1_99, %c0_100, %c0_101] : memref<3x64x64xf32, #tpu.memory_space<vmem>>, vector<1x64x64xf32>
    %132 = vector.shape_cast %131 : vector<1x64x64xf32> to vector<64x64xf32>
    %cst_102 = arith.constant dense<0.000000e+00> : vector<8x64xf32>
    %133 = tpu.matmul %130, %132, %cst_102 {dimension_numbers = #tpu.dot_dimension_numbers<[1], [0], [0], [1], [0, 0, 1, 1], [], []>} : vector<8x64xf32>, vector<64x64xf32>, vector<8x64xf32> -> vector<8x64xf32>
    %c0_103 = arith.constant 0 : index
    %c0_104 = arith.constant 0 : index
    %134 = vector.load %arg25[%c0_103, %c0_104] : memref<1x64xf32, #tpu.memory_space<vmem>>, vector<1x64xf32>
    %135 = vector.broadcast %134 : vector<1x64xf32> to vector<8x64xf32>
    %136 = arith.addf %133, %135 : vector<8x64xf32>
    %c0_105 = arith.constant 0 : index
    %c0_106 = arith.constant 0 : index
    %137 = vector.load %arg26[%c0_105, %c0_106] : memref<64x128xf32, #tpu.memory_space<vmem>>, vector<64x128xf32>
    %cst_107 = arith.constant dense<0.000000e+00> : vector<8x128xf32>
    %138 = tpu.matmul %136, %137, %cst_107 {dimension_numbers = #tpu.dot_dimension_numbers<[1], [0], [0], [1], [0, 0, 1, 1], [], []>} : vector<8x64xf32>, vector<64x128xf32>, vector<8x128xf32> -> vector<8x128xf32>
    %c0_108 = arith.constant 0 : index
    %c0_109 = arith.constant 0 : index
    %139 = vector.load %arg27[%c0_108, %c0_109] : memref<1x128xf32, #tpu.memory_space<vmem>>, vector<1x128xf32>
    %140 = vector.broadcast %139 : vector<1x128xf32> to vector<8x128xf32>
    %141 = arith.addf %138, %140 : vector<8x128xf32>
    %142 = arith.addf %125, %141 : vector<8x128xf32>
    %143 = vector.shape_cast %142 : vector<8x128xf32> to vector<4x2x128xf32>
    %cst_110 = arith.constant dense<0xFF800000> : vector<4x128xf32>
    %144 = vector.multi_reduction <maximumf>, %143, %cst_110 [1] : vector<4x2x128xf32> to vector<4x128xf32>
    %cst_111 = arith.constant 0.000000e+00 : f32
    %145 = vector.broadcast %cst_111 : f32 to vector<4x128xf32>
    %146 = arith.maximumf %144, %145 : vector<4x128xf32>
    %cst_112 = arith.constant dense<0.000000e+00> : vector<128xf32>
    %147 = vector.multi_reduction <add>, %146, %cst_112 [0] : vector<4x128xf32> to vector<128xf32>
    %148 = vector.shape_cast %147 : vector<128xf32> to vector<1x128xf32>
    %cst_113 = arith.constant 4.000000e+00 : f32
    %149 = vector.broadcast %cst_113 : f32 to vector<1x128xf32>
    %150 = arith.divf %148, %149 : vector<1x128xf32>
    %c0_114 = arith.constant 0 : index
    %c0_115 = arith.constant 0 : index
    %151 = vector.load %arg28[%c0_114, %c0_115] : memref<128x20xf32, #tpu.memory_space<vmem>>, vector<128x20xf32>
    %cst_116 = arith.constant dense<0.000000e+00> : vector<1x20xf32>
    %152 = tpu.matmul %150, %151, %cst_116 {dimension_numbers = #tpu.dot_dimension_numbers<[1], [0], [0], [1], [0, 0, 1, 1], [], []>} : vector<1x128xf32>, vector<128x20xf32>, vector<1x20xf32> -> vector<1x20xf32>
    %c0_117 = arith.constant 0 : index
    %c0_118 = arith.constant 0 : index
    %153 = vector.load %arg29[%c0_117, %c0_118] : memref<1x20xf32, #tpu.memory_space<vmem>>, vector<1x20xf32>
    %154 = arith.addf %152, %153 : vector<1x20xf32>
    %cst_119 = arith.constant dense<0xFF800000> : vector<1xf32>
    %155 = vector.multi_reduction <maximumf>, %154, %cst_119 [1] : vector<1x20xf32> to vector<1xf32>
    %156 = vector.shape_cast %155 : vector<1xf32> to vector<1x1xf32>
    %157 = vector.broadcast %156 : vector<1x1xf32> to vector<1x20xf32>
    %158 = arith.subf %154, %157 : vector<1x20xf32>
    %159 = math.exp %158 : vector<1x20xf32>
    %cst_120 = arith.constant dense<0.000000e+00> : vector<1xf32>
    %160 = vector.multi_reduction <add>, %159, %cst_120 [1] : vector<1x20xf32> to vector<1xf32>
    %161 = vector.shape_cast %160 : vector<1xf32> to vector<1x1xf32>
    %162 = vector.broadcast %161 : vector<1x1xf32> to vector<1x20xf32>
    %163 = arith.divf %159, %162 : vector<1x20xf32>
    %c0_121 = arith.constant 0 : index
    %c0_122 = arith.constant 0 : index
    %c0_123 = arith.constant 0 : index
    %164 = vector.load %arg30[%c0_121, %c0_122, %c0_123] : memref<1x1x20xf32, #tpu.memory_space<vmem>>, vector<1x1x20xf32>
    %165 = vector.shape_cast %164 : vector<1x1x20xf32> to vector<1x20xf32>
    %166 = vector.shape_cast %163 : vector<1x20xf32> to vector<1x1x20xf32>
    tpu.vector_store %arg30[%c0_121, %c0_122, %c0_123], %166 {strides = array<i32>} : memref<1x1x20xf32, #tpu.memory_space<vmem>>, vector<1x1x20xf32>,
    return
  }
  func.func @transform_0(%arg0: i32) -> (i32, i32, i32) {
    %c0_i32 = arith.constant 0 : i32
    %c0_i32_0 = arith.constant 0 : i32
    %c0_i32_1 = arith.constant 0 : i32
    return %arg0, %c0_i32, %c0_i32_0 : i32, i32, i32
  }
  func.func @transform_1(%arg0: i32) -> (i32, i32, i32) {
    %c0_i32 = arith.constant 0 : i32
    %c0_i32_0 = arith.constant 0 : i32
    %c0_i32_1 = arith.constant 0 : i32
    %c0_i32_2 = arith.constant 0 : i32
    return %c0_i32, %c0_i32_0, %c0_i32_1 : i32, i32, i32
  }
  func.func @transform_2(%arg0: i32) -> (i32, i32) {
    %c0_i32 = arith.constant 0 : i32
    %c0_i32_0 = arith.constant 0 : i32
    %c0_i32_1 = arith.constant 0 : i32
    return %c0_i32, %c0_i32_0 : i32, i32
  }
  func.func @transform_3(%arg0: i32) -> (i32, i32) {
    %c0_i32 = arith.constant 0 : i32
    %c0_i32_0 = arith.constant 0 : i32
    %c0_i32_1 = arith.constant 0 : i32
    return %c0_i32, %c0_i32_0 : i32, i32
  }
  func.func @transform_4(%arg0: i32) -> (i32, i32) {
    %c0_i32 = arith.constant 0 : i32
    %c0_i32_0 = arith.constant 0 : i32
    %c0_i32_1 = arith.constant 0 : i32
    return %c0_i32, %c0_i32_0 : i32, i32
  }
  func.func @transform_5(%arg0: i32) -> (i32, i32, i32) {
    %c0_i32 = arith.constant 0 : i32
    %c0_i32_0 = arith.constant 0 : i32
    %c0_i32_1 = arith.constant 0 : i32
    %c0_i32_2 = arith.constant 0 : i32
    return %c0_i32, %c0_i32_0, %c0_i32_1 : i32, i32, i32
  }
  func.func @transform_6(%arg0: i32) -> (i32, i32) {
    %c0_i32 = arith.constant 0 : i32
    %c0_i32_0 = arith.constant 0 : i32
    %c0_i32_1 = arith.constant 0 : i32
    return %c0_i32, %c0_i32_0 : i32, i32
  }
  func.func @transform_7(%arg0: i32) -> (i32, i32) {
    %c0_i32 = arith.constant 0 : i32
    %c0_i32_0 = arith.constant 0 : i32
    %c0_i32_1 = arith.constant 0 : i32
    return %c0_i32, %c0_i32_0 : i32, i32
  }
  func.func @transform_8(%arg0: i32) -> (i32, i32) {
    %c0_i32 = arith.constant 0 : i32
    %c0_i32_0 = arith.constant 0 : i32
    %c0_i32_1 = arith.constant 0 : i32
    return %c0_i32, %c0_i32_0 : i32, i32
  }
  func.func @transform_9(%arg0: i32) -> (i32, i32) {
    %c0_i32 = arith.constant 0 : i32
    %c0_i32_0 = arith.constant 0 : i32
    %c0_i32_1 = arith.constant 0 : i32
    return %c0_i32, %c0_i32_0 : i32, i32
  }
  func.func @transform_10(%arg0: i32) -> (i32, i32) {
    %c0_i32 = arith.constant 0 : i32
    %c0_i32_0 = arith.constant 0 : i32
    %c0_i32_1 = arith.constant 0 : i32
    return %c0_i32, %c0_i32_0 : i32, i32
  }
  func.func @transform_11(%arg0: i32) -> (i32, i32, i32) {
    %c0_i32 = arith.constant 0 : i32
    %c0_i32_0 = arith.constant 0 : i32
    %c0_i32_1 = arith.constant 0 : i32
    %c0_i32_2 = arith.constant 0 : i32
    return %c0_i32, %c0_i32_0, %c0_i32_1 : i32, i32, i32
  }
  func.func @transform_12(%arg0: i32) -> (i32, i32) {
    %c0_i32 = arith.constant 0 : i32
    %c0_i32_0 = arith.constant 0 : i32
    %c0_i32_1 = arith.constant 0 : i32
    return %c0_i32, %c0_i32_0 : i32, i32
  }
  func.func @transform_13(%arg0: i32) -> (i32, i32) {
    %c0_i32 = arith.constant 0 : i32
    %c0_i32_0 = arith.constant 0 : i32
    %c0_i32_1 = arith.constant 0 : i32
    return %c0_i32, %c0_i32_0 : i32, i32
  }
  func.func @transform_14(%arg0: i32) -> (i32, i32) {
    %c0_i32 = arith.constant 0 : i32
    %c0_i32_0 = arith.constant 0 : i32
    %c0_i32_1 = arith.constant 0 : i32
    return %c0_i32, %c0_i32_0 : i32, i32
  }
  func.func @transform_15(%arg0: i32) -> (i32, i32) {
    %c0_i32 = arith.constant 0 : i32
    %c0_i32_0 = arith.constant 0 : i32
    %c0_i32_1 = arith.constant 0 : i32
    return %c0_i32, %c0_i32_0 : i32, i32
  }
  func.func @transform_16(%arg0: i32) -> (i32, i32) {
    %c0_i32 = arith.constant 0 : i32
    %c0_i32_0 = arith.constant 0 : i32
    %c0_i32_1 = arith.constant 0 : i32
    return %c0_i32, %c0_i32_0 : i32, i32
  }
  func.func @transform_17(%arg0: i32) -> (i32, i32, i32) {
    %c0_i32 = arith.constant 0 : i32
    %c0_i32_0 = arith.constant 0 : i32
    %c0_i32_1 = arith.constant 0 : i32
    %c0_i32_2 = arith.constant 0 : i32
    return %c0_i32, %c0_i32_0, %c0_i32_1 : i32, i32, i32
  }
  func.func @transform_18(%arg0: i32) -> (i32, i32) {
    %c0_i32 = arith.constant 0 : i32
    %c0_i32_0 = arith.constant 0 : i32
    %c0_i32_1 = arith.constant 0 : i32
    return %c0_i32, %c0_i32_0 : i32, i32
  }
  func.func @transform_19(%arg0: i32) -> (i32, i32) {
    %c0_i32 = arith.constant 0 : i32
    %c0_i32_0 = arith.constant 0 : i32
    %c0_i32_1 = arith.constant 0 : i32
    return %c0_i32, %c0_i32_0 : i32, i32
  }
  func.func @transform_20(%arg0: i32) -> (i32, i32) {
    %c0_i32 = arith.constant 0 : i32
    %c0_i32_0 = arith.constant 0 : i32
    %c0_i32_1 = arith.constant 0 : i32
    return %c0_i32, %c0_i32_0 : i32, i32
  }
  func.func @transform_21(%arg0: i32) -> (i32, i32) {
    %c0_i32 = arith.constant 0 : i32
    %c0_i32_0 = arith.constant 0 : i32
    %c0_i32_1 = arith.constant 0 : i32
    return %c0_i32, %c0_i32_0 : i32, i32
  }
  func.func @transform_22(%arg0: i32) -> (i32, i32) {
    %c0_i32 = arith.constant 0 : i32
    %c0_i32_0 = arith.constant 0 : i32
    %c0_i32_1 = arith.constant 0 : i32
    return %c0_i32, %c0_i32_0 : i32, i32
  }
  func.func @transform_23(%arg0: i32) -> (i32, i32, i32) {
    %c0_i32 = arith.constant 0 : i32
    %c0_i32_0 = arith.constant 0 : i32
    %c0_i32_1 = arith.constant 0 : i32
    %c0_i32_2 = arith.constant 0 : i32
    return %c0_i32, %c0_i32_0, %c0_i32_1 : i32, i32, i32
  }
  func.func @transform_24(%arg0: i32) -> (i32, i32) {
    %c0_i32 = arith.constant 0 : i32
    %c0_i32_0 = arith.constant 0 : i32
    %c0_i32_1 = arith.constant 0 : i32
    return %c0_i32, %c0_i32_0 : i32, i32
  }
  func.func @transform_25(%arg0: i32) -> (i32, i32) {
    %c0_i32 = arith.constant 0 : i32
    %c0_i32_0 = arith.constant 0 : i32
    %c0_i32_1 = arith.constant 0 : i32
    return %c0_i32, %c0_i32_0 : i32, i32
  }
  func.func @transform_26(%arg0: i32) -> (i32, i32) {
    %c0_i32 = arith.constant 0 : i32
    %c0_i32_0 = arith.constant 0 : i32
    %c0_i32_1 = arith.constant 0 : i32
    return %c0_i32, %c0_i32_0 : i32, i32
  }
  func.func @transform_27(%arg0: i32) -> (i32, i32) {
    %c0_i32 = arith.constant 0 : i32
    %c0_i32_0 = arith.constant 0 : i32
    %c0_i32_1 = arith.constant 0 : i32
    return %c0_i32, %c0_i32_0 : i32, i32
  }
  func.func @transform_28(%arg0: i32) -> (i32, i32) {
    %c0_i32 = arith.constant 0 : i32
    %c0_i32_0 = arith.constant 0 : i32
    %c0_i32_1 = arith.constant 0 : i32
    return %c0_i32, %c0_i32_0 : i32, i32
  }
  func.func @transform_29(%arg0: i32) -> (i32, i32, i32) {
    %c0_i32 = arith.constant 0 : i32
    %c0_i32_0 = arith.constant 0 : i32
    %c0_i32_1 = arith.constant 0 : i32
    return %arg0, %c0_i32, %c0_i32_0 : i32, i32, i32
  }
}

</mosaic_0001>

<bundles_post_ra>
// kernel: tpu_custom_call.1
= control target key start
LH: loop header
LB: loop body
LE: loop exit
PB: predicated region body
PF: predicated region fallthrough
CT: control target
= control target key end

     0   :  { %s12012_s6 = smov 1   ;;  %s12013_s10 = smov 2   ;;  %s16657_s0 = inlined_call_operand.smem [shape: u32[30], index: -1, kind: input, shape index: {}] }
   0x1   :  { %s12053_s5 = sld [smem:[%s16657_s0]]   ;;  %s12014_s14 = smov 3  }
   0x2   :  { %s12058_s9 = sld [smem:[%s16657_s0 + %s12012_s6]]   ;;  %s12015_s18 = smov 4  }
   0x3   :  { %s12063_s13 = sld [smem:[%s16657_s0 + %s12013_s10]]   ;;  %s12016_s22 = smov 5  }
   0x4   :  { %s12068_s17 = sld [smem:[%s16657_s0 + %s12014_s14]]   ;;  %s12017_s26 = smov 6  }
   0x5   :  { %s12073_s21 = sld [smem:[%s16657_s0 + %s12015_s18]]   ;;  %s12018_s30 = smov 7  }
   0x6   :  { %s12078_s25 = sld [smem:[%s16657_s0 + %s12016_s22]]   ;;  %s12019_s4 = smov 8  }
   0x7   :  { %16785 = sst [smem:[#allocation5_spill]] %s12053_s5  ;;  %s12020_s10 = smov 9  }
   0x8   :  { %16786 = sst [smem:[#allocation6_spill]] %s12058_s9  ;;  %s12021_s15 = smov 10  }
   0x9   :  { %16787 = sst [smem:[#allocation7_spill]] %s12063_s13  ;;  %s12022_s20 = smov 11  }
   0xa   :  { %s12083_s29 = sld [smem:[%s16657_s0 + %s12017_s26]]   ;;  %s12023_s26 = smov 12  }
   0xb   :  { %s12088_s3 = sld [smem:[%s16657_s0 + %s12018_s30]]   ;;  %s12024_s1 = smov 13  }
   0xc   :  { %s12093_s8 = sld [smem:[%s16657_s0 + %s12019_s4]]   ;;  %s12025_s7 = smov 14  }
   0xd   :  { %s12098_s14 = sld [smem:[%s16657_s0 + %s12020_s10]]   ;;  %s12027_s22 = smov 16  }
   0xe   :  { %s12103_s19 = sld [smem:[%s16657_s0 + %s12021_s15]]   ;;  %s12026_s15 = smov 15  }
   0xf   :  { %s12108_s24 = sld [smem:[%s16657_s0 + %s12022_s20]]   ;;  %s12028_s28 = smov 17  }
  0x10   :  { %s12113_s30 = sld [smem:[%s16657_s0 + %s12023_s26]]  }
  0x11   :  { %16788 = sst [smem:[#allocation8_spill]] %s12088_s3 }
  0x12   :  { %16789 = sst [smem:[#allocation9_spill]] %s12093_s8 }
  0x13   :  { %16790 = sst [smem:[#allocation10_spill]] %s12098_s14 }
  0x14   :  { %s12118_s6 = sld [smem:[%s16657_s0 + %s12024_s1]]  }
  0x15   :  { %s12123_s12 = sld [smem:[%s16657_s0 + %s12025_s7]]   ;;  %s12029_s7 = smov 18  }
  0x16   :  { %s12128_s20 = sld [smem:[%s16657_s0 + %s12026_s15]]   ;;  %s12030_s15 = smov 19  }
  0x17   :  { %s12133_s27 = sld [smem:[%s16657_s0 + %s12027_s22]]   ;;  %s12031_s22 = smov 20  }
  0x18   :  { %s12138_s4 = sld [smem:[%s16657_s0 + %s12028_s28]]   ;;  %s12032_s28 = smov 21  }
  0x1a   :  { %16791 = sst [smem:[#allocation11_spill]] %s12118_s6 }
  0x1b   :  { %16792 = sst [smem:[#allocation12_spill]] %s12123_s12 }
  0x1c   :  { %16793 = sst [smem:[#allocation13_spill]] %s12128_s20 }
  0x1d   :  { %16794 = sst [smem:[#allocation14_spill]] %s12133_s27 }
  0x1e   :  { %16795 = sst [smem:[#allocation15_spill]] %s12138_s4 }
  0x1f   :  { %s12143_s12 = sld [smem:[%s16657_s0 + %s12029_s7]]   ;;  %s12033_s7 = smov 22  }
  0x20   :  { %s12148_s20 = sld [smem:[%s16657_s0 + %s12030_s15]]   ;;  %s12034_s15 = smov 23  }
  0x21   :  { %s12153_s27 = sld [smem:[%s16657_s0 + %s12031_s22]]   ;;  %s12035_s22 = smov 24  }
  0x22   :  { %s12158_s4 = sld [smem:[%s16657_s0 + %s12032_s28]]   ;;  %s12036_s28 = smov 25  }
  0x25   :  { %16796 = sst [smem:[#allocation16_spill]] %s12143_s12 }
  0x26   :  { %16797 = sst [smem:[#allocation17_spill]] %s12148_s20 }
  0x27   :  { %16798 = sst [smem:[#allocation18_spill]] %s12153_s27 }
  0x28   :  { %16799 = sst [smem:[#allocation19_spill]] %s12158_s4 }
  0x29   :  { %s12163_s12 = sld [smem:[%s16657_s0 + %s12033_s7]]   ;;  %s12037_s7 = smov 26  }
  0x2a   :  { %s12168_s20 = sld [smem:[%s16657_s0 + %s12034_s15]]   ;;  %s12038_s15 = smov 27  }
  0x2b   :  { %s12173_s27 = sld [smem:[%s16657_s0 + %s12035_s22]]   ;;  %s12039_s22 = smov 28  }
  0x2c   :  { %s12178_s4 = sld [smem:[%s16657_s0 + %s12036_s28]]   ;;  %s12040_s28 = smov 29  }
  0x2f   :  { %16800 = sst [smem:[#allocation20_spill]] %s12163_s12 }
  0x30   :  { %16801 = sst [smem:[#allocation21_spill]] %s12168_s20 }
  0x31   :  { %16802 = sst [smem:[#allocation22_spill]] %s12173_s27 }
  0x32   :  { %16803 = sst [smem:[#allocation23_spill]] %s12178_s4 }
  0x33   :  { %s12183_s12 = sld [smem:[%s16657_s0 + %s12037_s7]]  }
  0x34   :  { %s12188_s20 = sld [smem:[%s16657_s0 + %s12038_s15]]  }
  0x35   :  { %s12193_s27 = sld [smem:[%s16657_s0 + %s12039_s22]]  }
  0x36   :  { %s12198_s4 = sld [smem:[%s16657_s0 + %s12040_s28]]  }
  0x39   :  { %16804 = sst [smem:[#allocation24_spill]] %s12183_s12 }
  0x3a   :  { %64 = vsyncpa [#allocation3], 0 }
  0x3b   :  { %66 = vsyncpa [#allocation3 + $0x1], 0  ;;  %s12200_s7 = smov 0   ;;  %s12202_s10 = smov 0  }
  0x3c   :  { %s12204_s11 = smov 0   ;;  %s12206_s15 = smov 0  }
  0x3d LB: > { %s16805_s14 = sld [smem:[#allocation10_spill]]  ;;  %s16806_s9 = sld [smem:[#allocation6_spill]]  ;;  %s11998_s7 = sphi %s12200_s7, %s17095_s7   ;;  %s12010_s15 = sphi %s12206_s15, %s17098_s15   ;;  %s12006_s11 = sphi %s12204_s11, %s17097_s11   ;;  %s12002_s10 = sphi %s12202_s10, %s17096_s10  }
  0x3e   : > { %s16807_s8 = sld [smem:[#allocation9_spill]]  ;;  %s16808_s6 = sld [smem:[#allocation11_spill]] }
  0x3f   : > { %s16809_s3 = sld [smem:[#allocation8_spill]]  ;;  %s12221_s0 = sadd.s32 4294967295, %s12010_s15  }
  0x40   : > { %s8520_s16 = sadd.s32 4294967294, %s12010_s15   ;;  %s12225_s18 = sadd.s32 1, %s12010_s15  }
  0x41   : > { %s693_s22 = sadd.s32 1, %s12006_s11  ;;  %s690_s23 = ssub.s32 %s12010_s15, %s12225_s18 }
  0x42   : > { %p703_p0 = scmp.ne.s32.totalorder %s12006_s11, %s12002_s10  ;;  %p691_p1 = scmp.eq.s32.totalorder %s690_s23, 0 }
  0x43   : > { %p704_p2 = scmp.eq.s32.totalorder %s12221_s0, 1  ;;  %p709_p3 = scmp.ne.s32.totalorder %s12002_s10, %s11998_s7 }
  0x44   : > { %p710_p4 = scmp.eq.s32.totalorder %s8520_s16, 1  ;;  %p8523_p7 = scmp.ge.s32.totalorder %s12010_s15, 1 }
  0x45   : > { %s12236_s26 = scalar_select %p691_p1, %s12006_s11, %s693_s22  }
  0x46   : > { %p12238_p5 = por %p704_p2, %p703_p0  ;;  %p12242_p6 = por %p710_p4, %p709_p3 }
  0x47   : > { %p820_p8 = scmp.lt.s32.totalorder %s12010_s15, 3 }
  0x49   : > { %p821_p9 = pnand %p8523_p7, %p820_p8 }
  0x4b   : > { %824 = sbr.rel (%p821_p9) target bundleno = 4549 (0x11c5), region = 136 }
  0x52   : > { %v999_v0 = vld [vmem:[%s16806_s9] sm:$0xff]  ;;  %v1000_v1 = vld [vmem:[%s16806_s9 + $0x8] sm:$0xff]  ;;  %v1001_v2 = vld [vmem:[%s16806_s9 + $0x10] sm:$0xff]  ;;  %vm1132_vm0 = vcmask 1040384   ;;  %v16666_v3 = vmov 0.0|0.0   ;;  %v16664_v5 = vmov 0.0  }
  0x53   : > { %10739 = vmatprep.subr.bf16.mxu0 %v16666_v3  ;;  %v10740_v4 = vpack.c.bf16 %v1000_v1, %v999_v0  ;;  %9597 = vmatprep.subr.mxu1 %v16664_v5  ;;  %v1002_v6 = vld [vmem:[%s16806_s9 + $0x18] sm:$0xff]  ;;  %s16812_s5 = sld [smem:[#allocation5_spill]]  ;;  %v1031_v7 = vld [vmem:[%s16806_s9 + $0x100] sm:$0x1]  ;;  %p895_p10 = scmp.lt.s32.totalorder %s12221_s0, 1  ;;  %vm12043_vm1 = vmmov 0  }
  0x54   : > { %9598 = vmatpush3.msk.msra.mxu1 %vm1132_vm0, %v1031_v7  ;;  %9599 = vmatprep.mubr.msk.f32.mxu1 %vm12043_vm1, %v16664_v5  ;;  %v10743_v8 = vpack.c.bf16 %v1002_v6, %v1001_v2  ;;  %v1003_v9 = vld [vmem:[%s16806_s9 + $0x20] sm:$0xff]  ;;  %v1004_v10 = vld [vmem:[%s16806_s9 + $0x28] sm:$0xff]  ;;  %vm1032_vm2 = vcmask 7168   ;;  %v1005_v13 = vld [vmem:[%s16806_s9 + $0x30] sm:$0xff]  ;;  %vm2156_vm3 = vcmask 1046528   ;;  %vm2816_vm4 = vcmask 1045504  }
  0x55   : > { %10741 = vmatpush1.bf16.msra.mxu0 %v10740_v4  ;;  %s896_s2 = scalar_select %p895_p10, %s12221_s0, 1  ;;  %10787 = vmatprep.subr.bf16.mxu1 %v16666_v3  ;;  %v10746_v11 = vpack.c.bf16 %v1004_v10, %v1003_v9  ;;  %v1006_v14 = vld [vmem:[%s16806_s9 + $0x38] sm:$0xff]  ;;  %v1007_v17 = vld [vmem:[%s16806_s9 + $0x40] sm:$0xff]  ;;  %v1008_v18 = vld [vmem:[%s16806_s9 + $0x48] sm:$0xff]  ;;  %vm3476_vm5 = vcmask 1044480   ;;  %vm4136_vm6 = vcmask 1043456  }
  0x56   : > { %10742 = vmatprep.subr.bf16.mxu0 %v16666_v3  ;;  %v10749_v16 = vpack.c.bf16 %v1006_v14, %v1005_v13  ;;  %v10752_v20 = vpack.c.bf16 %v1008_v18, %v1007_v17  ;;  %v1009_v21 = vld [vmem:[%s16806_s9 + $0x50] sm:$0xff]  ;;  %v1010_v22 = vld [vmem:[%s16806_s9 + $0x58] sm:$0xff]  ;;  %v8559_v24 = vld [vmem:[%s16806_s9 + $0x108] sm:$0xff]  ;;  %s16839_s13 = sld [smem:[#allocation7_spill]]  ;;  %s16960_s23 = sld [smem:[#allocation13_spill]] }
  0x57   : > { %s11675_s16 = smul.u32 792, %s896_s2  ;;  %v8560_v25 = vld [vmem:[%s16806_s9 + $0x110] sm:$0xff]  ;;  %v10755_v28 = vpack.c.bf16 %v1010_v22, %v1009_v21  ;;  %v1011_v29 = vld [vmem:[%s16806_s9 + $0x60] sm:$0xff]  ;;  %v1012_v30 = vld [vmem:[%s16806_s9 + $0x68] sm:$0xff]  ;;  %s16961_s2 = sld [smem:[#allocation15_spill]] }
  0x58   : > { %v10788_v27 = vpack.c.bf16 %v8560_v25, %v8559_v24  ;;  %v8561_v31 = vld [vmem:[%s16806_s9 + $0x118] sm:$0xff]  ;;  %v8562_v32 = vld [vmem:[%s16806_s9 + $0x120] sm:$0xff]  ;;  %v10758_v35 = vpack.c.bf16 %v1012_v30, %v1011_v29  ;;  %v8563_v36 = vld [vmem:[%s16806_s9 + $0x128] sm:$0xff]  ;;  %s17094_s12 = sld [smem:[#allocation24_spill]] }
  0x59   : > { %10744 = vmatpush1.bf16.msra.mxu0 %v10743_v8  ;;  %s12265_s22 = scalar_lea.vmem %s16812_s5, %s11675_s16  ;;  %v10791_v33 = vpack.c.bf16 %v8562_v32, %v8561_v31  ;;  %v1013_v37 = vld [vmem:[%s16806_s9 + $0x70] sm:$0xff]  ;;  %v1014_v38 = vld [vmem:[%s16806_s9 + $0x78] sm:$0xff]  ;;  %v8566_v44 = vld [vmem:[%s16806_s9 + $0x140] sm:$0xff]  ;;  %s16963_s16 = sld [smem:[#allocation12_spill]] }
  0x5a   : > { %v902_v12 = vld [vmem:[%s12265_s22 + $0x10] sm:$0xff]  ;;  %10745 = vmatprep.subr.bf16.mxu0 %v16666_v3  ;;  %v905_v15 = vld [vmem:[%s12265_s22 + $0x28] sm:$0xff]  ;;  %v908_v19 = vld [vmem:[%s12265_s22 + $0x40] sm:$0xff]  ;;  %v10761_v43 = vpack.c.bf16 %v1014_v38, %v1013_v37  ;;  %s17093_s5 = sld [smem:[#allocation22_spill]] }
  0x5b   : > { %9600 = vmatmul.mubr.msk.f32.vlgmr.msra.gmra.mrb[0].mxu1 %vm1032_vm2, %v902_v12  ;;  %v12286_v23 = vld [vmem:[%s12265_s22 + $0x8] sm:$0xff]  ;;  %v911_v26 = vld [vmem:[%s12265_s22 + $0x58] sm:$0xff]  ;;  %v914_v34 = vld [vmem:[%s12265_s22 + $0x70] sm:$0xff] }
  0x5c   : > { %9602 = vmatprep.mubr.msk.f32.mxu1 %vm12043_vm1, %v16664_v5  ;;  %1200 = vmatprep.mubr.f32.mxu0 %v12286_v23  ;;  %v8564_v39 = vld [vmem:[%s16806_s9 + $0x130] sm:$0xff]  ;;  %v917_v41 = vld [vmem:[%s12265_s22 + $0x88] sm:$0xff]  ;;  %v8565_v42 = vld [vmem:[%s16806_s9 + $0x138] sm:$0xff] }
  0x5d   : > { %10747 = vmatpush1.bf16.msra.mxu0 %v10746_v11  ;;  %10789 = vmatpush1.bf16.msra.mxu1 %v10788_v27  ;;  %v10794_v40 = vpack.c.bf16 %v8564_v39, %v8563_v36  ;;  %v1015_v45 = vld [vmem:[%s16806_s9 + $0x80] sm:$0xff]  ;;  %v1016_v46 = vld [vmem:[%s16806_s9 + $0x88] sm:$0xff]  ;;  %v10797_v47 = vpack.c.bf16 %v8566_v44, %v8565_v42  ;;  %v8568_v49 = vld [vmem:[%s16806_s9 + $0x150] sm:$0xff] }
  0x5e   : > { %10748 = vmatprep.subr.bf16.mxu0 %v16666_v3  ;;  %10790 = vmatprep.subr.bf16.mxu1 %v16666_v3  ;;  %v8567_v48 = vld [vmem:[%s16806_s9 + $0x148] sm:$0xff]  ;;  %v920_v50 = vld [vmem:[%s12265_s22 + $0xa0] sm:$0xff]  ;;  %v10764_v51 = vpack.c.bf16 %v1016_v46, %v1015_v45  ;;  %v1017_v52 = vld [vmem:[%s16806_s9 + $0x90] sm:$0xff] }
  0x5f   : > { %9603 = vmatmul.mubr.msk.f32.gmra.mrb[2].mxu1 %vm1032_vm2, %v905_v15  ;;  %v1018_v53 = vld [vmem:[%s16806_s9 + $0x98] sm:$0xff]  ;;  %v10800_v54 = vpack.c.bf16 %v8568_v49, %v8567_v48  ;;  %v8570_v56 = vld [vmem:[%s16806_s9 + $0x160] sm:$0xff]  ;;  %v1020_v60 = vld [vmem:[%s16806_s9 + $0xa8] sm:$0xff] }
  0x60   : > { %9605 = vmatprep.mubr.msk.f32.mxu1 %vm12043_vm1, %v16664_v5  ;;  %v8569_v55 = vld [vmem:[%s16806_s9 + $0x158] sm:$0xff]  ;;  %v10767_v58 = vpack.c.bf16 %v1018_v53, %v1017_v52  ;;  %v1019_v59 = vld [vmem:[%s16806_s9 + $0xa0] sm:$0xff]  ;;  %v8571_v62 = vld [vmem:[%s16806_s9 + $0x168] sm:$0xff] }
  0x61   : > { %10750 = vmatpush1.bf16.msra.mxu0 %v10749_v16  ;;  %10792 = vmatpush1.bf16.msra.mxu1 %v10791_v33  ;;  %v923_v57 = vld [vmem:[%s12265_s22 + $0xb8] sm:$0xff]  ;;  %v10803_v61 = vpack.c.bf16 %v8570_v56, %v8569_v55  ;;  %v8572_v63 = vld [vmem:[%s16806_s9 + $0x170] sm:$0xff]  ;;  %v10770_v1 = vpack.c.bf16 %v1020_v60, %v1019_v59  ;;  %v8574_v8 = vld [vmem:[%s16806_s9 + $0x180] sm:$0xff] }
  0x62   : > { %10751 = vmatprep.subr.bf16.mxu0 %v16666_v3  ;;  %10793 = vmatprep.subr.bf16.mxu1 %v16666_v3  ;;  %v926_v0 = vld [vmem:[%s12265_s22 + $0xd0] sm:$0xff]  ;;  %v1022_v4 = vld [vmem:[%s16806_s9 + $0xb8] sm:$0xff]  ;;  %v10806_v6 = vpack.c.bf16 %v8572_v63, %v8571_v62  ;;  %v929_v9 = vld [vmem:[%s12265_s22 + $0xe8] sm:$0xff] }
  0x63   : > { %9606 = vmatmul.mubr.msk.f32.gmra.mrb[4].mxu1 %vm1032_vm2, %v908_v19  ;;  %v1021_v2 = vld [vmem:[%s16806_s9 + $0xb0] sm:$0xff]  ;;  %v8573_v7 = vld [vmem:[%s16806_s9 + $0x178] sm:$0xff]  ;;  %v1023_v11 = vld [vmem:[%s16806_s9 + $0xc0] sm:$0xff] }
  0x64   : > { %9608 = vmatprep.mubr.msk.f32.mxu1 %vm12043_vm1, %v16664_v5  ;;  %v10773_v10 = vpack.c.bf16 %v1022_v4, %v1021_v2  ;;  %v1024_v12 = vld [vmem:[%s16806_s9 + $0xc8] sm:$0xff]  ;;  %v10809_v13 = vpack.c.bf16 %v8574_v8, %v8573_v7  ;;  %v8576_v15 = vld [vmem:[%s16806_s9 + $0x190] sm:$0xff]  ;;  %v932_v16 = vld [vmem:[%s12265_s22 + $0x100] sm:$0xff] }
  0x65   : > { %10753 = vmatpush1.bf16.msra.mxu0 %v10752_v20  ;;  %10795 = vmatpush1.bf16.msra.mxu1 %v10794_v40  ;;  %v8575_v14 = vld [vmem:[%s16806_s9 + $0x188] sm:$0xff]  ;;  %v10776_v17 = vpack.c.bf16 %v1024_v12, %v1023_v11  ;;  %v1025_v18 = vld [vmem:[%s16806_s9 + $0xd0] sm:$0xff]  ;;  %v1026_v19 = vld [vmem:[%s16806_s9 + $0xd8] sm:$0xff] }
  0x66   : > { %10754 = vmatprep.subr.bf16.mxu0 %v16666_v3  ;;  %10796 = vmatprep.subr.bf16.mxu1 %v16666_v3  ;;  %v10812_v20 = vpack.c.bf16 %v8576_v15, %v8575_v14  ;;  %v8577_v21 = vld [vmem:[%s16806_s9 + $0x198] sm:$0xff]  ;;  %v8578_v22 = vld [vmem:[%s16806_s9 + $0x1a0] sm:$0xff]  ;;  %v10779_v25 = vpack.c.bf16 %v1026_v19, %v1025_v18  ;;  %v1028_v27 = vld [vmem:[%s16806_s9 + $0xe8] sm:$0xff] }
  0x67   : > { %9609 = vmatmul.mubr.msk.f32.gmra.mrb[6].mxu1 %vm1032_vm2, %v911_v26  ;;  %v935_v24 = vld [vmem:[%s12265_s22 + $0x118] sm:$0xff]  ;;  %v1027_v26 = vld [vmem:[%s16806_s9 + $0xe0] sm:$0xff]  ;;  %v8579_v29 = vld [vmem:[%s16806_s9 + $0x1a8] sm:$0xff] }
  0x68   : > { %9611 = vmatprep.mubr.msk.f32.mxu1 %vm12043_vm1, %v16664_v5  ;;  %v8580_v30 = vld [vmem:[%s16806_s9 + $0x1b0] sm:$0xff]  ;;  %v10782_v32 = vpack.c.bf16 %v1028_v27, %v1027_v26  ;;  %v8581_v36 = vld [vmem:[%s16806_s9 + $0x1b8] sm:$0xff]  ;;  %v8582_v37 = vld [vmem:[%s16806_s9 + $0x1c0] sm:$0xff] }
  0x69   : > { %10756 = vmatpush1.bf16.msra.mxu0 %v10755_v28  ;;  %10798 = vmatpush1.bf16.msra.mxu1 %v10797_v47  ;;  %v10815_v28 = vpack.c.bf16 %v8578_v22, %v8577_v21  ;;  %v938_v31 = vld [vmem:[%s12265_s22 + $0x130] sm:$0xff]  ;;  %v941_v38 = vld [vmem:[%s12265_s22 + $0x148] sm:$0xff]  ;;  %v10821_v42 = vpack.c.bf16 %v8582_v37, %v8581_v36  ;;  %v944_v45 = vld [vmem:[%s12265_s22 + $0x160] sm:$0xff] }
  0x6a   : > { %10757 = vmatprep.subr.bf16.mxu0 %v16666_v3  ;;  %10799 = vmatprep.subr.bf16.mxu1 %v16666_v3  ;;  %v1029_v33 = vld [vmem:[%s16806_s9 + $0xf0] sm:$0xff]  ;;  %v12408_v46 = vld [vmem:[%s12265_s22] sm:$0xff]  ;;  %v8585_v52 = vld [vmem:[%s16806_s9 + $0x1d8] sm:$0xff] }
  0x6b   : > { %9612 = vmatmul.mubr.msk.f32.gmra.mrb[8].mxu1 %vm1032_vm2, %v914_v34  ;;  %v1030_v34 = vld [vmem:[%s16806_s9 + $0xf8] sm:$0xff]  ;;  %v8626_v40 = vld [vmem:[%s16806_s9 + $0x210] sm:$0xff]  ;;  %v12412_v48 = vld [vmem:[%s12265_s22 + $0x20] sm:$0xff] }
  0x6c   : > { %9614 = vmatprep.mubr.msk.f32.mxu1 %vm12043_vm1, %v16664_v5  ;;  %v10785_v39 = vpack.c.bf16 %v1030_v34, %v1029_v33  ;;  %v8584_v44 = vld [vmem:[%s16806_s9 + $0x1d0] sm:$0xff]  ;;  %v8628_v49 = vld [vmem:[%s16806_s9 + $0x220] sm:$0xff]  ;;  %v12426_v55 = vld [vmem:[%s12265_s22 + $0x18] sm:$0xff] }
  0x6d   : > { %10759 = vmatpush1.bf16.msra.mxu0 %v10758_v35  ;;  %10801 = vmatpush1.bf16.msra.mxu1 %v10800_v54  ;;  %v10818_v35 = vpack.c.bf16 %v8580_v30, %v8579_v29  ;;  %v8586_v53 = vld [vmem:[%s16806_s9 + $0x1e0] sm:$0xff]  ;;  %v947_v54 = vld [vmem:[%s12265_s22 + $0x178] sm:$0xff]  ;;  %v8588_v62 = vld [vmem:[%s16806_s9 + $0x1f0] sm:$0xff] }
  0x6e   : > { %10760 = vmatprep.subr.bf16.mxu0 %v16666_v3  ;;  %10802 = vmatprep.subr.bf16.mxu1 %v16666_v3  ;;  %v8631_v59 = vld [vmem:[%s16806_s9 + $0x238] sm:$0xff]  ;;  %v10827_v60 = vpack.c.bf16 %v8586_v53, %v8585_v52  ;;  %v950_v63 = vld [vmem:[%s12265_s22 + $0x190] sm:$0xff]  ;;  %v8632_v4 = vld [vmem:[%s16806_s9 + $0x240] sm:$0xff] }
  0x6f   : > { %9615 = vmatmul.mubr.msk.f32.gmra.mrb[10].mxu1 %vm1032_vm2, %v917_v41  ;;  %v8627_v41 = vld [vmem:[%s16806_s9 + $0x218] sm:$0xff]  ;;  %v12447_v2 = vld [vmem:[%s12265_s22 + $0x50] sm:$0xff]  ;;  %v12462_v11 = vld [vmem:[%s12265_s22 + $0x48] sm:$0xff] }
  0x70   : > { %9617 = vmatprep.mubr.msk.f32.mxu1 %vm12043_vm1, %v16664_v5  ;;  %v10836_v47 = vpack.c.bf16 %v8627_v41, %v8626_v40  ;;  %v8589_v8 = vld [vmem:[%s16806_s9 + $0x1f8] sm:$0xff]  ;;  %v8634_v14 = vld [vmem:[%s16806_s9 + $0x250] sm:$0xff]  ;;  %v12478_v18 = vld [vmem:[%s12265_s22 + $0x60] sm:$0xff] }
  0x71   : > { %10762 = vmatpush1.bf16.msra.mxu0 %v10761_v43  ;;  %10804 = vmatpush1.bf16.msra.mxu1 %v10803_v61  ;;  %v8583_v43 = vld [vmem:[%s16806_s9 + $0x1c8] sm:$0xff]  ;;  %v8635_v15 = vld [vmem:[%s16806_s9 + $0x258] sm:$0xff]  ;;  %v8636_v21 = vld [vmem:[%s16806_s9 + $0x260] sm:$0xff] }
  0x72   : > { %10763 = vmatprep.subr.bf16.mxu0 %v16666_v3  ;;  %10805 = vmatprep.subr.bf16.mxu1 %v16666_v3  ;;  %v8587_v61 = vld [vmem:[%s16806_s9 + $0x1e8] sm:$0xff]  ;;  %v10848_v19 = vpack.c.bf16 %v8635_v15, %v8634_v14  ;;  %v12497_v27 = vld [vmem:[%s12265_s22 + $0x98] sm:$0xff]  ;;  %v962_v30 = vld [vmem:[%s12265_s22 + $0x1f0] sm:$0xff] }
  0x73   : > { %9618 = vmatmul.mubr.msk.f32.gmra.mrb[12].mxu1 %vm1032_vm2, %v920_v50  ;;  %v8629_v50 = vld [vmem:[%s16806_s9 + $0x228] sm:$0xff]  ;;  %v10830_v7 = vpack.c.bf16 %v8588_v62, %v8587_v61  ;;  %v8639_v29 = vld [vmem:[%s16806_s9 + $0x278] sm:$0xff]  ;;  %v12512_v33 = vld [vmem:[%s12265_s22 + $0xb0] sm:$0xff] }
  0x74   : > { %9620 = vmatprep.mubr.msk.f32.mxu1 %vm12043_vm1, %v16664_v5  ;;  %v10839_v56 = vpack.c.bf16 %v8629_v50, %v8628_v49  ;;  %v8637_v22 = vld [vmem:[%s16806_s9 + $0x268] sm:$0xff]  ;;  %v8640_v34 = vld [vmem:[%s16806_s9 + $0x280] sm:$0xff]  ;;  %v8642_v40 = vld [vmem:[%s16806_s9 + $0x290] sm:$0xff] }
  0x75   : > { %10765 = vmatpush1.bf16.msra.mxu0 %v10764_v51  ;;  %10807 = vmatpush1.bf16.msra.mxu1 %v10806_v6  ;;  %v10824_v51 = vpack.c.bf16 %v8584_v44, %v8583_v43  ;;  %v8633_v6 = vld [vmem:[%s16806_s9 + $0x248] sm:$0xff]  ;;  %v10851_v26 = vpack.c.bf16 %v8637_v22, %v8636_v21  ;;  %v8643_v41 = vld [vmem:[%s16806_s9 + $0x298] sm:$0xff]  ;;  %v12539_v43 = vld [vmem:[%s12265_s22 + $0xc0] sm:$0xff] }
  0x76   : > { %10766 = vmatprep.subr.bf16.mxu0 %v16666_v3  ;;  %10808 = vmatprep.subr.bf16.mxu1 %v16666_v3  ;;  %v10845_v12 = vpack.c.bf16 %v8633_v6, %v8632_v4  ;;  %v965_v36 = vld [vmem:[%s12265_s22 + $0x208] sm:$0xff]  ;;  %v10860_v44 = vpack.c.bf16 %v8643_v41, %v8642_v40  ;;  %v971_v50 = vld [vmem:[%s12265_s22 + $0x238] sm:$0xff]  ;;  %v12572_v61 = vld [vmem:[%s12265_s22 + $0x110] sm:$0xff] }
  0x77   : > { %9621 = vmatmul.mubr.msk.f32.gmra.mrb[14].mxu1 %vm1032_vm2, %v923_v57  ;;  %v12429_v57 = vld [vmem:[%s12265_s22 + $0x38] sm:$0xff]  ;;  %v12524_v37 = vld [vmem:[%s12265_s22 + $0xa8] sm:$0xff]  ;;  %v8648_v62 = vld [vmem:[%s16806_s9 + $0x2c0] sm:$0xff] }
  0x78   : > { %9623 = vmatprep.mubr.msk.f32.mxu1 %vm12043_vm1, %v16664_v5  ;;  %v8645_v49 = vld [vmem:[%s16806_s9 + $0x2a8] sm:$0xff]  ;;  %v12557_v53 = vld [vmem:[%s12265_s22 + $0xf8] sm:$0xff]  ;;  %v12602_v15 = vld [vmem:[%s12265_s22 + $0x140] sm:$0xff] }
  0x79   : > { %10768 = vmatpush1.bf16.msra.mxu0 %v10767_v58  ;;  %10810 = vmatpush1.bf16.msra.mxu1 %v10809_v13  ;;  %v8630_v58 = vld [vmem:[%s16806_s9 + $0x230] sm:$0xff]  ;;  %v12465_v13 = vld [vmem:[%s12265_s22 + $0x68] sm:$0xff]  ;;  %v12614_v21 = vld [vmem:[%s12265_s22 + $0x138] sm:$0xff] }
  0x7a   : > { %10769 = vmatprep.subr.bf16.mxu0 %v16666_v3  ;;  %10811 = vmatprep.subr.bf16.mxu1 %v16666_v3  ;;  %v12584_v4 = vld [vmem:[%s12265_s22 + $0x108] sm:$0xff] }
  0x7b   : > { %9624 = vmatmul.mubr.msk.f32.gmra.mrb[16].mxu1 %vm1032_vm2, %v926_v0  ;;  %v12444_v0 = vld [vmem:[%s12265_s22 + $0x30] sm:$0xff]  ;;  %v12644_v40 = vld [vmem:[%s12265_s22 + $0x168] sm:$0xff] }
  0x7c   : > { %9626 = vmatprep.mubr.msk.f32.mxu1 %vm12043_vm1, %v16664_v5 }
  0x7d   : > { %10771 = vmatpush1.bf16.msra.mxu0 %v10770_v1  ;;  %10813 = vmatpush1.bf16.msra.mxu1 %v10812_v20  ;;  %v10842_v1 = vpack.c.bf16 %v8631_v59, %v8630_v58  ;;  %v12481_v20 = vld [vmem:[%s12265_s22 + $0x80] sm:$0xff]  ;;  %v974_v58 = vld [vmem:[%s12265_s22 + $0x250] sm:$0xff] }
  0x7e   : > { %10772 = vmatprep.subr.bf16.mxu0 %v16666_v3  ;;  %10814 = vmatprep.subr.bf16.mxu1 %v16666_v3  ;;  %v12569_v59 = vld [vmem:[%s12265_s22 + $0xf0] sm:$0xff] }
  0x7f   : > { %9627 = vmatmul.mubr.msk.f32.gmra.mrb[18].mxu1 %vm1032_vm2, %v929_v9  ;;  %v8590_v9 = vld [vmem:[%s16806_s9 + $0x200] sm:$0xff] }
  0x80   : > { %9629 = vmatprep.mubr.msk.f32.mxu1 %vm12043_vm1, %v16664_v5 }
  0x81   : > { %10774 = vmatpush1.bf16.msra.mxu0 %v10773_v10  ;;  %10816 = vmatpush1.bf16.msra.mxu1 %v10815_v28  ;;  %v953_v10 = vld [vmem:[%s12265_s22 + $0x1a8] sm:$0xff]  ;;  %v8638_v28 = vld [vmem:[%s16806_s9 + $0x270] sm:$0xff] }
  0x82   : > { %10775 = vmatprep.subr.bf16.mxu0 %v16666_v3  ;;  %10817 = vmatprep.subr.bf16.mxu1 %v16666_v3 }
  0x83   : > { %9630 = vmatmul.mubr.msk.f32.gmra.mrb[20].mxu1 %vm1032_vm2, %v932_v16  ;;  %v10833_v16 = vpack.c.bf16 %v8590_v9, %v8589_v8  ;;  %v8650_v8 = vld [vmem:[%s16806_s9 + $0x2d0] sm:$0xff]  ;;  %v8651_v9 = vld [vmem:[%s16806_s9 + $0x2d8] sm:$0xff] }
  0x84   : > { %9632 = vmatprep.mubr.msk.f32.mxu1 %vm12043_vm1, %v16664_v5  ;;  %v10872_v14 = vpack.c.bf16 %v8651_v9, %v8650_v8  ;;  %v12707_v8 = vld [vmem:[%s12265_s22 + $0x200] sm:$0xff]  ;;  %v12715_v9 = vld [vmem:[%s12265_s22 + $0x1f8] sm:$0xff] }
  0x85   : > { %10777 = vmatpush1.bf16.msra.mxu0 %v10776_v17  ;;  %10819 = vmatpush1.bf16.msra.mxu1 %v10818_v35  ;;  %v956_v17 = vld [vmem:[%s12265_s22 + $0x1c0] sm:$0xff]  ;;  %v8641_v35 = vld [vmem:[%s16806_s9 + $0x288] sm:$0xff] }
  0x86   : > { %10778 = vmatprep.subr.bf16.mxu0 %v16666_v3  ;;  %10820 = vmatprep.subr.bf16.mxu1 %v16666_v3 }
  0x87   : > { %9633 = vmatmul.mubr.msk.f32.gmra.mrb[22].mxu1 %vm1032_vm2, %v935_v24  ;;  %v959_v24 = vld [vmem:[%s12265_s22 + $0x1d8] sm:$0xff] }
  0x88   : > { %9635 = vmatprep.mubr.msk.f32.mxu1 %vm12043_vm1, %v16664_v5 }
  0x89   : > { %10780 = vmatpush1.bf16.msra.mxu0 %v10779_v25  ;;  %10822 = vmatpush1.bf16.msra.mxu1 %v10821_v42  ;;  %v12494_v25 = vld [vmem:[%s12265_s22 + $0x78] sm:$0xff]  ;;  %v968_v42 = vld [vmem:[%s12265_s22 + $0x220] sm:$0xff] }
  0x8a   : > { %10781 = vmatprep.subr.bf16.mxu0 %v16666_v3  ;;  %10823 = vmatprep.subr.bf16.mxu1 %v16666_v3 }
  0x8b   : > { %9636 = vmatmul.mubr.msk.f32.gmra.mrb[24].mxu1 %vm1032_vm2, %v938_v31  ;;  %v12509_v31 = vld [vmem:[%s12265_s22 + $0x90] sm:$0xff] }
  0x8c   : > { %9638 = vmatprep.mubr.msk.f32.mxu1 %vm12043_vm1, %v16664_v5 }
  0x8d   : > { %10783 = vmatpush1.bf16.msra.mxu0 %v10782_v32  ;;  %10825 = vmatpush1.bf16.msra.mxu1 %v10824_v51  ;;  %v10854_v32 = vpack.c.bf16 %v8639_v29, %v8638_v28  ;;  %v12554_v51 = vld [vmem:[%s12265_s22 + $0xd8] sm:$0xff]  ;;  %v986_v29 = vld [vmem:[%s12265_s22 + $0x2b0] sm:$0xff] }
  0x8e   : > { %10784 = vmatprep.subr.bf16.mxu0 %v16666_v3  ;;  %10826 = vmatprep.subr.bf16.mxu1 %v16666_v3  ;;  %v8655_v28 = vld [vmem:[%s16806_s9 + $0x2f8] sm:$0xff] }
  0x8f   : > { %9639 = vmatmul.mubr.msk.f32.gmra.mrb[26].mxu1 %vm1032_vm2, %v941_v38  ;;  %v10857_v38 = vpack.c.bf16 %v8641_v35, %v8640_v34  ;;  %v12632_v34 = vld [vmem:[%s12265_s22 + $0x170] sm:$0xff]  ;;  %v8656_v35 = vld [vmem:[%s16806_s9 + $0x300] sm:$0xff] }
  0x90   : > { %9641 = vmatprep.mubr.msk.f32.mxu1 %vm12043_vm1, %v16664_v5 }
  0x91   : > { %10786 = vmatpush1.bf16.msra.mxu0 %v10785_v39  ;;  %10828 = vmatpush1.bf16.msra.mxu1 %v10827_v60  ;;  %v12527_v39 = vld [vmem:[%s12265_s22 + $0xc8] sm:$0xff] }
  0x92   : > { %10835 = vmatprep.subr.bf16.mxu0 %v16666_v3  ;;  %10829 = vmatprep.subr.bf16.mxu1 %v16666_v3 }
  0x93   : > { %9642 = vmatmul.mubr.msk.f32.gmra.mrb[28].mxu1 %vm1032_vm2, %v944_v45  ;;  %v12542_v45 = vld [vmem:[%s12265_s22 + $0xe0] sm:$0xff] }
  0x94   : > { %1201 = vmatmul.mubr.f32.vlgmr.msra.gmra.mrb[0].mxu0 %v12408_v46  ;;  %9644 = vmatprep.mubr.msk.f32.mxu1 %vm12043_vm1, %v16664_v5 }
  0x95   : > { %10837 = vmatpush1.bf16.msra.mxu0 %v10836_v47  ;;  %1205 = vmatprep.mubr.f32.mxu0 %v12412_v48  ;;  %v8644_v47 = vld [vmem:[%s16806_s9 + $0x2a0] sm:$0xff] }
  0x96   : > { %10838 = vmatprep.subr.bf16.mxu0 %v16666_v3  ;;  %10831 = vmatpush1.bf16.msra.mxu1 %v10830_v7  ;;  %v10863_v52 = vpack.c.bf16 %v8645_v49, %v8644_v47  ;;  %v12587_v7 = vld [vmem:[%s12265_s22 + $0x128] sm:$0xff]  ;;  %v12657_v47 = vld [vmem:[%s12265_s22 + $0x180] sm:$0xff] }
  0x97   : > { %9645 = vmatmul.mubr.msk.f32.gmra.mrb[30].mxu1 %vm1032_vm2, %v947_v54  ;;  %10832 = vmatprep.subr.bf16.mxu1 %v16666_v3  ;;  %v8646_v54 = vld [vmem:[%s16806_s9 + $0x2b0] sm:$0xff]  ;;  %v12660_v49 = vld [vmem:[%s12265_s22 + $0x1a0] sm:$0xff] }
  0x98   : > { %1206 = vmatmul.mubr.f32.gmra.mrb[2].mxu0 %v12426_v55  ;;  %9647 = vmatprep.mubr.msk.f32.mxu1 %vm12043_vm1, %v16664_v5 }
  0x99   : > { %1210 = vmatprep.mubr.f32.mxu0 %v12429_v57  ;;  %10840 = vmatpush1.bf16.msra.mxu0 %v10839_v56  ;;  %v8647_v56 = vld [vmem:[%s16806_s9 + $0x2b8] sm:$0xff] }
  0x9a   : > { %10841 = vmatprep.subr.bf16.mxu0 %v16666_v3  ;;  %10834 = vmatpush1.bf16.msra.mxu1 %v10833_v16  ;;  %v10866_v60 = vpack.c.bf16 %v8647_v56, %v8646_v54  ;;  %v8652_v16 = vld [vmem:[%s16806_s9 + $0x2e0] sm:$0xff]  ;;  %v12673_v54 = vld [vmem:[%s12265_s22 + $0x1b8] sm:$0xff]  ;;  %v998_v56 = vld [vmem:[%s12265_s22 + $0x310] sm:$0xf] }
  0x9b   : > { %9648 = vmatmul.mubr.msk.f32.gmra.mrb[32].mxu1 %vm1032_vm2, %v950_v63  ;;  %9698 = vmatprep.subr.mxu1 %v16664_v5  ;;  %v8649_v63 = vld [vmem:[%s16806_s9 + $0x2c8] sm:$0xff] }
  0x9c   : > { %1211 = vmatmul.mubr.f32.gmra.mrb[4].mxu0 %v12444_v0  ;;  %9650 = vmatprep.mubr.msk.f32.mxu1 %vm12043_vm1, %v16664_v5  ;;  %v10869_v6 = vpack.c.bf16 %v8649_v63, %v8648_v62  ;;  %v12692_v62 = vld [vmem:[%s12265_s22 + $0x1c8] sm:$0xff] }
  0x9d   : > { %1215 = vmatprep.mubr.f32.mxu0 %v12447_v2  ;;  %10843 = vmatpush1.bf16.msra.mxu0 %v10842_v1  ;;  %v977_v1 = vld [vmem:[%s12265_s22 + $0x268] sm:$0xff] }
  0x9e   : > { %10844 = vmatprep.subr.bf16.mxu0 %v16666_v3  ;;  %v12695_v63 = vld [vmem:[%s12265_s22 + $0x1e8] sm:$0xff] }
  0x9f   : > { %9651 = vmatmul.mubr.msk.f32.gmra.mrb[34].mxu1 %vm1032_vm2, %v953_v10  ;;  %v980_v10 = vld [vmem:[%s12265_s22 + $0x280] sm:$0xff] }
  0xa0   : > { %1216 = vmatmul.mubr.f32.gmra.mrb[6].mxu0 %v12462_v11  ;;  %9653 = vmatprep.mubr.msk.f32.mxu1 %vm12043_vm1, %v16664_v5 }
  0xa1   : > { %1220 = vmatprep.mubr.f32.mxu0 %v12465_v13  ;;  %10846 = vmatpush1.bf16.msra.mxu0 %v10845_v12  ;;  %v12599_v12 = vld [vmem:[%s12265_s22 + $0x120] sm:$0xff] }
  0xa2   : > { %10847 = vmatprep.subr.bf16.mxu0 %v16666_v3 }
  0xa3   : > { %9654 = vmatmul.mubr.msk.f32.gmra.mrb[36].mxu1 %vm1032_vm2, %v956_v17  ;;  %v8653_v17 = vld [vmem:[%s16806_s9 + $0x2e8] sm:$0xff] }
  0xa4   : > { %1221 = vmatmul.mubr.f32.gmra.mrb[8].mxu0 %v12478_v18  ;;  %9656 = vmatprep.mubr.msk.f32.mxu1 %vm12043_vm1, %v16664_v5  ;;  %v10875_v22 = vpack.c.bf16 %v8653_v17, %v8652_v16  ;;  %v12728_v16 = vld [vmem:[%s12265_s22 + $0x230] sm:$0xff]  ;;  %v12735_v17 = vld [vmem:[%s12265_s22 + $0x228] sm:$0xff] }
  0xa5   : > { %1225 = vmatprep.mubr.f32.mxu0 %v12481_v20  ;;  %10849 = vmatpush1.bf16.msra.mxu0 %v10848_v19  ;;  %v983_v19 = vld [vmem:[%s12265_s22 + $0x298] sm:$0xff] }
  0xa6   : > { %10850 = vmatprep.subr.bf16.mxu0 %v16666_v3 }
  0xa7   : > { %9657 = vmatmul.mubr.msk.f32.gmra.mrb[38].mxu1 %vm1032_vm2, %v959_v24  ;;  %v12617_v24 = vld [vmem:[%s12265_s22 + $0x158] sm:$0xff] }
  0xa8   : > { %1226 = vmatmul.mubr.f32.gmra.mrb[10].mxu0 %v12494_v25  ;;  %9659 = vmatprep.mubr.msk.f32.mxu1 %vm12043_vm1, %v16664_v5 }
  0xa9   : > { %1230 = vmatprep.mubr.f32.mxu0 %v12497_v27  ;;  %10852 = vmatpush1.bf16.msra.mxu0 %v10851_v26  ;;  %v8654_v26 = vld [vmem:[%s16806_s9 + $0x2f0] sm:$0xff] }
  0xaa   : > { %10853 = vmatprep.subr.bf16.mxu0 %v16666_v3 }
  0xab   : > { %9660 = vmatmul.mubr.msk.f32.gmra.mrb[40].mxu1 %vm1032_vm2, %v962_v30  ;;  %v12629_v30 = vld [vmem:[%s12265_s22 + $0x150] sm:$0xff] }
  0xac   : > { %1231 = vmatmul.mubr.f32.gmra.mrb[12].mxu0 %v12509_v31  ;;  %9662 = vmatprep.mubr.msk.f32.mxu1 %vm12043_vm1, %v16664_v5 }
  0xad   : > { %1235 = vmatprep.mubr.f32.mxu0 %v12512_v33  ;;  %10855 = vmatpush1.bf16.msra.mxu0 %v10854_v32  ;;  %v10878_v32 = vpack.c.bf16 %v8655_v28, %v8654_v26  ;;  %v12748_v26 = vld [vmem:[%s12265_s22 + $0x260] sm:$0xff]  ;;  %v12755_v28 = vld [vmem:[%s12265_s22 + $0x258] sm:$0xff] }
  0xae   : > { %10856 = vmatprep.subr.bf16.mxu0 %v16666_v3 }
  0xaf   : > { %9663 = vmatmul.mubr.msk.f32.gmra.mrb[42].mxu1 %vm1032_vm2, %v965_v36  ;;  %v8657_v36 = vld [vmem:[%s16806_s9 + $0x308] sm:$0xff] }
  0xb0   : > { %1236 = vmatmul.mubr.f32.gmra.mrb[14].mxu0 %v12524_v37  ;;  %9665 = vmatprep.mubr.msk.f32.mxu1 %vm12043_vm1, %v16664_v5  ;;  %v10881_v41 = vpack.c.bf16 %v8657_v36, %v8656_v35  ;;  %v12768_v35 = vld [vmem:[%s12265_s22 + $0x290] sm:$0xff]  ;;  %v12775_v36 = vld [vmem:[%s12265_s22 + $0x288] sm:$0xff] }
  0xb1   : > { %1240 = vmatprep.mubr.f32.mxu0 %v12527_v39  ;;  %10858 = vmatpush1.bf16.msra.mxu0 %v10857_v38  ;;  %v989_v38 = vld [vmem:[%s12265_s22 + $0x2c8] sm:$0xff] }
  0xb2   : > { %10859 = vmatprep.subr.bf16.mxu0 %v16666_v3 }
  0xb3   : > { %9666 = vmatmul.mubr.msk.f32.gmra.mrb[44].mxu1 %vm1032_vm2, %v968_v42  ;;  %v12647_v42 = vld [vmem:[%s12265_s22 + $0x188] sm:$0xff] }
  0xb4   : > { %1241 = vmatmul.mubr.f32.gmra.mrb[16].mxu0 %v12539_v43  ;;  %9668 = vmatprep.mubr.msk.f32.mxu1 %vm12043_vm1, %v16664_v5 }
  0xb5   : > { %1245 = vmatprep.mubr.f32.mxu0 %v12542_v45  ;;  %10861 = vmatpush1.bf16.msra.mxu0 %v10860_v44  ;;  %v992_v44 = vld [vmem:[%s12265_s22 + $0x2e0] sm:$0xff] }
  0xb6   : > { %10862 = vmatprep.subr.bf16.mxu0 %v16666_v3 }
  0xb7   : > { %9669 = vmatmul.mubr.msk.f32.gmra.mrb[46].mxu1 %vm1032_vm2, %v971_v50  ;;  %v995_v50 = vld [vmem:[%s12265_s22 + $0x2f8] sm:$0xff] }
  0xb8   : > { %1246 = vmatmul.mubr.f32.gmra.mrb[18].mxu0 %v12554_v51  ;;  %9671 = vmatprep.mubr.msk.f32.mxu1 %vm12043_vm1, %v16664_v5 }
  0xb9   : > { %1250 = vmatprep.mubr.f32.mxu0 %v12557_v53  ;;  %10864 = vmatpush1.bf16.msra.mxu0 %v10863_v52  ;;  %v12670_v52 = vld [vmem:[%s12265_s22 + $0x198] sm:$0xff] }
  0xba   : > { %10865 = vmatprep.subr.bf16.mxu0 %v16666_v3 }
  0xbb   : > { %9672 = vmatmul.mubr.msk.f32.gmra.mrb[48].mxu1 %vm1032_vm2, %v974_v58  ;;  %v12682_v58 = vld [vmem:[%s12265_s22 + $0x1b0] sm:$0xff] }
  0xbc   : > { %1251 = vmatmul.mubr.f32.gmra.mrb[20].mxu0 %v12569_v59  ;;  %9674 = vmatprep.mubr.msk.f32.mxu1 %vm12043_vm1, %v16664_v5 }
  0xbd   : > { %1255 = vmatprep.mubr.f32.mxu0 %v12572_v61  ;;  %10867 = vmatpush1.bf16.msra.mxu0 %v10866_v60  ;;  %v12685_v60 = vld [vmem:[%s12265_s22 + $0x1d0] sm:$0xff] }
  0xbe   : > { %10868 = vmatprep.subr.bf16.mxu0 %v16666_v3 }
  0xbf   : > { %9675 = vmatmul.mubr.msk.f32.gmra.mrb[50].mxu1 %vm1032_vm2, %v977_v1  ;;  %v8591_v1 = vld [vmem:[%s16806_s9 + $0x208] sm:$0x1] }
  0xc0   : > { %1256 = vmatmul.mubr.f32.gmra.mrb[22].mxu0 %v12584_v4  ;;  %9677 = vmatprep.mubr.msk.f32.mxu1 %vm12043_vm1, %v16664_v5 }
  0xc1   : > { %1260 = vmatprep.mubr.f32.mxu0 %v12587_v7  ;;  %10870 = vmatpush1.bf16.msra.mxu0 %v10869_v6  ;;  %v12703_v6 = vld [vmem:[%s12265_s22 + $0x1e0] sm:$0xff] }
  0xc2   : > { %10871 = vmatprep.subr.bf16.mxu0 %v16666_v3 }
  0xc3   : > { %9678 = vmatmul.mubr.msk.f32.gmra.mrb[52].mxu1 %vm1032_vm2, %v980_v10  ;;  %v12718_v10 = vld [vmem:[%s12265_s22 + $0x218] sm:$0xff] }
  0xc4   : > { %1261 = vmatmul.mubr.f32.gmra.mrb[24].mxu0 %v12599_v12  ;;  %9680 = vmatprep.mubr.msk.f32.mxu1 %vm12043_vm1, %v16664_v5 }
  0xc5   : > { %1265 = vmatprep.mubr.f32.mxu0 %v12602_v15  ;;  %10873 = vmatpush1.bf16.msra.mxu0 %v10872_v14  ;;  %v12725_v14 = vld [vmem:[%s12265_s22 + $0x210] sm:$0xff] }
  0xc6   : > { %10874 = vmatprep.subr.bf16.mxu0 %v16666_v3 }
  0xc7   : > { %9681 = vmatmul.mubr.msk.f32.gmra.mrb[54].mxu1 %vm1032_vm2, %v983_v19  ;;  %v12738_v19 = vld [vmem:[%s12265_s22 + $0x248] sm:$0xff] }
  0xc8   : > { %1266 = vmatmul.mubr.f32.gmra.mrb[26].mxu0 %v12614_v21  ;;  %9683 = vmatprep.mubr.msk.f32.mxu1 %vm12043_vm1, %v16664_v5 }
  0xc9   : > { %1270 = vmatprep.mubr.f32.mxu0 %v12617_v24  ;;  %10876 = vmatpush1.bf16.msra.mxu0 %v10875_v22  ;;  %v12745_v22 = vld [vmem:[%s12265_s22 + $0x240] sm:$0xff] }
  0xca   : > { %10877 = vmatprep.subr.bf16.mxu0 %v16666_v3 }
  0xcb   : > { %9684 = vmatmul.mubr.msk.f32.gmra.mrb[56].mxu1 %vm1032_vm2, %v986_v29  ;;  %v12758_v29 = vld [vmem:[%s12265_s22 + $0x278] sm:$0xff] }
  0xcc   : > { %1271 = vmatmul.mubr.f32.gmra.mrb[28].mxu0 %v12629_v30  ;;  %9686 = vmatprep.mubr.msk.f32.mxu1 %vm12043_vm1, %v16664_v5 }
  0xcd   : > { %1275 = vmatprep.mubr.f32.mxu0 %v12632_v34  ;;  %10879 = vmatpush1.bf16.msra.mxu0 %v10878_v32  ;;  %v12765_v32 = vld [vmem:[%s12265_s22 + $0x270] sm:$0xff] }
  0xce   : > { %10880 = vmatprep.subr.bf16.mxu0 %v16666_v3 }
  0xcf   : > { %9687 = vmatmul.mubr.msk.f32.gmra.mrb[58].mxu1 %vm1032_vm2, %v989_v38  ;;  %v12778_v38 = vld [vmem:[%s12265_s22 + $0x2a8] sm:$0xff] }
  0xd0   : > { %1276 = vmatmul.mubr.f32.gmra.mrb[30].mxu0 %v12644_v40  ;;  %9689 = vmatprep.mubr.msk.f32.mxu1 %vm12043_vm1, %v16664_v5 }
  0xd1   : > { %1280 = vmatprep.mubr.f32.mxu0 %v12647_v42  ;;  %10882 = vmatpush1.bf16.msra.mxu0 %v10881_v41  ;;  %v12785_v41 = vld [vmem:[%s12265_s22 + $0x2a0] sm:$0xff] }
  0xd2   : > { %9799 = vmatprep.subr.mxu0 %v16664_v5 }
  0xd3   : > { %9690 = vmatmul.mubr.msk.f32.gmra.mrb[60].mxu1 %vm1032_vm2, %v992_v44  ;;  %v12788_v44 = vld [vmem:[%s12265_s22 + $0x2c0] sm:$0xff] }
  0xd4   : > { %1281 = vmatmul.mubr.f32.gmra.mrb[32].mxu0 %v12657_v47  ;;  %9692 = vmatprep.mubr.msk.f32.mxu1 %vm12043_vm1, %v16664_v5 }
  0xd5   : > { %1285 = vmatprep.mubr.f32.mxu0 %v12660_v49 }
  0xd7   : > { %9693 = vmatmul.mubr.msk.f32.gmra.mrb[62].mxu1 %vm1032_vm2, %v995_v50  ;;  %v12795_v50 = vld [vmem:[%s12265_s22 + $0x2b8] sm:$0xff] }
  0xd8   : > { %1286 = vmatmul.mubr.f32.gmra.mrb[34].mxu0 %v12670_v52  ;;  %9695 = vmatprep.mubr.msk.f32.mxu1 %vm12043_vm1, %v16664_v5  ;;  %16813 = vst [vmem:[#allocation25_spill] sm:$0xff] %v12795_v50  ;;  %v12808_v5 = vld [vmem:[%s12265_s22 + $0x2f0] sm:$0xff] }
  0xd9   : > { %1290 = vmatprep.mubr.f32.mxu0 %v12673_v54  ;;  %16815 = vst [vmem:[#allocation27_spill] sm:$0xff] %v12808_v5 }
  0xdb   : > { %9696 = vmatmul.mubr.msk.f32.gmra.mrb[64].mxu1 %vm1032_vm2, %v998_v56  ;;  %v12798_v56 = vld [vmem:[%s12265_s22 + $0x2d8] sm:$0xff] }
  0xdc   : > { %1291 = vmatmul.mubr.f32.gmra.mrb[36].mxu0 %v12682_v58  ;;  %1727 = vmatprep.mubr.f32.mxu1 %v12286_v23  ;;  %16814 = vst [vmem:[#allocation26_spill] sm:$0xff] %v12798_v56 }
  0xdd   : > { %1295 = vmatprep.mubr.f32.mxu0 %v12685_v60 }
  0xdf   : > { %1728 = vmatmul.mubr.f32.vlgmr.msra.gmra.mrb[66].mxu1 %v12408_v46 }
  0xe0   : > { %1296 = vmatmul.mubr.f32.gmra.mrb[38].mxu0 %v12692_v62  ;;  %1732 = vmatprep.mubr.f32.mxu1 %v12412_v48 }
  0xe1   : > { %1300 = vmatprep.mubr.f32.mxu0 %v12695_v63  ;;  %9699 = vmatpush3.msk.msra.mxu1 %vm1132_vm0, %v8591_v1  ;;  %v12805_v1 = vld [vmem:[%s12265_s22 + $0x2d0] sm:$0xff] }
  0xe2   : > { %10883 = vmatprep.subr.bf16.mxu1 %v16666_v3  ;;  %v12815_v3 = vld [vmem:[%s12265_s22 + $0x2e8] sm:$0xff] }
  0xe3   : > { %1733 = vmatmul.mubr.f32.gmra.mrb[68].mxu1 %v12426_v55 }
  0xe4   : > { %1301 = vmatmul.mubr.f32.gmra.mrb[40].mxu0 %v12703_v6  ;;  %1737 = vmatprep.mubr.f32.mxu1 %v12429_v57 }
  0xe5   : > { %1305 = vmatprep.mubr.f32.mxu0 %v12707_v8 }
  0xe7   : > { %1738 = vmatmul.mubr.f32.gmra.mrb[70].mxu1 %v12444_v0 }
  0xe8   : > { %1306 = vmatmul.mubr.f32.gmra.mrb[42].mxu0 %v12715_v9  ;;  %1742 = vmatprep.mubr.f32.mxu1 %v12447_v2 }
  0xe9   : > { %1310 = vmatprep.mubr.f32.mxu0 %v12718_v10 }
  0xeb   : > { %1743 = vmatmul.mubr.f32.gmra.mrb[72].mxu1 %v12462_v11 }
  0xec   : > { %1311 = vmatmul.mubr.f32.gmra.mrb[44].mxu0 %v12725_v14  ;;  %1747 = vmatprep.mubr.f32.mxu1 %v12465_v13 }
  0xed   : > { %1315 = vmatprep.mubr.f32.mxu0 %v12728_v16 }
  0xef   : > { %1748 = vmatmul.mubr.f32.gmra.mrb[74].mxu1 %v12478_v18 }
  0xf0   : > { %1316 = vmatmul.mubr.f32.gmra.mrb[46].mxu0 %v12735_v17  ;;  %1752 = vmatprep.mubr.f32.mxu1 %v12481_v20 }
  0xf1   : > { %1320 = vmatprep.mubr.f32.mxu0 %v12738_v19 }
  0xf3   : > { %1753 = vmatmul.mubr.f32.gmra.mrb[76].mxu1 %v12494_v25 }
  0xf4   : > { %1321 = vmatmul.mubr.f32.gmra.mrb[48].mxu0 %v12745_v22  ;;  %1757 = vmatprep.mubr.f32.mxu1 %v12497_v27 }
  0xf5   : > { %1325 = vmatprep.mubr.f32.mxu0 %v12748_v26 }
  0xf7   : > { %1758 = vmatmul.mubr.f32.gmra.mrb[78].mxu1 %v12509_v31 }
  0xf8   : > { %1326 = vmatmul.mubr.f32.gmra.mrb[50].mxu0 %v12755_v28  ;;  %1762 = vmatprep.mubr.f32.mxu1 %v12512_v33 }
  0xf9   : > { %1330 = vmatprep.mubr.f32.mxu0 %v12758_v29 }
  0xfb   : > { %1763 = vmatmul.mubr.f32.gmra.mrb[80].mxu1 %v12524_v37 }
  0xfc   : > { %1331 = vmatmul.mubr.f32.gmra.mrb[52].mxu0 %v12765_v32  ;;  %1767 = vmatprep.mubr.f32.mxu1 %v12527_v39 }
  0xfd   : > { %1335 = vmatprep.mubr.f32.mxu0 %v12768_v35 }
  0xff   : > { %1768 = vmatmul.mubr.f32.gmra.mrb[82].mxu1 %v12539_v43 }
 0x100   : > { %1336 = vmatmul.mubr.f32.gmra.mrb[54].mxu0 %v12775_v36  ;;  %1772 = vmatprep.mubr.f32.mxu1 %v12542_v45 }
 0x101   : > { %1340 = vmatprep.mubr.f32.mxu0 %v12778_v38 }
 0x103   : > { %1773 = vmatmul.mubr.f32.gmra.mrb[84].mxu1 %v12554_v51 }
 0x104   : > { %1341 = vmatmul.mubr.f32.gmra.mrb[56].mxu0 %v12785_v41  ;;  %1777 = vmatprep.mubr.f32.mxu1 %v12557_v53 }
 0x105   : > { %1345 = vmatprep.mubr.f32.mxu0 %v12788_v44 }
 0x107   : > { %1778 = vmatmul.mubr.f32.gmra.mrb[86].mxu1 %v12569_v59 }
 0x108   : > { %1346 = vmatmul.mubr.f32.gmra.mrb[58].mxu0 %v12795_v50  ;;  %1782 = vmatprep.mubr.f32.mxu1 %v12572_v61  ;;  %v12818_v50 = vld [vmem:[%s12265_s22 + $0x308] sm:$0xf] }
 0x109   : > { %1350 = vmatprep.mubr.f32.mxu0 %v12798_v56  ;;  %16816 = vst [vmem:[#allocation28_spill] sm:$0xff] %v12818_v50  ;;  %v12825_v56 = vld [vmem:[%s12265_s22 + $0x300] sm:$0xf] }
 0x10b   : > { %1783 = vmatmul.mubr.f32.gmra.mrb[88].mxu1 %v12584_v4 }
 0x10c   : > { %1351 = vmatmul.mubr.f32.gmra.mrb[60].mxu0 %v12805_v1  ;;  %1787 = vmatprep.mubr.f32.mxu1 %v12587_v7 }
 0x10d   : > { %1355 = vmatprep.mubr.f32.mxu0 %v12808_v5  ;;  %v8658_v5 = vld [vmem:[%s16806_s9 + $0x310] sm:$0x1] }
 0x10f   : > { %1788 = vmatmul.mubr.f32.gmra.mrb[90].mxu1 %v12599_v12 }
 0x110   : > { %1356 = vmatmul.mubr.f32.gmra.mrb[62].mxu0 %v12815_v3  ;;  %1792 = vmatprep.mubr.f32.mxu1 %v12602_v15 }
 0x111   : > { %1360 = vmatprep.mubr.f32.mxu0 %v12818_v50  ;;  %v16817_v50 = vmov 0.0|0.0  }
 0x113   : > { %1793 = vmatmul.mubr.f32.gmra.mrb[92].mxu1 %v12614_v21 }
 0x114   : > { %1361 = vmatmul.mubr.f32.gmra.mrb[64].mxu0 %v12825_v56  ;;  %1797 = vmatprep.mubr.f32.mxu1 %v12617_v24 }
 0x115   : > { %2387 = vmatprep.mubr.f32.mxu0 %v12286_v23 }
 0x117   : > { %1798 = vmatmul.mubr.f32.gmra.mrb[94].mxu1 %v12629_v30 }
 0x118   : > { %2388 = vmatmul.mubr.f32.vlgmr.msra.gmra.mrb[66].mxu0 %v12408_v46  ;;  %1802 = vmatprep.mubr.f32.mxu1 %v12632_v34 }
 0x119   : > { %9800 = vmatpush3.msk.msra.mxu0 %vm1132_vm0, %v8658_v5  ;;  %2392 = vmatprep.mubr.f32.mxu0 %v12412_v48 }
 0x11a   : > { %10931 = vmatprep.subr.bf16.mxu0 %v16817_v50 }
 0x11b   : > { %1803 = vmatmul.mubr.f32.gmra.mrb[96].mxu1 %v12644_v40 }
 0x11c   : > { %2393 = vmatmul.mubr.f32.gmra.mrb[68].mxu0 %v12426_v55  ;;  %1807 = vmatprep.mubr.f32.mxu1 %v12647_v42 }
 0x11d   : > { %2397 = vmatprep.mubr.f32.mxu0 %v12429_v57 }
 0x11f   : > { %1808 = vmatmul.mubr.f32.gmra.mrb[98].mxu1 %v12657_v47 }
 0x120   : > { %2398 = vmatmul.mubr.f32.gmra.mrb[70].mxu0 %v12444_v0  ;;  %1812 = vmatprep.mubr.f32.mxu1 %v12660_v49 }
 0x121   : > { %2402 = vmatprep.mubr.f32.mxu0 %v12447_v2 }
 0x123   : > { %1813 = vmatmul.mubr.f32.gmra.mrb[100].mxu1 %v12670_v52 }
 0x124   : > { %2403 = vmatmul.mubr.f32.gmra.mrb[72].mxu0 %v12462_v11  ;;  %1817 = vmatprep.mubr.f32.mxu1 %v12673_v54 }
 0x125   : > { %2407 = vmatprep.mubr.f32.mxu0 %v12465_v13 }
 0x127   : > { %1818 = vmatmul.mubr.f32.gmra.mrb[102].mxu1 %v12682_v58 }
 0x128   : > { %2408 = vmatmul.mubr.f32.gmra.mrb[74].mxu0 %v12478_v18  ;;  %1822 = vmatprep.mubr.f32.mxu1 %v12685_v60 }
 0x129   : > { %2412 = vmatprep.mubr.f32.mxu0 %v12481_v20 }
 0x12b   : > { %1823 = vmatmul.mubr.f32.gmra.mrb[104].mxu1 %v12692_v62 }
 0x12c   : > { %2413 = vmatmul.mubr.f32.gmra.mrb[76].mxu0 %v12494_v25  ;;  %1827 = vmatprep.mubr.f32.mxu1 %v12695_v63 }
 0x12d   : > { %2417 = vmatprep.mubr.f32.mxu0 %v12497_v27 }
 0x12e   : > { %v12858_v5 = vpop.f32.mrb[0].mxu1 }
 0x12f   : > { %1828 = vmatmul.mubr.f32.gmra.mrb[106].mxu1 %v12703_v6  ;;  %v9601_v23 = vpop.f32.mrb[1].mxu1 }
 0x130   : > { %2418 = vmatmul.mubr.f32.gmra.mrb[78].mxu0 %v12509_v31  ;;  %1832 = vmatprep.mubr.f32.mxu1 %v12707_v8 }
 0x131   : > { %2422 = vmatprep.mubr.f32.mxu0 %v12512_v33 }
 0x132   : > { %v12864_v46 = vpop.f32.mrb[2].mxu1 }
 0x133   : > { %1833 = vmatmul.mubr.f32.gmra.mrb[108].mxu1 %v12715_v9  ;;  %v9604_v48 = vpop.f32.mrb[3].mxu1 }
 0x134   : > { %2423 = vmatmul.mubr.f32.gmra.mrb[80].mxu0 %v12524_v37  ;;  %1837 = vmatprep.mubr.f32.mxu1 %v12718_v10  ;;  %v8697_v48 = vld [vmem:[%s16806_s9 + $0x338] sm:$0xff] }
 0x135   : > { %2427 = vmatprep.mubr.f32.mxu0 %v12527_v39 }
 0x136   : > { %v12870_v55 = vpop.f32.mrb[4].mxu1 }
 0x137   : > { %1838 = vmatmul.mubr.f32.gmra.mrb[110].mxu1 %v12725_v14  ;;  %v9607_v57 = vpop.f32.mrb[5].mxu1 }
 0x138   : > { %2428 = vmatmul.mubr.f32.gmra.mrb[82].mxu0 %v12539_v43  ;;  %1842 = vmatprep.mubr.f32.mxu1 %v12728_v16  ;;  %v8698_v57 = vld [vmem:[%s16806_s9 + $0x340] sm:$0xff] }
 0x139   : > { %2432 = vmatprep.mubr.f32.mxu0 %v12542_v45  ;;  %v16818_v45 = vld [vmem:[#allocation25_spill] sm:$0xff] }
 0x13a   : > { %v12876_v0 = vpop.f32.mrb[6].mxu1 }
 0x13b   : > { %1843 = vmatmul.mubr.f32.gmra.mrb[112].mxu1 %v12735_v17  ;;  %v9610_v2 = vpop.f32.mrb[7].mxu1 }
 0x13c   : > { %2433 = vmatmul.mubr.f32.gmra.mrb[84].mxu0 %v12554_v51  ;;  %1847 = vmatprep.mubr.f32.mxu1 %v12738_v19  ;;  %v12958_v2 = vld [vmem:[%s12265_s22 + $0x28] sm:$0xff] }
 0x13d   : > { %2437 = vmatprep.mubr.f32.mxu0 %v12557_v53  ;;  %v16819_v53 = vld [vmem:[#allocation26_spill] sm:$0xff] }
 0x13e   : > { %v12882_v11 = vpop.f32.mrb[8].mxu1 }
 0x13f   : > { %1848 = vmatmul.mubr.f32.gmra.mrb[114].mxu1 %v12745_v22  ;;  %v9613_v13 = vpop.f32.mrb[9].mxu1 }
 0x140   : > { %2438 = vmatmul.mubr.f32.gmra.mrb[86].mxu0 %v12569_v59  ;;  %1852 = vmatprep.mubr.f32.mxu1 %v12748_v26 }
 0x141   : > { %2442 = vmatprep.mubr.f32.mxu0 %v12572_v61 }
 0x142   : > { %v12888_v18 = vpop.f32.mrb[10].mxu1 }
 0x143   : > { %1853 = vmatmul.mubr.f32.gmra.mrb[116].mxu1 %v12755_v28  ;;  %v9616_v20 = vpop.f32.mrb[11].mxu1 }
 0x144   : > { %2443 = vmatmul.mubr.f32.gmra.mrb[88].mxu0 %v12584_v4  ;;  %1857 = vmatprep.mubr.f32.mxu1 %v12758_v29  ;;  %v16820_v4 = vld [vmem:[#allocation27_spill] sm:$0xff] }
 0x145   : > { %2447 = vmatprep.mubr.f32.mxu0 %v12587_v7 }
 0x146   : > { %v12894_v25 = vpop.f32.mrb[12].mxu1 }
 0x147   : > { %1858 = vmatmul.mubr.f32.gmra.mrb[118].mxu1 %v12765_v32  ;;  %v9619_v27 = vpop.f32.mrb[13].mxu1 }
 0x148   : > { %2448 = vmatmul.mubr.f32.gmra.mrb[90].mxu0 %v12599_v12  ;;  %1862 = vmatprep.mubr.f32.mxu1 %v12768_v35  ;;  %v10890_v27 = vpack.c.bf16 %v8698_v57, %v8697_v48  ;;  %v8703_v48 = vld [vmem:[%s16806_s9 + $0x368] sm:$0xff]  ;;  %v8704_v57 = vld [vmem:[%s16806_s9 + $0x370] sm:$0xff] }
 0x149   : > { %2452 = vmatprep.mubr.f32.mxu0 %v12602_v15  ;;  %v16821_v15 = vld [vmem:[#allocation28_spill] sm:$0xff] }
 0x14a   : > { %v12900_v31 = vpop.f32.mrb[14].mxu1 }
 0x14b   : > { %1863 = vmatmul.mubr.f32.gmra.mrb[120].mxu1 %v12775_v36  ;;  %v9622_v33 = vpop.f32.mrb[15].mxu1 }
 0x14c   : > { %2453 = vmatmul.mubr.f32.gmra.mrb[92].mxu0 %v12614_v21  ;;  %1867 = vmatprep.mubr.f32.mxu1 %v12778_v38 }
 0x14d   : > { %2457 = vmatprep.mubr.f32.mxu0 %v12617_v24  ;;  %v8693_v24 = vld [vmem:[%s16806_s9 + $0x318] sm:$0xff] }
 0x14e   : > { %v12906_v37 = vpop.f32.mrb[16].mxu1 }
 0x14f   : > { %1868 = vmatmul.mubr.f32.gmra.mrb[122].mxu1 %v12785_v41  ;;  %v9625_v39 = vpop.f32.mrb[17].mxu1 }
 0x150   : > { %2458 = vmatmul.mubr.f32.gmra.mrb[94].mxu0 %v12629_v30  ;;  %1872 = vmatprep.mubr.f32.mxu1 %v12788_v44  ;;  %v8694_v30 = vld [vmem:[%s16806_s9 + $0x320] sm:$0xff]  ;;  %v8699_v39 = vld [vmem:[%s16806_s9 + $0x348] sm:$0xff] }
 0x151   : > { %2462 = vmatprep.mubr.f32.mxu0 %v12632_v34 }
 0x152   : > { %v12912_v43 = vpop.f32.mrb[18].mxu1 }
 0x153   : > { %1873 = vmatmul.mubr.f32.gmra.mrb[124].mxu1 %v16818_v45  ;;  %v9628_v51 = vpop.f32.mrb[19].mxu1 }
 0x154   : > { %2463 = vmatmul.mubr.f32.gmra.mrb[96].mxu0 %v12644_v40  ;;  %1877 = vmatprep.mubr.f32.mxu1 %v16819_v53  ;;  %v16822_v40 = vmov 0.0   ;;  %v8700_v51 = vld [vmem:[%s16806_s9 + $0x350] sm:$0xff] }
 0x155   : > { %2467 = vmatprep.mubr.f32.mxu0 %v12647_v42  ;;  %v10884_v42 = vpack.c.bf16 %v8694_v30, %v8693_v24  ;;  %v10893_v24 = vpack.c.bf16 %v8700_v51, %v8699_v39  ;;  %v8705_v39 = vld [vmem:[%s16806_s9 + $0x378] sm:$0xff]  ;;  %v8706_v51 = vld [vmem:[%s16806_s9 + $0x380] sm:$0xff] }
 0x156   : > { %v12918_v59 = vpop.f32.mrb[20].mxu1 }
 0x157   : > { %1878 = vmatmul.mubr.f32.gmra.mrb[126].mxu1 %v12805_v1  ;;  %v9631_v61 = vpop.f32.mrb[21].mxu1 }
 0x158   : > { %2468 = vmatmul.mubr.f32.gmra.mrb[98].mxu0 %v12657_v47  ;;  %1882 = vmatprep.mubr.f32.mxu1 %v16820_v4 }
 0x159   : > { %2472 = vmatprep.mubr.f32.mxu0 %v12660_v49  ;;  %v8695_v49 = vld [vmem:[%s16806_s9 + $0x328] sm:$0xff] }
 0x15a   : > { %v12924_v7 = vpop.f32.mrb[22].mxu1 }
 0x15b   : > { %1883 = vmatmul.mubr.f32.gmra.mrb[128].mxu1 %v12815_v3  ;;  %v9634_v12 = vpop.f32.mrb[23].mxu1 }
 0x15c   : > { %2473 = vmatmul.mubr.f32.gmra.mrb[100].mxu0 %v12670_v52  ;;  %1887 = vmatprep.mubr.f32.mxu1 %v16821_v15  ;;  %v8696_v52 = vld [vmem:[%s16806_s9 + $0x330] sm:$0xff] }
 0x15d   : > { %2477 = vmatprep.mubr.f32.mxu0 %v12673_v54  ;;  %v12944_v54 = vld [vmem:[%s12265_s22 + $0x10] sm:$0xff] }
 0x15e   : > { %v12930_v21 = vpop.f32.mrb[24].mxu1 }
 0x15f   : > { %1888 = vmatmul.mubr.f32.gmra.mrb[130].mxu1 %v12825_v56  ;;  %v9637_v34 = vpop.f32.mrb[25].mxu1 }
 0x160   : > { %2478 = vmatmul.mubr.f32.gmra.mrb[102].mxu0 %v12682_v58  ;;  %9700 = vmatprep.mubr.msk.f32.mxu1 %vm12043_vm1, %v16822_v40  ;;  %v10887_v58 = vpack.c.bf16 %v8696_v52, %v8695_v49  ;;  %v8701_v34 = vld [vmem:[%s16806_s9 + $0x358] sm:$0xff] }
 0x161   : > { %2482 = vmatprep.mubr.f32.mxu0 %v12685_v60 }
 0x162   : > { %v12939_v47 = vpop.f32.mrb[26].mxu1 }
 0x163   : > { %9701 = vmatmul.mubr.msk.f32.vlgmr.msra.gmra.mrb[66].mxu1 %vm1032_vm2, %v12944_v54  ;;  %v9640_v23 = vpop.f32.mrb[27].mxu1 }
 0x164   : > { %2483 = vmatmul.mubr.f32.gmra.mrb[104].mxu0 %v12692_v62  ;;  %9703 = vmatprep.mubr.msk.f32.mxu1 %vm12043_vm1, %v16822_v40 }
 0x165   : > { %2487 = vmatprep.mubr.f32.mxu0 %v12695_v63  ;;  %10885 = vmatpush1.bf16.msra.mxu1 %v10884_v42  ;;  %v8702_v42 = vld [vmem:[%s16806_s9 + $0x360] sm:$0xff] }
 0x166   : > { %v12952_v60 = vpop.f32.mrb[28].mxu1  ;;  %10886 = vmatprep.subr.bf16.mxu1 %v16817_v50  ;;  %v10896_v23 = vpack.c.bf16 %v8702_v42, %v8701_v34  ;;  %v8707_v34 = vld [vmem:[%s16806_s9 + $0x388] sm:$0xff]  ;;  %v8708_v42 = vld [vmem:[%s16806_s9 + $0x390] sm:$0xff] }
 0x167   : > { %9704 = vmatmul.mubr.msk.f32.gmra.mrb[68].mxu1 %vm1032_vm2, %v12958_v2  ;;  %v1202_v62 = vpop.f32.mrb[0].mxu0  ;;  %v9643_v13 = vpop.f32.mrb[29].mxu1 }
 0x168   : > { %v12963_v63 = vadd.f32 %v12858_v5, %v1202_v62  ;;  %v1204_v20 = vpop.f32.mrb[1].mxu0  ;;  %2488 = vmatmul.mubr.f32.gmra.mrb[106].mxu0 %v12703_v6  ;;  %9706 = vmatprep.mubr.msk.f32.mxu1 %vm12043_vm1, %v16822_v40  ;;  %v12975_v5 = vld [vmem:[%s12265_s22 + $0x40] sm:$0xff] }
 0x169   : > { %2492 = vmatprep.mubr.f32.mxu0 %v12707_v8  ;;  %10888 = vmatpush1.bf16.msra.mxu1 %v10887_v58  ;;  %v10899_v20 = vpack.c.bf16 %v8704_v57, %v8703_v48  ;;  %v8709_v48 = vld [vmem:[%s16806_s9 + $0x398] sm:$0xff]  ;;  %v8710_v57 = vld [vmem:[%s16806_s9 + $0x3a0] sm:$0xff] }
 0x16a   : > { %v12969_v33 = vpop.f32.mrb[30].mxu1  ;;  %10889 = vmatprep.subr.bf16.mxu1 %v16817_v50 }
 0x16b   : > { %9707 = vmatmul.mubr.msk.f32.gmra.mrb[70].mxu1 %vm1032_vm2, %v12975_v5  ;;  %v1207_v6 = vpop.f32.mrb[2].mxu0  ;;  %v9646_v61 = vpop.f32.mrb[31].mxu1 }
 0x16c   : > { %v12980_v8 = vadd.f32 %v12864_v46, %v1207_v6  ;;  %v1209_v12 = vpop.f32.mrb[3].mxu0  ;;  %2493 = vmatmul.mubr.f32.gmra.mrb[108].mxu0 %v12715_v9  ;;  %9709 = vmatprep.mubr.msk.f32.mxu1 %vm12043_vm1, %v16822_v40  ;;  %v12992_v46 = vld [vmem:[%s12265_s22 + $0x58] sm:$0xff] }
 0x16d   : > { %2497 = vmatprep.mubr.f32.mxu0 %v12718_v10  ;;  %10891 = vmatpush1.bf16.msra.mxu1 %v10890_v27  ;;  %v10902_v12 = vpack.c.bf16 %v8706_v51, %v8705_v39  ;;  %v8711_v39 = vld [vmem:[%s16806_s9 + $0x3a8] sm:$0xff]  ;;  %v8712_v51 = vld [vmem:[%s16806_s9 + $0x3b0] sm:$0xff] }
 0x16e   : > { %v12986_v30 = vpop.f32.mrb[32].mxu1  ;;  %10892 = vmatprep.subr.bf16.mxu1 %v16817_v50 }
 0x16f   : > { %9710 = vmatmul.mubr.msk.f32.gmra.mrb[72].mxu1 %vm1032_vm2, %v12992_v46  ;;  %v1212_v9 = vpop.f32.mrb[4].mxu0  ;;  %v9649_v49 = vpop.f32.mrb[33].mxu1 }
 0x170   : > { %v12997_v10 = vadd.f32 %v12870_v55, %v1212_v9  ;;  %v1214_v52 = vpop.f32.mrb[5].mxu0  ;;  %2498 = vmatmul.mubr.f32.gmra.mrb[110].mxu0 %v12725_v14  ;;  %9712 = vmatprep.mubr.msk.f32.mxu1 %vm12043_vm1, %v16822_v40  ;;  %v13009_v55 = vld [vmem:[%s12265_s22 + $0x70] sm:$0xff] }
 0x171   : > { %2502 = vmatprep.mubr.f32.mxu0 %v12728_v16  ;;  %10894 = vmatpush1.bf16.msra.mxu1 %v10893_v24  ;;  %v10905_v52 = vpack.c.bf16 %v8708_v42, %v8707_v34  ;;  %v8713_v34 = vld [vmem:[%s16806_s9 + $0x3b8] sm:$0xff]  ;;  %v8714_v42 = vld [vmem:[%s16806_s9 + $0x3c0] sm:$0xff] }
 0x172   : > { %v13003_v58 = vpop.f32.mrb[34].mxu1  ;;  %10895 = vmatprep.subr.bf16.mxu1 %v16817_v50 }
 0x173   : > { %9713 = vmatmul.mubr.msk.f32.gmra.mrb[74].mxu1 %vm1032_vm2, %v13009_v55  ;;  %v1217_v14 = vpop.f32.mrb[6].mxu0  ;;  %v9652_v62 = vpop.f32.mrb[35].mxu1 }
 0x174   : > { %v13014_v16 = vadd.f32 %v12876_v0, %v1217_v14  ;;  %v1219_v13 = vpop.f32.mrb[7].mxu0  ;;  %2503 = vmatmul.mubr.f32.gmra.mrb[112].mxu0 %v12735_v17  ;;  %9715 = vmatprep.mubr.msk.f32.mxu1 %vm12043_vm1, %v16822_v40  ;;  %v13026_v0 = vld [vmem:[%s12265_s22 + $0x88] sm:$0xff] }
 0x175   : > { %2507 = vmatprep.mubr.f32.mxu0 %v12738_v19  ;;  %10897 = vmatpush1.bf16.msra.mxu1 %v10896_v23  ;;  %v10908_v13 = vpack.c.bf16 %v8710_v57, %v8709_v48  ;;  %v8715_v48 = vld [vmem:[%s16806_s9 + $0x3c8] sm:$0xff]  ;;  %v8716_v57 = vld [vmem:[%s16806_s9 + $0x3d0] sm:$0xff] }
 0x176   : > { %v13020_v27 = vpop.f32.mrb[36].mxu1  ;;  %10898 = vmatprep.subr.bf16.mxu1 %v16817_v50 }
 0x177   : > { %9716 = vmatmul.mubr.msk.f32.gmra.mrb[76].mxu1 %vm1032_vm2, %v13026_v0  ;;  %v1222_v17 = vpop.f32.mrb[8].mxu0  ;;  %v9655_v6 = vpop.f32.mrb[37].mxu1 }
 0x178   : > { %v13031_v19 = vadd.f32 %v12882_v11, %v1222_v17  ;;  %v1224_v61 = vpop.f32.mrb[9].mxu0  ;;  %2508 = vmatmul.mubr.f32.gmra.mrb[114].mxu0 %v12745_v22  ;;  %9718 = vmatprep.mubr.msk.f32.mxu1 %vm12043_vm1, %v16822_v40  ;;  %v13043_v11 = vld [vmem:[%s12265_s22 + $0xa0] sm:$0xff] }
 0x179   : > { %2512 = vmatprep.mubr.f32.mxu0 %v12748_v26  ;;  %10900 = vmatpush1.bf16.msra.mxu1 %v10899_v20  ;;  %v10911_v61 = vpack.c.bf16 %v8712_v51, %v8711_v39  ;;  %v8717_v39 = vld [vmem:[%s16806_s9 + $0x3d8] sm:$0xff]  ;;  %v8718_v51 = vld [vmem:[%s16806_s9 + $0x3e0] sm:$0xff] }
 0x17a   : > { %v13037_v24 = vpop.f32.mrb[38].mxu1  ;;  %10901 = vmatprep.subr.bf16.mxu1 %v16817_v50 }
 0x17b   : > { %9719 = vmatmul.mubr.msk.f32.gmra.mrb[78].mxu1 %vm1032_vm2, %v13043_v11  ;;  %v1227_v22 = vpop.f32.mrb[10].mxu0  ;;  %v9658_v9 = vpop.f32.mrb[39].mxu1 }
 0x17c   : > { %v13048_v26 = vadd.f32 %v12888_v18, %v1227_v22  ;;  %v1229_v49 = vpop.f32.mrb[11].mxu0  ;;  %2513 = vmatmul.mubr.f32.gmra.mrb[116].mxu0 %v12755_v28  ;;  %9721 = vmatprep.mubr.msk.f32.mxu1 %vm12043_vm1, %v16822_v40  ;;  %v13060_v18 = vld [vmem:[%s12265_s22 + $0xb8] sm:$0xff] }
 0x17d   : > { %2517 = vmatprep.mubr.f32.mxu0 %v12758_v29  ;;  %10903 = vmatpush1.bf16.msra.mxu1 %v10902_v12  ;;  %v10914_v49 = vpack.c.bf16 %v8714_v42, %v8713_v34  ;;  %v8719_v34 = vld [vmem:[%s16806_s9 + $0x3e8] sm:$0xff]  ;;  %v8720_v42 = vld [vmem:[%s16806_s9 + $0x3f0] sm:$0xff] }
 0x17e   : > { %v13054_v23 = vpop.f32.mrb[40].mxu1  ;;  %10904 = vmatprep.subr.bf16.mxu1 %v16817_v50 }
 0x17f   : > { %9722 = vmatmul.mubr.msk.f32.gmra.mrb[80].mxu1 %vm1032_vm2, %v13060_v18  ;;  %v1232_v28 = vpop.f32.mrb[12].mxu0  ;;  %v9661_v14 = vpop.f32.mrb[41].mxu1 }
 0x180   : > { %v13065_v29 = vadd.f32 %v12894_v25, %v1232_v28  ;;  %v1234_v62 = vpop.f32.mrb[13].mxu0  ;;  %2518 = vmatmul.mubr.f32.gmra.mrb[118].mxu0 %v12765_v32  ;;  %9724 = vmatprep.mubr.msk.f32.mxu1 %vm12043_vm1, %v16822_v40  ;;  %v13077_v25 = vld [vmem:[%s12265_s22 + $0xd0] sm:$0xff] }
 0x181   : > { %2522 = vmatprep.mubr.f32.mxu0 %v12768_v35  ;;  %10906 = vmatpush1.bf16.msra.mxu1 %v10905_v52  ;;  %v10917_v62 = vpack.c.bf16 %v8716_v57, %v8715_v48  ;;  %v8761_v48 = vld [vmem:[%s16806_s9 + $0x428] sm:$0xff] }
 0x182   : > { %v13071_v20 = vpop.f32.mrb[42].mxu1  ;;  %10907 = vmatprep.subr.bf16.mxu1 %v16817_v50 }
 0x183   : > { %9725 = vmatmul.mubr.msk.f32.gmra.mrb[82].mxu1 %vm1032_vm2, %v13077_v25  ;;  %v1237_v32 = vpop.f32.mrb[14].mxu0  ;;  %v9664_v17 = vpop.f32.mrb[43].mxu1 }
 0x184   : > { %v13082_v35 = vadd.f32 %v12900_v31, %v1237_v32  ;;  %v1239_v6 = vpop.f32.mrb[15].mxu0  ;;  %2523 = vmatmul.mubr.f32.gmra.mrb[120].mxu0 %v12775_v36  ;;  %9727 = vmatprep.mubr.msk.f32.mxu1 %vm12043_vm1, %v16822_v40  ;;  %v13094_v31 = vld [vmem:[%s12265_s22 + $0xe8] sm:$0xff] }
 0x185   : > { %2527 = vmatprep.mubr.f32.mxu0 %v12778_v38  ;;  %10909 = vmatpush1.bf16.msra.mxu1 %v10908_v13  ;;  %v10920_v6 = vpack.c.bf16 %v8718_v51, %v8717_v39  ;;  %v8762_v51 = vld [vmem:[%s16806_s9 + $0x430] sm:$0xff] }
 0x186   : > { %v13088_v12 = vpop.f32.mrb[44].mxu1  ;;  %10910 = vmatprep.subr.bf16.mxu1 %v16817_v50 }
 0x187   : > { %9728 = vmatmul.mubr.msk.f32.gmra.mrb[84].mxu1 %vm1032_vm2, %v13094_v31  ;;  %v1242_v36 = vpop.f32.mrb[16].mxu0  ;;  %v9667_v22 = vpop.f32.mrb[45].mxu1 }
 0x188   : > { %v13099_v38 = vadd.f32 %v12906_v37, %v1242_v36  ;;  %v1244_v9 = vpop.f32.mrb[17].mxu0  ;;  %2528 = vmatmul.mubr.f32.gmra.mrb[122].mxu0 %v12785_v41  ;;  %9730 = vmatprep.mubr.msk.f32.mxu1 %vm12043_vm1, %v16822_v40  ;;  %v13111_v37 = vld [vmem:[%s12265_s22 + $0x100] sm:$0xff] }
 0x189   : > { %2532 = vmatprep.mubr.f32.mxu0 %v12788_v44  ;;  %10912 = vmatpush1.bf16.msra.mxu1 %v10911_v61  ;;  %v10923_v9 = vpack.c.bf16 %v8720_v42, %v8719_v34  ;;  %v8723_v34 = vld [vmem:[%s16806_s9 + $0x408] sm:$0xff]  ;;  %v8724_v42 = vld [vmem:[%s16806_s9 + $0x410] sm:$0xff] }
 0x18a   : > { %v13105_v52 = vpop.f32.mrb[46].mxu1  ;;  %10913 = vmatprep.subr.bf16.mxu1 %v16817_v50 }
 0x18b   : > { %9731 = vmatmul.mubr.msk.f32.gmra.mrb[86].mxu1 %vm1032_vm2, %v13111_v37  ;;  %v1247_v41 = vpop.f32.mrb[18].mxu0  ;;  %v9670_v28 = vpop.f32.mrb[47].mxu1 }
 0x18c   : > { %v13116_v44 = vadd.f32 %v12912_v43, %v1247_v41  ;;  %v1249_v14 = vpop.f32.mrb[19].mxu0  ;;  %2533 = vmatmul.mubr.f32.gmra.mrb[124].mxu0 %v16818_v45  ;;  %9733 = vmatprep.mubr.msk.f32.mxu1 %vm12043_vm1, %v16822_v40  ;;  %v13128_v43 = vld [vmem:[%s12265_s22 + $0x118] sm:$0xff] }
 0x18d   : > { %2537 = vmatprep.mubr.f32.mxu0 %v16819_v53  ;;  %10915 = vmatpush1.bf16.msra.mxu1 %v10914_v49  ;;  %v8760_v49 = vld [vmem:[%s16806_s9 + $0x420] sm:$0xff]  ;;  %v8721_v28 = vld [vmem:[%s16806_s9 + $0x3f8] sm:$0xff] }
 0x18e   : > { %v13122_v13 = vpop.f32.mrb[48].mxu1  ;;  %10916 = vmatprep.subr.bf16.mxu1 %v16817_v50  ;;  %v10932_v39 = vpack.c.bf16 %v8761_v48, %v8760_v49  ;;  %v8765_v49 = vld [vmem:[%s16806_s9 + $0x448] sm:$0xff] }
 0x18f   : > { %9734 = vmatmul.mubr.msk.f32.gmra.mrb[88].mxu1 %vm1032_vm2, %v13128_v43  ;;  %v1252_v45 = vpop.f32.mrb[20].mxu0  ;;  %v9673_v32 = vpop.f32.mrb[49].mxu1 }
 0x190   : > { %v13133_v53 = vadd.f32 %v12918_v59, %v1252_v45  ;;  %v1254_v17 = vpop.f32.mrb[21].mxu0  ;;  %2538 = vmatmul.mubr.f32.gmra.mrb[126].mxu0 %v12805_v1  ;;  %9736 = vmatprep.mubr.msk.f32.mxu1 %vm12043_vm1, %v16822_v40  ;;  %v13145_v59 = vld [vmem:[%s12265_s22 + $0x130] sm:$0xff]  ;;  %v8763_v45 = vld [vmem:[%s16806_s9 + $0x438] sm:$0xff] }
 0x191   : > { %2542 = vmatprep.mubr.f32.mxu0 %v16820_v4  ;;  %10918 = vmatpush1.bf16.msra.mxu1 %v10917_v62  ;;  %v13182_v17 = vld [vmem:[%s12265_s22 + $0x160] sm:$0xff] }
 0x192   : > { %v13139_v61 = vpop.f32.mrb[50].mxu1  ;;  %10919 = vmatprep.subr.bf16.mxu1 %v16817_v50 }
 0x193   : > { %9737 = vmatmul.mubr.msk.f32.gmra.mrb[90].mxu1 %vm1032_vm2, %v13145_v59  ;;  %v1257_v1 = vpop.f32.mrb[22].mxu0  ;;  %v9676_v36 = vpop.f32.mrb[51].mxu1 }
 0x194   : > { %v13150_v4 = vadd.f32 %v12924_v7, %v1257_v1  ;;  %v1259_v22 = vpop.f32.mrb[23].mxu0  ;;  %2543 = vmatmul.mubr.f32.gmra.mrb[128].mxu0 %v12815_v3  ;;  %9739 = vmatprep.mubr.msk.f32.mxu1 %vm12043_vm1, %v16822_v40  ;;  %v13162_v7 = vld [vmem:[%s12265_s22 + $0x148] sm:$0xff] }
 0x195   : > { %2547 = vmatprep.mubr.f32.mxu0 %v16821_v15  ;;  %10921 = vmatpush1.bf16.msra.mxu1 %v10920_v6  ;;  %v8722_v15 = vld [vmem:[%s16806_s9 + $0x400] sm:$0xff]  ;;  %v10935_v22 = vpack.c.bf16 %v8763_v45, %v8762_v51  ;;  %v8767_v51 = vld [vmem:[%s16806_s9 + $0x458] sm:$0xff] }
 0x196   : > { %v13158_v57 = vpop.f32.mrb[52].mxu1  ;;  %10922 = vmatprep.subr.bf16.mxu1 %v16817_v50 }
 0x197   : > { %9740 = vmatmul.mubr.msk.f32.gmra.mrb[92].mxu1 %vm1032_vm2, %v13162_v7  ;;  %v1262_v3 = vpop.f32.mrb[24].mxu0  ;;  %v9679_v41 = vpop.f32.mrb[53].mxu1 }
 0x198   : > { %v13169_v14 = vadd.f32 %v12930_v21, %v1262_v3  ;;  %v1264_v62 = vpop.f32.mrb[25].mxu0  ;;  %2548 = vmatmul.mubr.f32.gmra.mrb[130].mxu0 %v12825_v56  ;;  %9742 = vmatprep.mubr.msk.f32.mxu1 %vm12043_vm1, %v16822_v40  ;;  %v10926_v21 = vpack.c.bf16 %v8722_v15, %v8721_v28  ;;  %v13203_v3 = vld [vmem:[%s12265_s22 + $0x178] sm:$0xff] }
 0x199   : > { %9801 = vmatprep.mubr.msk.f32.mxu0 %vm12043_vm1, %v16822_v40  ;;  %10924 = vmatpush1.bf16.msra.mxu1 %v10923_v9  ;;  %v8764_v9 = vld [vmem:[%s16806_s9 + $0x440] sm:$0xff] }
 0x19a   : > { %v13178_v32 = vpop.f32.mrb[54].mxu1  ;;  %10925 = vmatprep.subr.bf16.mxu1 %v16817_v50  ;;  %v10938_v62 = vpack.c.bf16 %v8765_v49, %v8764_v9 }
 0x19b   : > { %9743 = vmatmul.mubr.msk.f32.gmra.mrb[94].mxu1 %vm1032_vm2, %v13182_v17  ;;  %v1267_v56 = vpop.f32.mrb[26].mxu0  ;;  %v9682_v6 = vpop.f32.mrb[55].mxu1 }
 0x19c   : > { %v13189_v1 = vadd.f32 %v12939_v47, %v1267_v56  ;;  %v1269_v36 = vpop.f32.mrb[27].mxu0  ;;  %9802 = vmatmul.mubr.msk.f32.vlgmr.msra.gmra.mrb[66].mxu0 %vm1032_vm2, %v12944_v54  ;;  %9745 = vmatprep.mubr.msk.f32.mxu1 %vm12043_vm1, %v16822_v40  ;;  %v10929_v47 = vpack.c.bf16 %v8724_v42, %v8723_v34  ;;  %v8768_v42 = vld [vmem:[%s16806_s9 + $0x460] sm:$0xff] }
 0x19d   : > { %10933 = vmatpush1.bf16.msra.mxu0 %v10932_v39  ;;  %9804 = vmatprep.mubr.msk.f32.mxu0 %vm12043_vm1, %v16822_v40  ;;  %v8766_v39 = vld [vmem:[%s16806_s9 + $0x450] sm:$0xff]  ;;  %v8769_v36 = vld [vmem:[%s16806_s9 + $0x468] sm:$0xff] }
 0x19e   : > { %10934 = vmatprep.subr.bf16.mxu0 %v16817_v50  ;;  %v13200_v48 = vpop.f32.mrb[56].mxu1  ;;  %10927 = vmatpush1.bf16.msra.mxu1 %v10926_v21  ;;  %v10941_v34 = vpack.c.bf16 %v8767_v51, %v8766_v39 }
 0x19f   : > { %9746 = vmatmul.mubr.msk.f32.gmra.mrb[96].mxu1 %vm1032_vm2, %v13203_v3  ;;  %v1272_v54 = vpop.f32.mrb[28].mxu0  ;;  %v9685_v41 = vpop.f32.mrb[57].mxu1  ;;  %10928 = vmatprep.subr.bf16.mxu1 %v16817_v50 }
 0x1a0   : > { %v13209_v28 = vadd.f32 %v12952_v60, %v1272_v54  ;;  %v1274_v15 = vpop.f32.mrb[29].mxu0  ;;  %9805 = vmatmul.mubr.msk.f32.gmra.mrb[68].mxu0 %vm1032_vm2, %v12958_v2  ;;  %9748 = vmatprep.mubr.msk.f32.mxu1 %vm12043_vm1, %v16822_v40  ;;  %v13223_v60 = vld [vmem:[%s12265_s22 + $0x190] sm:$0xff]  ;;  %v10944_v54 = vpack.c.bf16 %v8769_v36, %v8768_v42  ;;  %v13279_v42 = vld [vmem:[%s12265_s22 + $0x1d8] sm:$0xff] }
 0x1a1   : > { %9807 = vmatprep.mubr.msk.f32.mxu0 %vm12043_vm1, %v16822_v40  ;;  %10936 = vmatpush1.bf16.msra.mxu0 %v10935_v22  ;;  %v13243_v22 = vld [vmem:[%s12265_s22 + $0x1a8] sm:$0xff]  ;;  %v8770_v41 = vld [vmem:[%s16806_s9 + $0x470] sm:$0xff]  ;;  %v8771_v15 = vld [vmem:[%s16806_s9 + $0x478] sm:$0xff] }
 0x1a2   : > { %10937 = vmatprep.subr.bf16.mxu0 %v16817_v50  ;;  %v13220_v45 = vpop.f32.mrb[58].mxu1  ;;  %10930 = vmatpush1.bf16.msra.mxu1 %v10929_v47 }
 0x1a3   : > { %9749 = vmatmul.mubr.msk.f32.gmra.mrb[98].mxu1 %vm1032_vm2, %v13223_v60  ;;  %v1277_v2 = vpop.f32.mrb[30].mxu0  ;;  %v9688_v21 = vpop.f32.mrb[59].mxu1  ;;  %9900 = vmatprep.subr.mxu1 %v16822_v40 }
 0x1a4   : > { %v13229_v56 = vadd.f32 %v12969_v33, %v1277_v2  ;;  %v1279_v6 = vpop.f32.mrb[31].mxu0  ;;  %9808 = vmatmul.mubr.msk.f32.gmra.mrb[70].mxu0 %vm1032_vm2, %v12975_v5  ;;  %9751 = vmatprep.mubr.msk.f32.mxu1 %vm12043_vm1, %v16822_v40  ;;  %v10947_v21 = vpack.c.bf16 %v8771_v15, %v8770_v41  ;;  %v13296_v41 = vld [vmem:[%s12265_s22 + $0x1f0] sm:$0xff] }
 0x1a5   : > { %9810 = vmatprep.mubr.msk.f32.mxu0 %vm12043_vm1, %v16822_v40  ;;  %10939 = vmatpush1.bf16.msra.mxu0 %v10938_v62  ;;  %v13262_v62 = vld [vmem:[%s12265_s22 + $0x1c0] sm:$0xff] }
 0x1a6   : > { %10940 = vmatprep.subr.bf16.mxu0 %v16817_v50  ;;  %v13240_v33 = vpop.f32.mrb[60].mxu1  ;;  %v8772_v6 = vld [vmem:[%s16806_s9 + $0x480] sm:$0xff] }
 0x1a7   : > { %9752 = vmatmul.mubr.msk.f32.gmra.mrb[100].mxu1 %vm1032_vm2, %v13243_v22  ;;  %v1282_v5 = vpop.f32.mrb[32].mxu0  ;;  %v9691_v9 = vpop.f32.mrb[61].mxu1 }
 0x1a8   : > { %v13248_v49 = vadd.f32 %v12986_v30, %v1282_v5  ;;  %v1284_v47 = vpop.f32.mrb[33].mxu0  ;;  %9811 = vmatmul.mubr.msk.f32.gmra.mrb[72].mxu0 %vm1032_vm2, %v12992_v46  ;;  %9754 = vmatprep.mubr.msk.f32.mxu1 %vm12043_vm1, %v16822_v40 }
 0x1a9   : > { %9813 = vmatprep.mubr.msk.f32.mxu0 %vm12043_vm1, %v16822_v40  ;;  %10942 = vmatpush1.bf16.msra.mxu0 %v10941_v34  ;;  %v8773_v34 = vld [vmem:[%s16806_s9 + $0x488] sm:$0xff] }
 0x1aa   : > { %10943 = vmatprep.subr.bf16.mxu0 %v16817_v50  ;;  %v13259_v30 = vpop.f32.mrb[62].mxu1  ;;  %v10950_v47 = vpack.c.bf16 %v8773_v34, %v8772_v6 }
 0x1ab   : > { %9755 = vmatmul.mubr.msk.f32.gmra.mrb[102].mxu1 %vm1032_vm2, %v13262_v62  ;;  %v1287_v46 = vpop.f32.mrb[34].mxu0  ;;  %v9694_v39 = vpop.f32.mrb[63].mxu1 }
 0x1ac   : > { %v13267_v51 = vadd.f32 %v13003_v58, %v1287_v46  ;;  %v1289_v2 = vpop.f32.mrb[35].mxu0  ;;  %9814 = vmatmul.mubr.msk.f32.gmra.mrb[74].mxu0 %vm1032_vm2, %v13009_v55  ;;  %9757 = vmatprep.mubr.msk.f32.mxu1 %vm12043_vm1, %v16822_v40 }
 0x1ad   : > { %9816 = vmatprep.mubr.msk.f32.mxu0 %vm12043_vm1, %v16822_v40  ;;  %10945 = vmatpush1.bf16.msra.mxu0 %v10944_v54  ;;  %v8774_v54 = vld [vmem:[%s16806_s9 + $0x490] sm:$0xff]  ;;  %v8776_v2 = vld [vmem:[%s16806_s9 + $0x4a0] sm:$0xff] }
 0x1ae   : > { %10946 = vmatprep.subr.bf16.mxu0 %v16817_v50  ;;  %v1591_v58 = vpop.f32.mrb[64].mxu1 }
 0x1af   : > { %9758 = vmatmul.mubr.msk.f32.gmra.mrb[104].mxu1 %vm1032_vm2, %v13279_v42  ;;  %v1292_v55 = vpop.f32.mrb[36].mxu0  ;;  %v9697_v36 = vpop.f32.mrb[65].mxu1 }
 0x1b0   : > { %v13284_v5 = vadd.f32 %v13020_v27, %v1292_v55  ;;  %v1294_v9 = vpop.f32.mrb[37].mxu0  ;;  %9817 = vmatmul.mubr.msk.f32.gmra.mrb[76].mxu0 %vm1032_vm2, %v13026_v0  ;;  %9760 = vmatprep.mubr.msk.f32.mxu1 %vm12043_vm1, %v16822_v40  ;;  %v8775_v27 = vld [vmem:[%s16806_s9 + $0x498] sm:$0xff]  ;;  %v8778_v55 = vld [vmem:[%s16806_s9 + $0x4b0] sm:$0xff]  ;;  %v13330_v36 = vld [vmem:[%s12265_s22 + $0x220] sm:$0xff] }
 0x1b1   : > { %9819 = vmatprep.mubr.msk.f32.mxu0 %vm12043_vm1, %v16822_v40  ;;  %10948 = vmatpush1.bf16.msra.mxu0 %v10947_v21  ;;  %v10953_v39 = vpack.c.bf16 %v8775_v27, %v8774_v54  ;;  %v13313_v21 = vld [vmem:[%s12265_s22 + $0x208] sm:$0xff]  ;;  %v8780_v27 = vld [vmem:[%s16806_s9 + $0x4c0] sm:$0xff] }
 0x1b2   : > { %10949 = vmatprep.subr.bf16.mxu0 %v16817_v50 }
 0x1b3   : > { %9761 = vmatmul.mubr.msk.f32.gmra.mrb[106].mxu1 %vm1032_vm2, %v13296_v41  ;;  %v1297_v0 = vpop.f32.mrb[38].mxu0 }
 0x1b4   : > { %v13301_v15 = vadd.f32 %v13037_v24, %v1297_v0  ;;  %v1299_v46 = vpop.f32.mrb[39].mxu0  ;;  %9820 = vmatmul.mubr.msk.f32.gmra.mrb[78].mxu0 %vm1032_vm2, %v13043_v11  ;;  %9763 = vmatprep.mubr.msk.f32.mxu1 %vm12043_vm1, %v16822_v40  ;;  %v8777_v24 = vld [vmem:[%s16806_s9 + $0x4a8] sm:$0xff]  ;;  %v13347_v0 = vld [vmem:[%s12265_s22 + $0x238] sm:$0xff] }
 0x1b5   : > { %9822 = vmatprep.mubr.msk.f32.mxu0 %vm12043_vm1, %v16822_v40  ;;  %10951 = vmatpush1.bf16.msra.mxu0 %v10950_v47  ;;  %v10956_v58 = vpack.c.bf16 %v8777_v24, %v8776_v2  ;;  %v8782_v24 = vld [vmem:[%s16806_s9 + $0x4d0] sm:$0xff] }
 0x1b6   : > { %10952 = vmatprep.subr.bf16.mxu0 %v16817_v50 }
 0x1b7   : > { %9764 = vmatmul.mubr.msk.f32.gmra.mrb[108].mxu1 %vm1032_vm2, %v13313_v21  ;;  %v1302_v11 = vpop.f32.mrb[40].mxu0 }
 0x1b8   : > { %v13318_v6 = vadd.f32 %v13054_v23, %v1302_v11  ;;  %v1304_v34 = vpop.f32.mrb[41].mxu0  ;;  %9823 = vmatmul.mubr.msk.f32.gmra.mrb[80].mxu0 %vm1032_vm2, %v13060_v18  ;;  %9766 = vmatprep.mubr.msk.f32.mxu1 %vm12043_vm1, %v16822_v40  ;;  %v8779_v23 = vld [vmem:[%s16806_s9 + $0x4b8] sm:$0xff]  ;;  %v13364_v11 = vld [vmem:[%s12265_s22 + $0x250] sm:$0xff] }
 0x1b9   : > { %9825 = vmatprep.mubr.msk.f32.mxu0 %vm12043_vm1, %v16822_v40  ;;  %10954 = vmatpush1.bf16.msra.mxu0 %v10953_v39  ;;  %v10959_v54 = vpack.c.bf16 %v8779_v23, %v8778_v55  ;;  %v8784_v23 = vld [vmem:[%s16806_s9 + $0x4e0] sm:$0xff] }
 0x1ba   : > { %10955 = vmatprep.subr.bf16.mxu0 %v16817_v50 }
 0x1bb   : > { %9767 = vmatmul.mubr.msk.f32.gmra.mrb[110].mxu1 %vm1032_vm2, %v13330_v36  ;;  %v1307_v18 = vpop.f32.mrb[42].mxu0 }
 0x1bc   : > { %v13335_v9 = vadd.f32 %v13071_v20, %v1307_v18  ;;  %v1309_v47 = vpop.f32.mrb[43].mxu0  ;;  %9826 = vmatmul.mubr.msk.f32.gmra.mrb[82].mxu0 %vm1032_vm2, %v13077_v25  ;;  %9769 = vmatprep.mubr.msk.f32.mxu1 %vm12043_vm1, %v16822_v40  ;;  %v8781_v20 = vld [vmem:[%s16806_s9 + $0x4c8] sm:$0xff] }
 0x1bd   : > { %9828 = vmatprep.mubr.msk.f32.mxu0 %vm12043_vm1, %v16822_v40  ;;  %10957 = vmatpush1.bf16.msra.mxu0 %v10956_v58  ;;  %v10962_v2 = vpack.c.bf16 %v8781_v20, %v8780_v27  ;;  %v13381_v18 = vld [vmem:[%s12265_s22 + $0x268] sm:$0xff]  ;;  %v8786_v20 = vld [vmem:[%s16806_s9 + $0x4f0] sm:$0xff] }
 0x1be   : > { %10958 = vmatprep.subr.bf16.mxu0 %v16817_v50 }
 0x1bf   : > { %9770 = vmatmul.mubr.msk.f32.gmra.mrb[112].mxu1 %vm1032_vm2, %v13347_v0  ;;  %v1312_v25 = vpop.f32.mrb[44].mxu0 }
 0x1c0   : > { %v13352_v46 = vadd.f32 %v13088_v12, %v1312_v25  ;;  %v1314_v39 = vpop.f32.mrb[45].mxu0  ;;  %9829 = vmatmul.mubr.msk.f32.gmra.mrb[84].mxu0 %vm1032_vm2, %v13094_v31  ;;  %9772 = vmatprep.mubr.msk.f32.mxu1 %vm12043_vm1, %v16822_v40  ;;  %v8783_v12 = vld [vmem:[%s16806_s9 + $0x4d8] sm:$0xff]  ;;  %v13398_v25 = vld [vmem:[%s12265_s22 + $0x280] sm:$0xff] }
 0x1c1   : > { %9831 = vmatprep.mubr.msk.f32.mxu0 %vm12043_vm1, %v16822_v40  ;;  %10960 = vmatpush1.bf16.msra.mxu0 %v10959_v54  ;;  %v10965_v55 = vpack.c.bf16 %v8783_v12, %v8782_v24  ;;  %v8788_v12 = vld [vmem:[%s16806_s9 + $0x500] sm:$0xff] }
 0x1c2   : > { %10961 = vmatprep.subr.bf16.mxu0 %v16817_v50 }
 0x1c3   : > { %9773 = vmatmul.mubr.msk.f32.gmra.mrb[114].mxu1 %vm1032_vm2, %v13364_v11  ;;  %v1317_v31 = vpop.f32.mrb[46].mxu0 }
 0x1c4   : > { %v13369_v34 = vadd.f32 %v13105_v52, %v1317_v31  ;;  %v1319_v58 = vpop.f32.mrb[47].mxu0  ;;  %9832 = vmatmul.mubr.msk.f32.gmra.mrb[86].mxu0 %vm1032_vm2, %v13111_v37  ;;  %9775 = vmatprep.mubr.msk.f32.mxu1 %vm12043_vm1, %v16822_v40  ;;  %v8785_v52 = vld [vmem:[%s16806_s9 + $0x4e8] sm:$0xff]  ;;  %v13415_v31 = vld [vmem:[%s12265_s22 + $0x298] sm:$0xff] }
 0x1c5   : > { %9834 = vmatprep.mubr.msk.f32.mxu0 %vm12043_vm1, %v16822_v40  ;;  %10963 = vmatpush1.bf16.msra.mxu0 %v10962_v2  ;;  %v10968_v27 = vpack.c.bf16 %v8785_v52, %v8784_v23  ;;  %v8790_v52 = vld [vmem:[%s16806_s9 + $0x510] sm:$0xff] }
 0x1c6   : > { %10964 = vmatprep.subr.bf16.mxu0 %v16817_v50 }
 0x1c7   : > { %9776 = vmatmul.mubr.msk.f32.gmra.mrb[116].mxu1 %vm1032_vm2, %v13381_v18  ;;  %v1322_v37 = vpop.f32.mrb[48].mxu0 }
 0x1c8   : > { %v13386_v47 = vadd.f32 %v13122_v13, %v1322_v37  ;;  %v1324_v54 = vpop.f32.mrb[49].mxu0  ;;  %9835 = vmatmul.mubr.msk.f32.gmra.mrb[88].mxu0 %vm1032_vm2, %v13128_v43  ;;  %9778 = vmatprep.mubr.msk.f32.mxu1 %vm12043_vm1, %v16822_v40  ;;  %v8787_v13 = vld [vmem:[%s16806_s9 + $0x4f8] sm:$0xff] }
 0x1c9   : > { %9837 = vmatprep.mubr.msk.f32.mxu0 %vm12043_vm1, %v16822_v40  ;;  %10966 = vmatpush1.bf16.msra.mxu0 %v10965_v55  ;;  %v10971_v24 = vpack.c.bf16 %v8787_v13, %v8786_v20  ;;  %v8791_v37 = vld [vmem:[%s16806_s9 + $0x518] sm:$0xff]  ;;  %v13432_v54 = vld [vmem:[%s12265_s22 + $0x2b0] sm:$0xff]  ;;  %v13447_v13 = vld [vmem:[%s12265_s22 + $0x2c8] sm:$0xff] }
 0x1ca   : > { %10967 = vmatprep.subr.bf16.mxu0 %v16817_v50  ;;  %v10977_v20 = vpack.c.bf16 %v8791_v37, %v8790_v52  ;;  %v8725_v52 = vld [vmem:[%s16806_s9 + $0x418] sm:$0x1]  ;;  %v13507_v37 = vld [vmem:[%s12265_s22] sm:$0xff] }
 0x1cb   : > { %9779 = vmatmul.mubr.msk.f32.gmra.mrb[118].mxu1 %vm1032_vm2, %v13398_v25  ;;  %v1327_v43 = vpop.f32.mrb[50].mxu0 }
 0x1cc   : > { %v13403_v39 = vadd.f32 %v13139_v61, %v1327_v43  ;;  %v1329_v2 = vpop.f32.mrb[51].mxu0  ;;  %9838 = vmatmul.mubr.msk.f32.gmra.mrb[90].mxu0 %vm1032_vm2, %v13145_v59  ;;  %9781 = vmatprep.mubr.msk.f32.mxu1 %vm12043_vm1, %v16822_v40  ;;  %v8789_v61 = vld [vmem:[%s16806_s9 + $0x508] sm:$0xff] }
 0x1cd   : > { %9840 = vmatprep.mubr.msk.f32.mxu0 %vm12043_vm1, %v16822_v40  ;;  %10969 = vmatpush1.bf16.msra.mxu0 %v10968_v27  ;;  %v10974_v23 = vpack.c.bf16 %v8789_v61, %v8788_v12  ;;  %v13462_v2 = vld [vmem:[%s12265_s22 + $0x2e0] sm:$0xff]  ;;  %v13476_v12 = vld [vmem:[%s12265_s22 + $0x2f8] sm:$0xff] }
 0x1ce   : > { %16823 = vst [vmem:[#allocation25_spill] sm:$0xff] %v13403_v39  ;;  %10970 = vmatprep.subr.bf16.mxu0 %v16817_v50  ;;  %v13761_v39 = vld [vmem:[%s12265_s22 + $0x210] sm:$0xff] }
 0x1cf   : > { %9782 = vmatmul.mubr.msk.f32.gmra.mrb[120].mxu1 %vm1032_vm2, %v13415_v31  ;;  %v1332_v59 = vpop.f32.mrb[52].mxu0 }
 0x1d0   : > { %v13420_v58 = vadd.f32 %v13158_v57, %v1332_v59  ;;  %v1334_v55 = vpop.f32.mrb[53].mxu0  ;;  %9841 = vmatmul.mubr.msk.f32.gmra.mrb[92].mxu0 %vm1032_vm2, %v13162_v7  ;;  %9784 = vmatprep.mubr.msk.f32.mxu1 %vm12043_vm1, %v16822_v40 }
 0x1d1   : > { %9843 = vmatprep.mubr.msk.f32.mxu0 %vm12043_vm1, %v16822_v40  ;;  %10972 = vmatpush1.bf16.msra.mxu0 %v10971_v24 }
 0x1d2   : > { %16824 = vst [vmem:[#allocation26_spill] sm:$0xff] %v13420_v58  ;;  %10973 = vmatprep.subr.bf16.mxu0 %v16817_v50 }
 0x1d3   : > { %9785 = vmatmul.mubr.msk.f32.gmra.mrb[122].mxu1 %vm1032_vm2, %v13432_v54  ;;  %v1337_v57 = vpop.f32.mrb[54].mxu0 }
 0x1d4   : > { %v13437_v7 = vadd.f32 %v13178_v32, %v1337_v57  ;;  %v1339_v27 = vpop.f32.mrb[55].mxu0  ;;  %9844 = vmatmul.mubr.msk.f32.gmra.mrb[94].mxu0 %vm1032_vm2, %v13182_v17  ;;  %9787 = vmatprep.mubr.msk.f32.mxu1 %vm12043_vm1, %v16822_v40 }
 0x1d5   : > { %9846 = vmatprep.mubr.msk.f32.mxu0 %vm12043_vm1, %v16822_v40  ;;  %10975 = vmatpush1.bf16.msra.mxu0 %v10974_v23  ;;  %v13520_v27 = vld [vmem:[%s12265_s22 + $0x18] sm:$0xff] }
 0x1d6   : > { %16825 = vst [vmem:[#allocation27_spill] sm:$0xff] %v13437_v7  ;;  %10976 = vmatprep.subr.bf16.mxu0 %v16817_v50  ;;  %v13670_v50 = vld [vmem:[%s12265_s22 + $0x158] sm:$0xff] }
 0x1d7   : > { %9788 = vmatmul.mubr.msk.f32.gmra.mrb[124].mxu1 %vm1032_vm2, %v13447_v13  ;;  %v1342_v32 = vpop.f32.mrb[56].mxu0 }
 0x1d8   : > { %v13452_v17 = vadd.f32 %v13200_v48, %v1342_v32  ;;  %v1344_v43 = vpop.f32.mrb[57].mxu0  ;;  %9847 = vmatmul.mubr.msk.f32.gmra.mrb[96].mxu0 %vm1032_vm2, %v13203_v3  ;;  %9790 = vmatprep.mubr.msk.f32.mxu1 %vm12043_vm1, %v16822_v40  ;;  %v13538_v32 = vld [vmem:[%s12265_s22 + $0x50] sm:$0xff] }
 0x1d9   : > { %9849 = vmatprep.mubr.msk.f32.mxu0 %vm12043_vm1, %v16822_v40  ;;  %10978 = vmatpush1.bf16.msra.mxu0 %v10977_v20  ;;  %v13532_v20 = vld [vmem:[%s12265_s22 + $0x30] sm:$0xff]  ;;  %v13550_v43 = vld [vmem:[%s12265_s22 + $0x68] sm:$0xff] }
 0x1da   : > { %16826 = vst [vmem:[#allocation28_spill] sm:$0xff] %v13452_v17  ;;  %10001 = vmatprep.subr.mxu0 %v16822_v40 }
 0x1db   : > { %9791 = vmatmul.mubr.msk.f32.gmra.mrb[126].mxu1 %vm1032_vm2, %v13462_v2  ;;  %v1347_v48 = vpop.f32.mrb[58].mxu0 }
 0x1dc   : > { %v13467_v24 = vadd.f32 %v13220_v45, %v1347_v48  ;;  %v1349_v3 = vpop.f32.mrb[59].mxu0  ;;  %9850 = vmatmul.mubr.msk.f32.gmra.mrb[98].mxu0 %vm1032_vm2, %v13223_v60  ;;  %9793 = vmatprep.mubr.msk.f32.mxu1 %vm12043_vm1, %v16822_v40  ;;  %v13490_v60 = vld [vmem:[%s12265_s22 + $0x310] sm:$0xf]  ;;  %v13562_v48 = vld [vmem:[%s12265_s22 + $0x80] sm:$0xff] }
 0x1dd   : > { %9852 = vmatprep.mubr.msk.f32.mxu0 %vm12043_vm1, %v16822_v40  ;;  %v13574_v3 = vld [vmem:[%s12265_s22 + $0x98] sm:$0xff] }
 0x1de   : > { %16827 = vst [vmem:[#allocation29_spill] sm:$0xff] %v13467_v24  ;;  %v13737_v24 = vld [vmem:[%s12265_s22 + $0x1e0] sm:$0xff] }
 0x1df   : > { %9794 = vmatmul.mubr.msk.f32.gmra.mrb[128].mxu1 %vm1032_vm2, %v13476_v12  ;;  %v1352_v61 = vpop.f32.mrb[60].mxu0 }
 0x1e0   : > { %v13481_v45 = vadd.f32 %v13240_v33, %v1352_v61  ;;  %v1354_v59 = vpop.f32.mrb[61].mxu0  ;;  %9853 = vmatmul.mubr.msk.f32.gmra.mrb[100].mxu0 %vm1032_vm2, %v13243_v22  ;;  %9796 = vmatprep.mubr.msk.f32.mxu1 %vm12043_vm1, %v16822_v40  ;;  %v13500_v22 = vld [vmem:[%s12265_s22 + $0x8] sm:$0xff]  ;;  %v13586_v61 = vld [vmem:[%s12265_s22 + $0xb0] sm:$0xff] }
 0x1e1   : > { %9855 = vmatprep.mubr.msk.f32.mxu0 %vm12043_vm1, %v16822_v40  ;;  %v13598_v59 = vld [vmem:[%s12265_s22 + $0xc8] sm:$0xff] }
 0x1e2   : > { %16828 = vst [vmem:[#allocation30_spill] sm:$0xff] %v13481_v45  ;;  %v13681_v45 = vld [vmem:[%s12265_s22 + $0x170] sm:$0xff] }
 0x1e3   : > { %9797 = vmatmul.mubr.msk.f32.gmra.mrb[130].mxu1 %vm1032_vm2, %v13490_v60  ;;  %v1357_v55 = vpop.f32.mrb[62].mxu0 }
 0x1e4   : > { %v13495_v33 = vadd.f32 %v13259_v30, %v1357_v55  ;;  %v1359_v23 = vpop.f32.mrb[63].mxu0  ;;  %9856 = vmatmul.mubr.msk.f32.gmra.mrb[102].mxu0 %vm1032_vm2, %v13262_v62  ;;  %3047 = vmatprep.mubr.f32.mxu1 %v13500_v22  ;;  %v13513_v62 = vld [vmem:[%s12265_s22 + $0x20] sm:$0xff] }
 0x1e5   : > { %9858 = vmatprep.mubr.msk.f32.mxu0 %vm12043_vm1, %v16822_v40  ;;  %v13610_v55 = vld [vmem:[%s12265_s22 + $0xe0] sm:$0xff]  ;;  %v13622_v23 = vld [vmem:[%s12265_s22 + $0xf8] sm:$0xff] }
 0x1e6   : > { %16829 = vst [vmem:[#allocation31_spill] sm:$0xff] %v13495_v33  ;;  %v13676_v33 = vld [vmem:[%s12265_s22 + $0x150] sm:$0xff] }
 0x1e7   : > { %3048 = vmatmul.mubr.f32.vlgmr.msra.gmra.mrb[132].mxu1 %v13507_v37  ;;  %v1362_v30 = vpop.f32.mrb[64].mxu0 }
 0x1e8   : > { %v1363_v57 = vpop.f32.mrb[65].mxu0  ;;  %9859 = vmatmul.mubr.msk.f32.gmra.mrb[104].mxu0 %vm1032_vm2, %v13279_v42  ;;  %3052 = vmatprep.mubr.f32.mxu1 %v13513_v62  ;;  %v13526_v42 = vld [vmem:[%s12265_s22 + $0x38] sm:$0xff]  ;;  %v13646_v30 = vld [vmem:[%s12265_s22 + $0x128] sm:$0xff] }
 0x1e9   : > { %9861 = vmatprep.mubr.msk.f32.mxu0 %vm12043_vm1, %v16822_v40  ;;  %9901 = vmatpush3.msk.msra.mxu1 %vm1132_vm0, %v8725_v52  ;;  %v13634_v52 = vld [vmem:[%s12265_s22 + $0x110] sm:$0xff]  ;;  %v13658_v57 = vld [vmem:[%s12265_s22 + $0x140] sm:$0xff] }
 0x1eb   : > { %3053 = vmatmul.mubr.f32.gmra.mrb[134].mxu1 %v13520_v27 }
 0x1ec   : > { %9862 = vmatmul.mubr.msk.f32.gmra.mrb[106].mxu0 %vm1032_vm2, %v13296_v41  ;;  %3057 = vmatprep.mubr.f32.mxu1 %v13526_v42  ;;  %v13544_v41 = vld [vmem:[%s12265_s22 + $0x48] sm:$0xff] }
 0x1ed   : > { %9864 = vmatprep.mubr.msk.f32.mxu0 %vm12043_vm1, %v16822_v40 }
 0x1ef   : > { %3058 = vmatmul.mubr.f32.gmra.mrb[136].mxu1 %v13532_v20 }
 0x1f0   : > { %9865 = vmatmul.mubr.msk.f32.gmra.mrb[108].mxu0 %vm1032_vm2, %v13313_v21  ;;  %3062 = vmatprep.mubr.f32.mxu1 %v13538_v32  ;;  %v13556_v21 = vld [vmem:[%s12265_s22 + $0x60] sm:$0xff] }
 0x1f1   : > { %9867 = vmatprep.mubr.msk.f32.mxu0 %vm12043_vm1, %v16822_v40 }
 0x1f3   : > { %3063 = vmatmul.mubr.f32.gmra.mrb[138].mxu1 %v13544_v41 }
 0x1f4   : > { %9868 = vmatmul.mubr.msk.f32.gmra.mrb[110].mxu0 %vm1032_vm2, %v13330_v36  ;;  %3067 = vmatprep.mubr.f32.mxu1 %v13550_v43  ;;  %v13568_v36 = vld [vmem:[%s12265_s22 + $0x78] sm:$0xff] }
 0x1f5   : > { %9870 = vmatprep.mubr.msk.f32.mxu0 %vm12043_vm1, %v16822_v40 }
 0x1f7   : > { %3068 = vmatmul.mubr.f32.gmra.mrb[140].mxu1 %v13556_v21 }
 0x1f8   : > { %9871 = vmatmul.mubr.msk.f32.gmra.mrb[112].mxu0 %vm1032_vm2, %v13347_v0  ;;  %3072 = vmatprep.mubr.f32.mxu1 %v13562_v48  ;;  %v13580_v0 = vld [vmem:[%s12265_s22 + $0x90] sm:$0xff] }
 0x1f9   : > { %9873 = vmatprep.mubr.msk.f32.mxu0 %vm12043_vm1, %v16822_v40 }
 0x1fb   : > { %3073 = vmatmul.mubr.f32.gmra.mrb[142].mxu1 %v13568_v36 }
 0x1fc   : > { %9874 = vmatmul.mubr.msk.f32.gmra.mrb[114].mxu0 %vm1032_vm2, %v13364_v11  ;;  %3077 = vmatprep.mubr.f32.mxu1 %v13574_v3  ;;  %v13592_v11 = vld [vmem:[%s12265_s22 + $0xa8] sm:$0xff] }
 0x1fd   : > { %9876 = vmatprep.mubr.msk.f32.mxu0 %vm12043_vm1, %v16822_v40 }
 0x1ff   : > { %3078 = vmatmul.mubr.f32.gmra.mrb[144].mxu1 %v13580_v0 }
 0x200   : > { %9877 = vmatmul.mubr.msk.f32.gmra.mrb[116].mxu0 %vm1032_vm2, %v13381_v18  ;;  %3082 = vmatprep.mubr.f32.mxu1 %v13586_v61  ;;  %v13604_v18 = vld [vmem:[%s12265_s22 + $0xc0] sm:$0xff] }
 0x201   : > { %9879 = vmatprep.mubr.msk.f32.mxu0 %vm12043_vm1, %v16822_v40 }
 0x203   : > { %3083 = vmatmul.mubr.f32.gmra.mrb[146].mxu1 %v13592_v11 }
 0x204   : > { %9880 = vmatmul.mubr.msk.f32.gmra.mrb[118].mxu0 %vm1032_vm2, %v13398_v25  ;;  %3087 = vmatprep.mubr.f32.mxu1 %v13598_v59  ;;  %v13616_v25 = vld [vmem:[%s12265_s22 + $0xd8] sm:$0xff] }
 0x205   : > { %9882 = vmatprep.mubr.msk.f32.mxu0 %vm12043_vm1, %v16822_v40 }
 0x207   : > { %3088 = vmatmul.mubr.f32.gmra.mrb[148].mxu1 %v13604_v18 }
 0x208   : > { %9883 = vmatmul.mubr.msk.f32.gmra.mrb[120].mxu0 %vm1032_vm2, %v13415_v31  ;;  %3092 = vmatprep.mubr.f32.mxu1 %v13610_v55  ;;  %v13628_v31 = vld [vmem:[%s12265_s22 + $0xf0] sm:$0xff] }
 0x209   : > { %9885 = vmatprep.mubr.msk.f32.mxu0 %vm12043_vm1, %v16822_v40 }
 0x20b   : > { %3093 = vmatmul.mubr.f32.gmra.mrb[150].mxu1 %v13616_v25 }
 0x20c   : > { %9886 = vmatmul.mubr.msk.f32.gmra.mrb[122].mxu0 %vm1032_vm2, %v13432_v54  ;;  %3097 = vmatprep.mubr.f32.mxu1 %v13622_v23  ;;  %v13640_v54 = vld [vmem:[%s12265_s22 + $0x108] sm:$0xff] }
 0x20d   : > { %9888 = vmatprep.mubr.msk.f32.mxu0 %vm12043_vm1, %v16822_v40 }
 0x20f   : > { %3098 = vmatmul.mubr.f32.gmra.mrb[152].mxu1 %v13628_v31 }
 0x210   : > { %9889 = vmatmul.mubr.msk.f32.gmra.mrb[124].mxu0 %vm1032_vm2, %v13447_v13  ;;  %3102 = vmatprep.mubr.f32.mxu1 %v13634_v52  ;;  %v13652_v13 = vld [vmem:[%s12265_s22 + $0x120] sm:$0xff] }
 0x211   : > { %9891 = vmatprep.mubr.msk.f32.mxu0 %vm12043_vm1, %v16822_v40 }
 0x213   : > { %3103 = vmatmul.mubr.f32.gmra.mrb[154].mxu1 %v13640_v54 }
 0x214   : > { %9892 = vmatmul.mubr.msk.f32.gmra.mrb[126].mxu0 %vm1032_vm2, %v13462_v2  ;;  %3107 = vmatprep.mubr.f32.mxu1 %v13646_v30  ;;  %v13664_v2 = vld [vmem:[%s12265_s22 + $0x138] sm:$0xff] }
 0x215   : > { %9894 = vmatprep.mubr.msk.f32.mxu0 %vm12043_vm1, %v16822_v40 }
 0x217   : > { %3108 = vmatmul.mubr.f32.gmra.mrb[156].mxu1 %v13652_v13 }
 0x218   : > { %9895 = vmatmul.mubr.msk.f32.gmra.mrb[128].mxu0 %vm1032_vm2, %v13476_v12  ;;  %3112 = vmatprep.mubr.f32.mxu1 %v13658_v57  ;;  %v8792_v12 = vld [vmem:[%s16806_s9 + $0x520] sm:$0x1] }
 0x219   : > { %9897 = vmatprep.mubr.msk.f32.mxu0 %vm12043_vm1, %v16822_v40 }
 0x21b   : > { %3113 = vmatmul.mubr.f32.gmra.mrb[158].mxu1 %v13664_v2 }
 0x21c   : > { %9898 = vmatmul.mubr.msk.f32.gmra.mrb[130].mxu0 %vm1032_vm2, %v13490_v60  ;;  %3117 = vmatprep.mubr.f32.mxu1 %v13670_v50  ;;  %v13687_v60 = vld [vmem:[%s12265_s22 + $0x168] sm:$0xff] }
 0x21d   : > { %3707 = vmatprep.mubr.f32.mxu0 %v13500_v22  ;;  %v13692_v22 = vld [vmem:[%s12265_s22 + $0x188] sm:$0xff] }
 0x21f   : > { %3118 = vmatmul.mubr.f32.gmra.mrb[160].mxu1 %v13676_v33 }
 0x220   : > { %3708 = vmatmul.mubr.f32.vlgmr.msra.gmra.mrb[132].mxu0 %v13507_v37  ;;  %3122 = vmatprep.mubr.f32.mxu1 %v13681_v45  ;;  %v13697_v37 = vld [vmem:[%s12265_s22 + $0x180] sm:$0xff] }
 0x221   : > { %10002 = vmatpush3.msk.msra.mxu0 %vm1132_vm0, %v8792_v12  ;;  %3712 = vmatprep.mubr.f32.mxu0 %v13513_v62  ;;  %v13702_v62 = vld [vmem:[%s12265_s22 + $0x1a0] sm:$0xff] }
 0x223   : > { %3123 = vmatmul.mubr.f32.gmra.mrb[162].mxu1 %v13687_v60 }
 0x224   : > { %3713 = vmatmul.mubr.f32.gmra.mrb[134].mxu0 %v13520_v27  ;;  %3127 = vmatprep.mubr.f32.mxu1 %v13692_v22  ;;  %v13707_v27 = vld [vmem:[%s12265_s22 + $0x198] sm:$0xff] }
 0x225   : > { %3717 = vmatprep.mubr.f32.mxu0 %v13526_v42  ;;  %v13712_v42 = vld [vmem:[%s12265_s22 + $0x1b8] sm:$0xff] }
 0x227   : > { %3128 = vmatmul.mubr.f32.gmra.mrb[164].mxu1 %v13697_v37 }
 0x228   : > { %3718 = vmatmul.mubr.f32.gmra.mrb[136].mxu0 %v13532_v20  ;;  %3132 = vmatprep.mubr.f32.mxu1 %v13702_v62  ;;  %v13717_v20 = vld [vmem:[%s12265_s22 + $0x1b0] sm:$0xff] }
 0x229   : > { %3722 = vmatprep.mubr.f32.mxu0 %v13538_v32  ;;  %v13722_v32 = vld [vmem:[%s12265_s22 + $0x1d0] sm:$0xff] }
 0x22b   : > { %3133 = vmatmul.mubr.f32.gmra.mrb[166].mxu1 %v13707_v27 }
 0x22c   : > { %3723 = vmatmul.mubr.f32.gmra.mrb[138].mxu0 %v13544_v41  ;;  %3137 = vmatprep.mubr.f32.mxu1 %v13712_v42  ;;  %v13727_v41 = vld [vmem:[%s12265_s22 + $0x1c8] sm:$0xff] }
 0x22d   : > { %3727 = vmatprep.mubr.f32.mxu0 %v13550_v43  ;;  %v13732_v43 = vld [vmem:[%s12265_s22 + $0x1e8] sm:$0xff] }
 0x22f   : > { %3138 = vmatmul.mubr.f32.gmra.mrb[168].mxu1 %v13717_v20 }
 0x230   : > { %3728 = vmatmul.mubr.f32.gmra.mrb[140].mxu0 %v13556_v21  ;;  %3142 = vmatprep.mubr.f32.mxu1 %v13722_v32 }
 0x231   : > { %3732 = vmatprep.mubr.f32.mxu0 %v13562_v48  ;;  %v13742_v48 = vld [vmem:[%s12265_s22 + $0x200] sm:$0xff] }
 0x233   : > { %3143 = vmatmul.mubr.f32.gmra.mrb[170].mxu1 %v13727_v41 }
 0x234   : > { %3733 = vmatmul.mubr.f32.gmra.mrb[142].mxu0 %v13568_v36  ;;  %3147 = vmatprep.mubr.f32.mxu1 %v13732_v43 }
 0x235   : > { %3737 = vmatprep.mubr.f32.mxu0 %v13574_v3 }
 0x236   : > { %v1959_v21 = vpop.f32.mrb[66].mxu1 }
 0x237   : > { %v9702_v12 = vpop.f32.mrb[67].mxu1  ;;  %3148 = vmatmul.mubr.f32.gmra.mrb[172].mxu1 %v13737_v24  ;;  %v2157_v17 = vrot.slane %v1959_v21, 1 }
 0x238   : > { %3738 = vmatmul.mubr.f32.gmra.mrb[144].mxu0 %v13580_v0  ;;  %3152 = vmatprep.mubr.f32.mxu1 %v13742_v48  ;;  %v13747_v12 = vld [vmem:[%s12265_s22 + $0x1f8] sm:$0xff] }
 0x239   : > { %3742 = vmatprep.mubr.f32.mxu0 %v13586_v61  ;;  %v13752_v0 = vld [vmem:[%s12265_s22 + $0x218] sm:$0xff] }
 0x23a   : > { %v1964_v36 = vpop.f32.mrb[68].mxu1 }
 0x23b   : > { %v2158_v3 = vrot.slane %v1964_v36, 1  ;;  %v9705_v7 = vpop.f32.mrb[69].mxu1  ;;  %3153 = vmatmul.mubr.f32.gmra.mrb[174].mxu1 %v13747_v12 }
 0x23c   : > { %3743 = vmatmul.mubr.f32.gmra.mrb[146].mxu0 %v13592_v11  ;;  %3157 = vmatprep.mubr.f32.mxu1 %v13752_v0  ;;  %v13766_v11 = vld [vmem:[%s12265_s22 + $0x230] sm:$0xff] }
 0x23d   : > { %v2159_v58 = vsel %vm2156_vm3, %v2157_v17, %v2158_v3  ;;  %3747 = vmatprep.mubr.f32.mxu0 %v13598_v59 }
 0x23e   : > { %v13758_v61 = vadd.f32 %v2159_v58, %v12963_v63  ;;  %v1969_v21 = vpop.f32.mrb[70].mxu1 }
 0x23f   : > { %v2160_v7 = vrot.slane %v1969_v21, 1  ;;  %v9708_v36 = vpop.f32.mrb[71].mxu1  ;;  %3158 = vmatmul.mubr.f32.gmra.mrb[176].mxu1 %v13761_v39 }
 0x240   : > { %3748 = vmatmul.mubr.f32.gmra.mrb[148].mxu0 %v13604_v18  ;;  %3162 = vmatprep.mubr.f32.mxu1 %v13766_v11  ;;  %v13775_v36 = vld [vmem:[%s12265_s22 + $0x228] sm:$0xff] }
 0x241   : > { %v2161_v17 = vsel %vm2156_vm3, %v2158_v3, %v2160_v7  ;;  %3752 = vmatprep.mubr.f32.mxu0 %v13610_v55  ;;  %v13780_v18 = vld [vmem:[%s12265_s22 + $0x248] sm:$0xff] }
 0x242   : > { %v13772_v63 = vadd.f32 %v2161_v17, %v12980_v8  ;;  %v1974_v58 = vpop.f32.mrb[72].mxu1 }
 0x243   : > { %v2162_v59 = vrot.slane %v1974_v58, 1  ;;  %v9711_v21 = vpop.f32.mrb[73].mxu1  ;;  %3163 = vmatmul.mubr.f32.gmra.mrb[178].mxu1 %v13775_v36 }
 0x244   : > { %3753 = vmatmul.mubr.f32.gmra.mrb[150].mxu0 %v13616_v25  ;;  %3167 = vmatprep.mubr.f32.mxu1 %v13780_v18  ;;  %v13789_v21 = vld [vmem:[%s12265_s22 + $0x240] sm:$0xff] }
 0x245   : > { %v2163_v55 = vsel %vm2156_vm3, %v2160_v7, %v2162_v59  ;;  %3757 = vmatprep.mubr.f32.mxu0 %v13622_v23  ;;  %v13794_v25 = vld [vmem:[%s12265_s22 + $0x260] sm:$0xff] }
 0x246   : > { %v13786_v8 = vadd.f32 %v2163_v55, %v12997_v10  ;;  %v1979_v3 = vpop.f32.mrb[74].mxu1 }
 0x247   : > { %v2164_v17 = vrot.slane %v1979_v3, 1  ;;  %v9714_v58 = vpop.f32.mrb[75].mxu1  ;;  %3168 = vmatmul.mubr.f32.gmra.mrb[180].mxu1 %v13789_v21 }
 0x248   : > { %3758 = vmatmul.mubr.f32.gmra.mrb[152].mxu0 %v13628_v31  ;;  %3172 = vmatprep.mubr.f32.mxu1 %v13794_v25  ;;  %v13803_v58 = vld [vmem:[%s12265_s22 + $0x258] sm:$0xff] }
 0x249   : > { %v2165_v23 = vsel %vm2156_vm3, %v2162_v59, %v2164_v17  ;;  %3762 = vmatprep.mubr.f32.mxu0 %v13634_v52  ;;  %v13808_v31 = vld [vmem:[%s12265_s22 + $0x278] sm:$0xff] }
 0x24a   : > { %v13800_v10 = vadd.f32 %v2165_v23, %v13014_v16  ;;  %v1984_v7 = vpop.f32.mrb[76].mxu1 }
 0x24b   : > { %v2166_v55 = vrot.slane %v1984_v7, 1  ;;  %v9717_v3 = vpop.f32.mrb[77].mxu1  ;;  %3173 = vmatmul.mubr.f32.gmra.mrb[182].mxu1 %v13803_v58 }
 0x24c   : > { %3763 = vmatmul.mubr.f32.gmra.mrb[154].mxu0 %v13640_v54  ;;  %3177 = vmatprep.mubr.f32.mxu1 %v13808_v31  ;;  %v13817_v3 = vld [vmem:[%s12265_s22 + $0x270] sm:$0xff] }
 0x24d   : > { %v2167_v52 = vsel %vm2156_vm3, %v2164_v17, %v2166_v55  ;;  %3767 = vmatprep.mubr.f32.mxu0 %v13646_v30  ;;  %v13822_v54 = vld [vmem:[%s12265_s22 + $0x290] sm:$0xff] }
 0x24e   : > { %v13814_v16 = vadd.f32 %v2167_v52, %v13031_v19  ;;  %v1989_v59 = vpop.f32.mrb[78].mxu1 }
 0x24f   : > { %v2168_v23 = vrot.slane %v1989_v59, 1  ;;  %v9720_v7 = vpop.f32.mrb[79].mxu1  ;;  %3178 = vmatmul.mubr.f32.gmra.mrb[184].mxu1 %v13817_v3 }
 0x250   : > { %3768 = vmatmul.mubr.f32.gmra.mrb[156].mxu0 %v13652_v13  ;;  %3182 = vmatprep.mubr.f32.mxu1 %v13822_v54  ;;  %v13831_v7 = vld [vmem:[%s12265_s22 + $0x288] sm:$0xff] }
 0x251   : > { %v2169_v30 = vsel %vm2156_vm3, %v2166_v55, %v2168_v23  ;;  %3772 = vmatprep.mubr.f32.mxu0 %v13658_v57  ;;  %v13836_v13 = vld [vmem:[%s12265_s22 + $0x2a8] sm:$0xff] }
 0x252   : > { %v13828_v19 = vadd.f32 %v2169_v30, %v13048_v26  ;;  %v1994_v17 = vpop.f32.mrb[80].mxu1 }
 0x253   : > { %v2170_v52 = vrot.slane %v1994_v17, 1  ;;  %v9723_v59 = vpop.f32.mrb[81].mxu1  ;;  %3183 = vmatmul.mubr.f32.gmra.mrb[186].mxu1 %v13831_v7 }
 0x254   : > { %3773 = vmatmul.mubr.f32.gmra.mrb[158].mxu0 %v13664_v2  ;;  %3187 = vmatprep.mubr.f32.mxu1 %v13836_v13  ;;  %v13845_v59 = vld [vmem:[%s12265_s22 + $0x2a0] sm:$0xff] }
 0x255   : > { %v2171_v57 = vsel %vm2156_vm3, %v2168_v23, %v2170_v52  ;;  %3777 = vmatprep.mubr.f32.mxu0 %v13670_v50  ;;  %v13850_v2 = vld [vmem:[%s12265_s22 + $0x2c0] sm:$0xff] }
 0x256   : > { %v13842_v26 = vadd.f32 %v2171_v57, %v13065_v29  ;;  %v1999_v55 = vpop.f32.mrb[82].mxu1 }
 0x257   : > { %v2172_v30 = vrot.slane %v1999_v55, 1  ;;  %v9726_v17 = vpop.f32.mrb[83].mxu1  ;;  %3188 = vmatmul.mubr.f32.gmra.mrb[188].mxu1 %v13845_v59 }
 0x258   : > { %3778 = vmatmul.mubr.f32.gmra.mrb[160].mxu0 %v13676_v33  ;;  %3192 = vmatprep.mubr.f32.mxu1 %v13850_v2  ;;  %v13859_v17 = vld [vmem:[%s12265_s22 + $0x2b8] sm:$0xff] }
 0x259   : > { %v2173_v50 = vsel %vm2156_vm3, %v2170_v52, %v2172_v30  ;;  %3782 = vmatprep.mubr.f32.mxu0 %v13681_v45  ;;  %v13864_v33 = vld [vmem:[%s12265_s22 + $0x2d8] sm:$0xff] }
 0x25a   : > { %v13856_v29 = vadd.f32 %v2173_v50, %v13082_v35  ;;  %v2004_v23 = vpop.f32.mrb[84].mxu1 }
 0x25b   : > { %v2174_v57 = vrot.slane %v2004_v23, 1  ;;  %v9729_v55 = vpop.f32.mrb[85].mxu1  ;;  %3193 = vmatmul.mubr.f32.gmra.mrb[190].mxu1 %v13859_v17 }
 0x25c   : > { %3783 = vmatmul.mubr.f32.gmra.mrb[162].mxu0 %v13687_v60  ;;  %3197 = vmatprep.mubr.f32.mxu1 %v13864_v33  ;;  %v13873_v55 = vld [vmem:[%s12265_s22 + $0x2d0] sm:$0xff] }
 0x25d   : > { %v2175_v45 = vsel %vm2156_vm3, %v2172_v30, %v2174_v57  ;;  %3787 = vmatprep.mubr.f32.mxu0 %v13692_v22  ;;  %v13878_v60 = vld [vmem:[%s12265_s22 + $0x2f0] sm:$0xff] }
 0x25e   : > { %v13870_v35 = vadd.f32 %v2175_v45, %v13099_v38  ;;  %v2009_v52 = vpop.f32.mrb[86].mxu1 }
 0x25f   : > { %v2176_v50 = vrot.slane %v2009_v52, 1  ;;  %v9732_v23 = vpop.f32.mrb[87].mxu1  ;;  %3198 = vmatmul.mubr.f32.gmra.mrb[192].mxu1 %v13873_v55 }
 0x260   : > { %3788 = vmatmul.mubr.f32.gmra.mrb[164].mxu0 %v13697_v37  ;;  %3202 = vmatprep.mubr.f32.mxu1 %v13878_v60  ;;  %v13887_v23 = vld [vmem:[%s12265_s22 + $0x2e8] sm:$0xff] }
 0x261   : > { %v2177_v22 = vsel %vm2156_vm3, %v2174_v57, %v2176_v50  ;;  %3792 = vmatprep.mubr.f32.mxu0 %v13702_v62  ;;  %v13892_v37 = vld [vmem:[%s12265_s22 + $0x308] sm:$0xf] }
 0x262   : > { %v13884_v38 = vadd.f32 %v2177_v22, %v13116_v44  ;;  %v2014_v30 = vpop.f32.mrb[88].mxu1 }
 0x263   : > { %v2178_v45 = vrot.slane %v2014_v30, 1  ;;  %v9735_v52 = vpop.f32.mrb[89].mxu1  ;;  %3203 = vmatmul.mubr.f32.gmra.mrb[194].mxu1 %v13887_v23 }
 0x264   : > { %3793 = vmatmul.mubr.f32.gmra.mrb[166].mxu0 %v13707_v27  ;;  %3207 = vmatprep.mubr.f32.mxu1 %v13892_v37  ;;  %v13901_v52 = vld [vmem:[%s12265_s22 + $0x300] sm:$0xf] }
 0x265   : > { %v2179_v57 = vsel %vm2156_vm3, %v2176_v50, %v2178_v45  ;;  %3797 = vmatprep.mubr.f32.mxu0 %v13712_v42 }
 0x266   : > { %v13898_v44 = vadd.f32 %v2179_v57, %v13133_v53  ;;  %v2019_v62 = vpop.f32.mrb[90].mxu1 }
 0x267   : > { %v2180_v22 = vrot.slane %v2019_v62, 1  ;;  %v9738_v30 = vpop.f32.mrb[91].mxu1  ;;  %3208 = vmatmul.mubr.f32.gmra.mrb[196].mxu1 %v13901_v52  ;;  %v13913_v62 = vld [vmem:[%s12265_s22 + $0x10] sm:$0xff] }
 0x268   : > { %3798 = vmatmul.mubr.f32.gmra.mrb[168].mxu0 %v13717_v20  ;;  %9902 = vmatprep.mubr.msk.f32.mxu1 %vm12043_vm1, %v16822_v40 }
 0x269   : > { %v2181_v27 = vsel %vm2156_vm3, %v2178_v45, %v2180_v22  ;;  %3802 = vmatprep.mubr.f32.mxu0 %v13722_v32 }
 0x26a   : > { %v13910_v53 = vadd.f32 %v2181_v27, %v13150_v4  ;;  %v2024_v42 = vpop.f32.mrb[92].mxu1  ;;  %v13926_v27 = vld [vmem:[%s12265_s22 + $0x28] sm:$0xff] }
 0x26b   : > { %v2182_v50 = vrot.slane %v2024_v42, 1  ;;  %v9741_v57 = vpop.f32.mrb[93].mxu1  ;;  %9903 = vmatmul.mubr.msk.f32.vlgmr.msra.gmra.mrb[132].mxu1 %vm1032_vm2, %v13913_v62  ;;  %16830 = vst [vmem:[#allocation32_spill] sm:$0xff] %v13926_v27 }
 0x26c   : > { %3803 = vmatmul.mubr.f32.gmra.mrb[170].mxu0 %v13727_v41  ;;  %9905 = vmatprep.mubr.msk.f32.mxu1 %vm12043_vm1, %v16822_v40 }
 0x26d   : > { %v2183_v20 = vsel %vm2156_vm3, %v2180_v22, %v2182_v50  ;;  %3807 = vmatprep.mubr.f32.mxu0 %v13732_v43 }
 0x26e   : > { %v13923_v4 = vadd.f32 %v2183_v20, %v13169_v14  ;;  %v2029_v32 = vpop.f32.mrb[94].mxu1 }
 0x26f   : > { %v2184_v45 = vrot.slane %v2029_v32, 1  ;;  %v9744_v30 = vpop.f32.mrb[95].mxu1  ;;  %9906 = vmatmul.mubr.msk.f32.gmra.mrb[134].mxu1 %vm1032_vm2, %v13926_v27  ;;  %v2619_v41 = vpop.f32.mrb[66].mxu0  ;;  %v13939_v32 = vld [vmem:[%s12265_s22 + $0x40] sm:$0xff] }
 0x270   : > { %v9803_v42 = vpop.f32.mrb[67].mxu0  ;;  %3808 = vmatmul.mubr.f32.gmra.mrb[172].mxu0 %v13737_v24  ;;  %9908 = vmatprep.mubr.msk.f32.mxu1 %vm12043_vm1, %v16822_v40  ;;  %v2817_v30 = vrot.slane %v2619_v41, 2 }
 0x271   : > { %v2185_v43 = vsel %vm2156_vm3, %v2182_v50, %v2184_v45  ;;  %3812 = vmatprep.mubr.f32.mxu0 %v13742_v48 }
 0x272   : > { %v13936_v14 = vadd.f32 %v2185_v43, %v13189_v1  ;;  %v2034_v22 = vpop.f32.mrb[96].mxu1 }
 0x273   : > { %v2186_v57 = vrot.slane %v2034_v22, 1  ;;  %v9747_v20 = vpop.f32.mrb[97].mxu1  ;;  %9909 = vmatmul.mubr.msk.f32.gmra.mrb[136].mxu1 %vm1032_vm2, %v13939_v32  ;;  %v2624_v24 = vpop.f32.mrb[68].mxu0 }
 0x274   : > { %v2818_v42 = vrot.slane %v2624_v24, 2  ;;  %v9806_v27 = vpop.f32.mrb[69].mxu0  ;;  %3813 = vmatmul.mubr.f32.gmra.mrb[174].mxu0 %v13747_v12  ;;  %9911 = vmatprep.mubr.msk.f32.mxu1 %vm12043_vm1, %v16822_v40  ;;  %v13956_v12 = vld [vmem:[%s12265_s22 + $0x58] sm:$0xff] }
 0x275   : > { %v2187_v1 = vsel %vm2156_vm3, %v2184_v45, %v2186_v57  ;;  %3817 = vmatprep.mubr.f32.mxu0 %v13752_v0 }
 0x276   : > { %v13949_v48 = vadd.f32 %v2187_v1, %v13209_v28  ;;  %v2819_v50 = vsel %vm2816_vm4, %v2817_v30, %v2818_v42  ;;  %v2039_v43 = vpop.f32.mrb[98].mxu1 }
 0x277   : > { %v13953_v22 = vadd.f32 %v2819_v50, %v13758_v61  ;;  %v2188_v41 = vrot.slane %v2039_v43, 1  ;;  %v9750_v27 = vpop.f32.mrb[99].mxu1  ;;  %9912 = vmatmul.mubr.msk.f32.gmra.mrb[138].mxu1 %vm1032_vm2, %v13956_v12  ;;  %v2629_v45 = vpop.f32.mrb[70].mxu0 }
 0x278   : > { %v2820_v20 = vrot.slane %v2629_v45, 2  ;;  %v9809_v0 = vpop.f32.mrb[71].mxu0  ;;  %3818 = vmatmul.mubr.f32.gmra.mrb[176].mxu0 %v13761_v39  ;;  %9914 = vmatprep.mubr.msk.f32.mxu1 %vm12043_vm1, %v16822_v40  ;;  %v13973_v39 = vld [vmem:[%s12265_s22 + $0x70] sm:$0xff] }
 0x279   : > { %v2189_v28 = vsel %vm2156_vm3, %v2186_v57, %v2188_v41  ;;  %3822 = vmatprep.mubr.f32.mxu0 %v13766_v11 }
 0x27a   : > { %v13966_v61 = vadd.f32 %v2189_v28, %v13229_v56  ;;  %v2821_v24 = vsel %vm2816_vm4, %v2818_v42, %v2820_v20  ;;  %v2044_v30 = vpop.f32.mrb[100].mxu1 }
 0x27b   : > { %v13970_v1 = vadd.f32 %v2821_v24, %v13772_v63  ;;  %v2190_v50 = vrot.slane %v2044_v30, 1  ;;  %v9753_v43 = vpop.f32.mrb[101].mxu1  ;;  %9915 = vmatmul.mubr.msk.f32.gmra.mrb[140].mxu1 %vm1032_vm2, %v13973_v39  ;;  %v2634_v57 = vpop.f32.mrb[72].mxu0 }
 0x27c   : > { %v2822_v27 = vrot.slane %v2634_v57, 2  ;;  %v9812_v11 = vpop.f32.mrb[73].mxu0  ;;  %3823 = vmatmul.mubr.f32.gmra.mrb[178].mxu0 %v13775_v36  ;;  %9917 = vmatprep.mubr.msk.f32.mxu1 %vm12043_vm1, %v16822_v40  ;;  %v13990_v36 = vld [vmem:[%s12265_s22 + $0x88] sm:$0xff] }
 0x27d   : > { %v2191_v56 = vsel %vm2156_vm3, %v2188_v41, %v2190_v50  ;;  %3827 = vmatprep.mubr.f32.mxu0 %v13780_v18 }
 0x27e   : > { %v13983_v63 = vadd.f32 %v2191_v56, %v13248_v49  ;;  %v2823_v42 = vsel %vm2816_vm4, %v2820_v20, %v2822_v27  ;;  %v2049_v45 = vpop.f32.mrb[102].mxu1 }
 0x27f   : > { %v13987_v0 = vadd.f32 %v2823_v42, %v13786_v8  ;;  %v2192_v28 = vrot.slane %v2049_v45, 1  ;;  %v9756_v24 = vpop.f32.mrb[103].mxu1  ;;  %9918 = vmatmul.mubr.msk.f32.gmra.mrb[142].mxu1 %vm1032_vm2, %v13990_v36  ;;  %v2639_v41 = vpop.f32.mrb[74].mxu0 }
 0x280   : > { %v2824_v30 = vrot.slane %v2639_v41, 2  ;;  %v9815_v18 = vpop.f32.mrb[75].mxu0  ;;  %3828 = vmatmul.mubr.f32.gmra.mrb[180].mxu0 %v13789_v21  ;;  %9920 = vmatprep.mubr.msk.f32.mxu1 %vm12043_vm1, %v16822_v40  ;;  %v14007_v21 = vld [vmem:[%s12265_s22 + $0xa0] sm:$0xff] }
 0x281   : > { %v2193_v49 = vsel %vm2156_vm3, %v2190_v50, %v2192_v28  ;;  %3832 = vmatprep.mubr.f32.mxu0 %v13794_v25 }
 0x282   : > { %v14000_v8 = vadd.f32 %v2193_v49, %v13267_v51  ;;  %v2825_v20 = vsel %vm2816_vm4, %v2822_v27, %v2824_v30  ;;  %v2054_v43 = vpop.f32.mrb[104].mxu1 }
 0x283   : > { %v14004_v57 = vadd.f32 %v2825_v20, %v13800_v10  ;;  %v2194_v11 = vrot.slane %v2054_v43, 1  ;;  %v9759_v56 = vpop.f32.mrb[105].mxu1  ;;  %9921 = vmatmul.mubr.msk.f32.gmra.mrb[144].mxu1 %vm1032_vm2, %v14007_v21  ;;  %v2644_v50 = vpop.f32.mrb[76].mxu0 }
 0x284   : > { %v2826_v42 = vrot.slane %v2644_v50, 2  ;;  %v9818_v25 = vpop.f32.mrb[77].mxu0  ;;  %3833 = vmatmul.mubr.f32.gmra.mrb[182].mxu0 %v13803_v58  ;;  %9923 = vmatprep.mubr.msk.f32.mxu1 %vm12043_vm1, %v16822_v40  ;;  %v14024_v58 = vld [vmem:[%s12265_s22 + $0xb8] sm:$0xff] }
 0x285   : > { %v2195_v51 = vsel %vm2156_vm3, %v2192_v28, %v2194_v11  ;;  %3837 = vmatprep.mubr.f32.mxu0 %v13808_v31 }
 0x286   : > { %v14017_v10 = vadd.f32 %v2195_v51, %v13284_v5  ;;  %v2827_v27 = vsel %vm2816_vm4, %v2824_v30, %v2826_v42  ;;  %v2059_v45 = vpop.f32.mrb[106].mxu1 }
 0x287   : > { %v14021_v24 = vadd.f32 %v2827_v27, %v13814_v16  ;;  %v2196_v41 = vrot.slane %v2059_v45, 1  ;;  %v9762_v18 = vpop.f32.mrb[107].mxu1  ;;  %9924 = vmatmul.mubr.msk.f32.gmra.mrb[146].mxu1 %vm1032_vm2, %v14024_v58  ;;  %v2649_v28 = vpop.f32.mrb[78].mxu0 }
 0x288   : > { %v2828_v49 = vrot.slane %v2649_v28, 2  ;;  %v9821_v31 = vpop.f32.mrb[79].mxu0  ;;  %3838 = vmatmul.mubr.f32.gmra.mrb[184].mxu0 %v13817_v3  ;;  %9926 = vmatprep.mubr.msk.f32.mxu1 %vm12043_vm1, %v16822_v40  ;;  %v14041_v3 = vld [vmem:[%s12265_s22 + $0xd0] sm:$0xff] }
 0x289   : > { %v2197_v5 = vsel %vm2156_vm3, %v2194_v11, %v2196_v41  ;;  %3842 = vmatprep.mubr.f32.mxu0 %v13822_v54 }
 0x28a   : > { %v14034_v16 = vadd.f32 %v2197_v5, %v13301_v15  ;;  %v2829_v30 = vsel %vm2816_vm4, %v2826_v42, %v2828_v49  ;;  %v2064_v20 = vpop.f32.mrb[108].mxu1 }
 0x28b   : > { %v14038_v43 = vadd.f32 %v2829_v30, %v13828_v19  ;;  %v2198_v56 = vrot.slane %v2064_v20, 1  ;;  %v9765_v50 = vpop.f32.mrb[109].mxu1  ;;  %9927 = vmatmul.mubr.msk.f32.gmra.mrb[148].mxu1 %vm1032_vm2, %v14041_v3  ;;  %v2654_v11 = vpop.f32.mrb[80].mxu0 }
 0x28c   : > { %v2830_v25 = vrot.slane %v2654_v11, 2  ;;  %v9824_v54 = vpop.f32.mrb[81].mxu0  ;;  %3843 = vmatmul.mubr.f32.gmra.mrb[186].mxu0 %v13831_v7  ;;  %9929 = vmatprep.mubr.msk.f32.mxu1 %vm12043_vm1, %v16822_v40  ;;  %v14058_v7 = vld [vmem:[%s12265_s22 + $0xe8] sm:$0xff] }
 0x28d   : > { %v2199_v15 = vsel %vm2156_vm3, %v2196_v41, %v2198_v56  ;;  %3847 = vmatprep.mubr.f32.mxu0 %v13836_v13 }
 0x28e   : > { %v14051_v19 = vadd.f32 %v2199_v15, %v13318_v6  ;;  %v2831_v42 = vsel %vm2816_vm4, %v2828_v49, %v2830_v25  ;;  %v2069_v51 = vpop.f32.mrb[110].mxu1 }
 0x28f   : > { %v14055_v27 = vadd.f32 %v2831_v42, %v13842_v26  ;;  %v2200_v45 = vrot.slane %v2069_v51, 1  ;;  %v9768_v18 = vpop.f32.mrb[111].mxu1  ;;  %9930 = vmatmul.mubr.msk.f32.gmra.mrb[150].mxu1 %vm1032_vm2, %v14058_v7  ;;  %v2659_v41 = vpop.f32.mrb[82].mxu0 }
 0x290   : > { %v2832_v28 = vrot.slane %v2659_v41, 2  ;;  %v9827_v13 = vpop.f32.mrb[83].mxu0  ;;  %3848 = vmatmul.mubr.f32.gmra.mrb[188].mxu0 %v13845_v59  ;;  %9932 = vmatprep.mubr.msk.f32.mxu1 %vm12043_vm1, %v16822_v40  ;;  %v14075_v59 = vld [vmem:[%s12265_s22 + $0x100] sm:$0xff] }
 0x291   : > { %v2201_v6 = vsel %vm2156_vm3, %v2198_v56, %v2200_v45  ;;  %3852 = vmatprep.mubr.f32.mxu0 %v13850_v2 }
 0x292   : > { %v14068_v26 = vadd.f32 %v2201_v6, %v13335_v9  ;;  %v2833_v49 = vsel %vm2816_vm4, %v2830_v25, %v2832_v28  ;;  %v2074_v31 = vpop.f32.mrb[112].mxu1 }
 0x293   : > { %v14072_v5 = vadd.f32 %v2833_v49, %v13856_v29  ;;  %v2202_v30 = vrot.slane %v2074_v31, 1  ;;  %v9771_v20 = vpop.f32.mrb[113].mxu1  ;;  %9933 = vmatmul.mubr.msk.f32.gmra.mrb[152].mxu1 %vm1032_vm2, %v14075_v59  ;;  %v2664_v56 = vpop.f32.mrb[84].mxu0 }
 0x294   : > { %v2834_v50 = vrot.slane %v2664_v56, 2  ;;  %v9830_v2 = vpop.f32.mrb[85].mxu0  ;;  %3853 = vmatmul.mubr.f32.gmra.mrb[190].mxu0 %v13859_v17  ;;  %9935 = vmatprep.mubr.msk.f32.mxu1 %vm12043_vm1, %v16822_v40  ;;  %v14092_v17 = vld [vmem:[%s12265_s22 + $0x118] sm:$0xff] }
 0x295   : > { %v2203_v9 = vsel %vm2156_vm3, %v2200_v45, %v2202_v30  ;;  %3857 = vmatprep.mubr.f32.mxu0 %v13864_v33 }
 0x296   : > { %v14085_v29 = vadd.f32 %v2203_v9, %v13352_v46  ;;  %v2835_v11 = vsel %vm2816_vm4, %v2832_v28, %v2834_v50  ;;  %v2079_v25 = vpop.f32.mrb[114].mxu1 }
 0x297   : > { %v14089_v54 = vadd.f32 %v2835_v11, %v13870_v35  ;;  %v2204_v15 = vrot.slane %v2079_v25, 1  ;;  %v9774_v42 = vpop.f32.mrb[115].mxu1  ;;  %9936 = vmatmul.mubr.msk.f32.gmra.mrb[154].mxu1 %vm1032_vm2, %v14092_v17  ;;  %v2669_v51 = vpop.f32.mrb[86].mxu0 }
 0x298   : > { %v2836_v45 = vrot.slane %v2669_v51, 2  ;;  %v9833_v33 = vpop.f32.mrb[87].mxu0  ;;  %3858 = vmatmul.mubr.f32.gmra.mrb[192].mxu0 %v13873_v55  ;;  %9938 = vmatprep.mubr.msk.f32.mxu1 %vm12043_vm1, %v16822_v40  ;;  %v14109_v55 = vld [vmem:[%s12265_s22 + $0x130] sm:$0xff] }
 0x299   : > { %v2205_v46 = vsel %vm2156_vm3, %v2202_v30, %v2204_v15  ;;  %3862 = vmatprep.mubr.f32.mxu0 %v13878_v60 }
 0x29a   : > { %v14102_v35 = vadd.f32 %v2205_v46, %v13369_v34  ;;  %v2837_v18 = vsel %vm2816_vm4, %v2834_v50, %v2836_v45  ;;  %v2084_v41 = vpop.f32.mrb[116].mxu1 }
 0x29b   : > { %v14106_v28 = vadd.f32 %v2837_v18, %v13884_v38  ;;  %v2206_v13 = vrot.slane %v2084_v41, 1  ;;  %v9777_v6 = vpop.f32.mrb[117].mxu1  ;;  %9939 = vmatmul.mubr.msk.f32.gmra.mrb[156].mxu1 %vm1032_vm2, %v14109_v55  ;;  %v2674_v49 = vpop.f32.mrb[88].mxu0 }
 0x29c   : > { %v2838_v31 = vrot.slane %v2674_v49, 2  ;;  %v9836_v60 = vpop.f32.mrb[89].mxu0  ;;  %3863 = vmatmul.mubr.f32.gmra.mrb[194].mxu0 %v13887_v23  ;;  %9941 = vmatprep.mubr.msk.f32.mxu1 %vm12043_vm1, %v16822_v40  ;;  %v14126_v23 = vld [vmem:[%s12265_s22 + $0x148] sm:$0xff] }
 0x29d   : > { %v2207_v34 = vsel %vm2156_vm3, %v2204_v15, %v2206_v13  ;;  %3867 = vmatprep.mubr.f32.mxu0 %v13892_v37 }
 0x29e   : > { %v14119_v38 = vadd.f32 %v2207_v34, %v13386_v47  ;;  %v2839_v30 = vsel %vm2816_vm4, %v2836_v45, %v2838_v31  ;;  %v2089_v20 = vpop.f32.mrb[118].mxu1 }
 0x29f   : > { %v14123_v56 = vadd.f32 %v2839_v30, %v13898_v44  ;;  %v2208_v50 = vrot.slane %v2089_v20, 1  ;;  %v9780_v2 = vpop.f32.mrb[119].mxu1  ;;  %9942 = vmatmul.mubr.msk.f32.gmra.mrb[158].mxu1 %vm1032_vm2, %v14126_v23  ;;  %v2679_v9 = vpop.f32.mrb[90].mxu0  ;;  %v16831_v44 = vld [vmem:[#allocation25_spill] sm:$0xff] }
 0x2a0   : > { %v2840_v11 = vrot.slane %v2679_v9, 2  ;;  %v9839_v37 = vpop.f32.mrb[91].mxu0  ;;  %3868 = vmatmul.mubr.f32.gmra.mrb[196].mxu0 %v13901_v52  ;;  %9944 = vmatprep.mubr.msk.f32.mxu1 %vm12043_vm1, %v16822_v40  ;;  %v14144_v52 = vld [vmem:[%s12265_s22 + $0x160] sm:$0xff] }
 0x2a1   : > { %v2209_v47 = vsel %vm2156_vm3, %v2206_v13, %v2208_v50  ;;  %10003 = vmatprep.mubr.msk.f32.mxu0 %vm12043_vm1, %v16822_v40  ;;  %v16832_v13 = vld [vmem:[#allocation26_spill] sm:$0xff]  ;;  %v16833_v9 = vld [vmem:[#allocation32_spill] sm:$0xff] }
 0x2a2   : > { %v14137_v25 = vadd.f32 %v2209_v47, %v16831_v44  ;;  %v2841_v15 = vsel %vm2816_vm4, %v2838_v31, %v2840_v11  ;;  %v2094_v42 = vpop.f32.mrb[120].mxu1 }
 0x2a3   : > { %v14141_v51 = vadd.f32 %v2841_v15, %v13910_v53  ;;  %v2210_v45 = vrot.slane %v2094_v42, 1  ;;  %v9783_v33 = vpop.f32.mrb[121].mxu1  ;;  %9945 = vmatmul.mubr.msk.f32.gmra.mrb[160].mxu1 %vm1032_vm2, %v14144_v52  ;;  %v2684_v46 = vpop.f32.mrb[92].mxu0 }
 0x2a4   : > { %v2842_v18 = vrot.slane %v2684_v46, 2  ;;  %v9842_v41 = vpop.f32.mrb[93].mxu0  ;;  %10004 = vmatmul.mubr.msk.f32.vlgmr.msra.gmra.mrb[132].mxu0 %vm1032_vm2, %v13913_v62  ;;  %9947 = vmatprep.mubr.msk.f32.mxu1 %vm12043_vm1, %v16822_v40  ;;  %v14163_v62 = vld [vmem:[%s12265_s22 + $0x178] sm:$0xff]  ;;  %v14182_v46 = vld [vmem:[%s12265_s22 + $0x190] sm:$0xff] }
 0x2a5   : > { %v2211_v53 = vsel %vm2156_vm3, %v2208_v50, %v2210_v45  ;;  %10006 = vmatprep.mubr.msk.f32.mxu0 %vm12043_vm1, %v16822_v40 }
 0x2a6   : > { %v14156_v6 = vadd.f32 %v2211_v53, %v16832_v13  ;;  %v2843_v49 = vsel %vm2816_vm4, %v2840_v11, %v2842_v18  ;;  %v2099_v31 = vpop.f32.mrb[122].mxu1  ;;  %v16834_v11 = vld [vmem:[#allocation27_spill] sm:$0xff] }
 0x2a7   : > { %v14160_v60 = vadd.f32 %v2843_v49, %v13923_v4  ;;  %v2212_v34 = vrot.slane %v2099_v31, 1  ;;  %v9786_v30 = vpop.f32.mrb[123].mxu1  ;;  %9948 = vmatmul.mubr.msk.f32.gmra.mrb[162].mxu1 %vm1032_vm2, %v14163_v62  ;;  %v2689_v20 = vpop.f32.mrb[94].mxu0 }
 0x2a8   : > { %v2844_v50 = vrot.slane %v2689_v20, 2  ;;  %v9845_v2 = vpop.f32.mrb[95].mxu0  ;;  %10007 = vmatmul.mubr.msk.f32.gmra.mrb[134].mxu0 %vm1032_vm2, %v16833_v9  ;;  %9950 = vmatprep.mubr.msk.f32.mxu1 %vm12043_vm1, %v16822_v40 }
 0x2a9   : > { %v2213_v4 = vsel %vm2156_vm3, %v2210_v45, %v2212_v34  ;;  %10009 = vmatprep.mubr.msk.f32.mxu0 %vm12043_vm1, %v16822_v40 }
 0x2aa   : > { %v14175_v37 = vadd.f32 %v2213_v4, %v16834_v11  ;;  %v2845_v47 = vsel %vm2816_vm4, %v2842_v18, %v2844_v50  ;;  %v2104_v44 = vpop.f32.mrb[124].mxu1  ;;  %v16835_v18 = vld [vmem:[#allocation28_spill] sm:$0xff] }
 0x2ab   : > { %v14179_v15 = vadd.f32 %v2845_v47, %v13936_v14  ;;  %v2214_v42 = vrot.slane %v2104_v44, 1  ;;  %v9789_v33 = vpop.f32.mrb[125].mxu1  ;;  %9951 = vmatmul.mubr.msk.f32.gmra.mrb[164].mxu1 %vm1032_vm2, %v14182_v46  ;;  %v2694_v45 = vpop.f32.mrb[96].mxu0 }
 0x2ac   : > { %v2846_v41 = vrot.slane %v2694_v45, 2  ;;  %v9848_v53 = vpop.f32.mrb[97].mxu0  ;;  %10010 = vmatmul.mubr.msk.f32.gmra.mrb[136].mxu0 %vm1032_vm2, %v13939_v32  ;;  %9953 = vmatprep.mubr.msk.f32.mxu1 %vm12043_vm1, %v16822_v40  ;;  %v14201_v32 = vld [vmem:[%s12265_s22 + $0x1a8] sm:$0xff] }
 0x2ad   : > { %v2215_v14 = vsel %vm2156_vm3, %v2212_v34, %v2214_v42  ;;  %10012 = vmatprep.mubr.msk.f32.mxu0 %vm12043_vm1, %v16822_v40 }
 0x2ae   : > { %v14194_v13 = vadd.f32 %v2215_v14, %v16835_v18  ;;  %v2847_v49 = vsel %vm2816_vm4, %v2844_v50, %v2846_v41  ;;  %v2109_v31 = vpop.f32.mrb[126].mxu1  ;;  %v16836_v50 = vld [vmem:[#allocation29_spill] sm:$0xff] }
 0x2af   : > { %v14198_v30 = vadd.f32 %v2847_v49, %v13949_v48  ;;  %v2216_v20 = vrot.slane %v2109_v31, 1  ;;  %v9792_v2 = vpop.f32.mrb[127].mxu1  ;;  %9954 = vmatmul.mubr.msk.f32.gmra.mrb[166].mxu1 %vm1032_vm2, %v14201_v32  ;;  %v2699_v34 = vpop.f32.mrb[98].mxu0 }
 0x2b0   : > { %v2848_v9 = vrot.slane %v2699_v34, 2  ;;  %v9851_v4 = vpop.f32.mrb[99].mxu0  ;;  %10013 = vmatmul.mubr.msk.f32.gmra.mrb[138].mxu0 %vm1032_vm2, %v13956_v12  ;;  %9956 = vmatprep.mubr.msk.f32.mxu1 %vm12043_vm1, %v16822_v40  ;;  %v14220_v12 = vld [vmem:[%s12265_s22 + $0x1c0] sm:$0xff] }
 0x2b1   : > { %v2217_v48 = vsel %vm2156_vm3, %v2214_v42, %v2216_v20  ;;  %10015 = vmatprep.mubr.msk.f32.mxu0 %vm12043_vm1, %v16822_v40 }
 0x2b2   : > { %v14213_v11 = vadd.f32 %v2217_v48, %v16836_v50  ;;  %v2849_v47 = vsel %vm2816_vm4, %v2846_v41, %v2848_v9  ;;  %v2114_v44 = vpop.f32.mrb[128].mxu1  ;;  %v16837_v41 = vld [vmem:[#allocation30_spill] sm:$0xff]  ;;  %v14239_v48 = vld [vmem:[%s12265_s22 + $0x1d8] sm:$0xff] }
 0x2b3   : > { %v14217_v33 = vadd.f32 %v2849_v47, %v13966_v61  ;;  %v2218_v45 = vrot.slane %v2114_v44, 1  ;;  %v9795_v53 = vpop.f32.mrb[129].mxu1  ;;  %9957 = vmatmul.mubr.msk.f32.gmra.mrb[168].mxu1 %vm1032_vm2, %v14220_v12  ;;  %v2704_v42 = vpop.f32.mrb[100].mxu0 }
 0x2b4   : > { %v2850_v14 = vrot.slane %v2704_v42, 2  ;;  %v9854_v18 = vpop.f32.mrb[101].mxu0  ;;  %10016 = vmatmul.mubr.msk.f32.gmra.mrb[140].mxu0 %vm1032_vm2, %v13973_v39  ;;  %9959 = vmatprep.mubr.msk.f32.mxu1 %vm12043_vm1, %v16822_v40 }
 0x2b5   : > { %v2219_v61 = vsel %vm2156_vm3, %v2216_v20, %v2218_v45  ;;  %10018 = vmatprep.mubr.msk.f32.mxu0 %vm12043_vm1, %v16822_v40  ;;  %v14258_v18 = vld [vmem:[%s12265_s22 + $0x1f0] sm:$0xff] }
 0x2b6   : > { %v14232_v49 = vadd.f32 %v2219_v61, %v16837_v41  ;;  %v2851_v31 = vsel %vm2816_vm4, %v2848_v9, %v2850_v14  ;;  %v2119_v2 = vpop.f32.mrb[130].mxu1  ;;  %v16838_v9 = vld [vmem:[#allocation31_spill] sm:$0xff] }
 0x2b7   : > { %v14236_v34 = vadd.f32 %v2851_v31, %v13983_v63  ;;  %v2220_v4 = vrot.slane %v2119_v2, 1  ;;  %v9798_v39 = vpop.f32.mrb[131].mxu1  ;;  %9960 = vmatmul.mubr.msk.f32.gmra.mrb[170].mxu1 %vm1032_vm2, %v14239_v48  ;;  %v2709_v20 = vpop.f32.mrb[102].mxu0 }
 0x2b8   : > { %v2852_v50 = vrot.slane %v2709_v20, 2  ;;  %v9857_v47 = vpop.f32.mrb[103].mxu0  ;;  %10019 = vmatmul.mubr.msk.f32.gmra.mrb[142].mxu0 %vm1032_vm2, %v13990_v36  ;;  %9962 = vmatprep.mubr.msk.f32.mxu1 %vm12043_vm1, %v16822_v40  ;;  %v14288_v39 = vld [vmem:[%s12265_s22 + $0x220] sm:$0xff] }
 0x2b9   : > { %v2221_v63 = vsel %vm2156_vm3, %v2218_v45, %v2220_v4  ;;  %10021 = vmatprep.mubr.msk.f32.mxu0 %vm12043_vm1, %v16822_v40 }
 0x2ba   : > { %v14251_v44 = vadd.f32 %v2221_v63, %v16838_v9  ;;  %v2853_v53 = vsel %vm2816_vm4, %v2850_v14, %v2852_v50  ;;  %v14273_v14 = vld [vmem:[%s12265_s22 + $0x208] sm:$0xff]  ;;  %v14303_v63 = vld [vmem:[%s12265_s22 + $0x238] sm:$0xff] }
 0x2bb   : > { %v14255_v42 = vadd.f32 %v2853_v53, %v14000_v8  ;;  %9963 = vmatmul.mubr.msk.f32.gmra.mrb[172].mxu1 %vm1032_vm2, %v14258_v18  ;;  %v2714_v36 = vpop.f32.mrb[104].mxu0 }
 0x2bc   : > { %v2854_v61 = vrot.slane %v2714_v36, 2  ;;  %v9860_v41 = vpop.f32.mrb[105].mxu0  ;;  %10022 = vmatmul.mubr.msk.f32.gmra.mrb[144].mxu0 %vm1032_vm2, %v14007_v21  ;;  %9965 = vmatprep.mubr.msk.f32.mxu1 %vm12043_vm1, %v16822_v40 }
 0x2bd   : > { %10024 = vmatprep.mubr.msk.f32.mxu0 %vm12043_vm1, %v16822_v40 }
 0x2be   : > { %v2855_v8 = vsel %vm2816_vm4, %v2852_v50, %v2854_v61 }
 0x2bf   : > { %v14270_v45 = vadd.f32 %v2855_v8, %v14017_v10  ;;  %9966 = vmatmul.mubr.msk.f32.gmra.mrb[174].mxu1 %vm1032_vm2, %v14273_v14  ;;  %v2719_v31 = vpop.f32.mrb[106].mxu0 }
 0x2c0   : > { %v2856_v2 = vrot.slane %v2719_v31, 2  ;;  %v9863_v4 = vpop.f32.mrb[107].mxu0  ;;  %10025 = vmatmul.mubr.msk.f32.gmra.mrb[146].mxu0 %vm1032_vm2, %v14024_v58  ;;  %9968 = vmatprep.mubr.msk.f32.mxu1 %vm12043_vm1, %v16822_v40 }
 0x2c1   : > { %10027 = vmatprep.mubr.msk.f32.mxu0 %vm12043_vm1, %v16822_v40 }
 0x2c2   : > { %v2857_v21 = vsel %vm2816_vm4, %v2854_v61, %v2856_v2  ;;  %v14318_v61 = vld [vmem:[%s12265_s22 + $0x250] sm:$0xff] }
 0x2c3   : > { %v14285_v10 = vadd.f32 %v2857_v21, %v14034_v16  ;;  %9969 = vmatmul.mubr.msk.f32.gmra.mrb[176].mxu1 %vm1032_vm2, %v14288_v39  ;;  %v2724_v20 = vpop.f32.mrb[108].mxu0 }
 0x2c4   : > { %v2858_v50 = vrot.slane %v2724_v20, 2  ;;  %v9866_v47 = vpop.f32.mrb[109].mxu0  ;;  %10028 = vmatmul.mubr.msk.f32.gmra.mrb[148].mxu0 %vm1032_vm2, %v14041_v3  ;;  %9971 = vmatprep.mubr.msk.f32.mxu1 %vm12043_vm1, %v16822_v40  ;;  %v4465_v20 = vld [vmem:[%s12068_s17] sm:$0xff] }
 0x2c5   : > { %10030 = vmatprep.mubr.msk.f32.mxu0 %vm12043_vm1, %v16822_v40 }
 0x2c6   : > { %v2859_v58 = vsel %vm2816_vm4, %v2856_v2, %v2858_v50  ;;  %v14333_v2 = vld [vmem:[%s12265_s22 + $0x268] sm:$0xff] }
 0x2c7   : > { %v14300_v16 = vadd.f32 %v2859_v58, %v14051_v19  ;;  %9972 = vmatmul.mubr.msk.f32.gmra.mrb[178].mxu1 %vm1032_vm2, %v14303_v63  ;;  %v2729_v9 = vpop.f32.mrb[110].mxu0  ;;  %v14350_v58 = vld [vmem:[%s12265_s22 + $0x280] sm:$0xff] }
 0x2c8   : > { %v2860_v53 = vrot.slane %v2729_v9, 2  ;;  %v9869_v36 = vpop.f32.mrb[111].mxu0  ;;  %10031 = vmatmul.mubr.msk.f32.gmra.mrb[150].mxu0 %vm1032_vm2, %v14058_v7  ;;  %9974 = vmatprep.mubr.msk.f32.mxu1 %vm12043_vm1, %v16822_v40 }
 0x2c9   : > { %10033 = vmatprep.mubr.msk.f32.mxu0 %vm12043_vm1, %v16822_v40 }
 0x2ca   : > { %v2861_v3 = vsel %vm2816_vm4, %v2858_v50, %v2860_v53  ;;  %v4466_v50 = vld [vmem:[%s12068_s17 + $0x8] sm:$0xff] }
 0x2cb   : > { %v14315_v19 = vadd.f32 %v2861_v3, %v14068_v26  ;;  %9975 = vmatmul.mubr.msk.f32.gmra.mrb[180].mxu1 %vm1032_vm2, %v14318_v61  ;;  %v2734_v41 = vpop.f32.mrb[112].mxu0  ;;  %v10979_v9 = vpack.c.bf16 %v4466_v50, %v4465_v20  ;;  %v14395_v20 = vld [vmem:[%s12265_s22 + $0x2c8] sm:$0xff] }
 0x2cc   : > { %v2862_v8 = vrot.slane %v2734_v41, 2  ;;  %v9872_v7 = vpop.f32.mrb[113].mxu0  ;;  %10034 = vmatmul.mubr.msk.f32.gmra.mrb[152].mxu0 %vm1032_vm2, %v14075_v59  ;;  %9977 = vmatprep.mubr.msk.f32.mxu1 %vm12043_vm1, %v16822_v40  ;;  %v14365_v41 = vld [vmem:[%s12265_s22 + $0x298] sm:$0xff] }
 0x2cd   : > { %10036 = vmatprep.mubr.msk.f32.mxu0 %vm12043_vm1, %v16822_v40  ;;  %10980 = vmatprep.subr.bf16.mxu1 %v10979_v9 }
 0x2ce   : > { %v2863_v26 = vsel %vm2816_vm4, %v2860_v53, %v2862_v8  ;;  %10982 = vmatpush3.bf16.msra.mxu1 %v10979_v9  ;;  %v4467_v9 = vld [vmem:[%s12068_s17 + $0x10] sm:$0xff] }
 0x2cf   : > { %v14330_v31 = vadd.f32 %v2863_v26, %v14085_v29  ;;  %9978 = vmatmul.mubr.msk.f32.gmra.mrb[182].mxu1 %vm1032_vm2, %v14333_v2  ;;  %v2739_v4 = vpop.f32.mrb[114].mxu0 }
 0x2d0   : > { %v2864_v21 = vrot.slane %v2739_v4, 2  ;;  %v9875_v59 = vpop.f32.mrb[115].mxu0  ;;  %10037 = vmatmul.mubr.msk.f32.gmra.mrb[154].mxu0 %vm1032_vm2, %v14092_v17  ;;  %9980 = vmatprep.mubr.msk.f32.mxu1 %vm12043_vm1, %v16822_v40  ;;  %v14380_v4 = vld [vmem:[%s12265_s22 + $0x2b0] sm:$0xff] }
 0x2d1   : > { %10039 = vmatprep.mubr.msk.f32.mxu0 %vm12043_vm1, %v16822_v40 }
 0x2d2   : > { %v2865_v29 = vsel %vm2816_vm4, %v2862_v8, %v2864_v21 }
 0x2d3   : > { %v14347_v47 = vadd.f32 %v2865_v29, %v14102_v35  ;;  %9981 = vmatmul.mubr.msk.f32.gmra.mrb[184].mxu1 %vm1032_vm2, %v14350_v58  ;;  %v2744_v17 = vpop.f32.mrb[116].mxu0 }
 0x2d4   : > { %v2866_v53 = vrot.slane %v2744_v17, 2  ;;  %v9878_v36 = vpop.f32.mrb[117].mxu0  ;;  %10040 = vmatmul.mubr.msk.f32.gmra.mrb[156].mxu0 %vm1032_vm2, %v14109_v55  ;;  %9983 = vmatprep.mubr.msk.f32.mxu1 %vm12043_vm1, %v16822_v40 }
 0x2d5   : > { %10042 = vmatprep.mubr.msk.f32.mxu0 %vm12043_vm1, %v16822_v40 }
 0x2d6   : > { %v2867_v35 = vsel %vm2816_vm4, %v2864_v21, %v2866_v53 }
 0x2d7   : > { %v14362_v3 = vadd.f32 %v2867_v35, %v14119_v38  ;;  %9984 = vmatmul.mubr.msk.f32.gmra.mrb[186].mxu1 %vm1032_vm2, %v14365_v41  ;;  %v2749_v55 = vpop.f32.mrb[118].mxu0  ;;  %v14412_v35 = vld [vmem:[%s12265_s22 + $0x2e0] sm:$0xff] }
 0x2d8   : > { %v2868_v8 = vrot.slane %v2749_v55, 2  ;;  %v9881_v7 = vpop.f32.mrb[119].mxu0  ;;  %10043 = vmatmul.mubr.msk.f32.gmra.mrb[158].mxu0 %vm1032_vm2, %v14126_v23  ;;  %9986 = vmatprep.mubr.msk.f32.mxu1 %vm12043_vm1, %v16822_v40 }
 0x2d9   : > { %10045 = vmatprep.mubr.msk.f32.mxu0 %vm12043_vm1, %v16822_v40 }
 0x2da   : > { %v2869_v38 = vsel %vm2816_vm4, %v2866_v53, %v2868_v8  ;;  %v4468_v53 = vld [vmem:[%s12068_s17 + $0x18] sm:$0xff] }
 0x2db   : > { %v14377_v26 = vadd.f32 %v2869_v38, %v14137_v25  ;;  %9987 = vmatmul.mubr.msk.f32.gmra.mrb[188].mxu1 %vm1032_vm2, %v14380_v4  ;;  %v2754_v21 = vpop.f32.mrb[120].mxu0  ;;  %v10983_v55 = vpack.c.bf16 %v4468_v53, %v4467_v9 }
 0x2dc   : > { %v2870_v59 = vrot.slane %v2754_v21, 2  ;;  %v9884_v23 = vpop.f32.mrb[121].mxu0  ;;  %10046 = vmatmul.mubr.msk.f32.gmra.mrb[160].mxu0 %vm1032_vm2, %v14144_v52  ;;  %9989 = vmatprep.mubr.msk.f32.mxu1 %vm12043_vm1, %v16822_v40  ;;  %v14427_v21 = vld [vmem:[%s12265_s22 + $0x2f8] sm:$0xff] }
 0x2dd   : > { %10048 = vmatprep.mubr.msk.f32.mxu0 %vm12043_vm1, %v16822_v40  ;;  %10984 = vmatprep.subr.bf16.mxu1 %v10983_v55 }
 0x2de   : > { %v2871_v25 = vsel %vm2816_vm4, %v2868_v8, %v2870_v59  ;;  %10986 = vmatpush3.bf16.msra.mxu1 %v10983_v55  ;;  %v4469_v55 = vld [vmem:[%s12068_s17 + $0x20] sm:$0xff] }
 0x2df   : > { %v14392_v29 = vadd.f32 %v2871_v25, %v14156_v6  ;;  %9990 = vmatmul.mubr.msk.f32.gmra.mrb[190].mxu1 %vm1032_vm2, %v14395_v20  ;;  %v2759_v50 = vpop.f32.mrb[122].mxu0 }
 0x2e0   : > { %v2872_v17 = vrot.slane %v2759_v50, 2  ;;  %v9887_v52 = vpop.f32.mrb[123].mxu0  ;;  %10049 = vmatmul.mubr.msk.f32.gmra.mrb[162].mxu0 %vm1032_vm2, %v14163_v62  ;;  %9992 = vmatprep.mubr.msk.f32.mxu1 %vm12043_vm1, %v16822_v40  ;;  %v14442_v50 = vld [vmem:[%s12265_s22 + $0x310] sm:$0xf]  ;;  %s17083_s22 = sld [smem:[#allocation17_spill]] }
 0x2e1   : > { %10051 = vmatprep.mubr.msk.f32.mxu0 %vm12043_vm1, %v16822_v40 }
 0x2e2   : > { %v2873_v6 = vsel %vm2816_vm4, %v2870_v59, %v2872_v17 }
 0x2e3   : > { %v14409_v36 = vadd.f32 %v2873_v6, %v14175_v37  ;;  %9993 = vmatmul.mubr.msk.f32.gmra.mrb[192].mxu1 %vm1032_vm2, %v14412_v35  ;;  %v2764_v62 = vpop.f32.mrb[124].mxu0 }
 0x2e4   : > { %v2874_v8 = vrot.slane %v2764_v62, 2  ;;  %v9890_v7 = vpop.f32.mrb[125].mxu0  ;;  %10052 = vmatmul.mubr.msk.f32.gmra.mrb[164].mxu0 %vm1032_vm2, %v14182_v46  ;;  %9995 = vmatprep.mubr.msk.f32.mxu1 %vm12043_vm1, %v16822_v40 }
 0x2e5   : > { %10054 = vmatprep.mubr.msk.f32.mxu0 %vm12043_vm1, %v16822_v40 }
 0x2e6   : > { %v2875_v37 = vsel %vm2816_vm4, %v2872_v17, %v2874_v8 }
 0x2e7   : > { %v14424_v38 = vadd.f32 %v2875_v37, %v14194_v13  ;;  %9996 = vmatmul.mubr.msk.f32.gmra.mrb[194].mxu1 %vm1032_vm2, %v14427_v21  ;;  %v2769_v46 = vpop.f32.mrb[126].mxu0  ;;  %v4476_v37 = vld [vmem:[%s12068_s17 + $0x58] sm:$0xff] }
 0x2e8   : > { %v2876_v59 = vrot.slane %v2769_v46, 2  ;;  %v9893_v23 = vpop.f32.mrb[127].mxu0  ;;  %10055 = vmatmul.mubr.msk.f32.gmra.mrb[166].mxu0 %vm1032_vm2, %v14201_v32  ;;  %9998 = vmatprep.mubr.msk.f32.mxu1 %vm12043_vm1, %v16822_v40 }
 0x2e9   : > { %10057 = vmatprep.mubr.msk.f32.mxu0 %vm12043_vm1, %v16822_v40 }
 0x2ea   : > { %v2877_v13 = vsel %vm2816_vm4, %v2874_v8, %v2876_v59  ;;  %v4470_v8 = vld [vmem:[%s12068_s17 + $0x28] sm:$0xff] }
 0x2eb   : > { %v14439_v25 = vadd.f32 %v2877_v13, %v14213_v11  ;;  %9999 = vmatmul.mubr.msk.f32.gmra.mrb[196].mxu1 %vm1032_vm2, %v14442_v50  ;;  %v2774_v17 = vpop.f32.mrb[128].mxu0  ;;  %v4479_v13 = vld [vmem:[%s12068_s17 + $0x70] sm:$0xff] }
 0x2ec   : > { %v2878_v32 = vrot.slane %v2774_v17, 2  ;;  %v9896_v52 = vpop.f32.mrb[129].mxu0  ;;  %10058 = vmatmul.mubr.msk.f32.gmra.mrb[168].mxu0 %vm1032_vm2, %v14220_v12  ;;  %v4480_v17 = vld [vmem:[%s12068_s17 + $0x78] sm:$0xff] }
 0x2ed   : > { %10060 = vmatprep.mubr.msk.f32.mxu0 %vm12043_vm1, %v16822_v40 }
 0x2ee   : > { %v2879_v6 = vsel %vm2816_vm4, %v2876_v59, %v2878_v32  ;;  %v4477_v59 = vld [vmem:[%s12068_s17 + $0x60] sm:$0xff] }
 0x2ef   : > { %v14452_v11 = vadd.f32 %v2879_v6, %v14232_v49  ;;  %v2779_v9 = vpop.f32.mrb[130].mxu0  ;;  %v10987_v49 = vpack.c.bf16 %v4470_v8, %v4469_v55 }
 0x2f0   : > { %v2880_v53 = vrot.slane %v2779_v9, 2  ;;  %v9899_v62 = vpop.f32.mrb[131].mxu0  ;;  %10061 = vmatmul.mubr.msk.f32.gmra.mrb[170].mxu0 %vm1032_vm2, %v14239_v48  ;;  %v4471_v48 = vld [vmem:[%s12068_s17 + $0x30] sm:$0xff] }
 0x2f1   : > { %10063 = vmatprep.mubr.msk.f32.mxu0 %vm12043_vm1, %v16822_v40  ;;  %10988 = vmatprep.subr.bf16.mxu1 %v10987_v49 }
 0x2f2   : > { %v2881_v12 = vsel %vm2816_vm4, %v2878_v32, %v2880_v53  ;;  %10990 = vmatpush3.bf16.msra.mxu1 %v10987_v49  ;;  %v11007_v32 = vpack.c.bf16 %v4480_v17, %v4479_v13 }
 0x2f3   : > { %v14462_v7 = vadd.f32 %v2881_v12, %v14251_v44  ;;  %v4472_v44 = vld [vmem:[%s12068_s17 + $0x38] sm:$0xff] }
 0x2f4   : > { %10064 = vmatmul.mubr.msk.f32.gmra.mrb[172].mxu0 %vm1032_vm2, %v14258_v18  ;;  %v10991_v18 = vpack.c.bf16 %v4472_v44, %v4471_v48 }
 0x2f5   : > { %10066 = vmatprep.mubr.msk.f32.mxu0 %vm12043_vm1, %v16822_v40 }
 0x2f6   : > { %10992 = vmatprep.subr.bf16.mxu1 %v10991_v18 }
 0x2f7   : > { %10994 = vmatpush3.bf16.msra.mxu1 %v10991_v18 }
 0x2f8   : > { %10067 = vmatmul.mubr.msk.f32.gmra.mrb[174].mxu0 %vm1032_vm2, %v14273_v14  ;;  %v4473_v14 = vld [vmem:[%s12068_s17 + $0x40] sm:$0xff] }
 0x2f9   : > { %10069 = vmatprep.mubr.msk.f32.mxu0 %vm12043_vm1, %v16822_v40 }
 0x2fc   : > { %10070 = vmatmul.mubr.msk.f32.gmra.mrb[176].mxu0 %vm1032_vm2, %v14288_v39  ;;  %v4474_v39 = vld [vmem:[%s12068_s17 + $0x48] sm:$0xff] }
 0x2fd   : > { %10072 = vmatprep.mubr.msk.f32.mxu0 %vm12043_vm1, %v16822_v40 }
 0x300   : > { %10073 = vmatmul.mubr.msk.f32.gmra.mrb[178].mxu0 %vm1032_vm2, %v14303_v63  ;;  %v10995_v63 = vpack.c.bf16 %v4474_v39, %v4473_v14 }
 0x301   : > { %10075 = vmatprep.mubr.msk.f32.mxu0 %vm12043_vm1, %v16822_v40 }
 0x302   : > { %10996 = vmatprep.subr.bf16.mxu1 %v10995_v63 }
 0x303   : > { %10998 = vmatpush3.bf16.msra.mxu1 %v10995_v63 }
 0x304   : > { %10076 = vmatmul.mubr.msk.f32.gmra.mrb[180].mxu0 %vm1032_vm2, %v14318_v61  ;;  %v4475_v61 = vld [vmem:[%s12068_s17 + $0x50] sm:$0xff] }
 0x305   : > { %10078 = vmatprep.mubr.msk.f32.mxu0 %vm12043_vm1, %v16822_v40  ;;  %v10999_v46 = vpack.c.bf16 %v4476_v37, %v4475_v61 }
 0x307   : > { %11000 = vmatprep.subr.bf16.mxu1 %v10999_v46 }
 0x308   : > { %10079 = vmatmul.mubr.msk.f32.gmra.mrb[182].mxu0 %vm1032_vm2, %v14333_v2  ;;  %11002 = vmatpush3.bf16.msra.mxu1 %v10999_v46  ;;  %v4478_v2 = vld [vmem:[%s12068_s17 + $0x68] sm:$0xff] }
 0x309   : > { %10081 = vmatprep.mubr.msk.f32.mxu0 %vm12043_vm1, %v16822_v40  ;;  %v11003_v23 = vpack.c.bf16 %v4478_v2, %v4477_v59 }
 0x30b   : > { %11004 = vmatprep.subr.bf16.mxu1 %v11003_v23 }
 0x30c   : > { %10082 = vmatmul.mubr.msk.f32.gmra.mrb[184].mxu0 %vm1032_vm2, %v14350_v58  ;;  %11006 = vmatpush3.bf16.msra.mxu1 %v11003_v23 }
 0x30d   : > { %10084 = vmatprep.mubr.msk.f32.mxu0 %vm12043_vm1, %v16822_v40  ;;  %11008 = vmatprep.subr.bf16.mxu1 %v11007_v32 }
 0x310   : > { %10085 = vmatmul.mubr.msk.f32.gmra.mrb[186].mxu0 %vm1032_vm2, %v14365_v41  ;;  %11010 = vmatpush3.bf16.msra.mxu1 %v11007_v32 }
 0x311   : > { %10087 = vmatprep.mubr.msk.f32.mxu0 %vm12043_vm1, %v16822_v40 }
 0x314   : > { %10088 = vmatmul.mubr.msk.f32.gmra.mrb[188].mxu0 %vm1032_vm2, %v14380_v4 }
 0x315   : > { %10090 = vmatprep.mubr.msk.f32.mxu0 %vm12043_vm1, %v16822_v40 }
 0x318   : > { %10091 = vmatmul.mubr.msk.f32.gmra.mrb[190].mxu0 %vm1032_vm2, %v14395_v20 }
 0x319   : > { %10093 = vmatprep.mubr.msk.f32.mxu0 %vm12043_vm1, %v16822_v40 }
 0x31c   : > { %10094 = vmatmul.mubr.msk.f32.gmra.mrb[192].mxu0 %vm1032_vm2, %v14412_v35 }
 0x31d   : > { %10096 = vmatprep.mubr.msk.f32.mxu0 %vm12043_vm1, %v16822_v40 }
 0x320   : > { %10097 = vmatmul.mubr.msk.f32.gmra.mrb[194].mxu0 %vm1032_vm2, %v14427_v21 }
 0x321   : > { %10099 = vmatprep.mubr.msk.f32.mxu0 %vm12043_vm1, %v16822_v40 }
 0x324   : > { %10100 = vmatmul.mubr.msk.f32.gmra.mrb[196].mxu0 %vm1032_vm2, %v14442_v50 }
 0x33e   : > { %v3279_v58 = vpop.f32.mrb[132].mxu1 }
 0x33f   : > { %v9904_v41 = vpop.f32.mrb[133].mxu1  ;;  %v3477_v20 = vrot.slane %v3279_v58, 3 }
 0x342   : > { %v3284_v4 = vpop.f32.mrb[134].mxu1 }
 0x343   : > { %v3478_v52 = vrot.slane %v3284_v4, 3  ;;  %v9907_v6 = vpop.f32.mrb[135].mxu1 }
 0x345   : > { %v3479_v35 = vsel %vm3476_vm5, %v3477_v20, %v3478_v52 }
 0x346   : > { %v14526_v9 = vadd.f32 %v3479_v35, %v13953_v22  ;;  %v3289_v53 = vpop.f32.mrb[136].mxu1 }
 0x347   : > { %v3480_v21 = vrot.slane %v3289_v53, 3  ;;  %v9910_v62 = vpop.f32.mrb[137].mxu1 }
 0x349   : > { %v3481_v12 = vsel %vm3476_vm5, %v3478_v52, %v3480_v21 }
 0x34a   : > { %v14530_v55 = vadd.f32 %v3481_v12, %v13970_v1  ;;  %v3294_v50 = vpop.f32.mrb[138].mxu1 }
 0x34b   : > { %v3482_v8 = vrot.slane %v3294_v50, 3  ;;  %v9913_v49 = vpop.f32.mrb[139].mxu1 }
 0x34d   : > { %v3483_v48 = vsel %vm3476_vm5, %v3480_v21, %v3482_v8 }
 0x34e   : > { %v14534_v44 = vadd.f32 %v3483_v48, %v13987_v0  ;;  %v3299_v18 = vpop.f32.mrb[140].mxu1 }
 0x34f   : > { %v3484_v14 = vrot.slane %v3299_v18, 3  ;;  %v9916_v22 = vpop.f32.mrb[141].mxu1 }
 0x351   : > { %v3485_v39 = vsel %vm3476_vm5, %v3482_v8, %v3484_v14 }
 0x352   : > { %v14538_v63 = vadd.f32 %v3485_v39, %v14004_v57  ;;  %v3304_v61 = vpop.f32.mrb[142].mxu1 }
 0x353   : > { %v3486_v37 = vrot.slane %v3304_v61, 3  ;;  %v9919_v1 = vpop.f32.mrb[143].mxu1 }
 0x355   : > { %v3487_v46 = vsel %vm3476_vm5, %v3484_v14, %v3486_v37 }
 0x356   : > { %v14542_v59 = vadd.f32 %v3487_v46, %v14021_v24  ;;  %v3309_v2 = vpop.f32.mrb[144].mxu1 }
 0x357   : > { %v3488_v23 = vrot.slane %v3309_v2, 3  ;;  %v9922_v0 = vpop.f32.mrb[145].mxu1 }
 0x359   : > { %v3489_v13 = vsel %vm3476_vm5, %v3486_v37, %v3488_v23 }
 0x35a   : > { %v14546_v17 = vadd.f32 %v3489_v13, %v14038_v43  ;;  %v3314_v32 = vpop.f32.mrb[146].mxu1 }
 0x35b   : > { %v3490_v58 = vrot.slane %v3314_v32, 3  ;;  %v9925_v57 = vpop.f32.mrb[147].mxu1 }
 0x35d   : > { %v3491_v41 = vsel %vm3476_vm5, %v3488_v23, %v3490_v58 }
 0x35e   : > { %v14550_v4 = vadd.f32 %v3491_v41, %v14055_v27  ;;  %v3319_v20 = vpop.f32.mrb[148].mxu1 }
 0x35f   : > { %v3492_v52 = vrot.slane %v3319_v20, 3  ;;  %v9928_v24 = vpop.f32.mrb[149].mxu1 }
 0x361   : > { %v3493_v6 = vsel %vm3476_vm5, %v3490_v58, %v3492_v52 }
 0x362   : > { %v14554_v35 = vadd.f32 %v3493_v6, %v14072_v5  ;;  %v3324_v53 = vpop.f32.mrb[150].mxu1 }
 0x363   : > { %v3494_v21 = vrot.slane %v3324_v53, 3  ;;  %v9931_v43 = vpop.f32.mrb[151].mxu1 }
 0x365   : > { %v3495_v62 = vsel %vm3476_vm5, %v3492_v52, %v3494_v21 }
 0x366   : > { %v14558_v12 = vadd.f32 %v3495_v62, %v14089_v54  ;;  %v3329_v50 = vpop.f32.mrb[152].mxu1 }
 0x367   : > { %v3496_v8 = vrot.slane %v3329_v50, 3  ;;  %v9934_v27 = vpop.f32.mrb[153].mxu1 }
 0x369   : > { %v3497_v49 = vsel %vm3476_vm5, %v3494_v21, %v3496_v8 }
 0x36a   : > { %v14562_v48 = vadd.f32 %v3497_v49, %v14106_v28  ;;  %v3334_v18 = vpop.f32.mrb[154].mxu1  ;;  %v14586_v49 = vld [vmem:[%s16839_s13] ss:$0 sm:$0xff] }
 0x36b   : > { %v3498_v14 = vrot.slane %v3334_v18, 3  ;;  %v9937_v5 = vpop.f32.mrb[155].mxu1 }
 0x36d   : > { %v3499_v22 = vsel %vm3476_vm5, %v3496_v8, %v3498_v14 }
 0x36e   : > { %v14566_v39 = vadd.f32 %v3499_v22, %v14123_v56  ;;  %v3339_v61 = vpop.f32.mrb[156].mxu1 }
 0x36f   : > { %v3500_v37 = vrot.slane %v3339_v61, 3  ;;  %v9940_v54 = vpop.f32.mrb[157].mxu1 }
 0x371   : > { %v3501_v1 = vsel %vm3476_vm5, %v3498_v14, %v3500_v37 }
 0x372   : > { %v14570_v46 = vadd.f32 %v3501_v1, %v14141_v51  ;;  %v3344_v2 = vpop.f32.mrb[158].mxu1 }
 0x373   : > { %v3502_v23 = vrot.slane %v3344_v2, 3  ;;  %v9943_v28 = vpop.f32.mrb[159].mxu1 }
 0x375   : > { %v3503_v0 = vsel %vm3476_vm5, %v3500_v37, %v3502_v23 }
 0x376   : > { %v14574_v13 = vadd.f32 %v3503_v0, %v14160_v60  ;;  %v3349_v32 = vpop.f32.mrb[160].mxu1 }
 0x377   : > { %v3504_v58 = vrot.slane %v3349_v32, 3  ;;  %v9946_v56 = vpop.f32.mrb[161].mxu1  ;;  %v3939_v57 = vpop.f32.mrb[132].mxu0 }
 0x378   : > { %v10005_v41 = vpop.f32.mrb[133].mxu0  ;;  %v4137_v21 = vrot.slane %v3939_v57, 4 }
 0x379   : > { %v3505_v20 = vsel %vm3476_vm5, %v3502_v23, %v3504_v58 }
 0x37a   : > { %v14578_v52 = vadd.f32 %v3505_v20, %v14179_v15  ;;  %v3354_v51 = vpop.f32.mrb[162].mxu1 }
 0x37b   : > { %v3506_v24 = vrot.slane %v3354_v51, 3  ;;  %v9949_v6 = vpop.f32.mrb[163].mxu1  ;;  %v3944_v53 = vpop.f32.mrb[134].mxu0 }
 0x37c   : > { %v4138_v43 = vrot.slane %v3944_v53, 4  ;;  %v10008_v60 = vpop.f32.mrb[135].mxu0 }
 0x37d   : > { %v3507_v62 = vsel %vm3476_vm5, %v3504_v58, %v3506_v24 }
 0x37e   : > { %v14582_v50 = vadd.f32 %v3507_v62, %v14198_v30  ;;  %v4139_v8 = vsel %vm4136_vm6, %v4137_v21, %v4138_v43  ;;  %v3359_v27 = vpop.f32.mrb[164].mxu1 }
 0x37f   : > { %v4234_v15 = vadd.f32 %v4139_v8, %v14526_v9  ;;  %v3508_v18 = vrot.slane %v3359_v27, 3  ;;  %v9952_v14 = vpop.f32.mrb[165].mxu1  ;;  %v3949_v5 = vpop.f32.mrb[136].mxu0 }
 0x380   : > { %v4140_v22 = vrot.slane %v3949_v5, 4  ;;  %v10011_v61 = vpop.f32.mrb[137].mxu0 }
 0x381   : > { %v3509_v37 = vsel %vm3476_vm5, %v3506_v24, %v3508_v18  ;;  %v14591_v54 = vadd.f32 %v14586_v49, %v4234_v15 }
 0x382   : > { %v14594_v30 = vadd.f32 %v3509_v37, %v14217_v33  ;;  %v4141_v1 = vsel %vm4136_vm6, %v4138_v43, %v4140_v22  ;;  %v3364_v2 = vpop.f32.mrb[166].mxu1 }
 0x383   : > { %v4235_v23 = vadd.f32 %v4141_v1, %v14530_v55  ;;  %v3510_v28 = vrot.slane %v3364_v2, 3  ;;  %v9955_v9 = vpop.f32.mrb[167].mxu1  ;;  %v3954_v0 = vpop.f32.mrb[138].mxu0  ;;  %v4337_v32 = vmul.f32 1.442695, %v14591_v54  ;;  %vm4305_vm7 = vcmp.gt.f32.partialorder %v14591_v54, 0.0 }
 0x384   : > { %v4142_v58 = vrot.slane %v3954_v0, 4  ;;  %v10014_v56 = vpop.f32.mrb[139].mxu0 }
 0x385   : > { %v14600_v57 = vadd.f32 %v14586_v49, %v4235_v23  ;;  %v3511_v41 = vsel %vm3476_vm5, %v3508_v18, %v3510_v28  ;;  %11747 = vpow2.f32 %v4337_v32 }
 0x386   : > { %v14604_v33 = vadd.f32 %v3511_v41, %v14236_v34  ;;  %v4143_v20 = vsel %vm4136_vm6, %v4140_v22, %v4142_v58  ;;  %v3369_v51 = vpop.f32.mrb[168].mxu1 }
 0x387   : > { %v4339_v55 = vmul.f32 1.442695, %v14600_v57  ;;  %v4236_v24 = vadd.f32 %v4143_v20, %v14534_v44  ;;  %v3512_v6 = vrot.slane %v3369_v51, 3  ;;  %v9958_v53 = vpop.f32.mrb[169].mxu1  ;;  %v3959_v21 = vpop.f32.mrb[140].mxu0  ;;  %v8861_v51 = vld [vmem:[%s12078_s25 + $0x40] sm:$0xff] }
 0x388   : > { %v4144_v43 = vrot.slane %v3959_v21, 4  ;;  %v10017_v60 = vpop.f32.mrb[141].mxu0  ;;  %v8864_v21 = vld [vmem:[%s12078_s25 + $0x58] sm:$0xff]  ;;  %vm4306_vm8 = vcmp.gt.f32.partialorder %v14600_v57, 0.0 }
 0x389   : > { %v3513_v62 = vsel %vm3476_vm5, %v3510_v28, %v3512_v6  ;;  %11749 = vpow2.f32 %v4339_v55  ;;  %v14611_v8 = vadd.f32 %v14586_v49, %v4236_v24  ;;  %v8862_v55 = vld [vmem:[%s12078_s25 + $0x48] sm:$0xff]  ;;  %v8863_v24 = vld [vmem:[%s12078_s25 + $0x50] sm:$0xff] }
 0x38a   : > { %v14614_v34 = vadd.f32 %v3513_v62, %v14255_v42  ;;  %v4145_v27 = vsel %vm4136_vm6, %v4142_v58, %v4144_v43  ;;  %v3374_v15 = vpop.f32.mrb[170].mxu1  ;;  %v11011_v53 = vpack.c.bf16 %v8862_v55, %v8861_v51 }
 0x38b   : > { %v4237_v18 = vadd.f32 %v4145_v27, %v14538_v63  ;;  %v3514_v44 = vrot.slane %v3374_v15, 3  ;;  %v9961_v14 = vpop.f32.mrb[171].mxu1  ;;  %v3964_v5 = vpop.f32.mrb[142].mxu0  ;;  %v4341_v22 = vmul.f32 1.442695, %v14611_v8  ;;  %v11015_v15 = vpack.c.bf16 %v8864_v21, %v8863_v24 }
 0x38c   : > { %v4146_v61 = vrot.slane %v3964_v5, 4  ;;  %v10020_v37 = vpop.f32.mrb[143].mxu0  ;;  %11012 = vmatprep.subr.bf16.mxu0 %v11011_v53  ;;  %vm4307_vm9 = vcmp.gt.f32.partialorder %v14611_v8, 0.0 }
 0x38d   : > { %v3515_v1 = vsel %vm3476_vm5, %v3512_v6, %v3514_v44  ;;  %11751 = vpow2.f32 %v4341_v22  ;;  %v14621_v42 = vadd.f32 %v14586_v49, %v4237_v18  ;;  %v8865_v18 = vld [vmem:[%s12078_s25 + $0x60] sm:$0xff]  ;;  %11014 = vmatpush3.bf16.msra.mxu0 %v11011_v53 }
 0x38e   : > { %v14624_v2 = vadd.f32 %v3515_v1, %v14270_v45  ;;  %v4147_v63 = vsel %vm4136_vm6, %v4144_v43, %v4146_v61  ;;  %v3379_v23 = vpop.f32.mrb[172].mxu1  ;;  %11016 = vmatprep.subr.bf16.mxu0 %v11015_v15 }
 0x38f   : > { %v11748_v28 = vpop.eup %11747  ;;  %v4238_v9 = vadd.f32 %v4147_v63, %v14542_v59  ;;  %v3516_v0 = vrot.slane %v3379_v23, 3  ;;  %v9964_v32 = vpop.f32.mrb[173].mxu1  ;;  %v4343_v56 = vmul.f32 1.442695, %v14621_v42  ;;  %vm4308_vm10 = vcmp.gt.f32.partialorder %v14621_v42, 0.0 }
 0x390   : > { %v3969_v58 = vpop.f32.mrb[144].mxu0  ;;  %v8828_v45 = vadd.f32 -1.0, %v11748_v28 }
 0x391   : > { %v4148_v41 = vrot.slane %v3969_v58, 4  ;;  %v10023_v20 = vpop.f32.mrb[145].mxu0  ;;  %v3517_v6 = vsel %vm3476_vm5, %v3514_v44, %v3516_v0  ;;  %11753 = vpow2.f32 %v4343_v56  ;;  %v14635_v59 = vadd.f32 %v14586_v49, %v4238_v9  ;;  %v8866_v44 = vld [vmem:[%s12078_s25 + $0x68] sm:$0xff]  ;;  %11018 = vmatpush3.bf16.msra.mxu0 %v11015_v15 }
 0x392   : > { %v14639_v43 = vadd.f32 %v3517_v6, %v14285_v10  ;;  %v3384_v62 = vpop.f32.mrb[174].mxu1  ;;  %v14645_v27 = vsel %vm4305_vm7, %v14591_v54, %v8828_v45 }
 0x393   : > { %v4149_v60 = vsel %vm4136_vm6, %v4146_v61, %v4148_v41  ;;  %v11750_v14 = vpop.eup %11749  ;;  %v3518_v22 = vrot.slane %v3384_v62, 3  ;;  %v9967_v37 = vpop.f32.mrb[175].mxu1  ;;  %10134 = vmatprep.mubr.f32.mxu1 %v14645_v27  ;;  %v4345_v10 = vmul.f32 1.442695, %v14635_v59  ;;  %vm4309_vm11 = vcmp.gt.f32.partialorder %v14635_v59, 0.0 }
 0x394   : > { %v4239_v5 = vadd.f32 %v4149_v60, %v14546_v17  ;;  %v3974_v1 = vpop.f32.mrb[146].mxu0  ;;  %v8829_v54 = vadd.f32 -1.0, %v11750_v14  ;;  %v11019_v17 = vpack.c.bf16 %v8866_v44, %v8865_v18 }
 0x395   : > { %v4150_v61 = vrot.slane %v3974_v1, 4  ;;  %v10026_v63 = vpop.f32.mrb[147].mxu0  ;;  %v3519_v23 = vsel %vm3476_vm5, %v3516_v0, %v3518_v22  ;;  %11755 = vpow2.f32 %v4345_v10 }
 0x396   : > { %v14655_v28 = vadd.f32 %v14586_v49, %v4239_v5  ;;  %v14658_v9 = vadd.f32 %v3519_v23, %v14300_v16  ;;  %v3389_v58 = vpop.f32.mrb[176].mxu1  ;;  %v14662_v56 = vsel %vm4306_vm8, %v14600_v57, %v8829_v54  ;;  %11020 = vmatprep.subr.bf16.mxu0 %v11019_v17 }
 0x397   : > { %v4151_v32 = vsel %vm4136_vm6, %v4148_v41, %v4150_v61  ;;  %v11752_v20 = vpop.eup %11751  ;;  %v3520_v51 = vrot.slane %v3389_v58, 3  ;;  %v9970_v0 = vpop.f32.mrb[177].mxu1  ;;  %10135 = vmatmul.mubr.f32.vlgmr.msra.gmra.mrb[198].mxu1 %v14662_v56  ;;  %11022 = vmatpush3.bf16.msra.mxu0 %v11019_v17 }
 0x398   : > { %v4240_v45 = vadd.f32 %v4151_v32, %v14550_v4  ;;  %v3979_v55 = vpop.f32.mrb[148].mxu0  ;;  %v4347_v24 = vmul.f32 1.442695, %v14655_v28  ;;  %v8830_v16 = vadd.f32 -1.0, %v11752_v20  ;;  %vm4310_vm12 = vcmp.gt.f32.partialorder %v14655_v28, 0.0 }
 0x399   : > { %v4152_v6 = vrot.slane %v3979_v55, 4  ;;  %v10029_v53 = vpop.f32.mrb[149].mxu0  ;;  %v3521_v41 = vsel %vm3476_vm5, %v3518_v22, %v3520_v51 }
 0x39a   : > { %11757 = vpow2.f32 %v4347_v24  ;;  %v14670_v57 = vadd.f32 %v14586_v49, %v4240_v45  ;;  %v14673_v4 = vadd.f32 %v3521_v41, %v14315_v19  ;;  %v3394_v60 = vpop.f32.mrb[178].mxu1  ;;  %v14677_v62 = vsel %vm4307_vm9, %v14611_v8, %v8830_v16 }
 0x39b   : > { %v4153_v21 = vsel %vm4136_vm6, %v4150_v61, %v4152_v6  ;;  %v11754_v18 = vpop.eup %11753  ;;  %v3522_v44 = vrot.slane %v3394_v60, 3  ;;  %v9973_v14 = vpop.f32.mrb[179].mxu1  ;;  %10137 = vmatprep.mubr.f32.mxu1 %v14677_v62 }
 0x39c   : > { %v4241_v15 = vadd.f32 %v4153_v21, %v14554_v35  ;;  %v3984_v5 = vpop.f32.mrb[150].mxu0  ;;  %v4349_v22 = vmul.f32 1.442695, %v14670_v57  ;;  %v8831_v19 = vadd.f32 -1.0, %v11754_v18  ;;  %vm4311_vm13 = vcmp.gt.f32.partialorder %v14670_v57, 0.0 }
 0x39d   : > { %v4154_v37 = vrot.slane %v3984_v5, 4  ;;  %v10032_v1 = vpop.f32.mrb[151].mxu0  ;;  %v3523_v10 = vsel %vm3476_vm5, %v3520_v51, %v3522_v44 }
 0x39e   : > { %11759 = vpow2.f32 %v4349_v22  ;;  %v14685_v8 = vadd.f32 %v14586_v49, %v4241_v15  ;;  %v14688_v35 = vadd.f32 %v3523_v10, %v14330_v31  ;;  %v3399_v63 = vpop.f32.mrb[180].mxu1  ;;  %v14692_v54 = vsel %vm4308_vm10, %v14621_v42, %v8831_v19 }
 0x39f   : > { %v4155_v61 = vsel %vm4136_vm6, %v4152_v6, %v4154_v37  ;;  %v11756_v23 = vpop.eup %11755  ;;  %v3524_v32 = vrot.slane %v3399_v63, 3  ;;  %v9976_v58 = vpop.f32.mrb[181].mxu1  ;;  %10138 = vmatmul.mubr.f32.gmra.mrb[200].mxu1 %v14692_v54 }
 0x3a0   : > { %v4242_v17 = vadd.f32 %v4155_v61, %v14558_v12  ;;  %v3989_v20 = vpop.f32.mrb[152].mxu0  ;;  %v4351_v45 = vmul.f32 1.442695, %v14685_v8  ;;  %v8832_v31 = vadd.f32 -1.0, %v11756_v23  ;;  %vm4312_vm14 = vcmp.gt.f32.partialorder %v14685_v8, 0.0 }
 0x3a1   : > { %v4156_v51 = vrot.slane %v3989_v20, 4  ;;  %v10035_v0 = vpop.f32.mrb[153].mxu0  ;;  %v3525_v55 = vsel %vm3476_vm5, %v3522_v44, %v3524_v32 }
 0x3a2   : > { %11761 = vpow2.f32 %v4351_v45  ;;  %v14700_v42 = vadd.f32 %v14586_v49, %v4242_v17  ;;  %v14703_v12 = vadd.f32 %v3525_v55, %v14347_v47  ;;  %v3404_v6 = vpop.f32.mrb[182].mxu1  ;;  %v14707_v53 = vsel %vm4309_vm11, %v14635_v59, %v8832_v31 }
 0x3a3   : > { %v4157_v24 = vsel %vm4136_vm6, %v4154_v37, %v4156_v51  ;;  %v3526_v21 = vrot.slane %v3404_v6, 3  ;;  %v9979_v60 = vpop.f32.mrb[183].mxu1  ;;  %v3994_v18 = vpop.f32.mrb[154].mxu0  ;;  %10140 = vmatprep.mubr.f32.mxu1 %v14707_v53 }
 0x3a4   : > { %v11758_v16 = vpop.eup %11757  ;;  %v4243_v41 = vadd.f32 %v4157_v24, %v14562_v48  ;;  %v4353_v15 = vmul.f32 1.442695, %v14700_v42  ;;  %v4158_v44 = vrot.slane %v3994_v18, 4  ;;  %v10038_v14 = vpop.f32.mrb[155].mxu0  ;;  %vm4313_vm15 = vcmp.gt.f32.partialorder %v14700_v42, 0.0 }
 0x3a5   : > { %v8833_v47 = vadd.f32 -1.0, %v11758_v16  ;;  %v3527_v5 = vsel %vm3476_vm5, %v3524_v32, %v3526_v21 }
 0x3a6   : > { %11763 = vpow2.f32 %v4353_v15  ;;  %v14715_v59 = vadd.f32 %v14586_v49, %v4243_v41  ;;  %v14718_v48 = vadd.f32 %v3527_v5, %v14362_v3  ;;  %v4159_v22 = vsel %vm4136_vm6, %v4156_v51, %v4158_v44  ;;  %v3409_v37 = vpop.f32.mrb[184].mxu1 }
 0x3a7   : > { %v14722_v1 = vsel %vm4310_vm12, %v14655_v28, %v8833_v47  ;;  %v4244_v10 = vadd.f32 %v4159_v22, %v14566_v39  ;;  %v3528_v61 = vrot.slane %v3409_v37, 3  ;;  %v9982_v63 = vpop.f32.mrb[185].mxu1  ;;  %v3999_v23 = vpop.f32.mrb[156].mxu0 }
 0x3a8   : > { %v11760_v19 = vpop.eup %11759  ;;  %10141 = vmatmul.mubr.f32.gmra.mrb[202].mxu1 %v14722_v1  ;;  %v4355_v17 = vmul.f32 1.442695, %v14715_v59  ;;  %v4160_v32 = vrot.slane %v3999_v23, 4  ;;  %v10041_v58 = vpop.f32.mrb[157].mxu0  ;;  %vm4314_vm2 = vcmp.gt.f32.partialorder %v14715_v59, 0.0 }
 0x3a9   : > { %v8834_v3 = vadd.f32 -1.0, %v11760_v19  ;;  %v3529_v20 = vsel %vm3476_vm5, %v3526_v21, %v3528_v61  ;;  %v14730_v28 = vadd.f32 %v14586_v49, %v4244_v10 }
 0x3aa   : > { %11765 = vpow2.f32 %v4355_v17  ;;  %v14733_v39 = vadd.f32 %v3529_v20, %v14377_v26  ;;  %v4161_v45 = vsel %vm4136_vm6, %v4158_v44, %v4160_v32  ;;  %v3414_v51 = vpop.f32.mrb[186].mxu1 }
 0x3ab   : > { %v14737_v0 = vsel %vm4311_vm13, %v14670_v57, %v8834_v3  ;;  %v4245_v55 = vadd.f32 %v4161_v45, %v14570_v46  ;;  %v3530_v24 = vrot.slane %v3414_v51, 3  ;;  %v9985_v6 = vpop.f32.mrb[187].mxu1  ;;  %v4004_v16 = vpop.f32.mrb[158].mxu0  ;;  %v4357_v41 = vmul.f32 1.442695, %v14730_v28 }
 0x3ac   : > { %v11762_v31 = vpop.eup %11761  ;;  %10143 = vmatprep.mubr.f32.mxu1 %v14737_v0  ;;  %v4162_v21 = vrot.slane %v4004_v16, 4  ;;  %v10044_v60 = vpop.f32.mrb[159].mxu0  ;;  %vm4315_vm3 = vcmp.gt.f32.partialorder %v14730_v28, 0.0 }
 0x3ad   : > { %v8835_v26 = vadd.f32 -1.0, %v11762_v31  ;;  %v3531_v18 = vsel %vm3476_vm5, %v3528_v61, %v3530_v24  ;;  %11767 = vpow2.f32 %v4357_v41  ;;  %v14745_v57 = vadd.f32 %v14586_v49, %v4245_v55 }
 0x3ae   : > { %v14748_v46 = vadd.f32 %v3531_v18, %v14392_v29  ;;  %v4163_v15 = vsel %vm4136_vm6, %v4160_v32, %v4162_v21  ;;  %v3419_v44 = vpop.f32.mrb[188].mxu1 }
 0x3af   : > { %v14752_v14 = vsel %vm4312_vm14, %v14685_v8, %v8835_v26  ;;  %v4246_v5 = vadd.f32 %v4163_v15, %v14574_v13  ;;  %v3532_v22 = vrot.slane %v3419_v44, 3  ;;  %v9988_v37 = vpop.f32.mrb[189].mxu1  ;;  %v4009_v19 = vpop.f32.mrb[160].mxu0  ;;  %v4359_v10 = vmul.f32 1.442695, %v14745_v57 }
 0x3b0   : > { %v11764_v47 = vpop.eup %11763  ;;  %10144 = vmatmul.mubr.f32.gmra.mrb[204].mxu1 %v14752_v14  ;;  %v4164_v61 = vrot.slane %v4009_v19, 4  ;;  %v10047_v63 = vpop.f32.mrb[161].mxu0  ;;  %vm4316_vm4 = vcmp.gt.f32.partialorder %v14745_v57, 0.0 }
 0x3b1   : > { %v8836_v29 = vadd.f32 -1.0, %v11764_v47  ;;  %v3533_v23 = vsel %vm3476_vm5, %v3530_v24, %v3532_v22  ;;  %11769 = vpow2.f32 %v4359_v10  ;;  %v14760_v8 = vadd.f32 %v14586_v49, %v4246_v5 }
 0x3b2   : > { %v14763_v13 = vadd.f32 %v3533_v23, %v14409_v36  ;;  %v4165_v17 = vsel %vm4136_vm6, %v4162_v21, %v4164_v61  ;;  %v3424_v32 = vpop.f32.mrb[190].mxu1 }
 0x3b3   : > { %v14767_v58 = vsel %vm4313_vm15, %v14700_v42, %v8836_v29  ;;  %v4247_v20 = vadd.f32 %v4165_v17, %v14578_v52  ;;  %v3534_v45 = vrot.slane %v3424_v32, 3  ;;  %v9991_v51 = vpop.f32.mrb[191].mxu1  ;;  %v4014_v31 = vpop.f32.mrb[162].mxu0  ;;  %v4361_v55 = vmul.f32 1.442695, %v14760_v8 }
 0x3b4   : > { %v11766_v3 = vpop.eup %11765  ;;  %10146 = vmatprep.mubr.f32.mxu1 %v14767_v58  ;;  %v4166_v24 = vrot.slane %v4014_v31, 4  ;;  %v10050_v6 = vpop.f32.mrb[163].mxu0  ;;  %vm4317_vm7 = vcmp.gt.f32.partialorder %v14760_v8, 0.0 }
 0x3b5   : > { %v8837_v36 = vadd.f32 -1.0, %v11766_v3  ;;  %v3535_v16 = vsel %vm3476_vm5, %v3532_v22, %v3534_v45  ;;  %11771 = vpow2.f32 %v4361_v55  ;;  %v14775_v42 = vadd.f32 %v14586_v49, %v4247_v20 }
 0x3b6   : > { %v14778_v52 = vadd.f32 %v3535_v16, %v14424_v38  ;;  %v4167_v41 = vsel %vm4136_vm6, %v4164_v61, %v4166_v24  ;;  %v3429_v21 = vpop.f32.mrb[192].mxu1 }
 0x3b7   : > { %v14782_v60 = vsel %vm4314_vm2, %v14715_v59, %v8837_v36  ;;  %v11768_v26 = vpop.eup %11767  ;;  %v4248_v18 = vadd.f32 %v4167_v41, %v14582_v50  ;;  %v3536_v15 = vrot.slane %v3429_v21, 3  ;;  %v9994_v44 = vpop.f32.mrb[193].mxu1  ;;  %v4363_v5 = vmul.f32 1.442695, %v14775_v42 }
 0x3b8   : > { %v4019_v47 = vpop.f32.mrb[164].mxu0  ;;  %10147 = vmatmul.mubr.f32.gmra.mrb[206].mxu1 %v14782_v60  ;;  %v8838_v38 = vadd.f32 -1.0, %v11768_v26 }
 0x3b9   : > { %v4168_v22 = vrot.slane %v4019_v47, 4  ;;  %v10053_v37 = vpop.f32.mrb[165].mxu0  ;;  %v3537_v19 = vsel %vm3476_vm5, %v3534_v45, %v3536_v15  ;;  %11773 = vpow2.f32 %v4363_v5  ;;  %v14790_v59 = vadd.f32 %v14586_v49, %v4248_v18 }
 0x3ba   : > { %v14793_v50 = vadd.f32 %v3537_v19, %v14439_v25  ;;  %v3434_v61 = vpop.f32.mrb[194].mxu1  ;;  %v14797_v63 = vsel %vm4315_vm3, %v14730_v28, %v8838_v38 }
 0x3bb   : > { %v4169_v10 = vsel %vm4136_vm6, %v4166_v24, %v4168_v22  ;;  %v11770_v29 = vpop.eup %11769  ;;  %v3538_v17 = vrot.slane %v3434_v61, 3  ;;  %v9997_v32 = vpop.f32.mrb[195].mxu1  ;;  %10149 = vmatprep.mubr.f32.mxu1 %v14797_v63  ;;  %v4365_v20 = vmul.f32 1.442695, %v14790_v59  ;;  %vm4319_vm8 = vcmp.gt.f32.partialorder %v14790_v59, 0.0 }
 0x3bc   : > { %v4249_v23 = vadd.f32 %v4169_v10, %v14594_v30  ;;  %v4024_v3 = vpop.f32.mrb[166].mxu0  ;;  %v8839_v25 = vadd.f32 -1.0, %v11770_v29 }
 0x3bd   : > { %v4170_v45 = vrot.slane %v4024_v3, 4  ;;  %v10056_v51 = vpop.f32.mrb[167].mxu0  ;;  %v3539_v31 = vsel %vm3476_vm5, %v3536_v15, %v3538_v17  ;;  %11775 = vpow2.f32 %v4365_v20 }
 0x3be   : > { %v4288_v28 = vadd.f32 %v14586_v49, %v4249_v23  ;;  %v14806_v55 = vadd.f32 %v3539_v31, %v14452_v11  ;;  %v3439_v24 = vpop.f32.mrb[196].mxu1  ;;  %v14810_v6 = vsel %vm4316_vm4, %v14745_v57, %v8839_v25 }
 0x3bf   : > { %v4171_v30 = vsel %vm4136_vm6, %v4168_v22, %v4170_v45  ;;  %v11772_v36 = vpop.eup %11771  ;;  %v3540_v41 = vrot.slane %v3439_v24, 3  ;;  %v10000_v21 = vpop.f32.mrb[197].mxu1  ;;  %10150 = vmatmul.mubr.f32.gmra.mrb[208].mxu1 %v14810_v6 }
 0x3c0   : > { %v4250_v16 = vadd.f32 %v4171_v30, %v14604_v33  ;;  %v4029_v26 = vpop.f32.mrb[168].mxu0  ;;  %v4367_v18 = vmul.f32 1.442695, %v4288_v28  ;;  %v8840_v47 = vadd.f32 -1.0, %v11772_v36  ;;  %vm4320_vm9 = vcmp.gt.f32.partialorder %v4288_v28, 0.0 }
 0x3c1   : > { %v4172_v15 = vrot.slane %v4029_v26, 4  ;;  %v10059_v44 = vpop.f32.mrb[169].mxu0  ;;  %v3541_v11 = vsel %vm3476_vm5, %v3538_v17, %v3540_v41  ;;  %vm4318_vm5 = vcmp.gt.f32.partialorder %v14775_v42, 0.0 }
 0x3c2   : > { %11777 = vpow2.f32 %v4367_v18  ;;  %v4289_v57 = vadd.f32 %v14586_v49, %v4250_v16  ;;  %v14818_v5 = vadd.f32 %v3541_v11, %v14462_v7  ;;  %v14822_v22 = vsel %vm4317_vm7, %v14760_v8, %v8840_v47 }
 0x3c3   : > { %v4173_v33 = vsel %vm4136_vm6, %v4170_v45, %v4172_v15  ;;  %v11774_v37 = vpop.eup %11773  ;;  %v4034_v19 = vpop.f32.mrb[170].mxu0  ;;  %10152 = vmatprep.mubr.f32.mxu1 %v14822_v22 }
 0x3c4   : > { %v4251_v38 = vadd.f32 %v4173_v33, %v14614_v34  ;;  %v4369_v10 = vmul.f32 1.442695, %v4289_v57  ;;  %v4174_v61 = vrot.slane %v4034_v19, 4  ;;  %v10062_v29 = vpop.f32.mrb[171].mxu0  ;;  %v8841_v23 = vadd.f32 -1.0, %v11774_v37 }
 0x3c5   : > { %vm4321_vm10 = vcmp.gt.f32.partialorder %v4289_v57, 0.0 }
 0x3c6   : > { %11779 = vpow2.f32 %v4369_v10  ;;  %v4290_v7 = vadd.f32 %v14586_v49, %v4251_v38  ;;  %v4175_v17 = vsel %vm4136_vm6, %v4172_v15, %v4174_v61  ;;  %v14830_v8 = vsel %vm4318_vm5, %v14775_v42, %v8841_v23 }
 0x3c7   : > { %v11776_v32 = vpop.eup %11775  ;;  %v4252_v34 = vadd.f32 %v4175_v17, %v14624_v2  ;;  %v4039_v3 = vpop.f32.mrb[172].mxu0  ;;  %10153 = vmatmul.mubr.f32.gmra.mrb[210].mxu1 %v14830_v8 }
 0x3c8   : > { %v4371_v20 = vmul.f32 1.442695, %v4290_v7  ;;  %v4176_v45 = vrot.slane %v4039_v3, 4  ;;  %v10065_v51 = vpop.f32.mrb[173].mxu0  ;;  %v8842_v25 = vadd.f32 -1.0, %v11776_v32  ;;  %vm4322_vm11 = vcmp.gt.f32.partialorder %v4290_v7, 0.0 }
 0x3c9   : > { %v4291_v31 = vadd.f32 %v14586_v49, %v4252_v34 }
 0x3ca   : > { %11781 = vpow2.f32 %v4371_v20  ;;  %v4177_v30 = vsel %vm4136_vm6, %v4174_v61, %v4176_v45  ;;  %v14838_v42 = vsel %vm4319_vm8, %v14790_v59, %v8842_v25 }
 0x3cb   : > { %v4253_v2 = vadd.f32 %v4177_v30, %v14639_v43  ;;  %v4044_v36 = vpop.f32.mrb[174].mxu0  ;;  %10155 = vmatprep.mubr.f32.mxu1 %v14838_v42  ;;  %v4373_v16 = vmul.f32 1.442695, %v4291_v31  ;;  %vm4323_vm12 = vcmp.gt.f32.partialorder %v4291_v31, 0.0 }
 0x3cc   : > { %v11778_v24 = vpop.eup %11777  ;;  %v4178_v41 = vrot.slane %v4044_v36, 4  ;;  %v10068_v21 = vpop.f32.mrb[175].mxu0 }
 0x3cd   : > { %v8843_v26 = vadd.f32 -1.0, %v11778_v24  ;;  %11783 = vpow2.f32 %v4373_v16  ;;  %v4292_v18 = vadd.f32 %v14586_v49, %v4253_v2 }
 0x3ce   : > { %v4179_v15 = vsel %vm4136_vm6, %v4176_v45, %v4178_v41 }
 0x3cf   : > { %v14844_v44 = vsel %vm4320_vm9, %v4288_v28, %v8843_v26  ;;  %v4254_v47 = vadd.f32 %v4179_v15, %v14658_v9  ;;  %v4049_v11 = vpop.f32.mrb[176].mxu0  ;;  %v4375_v43 = vmul.f32 1.442695, %v4292_v18  ;;  %vm4324_vm13 = vcmp.gt.f32.partialorder %v4292_v18, 0.0 }
 0x3d0   : > { %v11780_v59 = vpop.eup %11779  ;;  %10156 = vmatmul.mubr.f32.gmra.mrb[212].mxu1 %v14844_v44  ;;  %v4180_v33 = vrot.slane %v4049_v11, 4  ;;  %v10071_v37 = vpop.f32.mrb[177].mxu0 }
 0x3d1   : > { %v8844_v38 = vadd.f32 -1.0, %v11780_v59  ;;  %11785 = vpow2.f32 %v4375_v43  ;;  %v4293_v19 = vadd.f32 %v14586_v49, %v4254_v47 }
 0x3d2   : > { %v4181_v10 = vsel %vm4136_vm6, %v4178_v41, %v4180_v33 }
 0x3d3   : > { %v14850_v61 = vsel %vm4321_vm10, %v4289_v57, %v8844_v38  ;;  %v4255_v29 = vadd.f32 %v4181_v10, %v14673_v4  ;;  %v4054_v23 = vpop.f32.mrb[178].mxu0  ;;  %v4377_v9 = vmul.f32 1.442695, %v4293_v19  ;;  %vm4325_vm14 = vcmp.gt.f32.partialorder %v4293_v19, 0.0 }
 0x3d4   : > { %v11782_v28 = vpop.eup %11781  ;;  %10158 = vmatprep.mubr.f32.mxu1 %v14850_v61  ;;  %v4182_v17 = vrot.slane %v4054_v23, 4  ;;  %v10074_v32 = vpop.f32.mrb[179].mxu0 }
 0x3d5   : > { %v8845_v34 = vadd.f32 -1.0, %v11782_v28  ;;  %11787 = vpow2.f32 %v4377_v9  ;;  %v4294_v3 = vadd.f32 %v14586_v49, %v4255_v29 }
 0x3d6   : > { %v4183_v20 = vsel %vm4136_vm6, %v4180_v33, %v4182_v17 }
 0x3d7   : > { %v14856_v45 = vsel %vm4322_vm11, %v4290_v7, %v8845_v34  ;;  %v11784_v57 = vpop.eup %11783  ;;  %v4256_v51 = vadd.f32 %v4183_v20, %v14688_v35  ;;  %v4059_v25 = vpop.f32.mrb[180].mxu0  ;;  %v4379_v4 = vmul.f32 1.442695, %v4294_v3  ;;  %vm4326_vm15 = vcmp.gt.f32.partialorder %v4294_v3, 0.0 }
 0x3d8   : > { %10159 = vmatmul.mubr.f32.gmra.mrb[214].mxu1 %v14856_v45  ;;  %v4184_v30 = vrot.slane %v4059_v25, 4  ;;  %v10077_v24 = vpop.f32.mrb[181].mxu0  ;;  %v8846_v2 = vadd.f32 -1.0, %v11784_v57 }
 0x3d9   : > { %11789 = vpow2.f32 %v4379_v4  ;;  %v4295_v36 = vadd.f32 %v14586_v49, %v4256_v51 }
 0x3da   : > { %v4185_v16 = vsel %vm4136_vm6, %v4182_v17, %v4184_v30  ;;  %v14862_v41 = vsel %vm4323_vm12, %v4291_v31, %v8846_v2 }
 0x3db   : > { %v11786_v7 = vpop.eup %11785  ;;  %v4257_v21 = vadd.f32 %v4185_v16, %v14703_v12  ;;  %v4064_v26 = vpop.f32.mrb[182].mxu0  ;;  %10161 = vmatprep.mubr.f32.mxu1 %v14862_v41  ;;  %v4381_v35 = vmul.f32 1.442695, %v4295_v36  ;;  %vm4327_vm2 = vcmp.gt.f32.partialorder %v4295_v36, 0.0 }
 0x3dc   : > { %v4186_v15 = vrot.slane %v4064_v26, 4  ;;  %v10080_v59 = vpop.f32.mrb[183].mxu0  ;;  %v8847_v47 = vadd.f32 -1.0, %v11786_v7 }
 0x3dd   : > { %11791 = vpow2.f32 %v4381_v35  ;;  %v4296_v11 = vadd.f32 %v14586_v49, %v4257_v21  ;;  %v8867_v35 = vld [vmem:[%s12078_s25 + $0x70] sm:$0xff] }
 0x3de   : > { %v4187_v43 = vsel %vm4136_vm6, %v4184_v30, %v4186_v15  ;;  %v14868_v33 = vsel %vm4324_vm13, %v4292_v18, %v8847_v47  ;;  %vm4729_vm13 = vcmask 523264  }
 0x3df   : > { %v11788_v31 = vpop.eup %11787  ;;  %v4258_v37 = vadd.f32 %v4187_v43, %v14718_v48  ;;  %v4069_v38 = vpop.f32.mrb[184].mxu0  ;;  %10162 = vmatmul.mubr.f32.gmra.mrb[216].mxu1 %v14868_v33  ;;  %v4383_v12 = vmul.f32 1.442695, %v4296_v11  ;;  %vm4328_vm3 = vcmp.gt.f32.partialorder %v4296_v11, 0.0 }
 0x3e0   : > { %v4188_v10 = vrot.slane %v4069_v38, 4  ;;  %v10083_v28 = vpop.f32.mrb[185].mxu0  ;;  %v8848_v29 = vadd.f32 -1.0, %v11788_v31 }
 0x3e1   : > { %11793 = vpow2.f32 %v4383_v12  ;;  %v4297_v23 = vadd.f32 %v14586_v49, %v4258_v37 }
 0x3e2   : > { %v4189_v9 = vsel %vm4136_vm6, %v4186_v15, %v4188_v10  ;;  %v14874_v17 = vsel %vm4325_vm14, %v4293_v19, %v8848_v29  ;;  %v8868_v15 = vld [vmem:[%s12078_s25 + $0x78] sm:$0xff]  ;;  %vm6565_vm14 = vcmask 1041409  }
 0x3e3   : > { %v11790_v18 = vpop.eup %11789  ;;  %v4259_v32 = vadd.f32 %v4189_v9, %v14733_v39  ;;  %v4074_v34 = vpop.f32.mrb[186].mxu0  ;;  %10164 = vmatprep.mubr.f32.mxu1 %v14874_v17  ;;  %v4385_v48 = vmul.f32 1.442695, %v4297_v23  ;;  %v11023_v47 = vpack.c.bf16 %v8868_v15, %v8867_v35  ;;  %vm4329_vm4 = vcmp.gt.f32.partialorder %v4297_v23, 0.0 }
 0x3e4   : > { %v4190_v20 = vrot.slane %v4074_v34, 4  ;;  %v10086_v57 = vpop.f32.mrb[187].mxu0  ;;  %v8849_v51 = vadd.f32 -1.0, %v11790_v18 }
 0x3e5   : > { %11795 = vpow2.f32 %v4385_v48  ;;  %v4298_v25 = vadd.f32 %v14586_v49, %v4259_v32  ;;  %11024 = vmatprep.subr.bf16.mxu0 %v11023_v47 }
 0x3e6   : > { %v4191_v4 = vsel %vm4136_vm6, %v4188_v10, %v4190_v20  ;;  %v14880_v19 = vsel %vm4326_vm15, %v4294_v3, %v8849_v51  ;;  %11026 = vmatpush3.bf16.msra.mxu0 %v11023_v47  ;;  %vm6567_vm15 = vcmask 1042434  }
 0x3e7   : > { %v11792_v30 = vpop.eup %11791  ;;  %v4260_v39 = vadd.f32 %v4191_v4, %v14748_v46  ;;  %v4079_v24 = vpop.f32.mrb[188].mxu0  ;;  %10165 = vmatmul.mubr.f32.gmra.mrb[218].mxu1 %v14880_v19  ;;  %v4387_v2 = vmul.f32 1.442695, %v4298_v25  ;;  %vm4330_vm7 = vcmp.gt.f32.partialorder %v4298_v25, 0.0 }
 0x3e8   : > { %v4192_v16 = vrot.slane %v4079_v24, 4  ;;  %v10089_v7 = vpop.f32.mrb[189].mxu0  ;;  %v8850_v21 = vadd.f32 -1.0, %v11792_v30 }
 0x3e9   : > { %11797 = vpow2.f32 %v4387_v2  ;;  %v4299_v26 = vadd.f32 %v14586_v49, %v4260_v39 }
 0x3ea   : > { %v4193_v59 = vsel %vm4136_vm6, %v4190_v20, %v4192_v16  ;;  %v14888_v3 = vsel %vm4327_vm2, %v4295_v36, %v8850_v21  ;;  %vm6569_vm2 = vcmask 1043459  }
 0x3eb   : > { %v11794_v43 = vpop.eup %11793  ;;  %v4261_v46 = vadd.f32 %v4193_v59, %v14763_v13  ;;  %v4084_v31 = vpop.f32.mrb[190].mxu0  ;;  %10167 = vmatprep.mubr.f32.mxu1 %v14888_v3  ;;  %v4389_v37 = vmul.f32 1.442695, %v4299_v26  ;;  %vm4331_vm5 = vcmp.gt.f32.partialorder %v4299_v26, 0.0 }
 0x3ec   : > { %v4194_v38 = vrot.slane %v4084_v31, 4  ;;  %v10092_v12 = vpop.f32.mrb[191].mxu0  ;;  %v8851_v10 = vadd.f32 -1.0, %v11794_v43 }
 0x3ed   : > { %11799 = vpow2.f32 %v4389_v37  ;;  %v4300_v28 = vadd.f32 %v14586_v49, %v4261_v46 }
 0x3ee   : > { %v4195_v36 = vsel %vm4136_vm6, %v4192_v16, %v4194_v38  ;;  %v14894_v29 = vsel %vm4328_vm3, %v4296_v11, %v8851_v10  ;;  %vm6571_vm3 = vcmask 1044484  }
 0x3ef   : > { %v11796_v9 = vpop.eup %11795  ;;  %v4262_v13 = vadd.f32 %v4195_v36, %v14778_v52  ;;  %v4089_v18 = vpop.f32.mrb[192].mxu0  ;;  %10168 = vmatmul.mubr.f32.gmra.mrb[220].mxu1 %v14894_v29  ;;  %v4391_v32 = vmul.f32 1.442695, %v4300_v28  ;;  %vm4332_vm8 = vcmp.gt.f32.partialorder %v4300_v28, 0.0 }
 0x3f0   : > { %v4196_v34 = vrot.slane %v4089_v18, 4  ;;  %v10095_v48 = vpop.f32.mrb[193].mxu0  ;;  %v8852_v20 = vadd.f32 -1.0, %v11796_v9 }
 0x3f1   : > { %11801 = vpow2.f32 %v4391_v32  ;;  %v4301_v57 = vadd.f32 %v14586_v49, %v4262_v13 }
 0x3f2   : > { %v4197_v51 = vsel %vm4136_vm6, %v4194_v38, %v4196_v34  ;;  %v14900_v4 = vsel %vm4329_vm4, %v4297_v23, %v8852_v20  ;;  %vm6573_vm4 = vcmask 1045509  }
 0x3f3   : > { %16840 = vst [vmem:[#allocation25_spill] sm:$0xff] %v14900_v4  ;;  %v11798_v11 = vpop.eup %11797  ;;  %v4263_v30 = vadd.f32 %v4197_v51, %v14793_v50  ;;  %v4094_v39 = vpop.f32.mrb[194].mxu0  ;;  %10170 = vmatprep.mubr.f32.mxu1 %v14900_v4  ;;  %v4393_v52 = vmul.f32 1.442695, %v4301_v57  ;;  %vm4333_vm9 = vcmp.gt.f32.partialorder %v4301_v57, 0.0 }
 0x3f4   : > { %v4198_v24 = vrot.slane %v4094_v39, 4  ;;  %v10098_v2 = vpop.f32.mrb[195].mxu0  ;;  %v8853_v16 = vadd.f32 -1.0, %v11798_v11  ;;  %v5052_v39 = vld [vmem:[%s12078_s25 + $0x8] sm:$0xff] }
 0x3f5   : > { %11803 = vpow2.f32 %v4393_v52  ;;  %v4302_v7 = vadd.f32 %v14586_v49, %v4263_v30  ;;  %v5051_v30 = vld [vmem:[%s12078_s25] sm:$0xff]  ;;  %v8927_v2 = vld [vmem:[%s12078_s25 + $0x88] sm:$0xff] }
 0x3f6   : > { %v4199_v21 = vsel %vm4136_vm6, %v4196_v34, %v4198_v24  ;;  %v14906_v35 = vsel %vm4330_vm7, %v4298_v25, %v8853_v16  ;;  %v11027_v52 = vpack.c.bf16 %v5052_v39, %v5051_v30  ;;  %vm6575_vm7 = vcmask 1046534  }
 0x3f7   : > { %16841 = vst [vmem:[#allocation26_spill] sm:$0xff] %v14906_v35  ;;  %v11800_v23 = vpop.eup %11799  ;;  %v4264_v15 = vadd.f32 %v4199_v21, %v14806_v55  ;;  %v4099_v59 = vpop.f32.mrb[196].mxu0  ;;  %10171 = vmatmul.mubr.f32.gmra.mrb[222].mxu1 %v14906_v35  ;;  %v4395_v50 = vmul.f32 1.442695, %v4302_v7  ;;  %vm4334_vm10 = vcmp.gt.f32.partialorder %v4302_v7, 0.0  ;;  %v8929_v21 = vld [vmem:[%s12078_s25 + $0x98] sm:$0xff] }
 0x3f8   : > { %v4200_v47 = vrot.slane %v4099_v59, 4  ;;  %v10101_v43 = vpop.f32.mrb[197].mxu0  ;;  %v8854_v46 = vadd.f32 -1.0, %v11800_v23  ;;  %11028 = vmatprep.subr.bf16.mxu0 %v11027_v52  ;;  %v8931_v59 = vld [vmem:[%s12078_s25 + $0xa8] sm:$0xff] }
 0x3f9   : > { %11805 = vpow2.f32 %v4395_v50  ;;  %v4303_v31 = vadd.f32 %v14586_v49, %v4264_v15  ;;  %v8930_v15 = vld [vmem:[%s12078_s25 + $0xa0] sm:$0xff]  ;;  %v8933_v43 = vld [vmem:[%s12078_s25 + $0xb8] sm:$0xff] }
 0x3fa   : > { %v4201_v37 = vsel %vm4136_vm6, %v4198_v24, %v4200_v47  ;;  %v14912_v38 = vsel %vm4331_vm5, %v4299_v26, %v8854_v46  ;;  %v8926_v24 = vld [vmem:[%s12078_s25 + $0x80] sm:$0xff]  ;;  %v14948_v50 = vpack.c.bf16 %v8931_v59, %v8930_v15  ;;  %v8932_v47 = vld [vmem:[%s12078_s25 + $0xb0] sm:$0xff]  ;;  %vm6577_vm5 = vcmask 1047559  }
 0x3fb   : > { %16842 = vst [vmem:[#allocation32_spill] sm:$0xff] %v14912_v38  ;;  %v11802_v25 = vpop.eup %11801  ;;  %v4265_v12 = vadd.f32 %v4201_v37, %v14818_v5  ;;  %10173 = vmatprep.mubr.f32.mxu1 %v14912_v38  ;;  %v4397_v55 = vmul.f32 1.442695, %v4303_v31  ;;  %vm4335_vm11 = vcmp.gt.f32.partialorder %v4303_v31, 0.0  ;;  %v14936_v16 = vpack.c.bf16 %v8927_v2, %v8926_v24 }
 0x3fc   : > { %v8855_v10 = vadd.f32 -1.0, %v11802_v25  ;;  %v14954_v46 = vpack.c.bf16 %v8933_v43, %v8932_v47  ;;  %v5053_v25 = vld [vmem:[%s12078_s25 + $0x10] sm:$0xff] }
 0x3fd   : > { %11807 = vpow2.f32 %v4397_v55  ;;  %v4304_v36 = vadd.f32 %v14586_v49, %v4265_v12  ;;  %11307 = vmatprep.subr.bf16.mxu1 %v14936_v16  ;;  %v5054_v12 = vld [vmem:[%s12078_s25 + $0x18] sm:$0xff] }
 0x3fe   : > { %v14917_v9 = vsel %vm4332_vm8, %v4300_v28, %v8855_v10  ;;  %11311 = vmatpush3.bf16.msra.mxu1 %v14936_v16 }
 0x3ff   : > { %16843 = vst [vmem:[#allocation27_spill] sm:$0xff] %v14917_v9  ;;  %v11804_v13 = vpop.eup %11803  ;;  %10174 = vmatmul.mubr.f32.gmra.mrb[224].mxu1 %v14917_v9  ;;  %v4399_v18 = vmul.f32 1.442695, %v4304_v36  ;;  %vm4336_vm12 = vcmp.gt.f32.partialorder %v4304_v36, 0.0 }
 0x400   : > { %v8856_v32 = vadd.f32 -1.0, %v11804_v13  ;;  %v11031_v13 = vpack.c.bf16 %v5054_v12, %v5053_v25 }
 0x401   : > { %11809 = vpow2.f32 %v4399_v18  ;;  %v5055_v18 = vld [vmem:[%s12078_s25 + $0x20] sm:$0xff] }
 0x402   : > { %v14920_v26 = vsel %vm4333_vm9, %v4301_v57, %v8856_v32  ;;  %v5056_v32 = vld [vmem:[%s12078_s25 + $0x28] sm:$0xff] }
 0x403   : > { %16844 = vst [vmem:[#allocation28_spill] sm:$0xff] %v14920_v26  ;;  %v11806_v5 = vpop.eup %11805  ;;  %10176 = vmatprep.mubr.f32.mxu1 %v14920_v26 }
 0x404   : > { %v8857_v34 = vadd.f32 -1.0, %v11806_v5  ;;  %v11035_v5 = vpack.c.bf16 %v5056_v32, %v5055_v18 }
 0x406   : > { %v14923_v48 = vsel %vm4334_vm10, %v4302_v7, %v8857_v34  ;;  %v8928_v7 = vld [vmem:[%s12078_s25 + $0x90] sm:$0xff] }
 0x407   : > { %16845 = vst [vmem:[#allocation29_spill] sm:$0xff] %v14923_v48  ;;  %v11808_v49 = vpop.eup %11807  ;;  %10177 = vmatmul.mubr.f32.gmra.mrb[226].mxu1 %v14923_v48  ;;  %v14942_v23 = vpack.c.bf16 %v8929_v21, %v8928_v7 }
 0x408   : > { %v8858_v28 = vadd.f32 -1.0, %v11808_v49  ;;  %v5057_v49 = vld [vmem:[%s12078_s25 + $0x30] sm:$0xff] }
 0x409   : > { %11308 = vmatprep.subr.bf16.mxu1 %v14942_v23 }
 0x40a   : > { %v14926_v20 = vsel %vm4335_vm11, %v4303_v31, %v8858_v28  ;;  %11312 = vmatpush3.bf16.msra.mxu1 %v14942_v23  ;;  %v14959_v31 = vld [vmem:[%s12073_s21] ss:$0 sm:$0xff]  ;;  %v5058_v28 = vld [vmem:[%s12078_s25 + $0x38] sm:$0xff] }
 0x40b   : > { %16846 = vst [vmem:[#allocation30_spill] sm:$0xff] %v14926_v20  ;;  %v11810_v57 = vpop.eup %11809  ;;  %10179 = vmatprep.mubr.f32.mxu1 %v14926_v20  ;;  %11309 = vmatprep.subr.bf16.mxu1 %v14948_v50  ;;  %v11039_v39 = vpack.c.bf16 %v5058_v28, %v5057_v49 }
 0x40c   : > { %v8859_v51 = vadd.f32 -1.0, %v11810_v57 }
 0x40e   : > { %v14929_v11 = vsel %vm4336_vm12, %v4304_v36, %v8859_v51  ;;  %11313 = vmatpush3.bf16.msra.mxu1 %v14948_v50 }
 0x40f   : > { %16847 = vst [vmem:[#allocation31_spill] sm:$0xff] %v14929_v11  ;;  %10180 = vmatmul.mubr.f32.gmra.mrb[228].mxu1 %v14929_v11  ;;  %11310 = vmatprep.subr.bf16.mxu1 %v14954_v46 }
 0x412   : > { %11314 = vmatpush3.bf16.msra.mxu1 %v14954_v46 }
 0x46a   : > { %v10136_v37 = vpop.f32.mrb[198].mxu1 }
 0x46b   : > { %v4554_v55 = vpop.f32.mrb[199].mxu1  ;;  %v14967_v36 = vadd.f32 %v10136_v37, %v14959_v31 }
 0x46c   : > { %v14964_v10 = vadd.f32 %v14959_v31, %v4554_v55 }
 0x46e   : > { %10198 = vmatprep.mubr.msk.f32.mxu0 %vm4729_vm13, %v14964_v10 }
 0x46f   : > { %10199 = vmatmul.mubr.msk.f32.vlgmr.msra.gmra.mrb[198].mxu0 %vm4729_vm13, %v14967_v36 }
 0x470   : > { %11030 = vmatpush3.bf16.msra.mxu0 %v11027_v52 }
 0x471   : > { %11032 = vmatprep.subr.bf16.mxu0 %v11031_v13 }
 0x472   : > { %v10139_v34 = vpop.f32.mrb[200].mxu1 }
 0x473   : > { %v4564_v57 = vpop.f32.mrb[201].mxu1  ;;  %v14981_v30 = vadd.f32 %v10139_v34, %v14959_v31 }
 0x474   : > { %v14978_v51 = vadd.f32 %v14959_v31, %v4564_v57  ;;  %11034 = vmatpush3.bf16.msra.mxu0 %v11031_v13 }
 0x475   : > { %11036 = vmatprep.subr.bf16.mxu0 %v11035_v5 }
 0x476   : > { %10201 = vmatprep.mubr.msk.f32.mxu0 %vm4729_vm13, %v14978_v51 }
 0x477   : > { %10202 = vmatmul.mubr.msk.f32.gmra.mrb[200].mxu0 %vm4729_vm13, %v14981_v30 }
 0x478   : > { %11038 = vmatpush3.bf16.msra.mxu0 %v11035_v5 }
 0x479   : > { %11040 = vmatprep.subr.bf16.mxu0 %v11039_v39 }
 0x47b   : > { %v10142_v52 = vpop.f32.mrb[202].mxu1 }
 0x47c   : > { %v4574_v24 = vpop.f32.mrb[203].mxu1  ;;  %11042 = vmatpush3.bf16.msra.mxu0 %v11039_v39  ;;  %v14991_v7 = vadd.f32 %v10142_v52, %v14959_v31 }
 0x47d   : > { %v14988_v2 = vadd.f32 %v14959_v31, %v4574_v24  ;;  %11044 = vmatprep.subr.bf16.mxu0 %v14936_v16 }
 0x47f   : > { %10204 = vmatprep.mubr.msk.f32.mxu0 %vm4729_vm13, %v14988_v2 }
 0x480   : > { %10205 = vmatmul.mubr.msk.f32.gmra.mrb[202].mxu0 %vm4729_vm13, %v14991_v7 }
 0x483   : > { %v10145_v21 = vpop.f32.mrb[204].mxu1 }
 0x484   : > { %v4584_v15 = vpop.f32.mrb[205].mxu1  ;;  %v15002_v47 = vadd.f32 %v10145_v21, %v14959_v31 }
 0x485   : > { %v14999_v59 = vadd.f32 %v14959_v31, %v4584_v15 }
 0x487   : > { %10207 = vmatprep.mubr.msk.f32.mxu0 %vm4729_vm13, %v14999_v59 }
 0x488   : > { %10208 = vmatmul.mubr.msk.f32.gmra.mrb[204].mxu0 %vm4729_vm13, %v15002_v47 }
 0x48b   : > { %v10148_v43 = vpop.f32.mrb[206].mxu1 }
 0x48c   : > { %v4594_v37 = vpop.f32.mrb[207].mxu1  ;;  %v15012_v12 = vadd.f32 %v10148_v43, %v14959_v31 }
 0x48d   : > { %v15009_v25 = vadd.f32 %v14959_v31, %v4594_v37 }
 0x48f   : > { %10210 = vmatprep.mubr.msk.f32.mxu0 %vm4729_vm13, %v15009_v25 }
 0x490   : > { %10211 = vmatmul.mubr.msk.f32.gmra.mrb[206].mxu0 %vm4729_vm13, %v15012_v12 }
 0x492   : > { %v10151_v55 = vpop.f32.mrb[208].mxu1 }
 0x493   : > { %v4604_v13 = vpop.f32.mrb[209].mxu1  ;;  %v15022_v32 = vadd.f32 %v10151_v55, %v14959_v31 }
 0x494   : > { %v15019_v18 = vadd.f32 %v14959_v31, %v4604_v13 }
 0x496   : > { %10213 = vmatprep.mubr.msk.f32.mxu0 %vm4729_vm13, %v15019_v18 }
 0x497   : > { %10214 = vmatmul.mubr.msk.f32.gmra.mrb[208].mxu0 %vm4729_vm13, %v15022_v32 }
 0x49a   : > { %v10154_v5 = vpop.f32.mrb[210].mxu1 }
 0x49b   : > { %v4614_v34 = vpop.f32.mrb[211].mxu1  ;;  %v15032_v28 = vadd.f32 %v10154_v5, %v14959_v31 }
 0x49c   : > { %v15029_v49 = vadd.f32 %v14959_v31, %v4614_v34 }
 0x49e   : > { %10216 = vmatprep.mubr.msk.f32.mxu0 %vm4729_vm13, %v15029_v49 }
 0x49f   : > { %10217 = vmatmul.mubr.msk.f32.gmra.mrb[210].mxu0 %vm4729_vm13, %v15032_v28 }
 0x4a3   : > { %v10157_v57 = vpop.f32.mrb[212].mxu1 }
 0x4a4   : > { %v4624_v39 = vpop.f32.mrb[213].mxu1  ;;  %v15042_v24 = vadd.f32 %v10157_v57, %v14959_v31 }
 0x4a5   : > { %v15039_v52 = vadd.f32 %v14959_v31, %v4624_v39 }
 0x4a7   : > { %10219 = vmatprep.mubr.msk.f32.mxu0 %vm4729_vm13, %v15039_v52 }
 0x4a8   : > { %10220 = vmatmul.mubr.msk.f32.gmra.mrb[212].mxu0 %vm4729_vm13, %v15042_v24 }
 0x4ab   : > { %v10160_v21 = vpop.f32.mrb[214].mxu1 }
 0x4ac   : > { %v4634_v15 = vpop.f32.mrb[215].mxu1  ;;  %v15052_v37 = vadd.f32 %v10160_v21, %v14959_v31 }
 0x4ad   : > { %v15049_v43 = vadd.f32 %v14959_v31, %v4634_v15 }
 0x4af   : > { %10222 = vmatprep.mubr.msk.f32.mxu0 %vm4729_vm13, %v15049_v43 }
 0x4b0   : > { %10223 = vmatmul.mubr.msk.f32.gmra.mrb[214].mxu0 %vm4729_vm13, %v15052_v37 }
 0x4b2   : > { %v10163_v55 = vpop.f32.mrb[216].mxu1 }
 0x4b3   : > { %v4644_v13 = vpop.f32.mrb[217].mxu1  ;;  %v15062_v34 = vadd.f32 %v10163_v55, %v14959_v31 }
 0x4b4   : > { %v15059_v5 = vadd.f32 %v14959_v31, %v4644_v13 }
 0x4b6   : > { %10225 = vmatprep.mubr.msk.f32.mxu0 %vm4729_vm13, %v15059_v5 }
 0x4b7   : > { %10226 = vmatmul.mubr.msk.f32.gmra.mrb[216].mxu0 %vm4729_vm13, %v15062_v34 }
 0x4ba   : > { %v10166_v57 = vpop.f32.mrb[218].mxu1 }
 0x4bb   : > { %v4654_v39 = vpop.f32.mrb[219].mxu1  ;;  %v15072_v15 = vadd.f32 %v10166_v57, %v14959_v31 }
 0x4bc   : > { %v15069_v21 = vadd.f32 %v14959_v31, %v4654_v39 }
 0x4be   : > { %10228 = vmatprep.mubr.msk.f32.mxu0 %vm4729_vm13, %v15069_v21 }
 0x4bf   : > { %10229 = vmatmul.mubr.msk.f32.gmra.mrb[218].mxu0 %vm4729_vm13, %v15072_v15 }
 0x4c2   : > { %v10169_v55 = vpop.f32.mrb[220].mxu1 }
 0x4c3   : > { %v4664_v13 = vpop.f32.mrb[221].mxu1  ;;  %v15082_v20 = vadd.f32 %v10169_v55, %v14959_v31 }
 0x4c4   : > { %v15079_v40 = vadd.f32 %v14959_v31, %v4664_v13 }
 0x4c6   : > { %10231 = vmatprep.mubr.msk.f32.mxu0 %vm4729_vm13, %v15079_v40 }
 0x4c7   : > { %10232 = vmatmul.mubr.msk.f32.gmra.mrb[220].mxu0 %vm4729_vm13, %v15082_v20 }
 0x4ca   : > { %v10172_v57 = vpop.f32.mrb[222].mxu1 }
 0x4cb   : > { %v4674_v39 = vpop.f32.mrb[223].mxu1  ;;  %v4680_v26 = vadd.f32 %v10172_v57, %v14959_v31 }
 0x4cc   : > { %v4675_v11 = vadd.f32 %v14959_v31, %v4674_v39 }
 0x4ce   : > { %10234 = vmatprep.mubr.msk.f32.mxu0 %vm4729_vm13, %v4675_v11  ;;  %10338 = vmatprep.mubr.msk.f32.mxu1 %vm4729_vm13, %v4675_v11 }
 0x4cf   : > { %10235 = vmatmul.mubr.msk.f32.gmra.mrb[222].mxu0 %vm4729_vm13, %v4680_v26  ;;  %10339 = vmatmul.mubr.msk.f32.vlgmr.msra.gmra.mrb[230].mxu1 %vm4729_vm13, %v4680_v26 }
 0x4d2   : > { %v10175_v55 = vpop.f32.mrb[224].mxu1 }
 0x4d3   : > { %v4684_v13 = vpop.f32.mrb[225].mxu1  ;;  %v4690_v38 = vadd.f32 %v10175_v55, %v14959_v31 }
 0x4d4   : > { %v4685_v48 = vadd.f32 %v14959_v31, %v4684_v13 }
 0x4d6   : > { %10237 = vmatprep.mubr.msk.f32.mxu0 %vm4729_vm13, %v4685_v48  ;;  %10341 = vmatprep.mubr.msk.f32.mxu1 %vm4729_vm13, %v4685_v48 }
 0x4d7   : > { %10238 = vmatmul.mubr.msk.f32.gmra.mrb[224].mxu0 %vm4729_vm13, %v4690_v38  ;;  %10342 = vmatmul.mubr.msk.f32.gmra.mrb[232].mxu1 %vm4729_vm13, %v4690_v38 }
 0x4da   : > { %v10178_v57 = vpop.f32.mrb[226].mxu1 }
 0x4db   : > { %v4694_v11 = vpop.f32.mrb[227].mxu1  ;;  %v4700_v26 = vadd.f32 %v10178_v57, %v14959_v31 }
 0x4dc   : > { %v4695_v39 = vadd.f32 %v14959_v31, %v4694_v11 }
 0x4de   : > { %10240 = vmatprep.mubr.msk.f32.mxu0 %vm4729_vm13, %v4695_v39  ;;  %10344 = vmatprep.mubr.msk.f32.mxu1 %vm4729_vm13, %v4695_v39 }
 0x4df   : > { %10241 = vmatmul.mubr.msk.f32.gmra.mrb[226].mxu0 %vm4729_vm13, %v4700_v26  ;;  %10345 = vmatmul.mubr.msk.f32.gmra.mrb[234].mxu1 %vm4729_vm13, %v4700_v26 }
 0x4e2   : > { %v10181_v55 = vpop.f32.mrb[228].mxu1 }
 0x4e3   : > { %v4704_v48 = vpop.f32.mrb[229].mxu1  ;;  %v4710_v38 = vadd.f32 %v10181_v55, %v14959_v31 }
 0x4e4   : > { %v4705_v13 = vadd.f32 %v14959_v31, %v4704_v48  ;;  %v5505_v31 = vld [vmem:[%s16809_s3 + $0x18] sm:$0xff] }
 0x4e6   : > { %10243 = vmatprep.mubr.msk.f32.mxu0 %vm4729_vm13, %v4705_v13  ;;  %10347 = vmatprep.mubr.msk.f32.mxu1 %vm4729_vm13, %v4705_v13 }
 0x4e7   : > { %10244 = vmatmul.mubr.msk.f32.gmra.mrb[228].mxu0 %vm4729_vm13, %v4710_v38  ;;  %10348 = vmatmul.mubr.msk.f32.gmra.mrb[236].mxu1 %vm4729_vm13, %v4710_v38 }
 0x4e8   : > { %10262 = vmatprep.mubr.msk.f32.mxu0 %vm4729_vm13, %v14964_v10 }
 0x4eb   : > { %10263 = vmatmul.mubr.msk.f32.vlgmr.msra.gmra.mrb[206].mxu0 %vm4729_vm13, %v14967_v36  ;;  %v5506_v36 = vld [vmem:[%s16809_s3 + $0x20] sm:$0xff] }
 0x4ec   : > { %10265 = vmatprep.mubr.msk.f32.mxu0 %vm4729_vm13, %v14978_v51  ;;  %11046 = vmatpush3.bf16.msra.mxu0 %v14936_v16  ;;  %v5502_v16 = vld [vmem:[%s16809_s3] sm:$0xff]  ;;  %v5507_v51 = vld [vmem:[%s16809_s3 + $0x28] sm:$0xff] }
 0x4ed   : > { %11048 = vmatprep.subr.bf16.mxu0 %v14942_v23 }
 0x4ef   : > { %10266 = vmatmul.mubr.msk.f32.gmra.mrb[208].mxu0 %vm4729_vm13, %v14981_v30  ;;  %v11067_v30 = vpack.c.bf16 %v5507_v51, %v5506_v36 }
 0x4f0   : > { %10268 = vmatprep.mubr.msk.f32.mxu0 %vm4729_vm13, %v14988_v2  ;;  %11050 = vmatpush3.bf16.msra.mxu0 %v14942_v23  ;;  %v5503_v23 = vld [vmem:[%s16809_s3 + $0x8] sm:$0xff] }
 0x4f1   : > { %11052 = vmatprep.subr.bf16.mxu0 %v14948_v50 }
 0x4f3   : > { %10269 = vmatmul.mubr.msk.f32.gmra.mrb[210].mxu0 %vm4729_vm13, %v14991_v7 }
 0x4f4   : > { %10271 = vmatprep.mubr.msk.f32.mxu0 %vm4729_vm13, %v14999_v59  ;;  %11054 = vmatpush3.bf16.msra.mxu0 %v14948_v50  ;;  %v11059_v50 = vpack.c.bf16 %v5503_v23, %v5502_v16 }
 0x4f5   : > { %11056 = vmatprep.subr.bf16.mxu0 %v14954_v46 }
 0x4f6   : > { %11060 = vmatprep.subr.bf16.mxu1 %v11059_v50 }
 0x4f7   : > { %10272 = vmatmul.mubr.msk.f32.gmra.mrb[212].mxu0 %vm4729_vm13, %v15002_v47  ;;  %11062 = vmatpush3.bf16.msra.mxu1 %v11059_v50 }
 0x4f8   : > { %10274 = vmatprep.mubr.msk.f32.mxu0 %vm4729_vm13, %v15009_v25  ;;  %11058 = vmatpush3.bf16.msra.mxu0 %v14954_v46  ;;  %v5504_v46 = vld [vmem:[%s16809_s3 + $0x10] sm:$0xff] }
 0x4f9   : > { %v11063_v10 = vpack.c.bf16 %v5505_v31, %v5504_v46 }
 0x4fb   : > { %10275 = vmatmul.mubr.msk.f32.gmra.mrb[214].mxu0 %vm4729_vm13, %v15012_v12  ;;  %11064 = vmatprep.subr.bf16.mxu1 %v11063_v10 }
 0x4fc   : > { %10277 = vmatprep.mubr.msk.f32.mxu0 %vm4729_vm13, %v15019_v18  ;;  %11066 = vmatpush3.bf16.msra.mxu1 %v11063_v10 }
 0x4fd   : > { %11068 = vmatprep.subr.bf16.mxu1 %v11067_v30 }
 0x4ff   : > { %10278 = vmatmul.mubr.msk.f32.gmra.mrb[216].mxu0 %vm4729_vm13, %v15022_v32 }
 0x500   : > { %10280 = vmatprep.mubr.msk.f32.mxu0 %vm4729_vm13, %v15029_v49  ;;  %11070 = vmatpush3.bf16.msra.mxu1 %v11067_v30 }
 0x503   : > { %10281 = vmatmul.mubr.msk.f32.gmra.mrb[218].mxu0 %vm4729_vm13, %v15032_v28 }
 0x504   : > { %10283 = vmatprep.mubr.msk.f32.mxu0 %vm4729_vm13, %v15039_v52 }
 0x507   : > { %10284 = vmatmul.mubr.msk.f32.gmra.mrb[220].mxu0 %vm4729_vm13, %v15042_v24 }
 0x508   : > { %10286 = vmatprep.mubr.msk.f32.mxu0 %vm4729_vm13, %v15049_v43 }
 0x50b   : > { %10287 = vmatmul.mubr.msk.f32.gmra.mrb[222].mxu0 %vm4729_vm13, %v15052_v37 }
 0x50c   : > { %10289 = vmatprep.mubr.msk.f32.mxu0 %vm4729_vm13, %v15059_v5 }
 0x50f   : > { %10290 = vmatmul.mubr.msk.f32.gmra.mrb[224].mxu0 %vm4729_vm13, %v15062_v34 }
 0x510   : > { %10292 = vmatprep.mubr.msk.f32.mxu0 %vm4729_vm13, %v15069_v21 }
 0x513   : > { %10293 = vmatmul.mubr.msk.f32.gmra.mrb[226].mxu0 %vm4729_vm13, %v15072_v15 }
 0x514   : > { %10295 = vmatprep.mubr.msk.f32.mxu0 %vm4729_vm13, %v15079_v40 }
 0x517   : > { %10296 = vmatmul.mubr.msk.f32.gmra.mrb[228].mxu0 %vm4729_vm13, %v15082_v20 }
 0x518   : > { %10314 = vmatprep.mubr.msk.f32.mxu0 %vm4729_vm13, %v15009_v25 }
 0x51b   : > { %10315 = vmatmul.mubr.msk.f32.vlgmr.msra.gmra.mrb[198].mxu0 %vm4729_vm13, %v15012_v12 }
 0x51c   : > { %10317 = vmatprep.mubr.msk.f32.mxu0 %vm4729_vm13, %v15019_v18 }
 0x51f   : > { %10318 = vmatmul.mubr.msk.f32.gmra.mrb[200].mxu0 %vm4729_vm13, %v15022_v32 }
 0x520   : > { %10320 = vmatprep.mubr.msk.f32.mxu0 %vm4729_vm13, %v15029_v49 }
 0x523   : > { %10321 = vmatmul.mubr.msk.f32.gmra.mrb[202].mxu0 %vm4729_vm13, %v15032_v28  ;;  %v15208_v28 = vld [vmem:[%s12083_s29] ss:$0 sm:$0xff] }
 0x524   : > { %10323 = vmatprep.mubr.msk.f32.mxu0 %vm4729_vm13, %v15039_v52 }
 0x527   : > { %10324 = vmatmul.mubr.msk.f32.gmra.mrb[204].mxu0 %vm4729_vm13, %v15042_v24 }
 0x528   : > { %10326 = vmatprep.mubr.msk.f32.mxu0 %vm4729_vm13, %v15049_v43 }
 0x52b   : > { %10327 = vmatmul.mubr.msk.f32.gmra.mrb[206].mxu0 %vm4729_vm13, %v15052_v37 }
 0x52c   : > { %10329 = vmatprep.mubr.msk.f32.mxu0 %vm4729_vm13, %v15059_v5 }
 0x52f   : > { %10330 = vmatmul.mubr.msk.f32.gmra.mrb[208].mxu0 %vm4729_vm13, %v15062_v34 }
 0x530   : > { %10332 = vmatprep.mubr.msk.f32.mxu0 %vm4729_vm13, %v15069_v21 }
 0x533   : > { %10333 = vmatmul.mubr.msk.f32.gmra.mrb[210].mxu0 %vm4729_vm13, %v15072_v15 }
 0x534   : > { %10335 = vmatprep.mubr.msk.f32.mxu0 %vm4729_vm13, %v15079_v40  ;;  %v5508_v40 = vld [vmem:[%s16809_s3 + $0x30] sm:$0xff] }
 0x537   : > { %10336 = vmatmul.mubr.msk.f32.gmra.mrb[212].mxu0 %vm4729_vm13, %v15082_v20  ;;  %v5509_v20 = vld [vmem:[%s16809_s3 + $0x38] sm:$0xff]  ;;  %s17086_s3 = sld [smem:[#allocation19_spill]] }
 0x538   : > { %v11071_v2 = vpack.c.bf16 %v5509_v20, %v5508_v40 }
 0x53a   : > { %11072 = vmatprep.subr.bf16.mxu1 %v11071_v2 }
 0x53b   : > { %11074 = vmatpush3.bf16.msra.mxu1 %v11071_v2 }
 0x5a2   : > { %v10340_v7 = vpop.f32.mrb[230].mxu1 }
 0x5a3   : > { %v5399_v59 = vpop.f32.mrb[231].mxu1 }
 0x5aa   : > { %v10343_v47 = vpop.f32.mrb[232].mxu1 }
 0x5ab   : > { %v5409_v25 = vpop.f32.mrb[233].mxu1 }
 0x5b2   : > { %v10346_v12 = vpop.f32.mrb[234].mxu1 }
 0x5b3   : > { %v5419_v18 = vpop.f32.mrb[235].mxu1 }
 0x5ba   : > { %v10349_v32 = vpop.f32.mrb[236].mxu1 }
 0x5bb   : > { %v5429_v49 = vpop.f32.mrb[237].mxu1 }
 0x5ce   : > { %v10276_v52 = vpop.f32.mrb[214].mxu0 }
 0x5cf   : > { %v11331_v24 = vadd.f32 %v10276_v52, %v15208_v28  ;;  %v5165_v43 = vpop.f32.mrb[215].mxu0 }
 0x5d0   : > { %v11333_v37 = vadd.f32 %v15208_v28, %v5165_v43 }
 0x5d1   : > { %v15212_v5 = vadd.f32 %v11331_v24, %v10340_v7 }
 0x5d2   : > { %v15214_v34 = vadd.f32 %v11333_v37, %v5399_v59  ;;  %v10279_v21 = vpop.f32.mrb[216].mxu0 }
 0x5d3   : > { %v11335_v15 = vadd.f32 %v10279_v21, %v15208_v28  ;;  %v5175_v57 = vpop.f32.mrb[217].mxu0 }
 0x5d4   : > { %v11337_v11 = vadd.f32 %v15208_v28, %v5175_v57 }
 0x5d5   : > { %v15218_v39 = vadd.f32 %v11335_v15, %v10343_v47 }
 0x5d6   : > { %v15220_v26 = vadd.f32 %v11337_v11, %v5409_v25  ;;  %v10282_v55 = vpop.f32.mrb[218].mxu0 }
 0x5d7   : > { %v11339_v48 = vadd.f32 %v10282_v55, %v15208_v28  ;;  %v5185_v13 = vpop.f32.mrb[219].mxu0 }
 0x5d8   : > { %v11341_v38 = vadd.f32 %v15208_v28, %v5185_v13 }
 0x5d9   : > { %v15224_v16 = vadd.f32 %v11339_v48, %v10346_v12 }
 0x5da   : > { %v15226_v23 = vadd.f32 %v11341_v38, %v5419_v18  ;;  %v10285_v50 = vpop.f32.mrb[220].mxu0 }
 0x5db   : > { %v11343_v46 = vadd.f32 %v10285_v50, %v15208_v28  ;;  %v5195_v31 = vpop.f32.mrb[221].mxu0 }
 0x5dc   : > { %v11345_v10 = vadd.f32 %v15208_v28, %v5195_v31 }
 0x5dd   : > { %v15230_v36 = vadd.f32 %v11343_v46, %v10349_v32 }
 0x5de   : > { %v15232_v51 = vadd.f32 %v11345_v10, %v5429_v49  ;;  %v15234_v30 = vpop.f32.mrb[222].mxu0 }
 0x5df   : > { %v5205_v40 = vpop.f32.mrb[223].mxu0 }
 0x5e2   : > { %v15236_v20 = vpop.f32.mrb[224].mxu0 }
 0x5e3   : > { %v15238_v2 = vpop.f32.mrb[225].mxu0 }
 0x5e6   : > { %v15240_v7 = vpop.f32.mrb[226].mxu0 }
 0x5e7   : > { %v15242_v59 = vpop.f32.mrb[227].mxu0 }
 0x5ea   : > { %v15244_v47 = vpop.f32.mrb[228].mxu0 }
 0x5eb   : > { %v15246_v25 = vpop.f32.mrb[229].mxu0 }
 0x5ee   : > { %v10316_v12 = vpop.f32.mrb[198].mxu0 }
 0x5ef   : > { %v5319_v18 = vpop.f32.mrb[199].mxu0  ;;  %v11315_v49 = vadd.f32 %v10316_v12, %v15208_v28 }
 0x5f0   : > { %v11316_v32 = vadd.f32 %v15208_v28, %v5319_v18 }
 0x5f2   : > { %v10319_v52 = vpop.f32.mrb[200].mxu0  ;;  %10366 = vmatprep.mubr.msk.f32.mxu1 %vm4729_vm13, %v11316_v32 }
 0x5f3   : > { %v5329_v24 = vpop.f32.mrb[201].mxu0  ;;  %10367 = vmatmul.mubr.msk.f32.vlgmr.msra.gmra.mrb[238].mxu1 %vm4729_vm13, %v11315_v49  ;;  %v11317_v37 = vadd.f32 %v10319_v52, %v15208_v28 }
 0x5f4   : > { %v11318_v43 = vadd.f32 %v15208_v28, %v5329_v24 }
 0x5f6   : > { %v10322_v21 = vpop.f32.mrb[202].mxu0  ;;  %10369 = vmatprep.mubr.msk.f32.mxu1 %vm4729_vm13, %v11318_v43 }
 0x5f7   : > { %v5339_v15 = vpop.f32.mrb[203].mxu0  ;;  %10370 = vmatmul.mubr.msk.f32.gmra.mrb[240].mxu1 %vm4729_vm13, %v11317_v37  ;;  %v11319_v11 = vadd.f32 %v10322_v21, %v15208_v28 }
 0x5f8   : > { %v11320_v57 = vadd.f32 %v15208_v28, %v5339_v15 }
 0x5fa   : > { %v10325_v55 = vpop.f32.mrb[204].mxu0  ;;  %10372 = vmatprep.mubr.msk.f32.mxu1 %vm4729_vm13, %v11320_v57 }
 0x5fb   : > { %v5349_v48 = vpop.f32.mrb[205].mxu0  ;;  %10373 = vmatmul.mubr.msk.f32.gmra.mrb[242].mxu1 %vm4729_vm13, %v11319_v11  ;;  %v11321_v38 = vadd.f32 %v10325_v55, %v15208_v28  ;;  %v6484_v55 = vld [vmem:[%s16805_s14 + $0x30] sm:$0xff] }
 0x5fc   : > { %v11322_v13 = vadd.f32 %v15208_v28, %v5349_v48  ;;  %v6485_v48 = vld [vmem:[%s16805_s14 + $0x38] sm:$0xff] }
 0x5fe   : > { %v10328_v50 = vpop.f32.mrb[206].mxu0  ;;  %10375 = vmatprep.mubr.msk.f32.mxu1 %vm4729_vm13, %v11322_v13  ;;  %v11087_v13 = vpack.c.bf16 %v6485_v48, %v6484_v55 }
 0x5ff   : > { %v5359_v46 = vpop.f32.mrb[207].mxu0  ;;  %10376 = vmatmul.mubr.msk.f32.gmra.mrb[244].mxu1 %vm4729_vm13, %v11321_v38  ;;  %v11323_v10 = vadd.f32 %v10328_v50, %v15208_v28  ;;  %v6486_v38 = vld [vmem:[%s16805_s14 + $0x40] sm:$0xff]  ;;  %v6487_v50 = vld [vmem:[%s16805_s14 + $0x48] sm:$0xff] }
 0x600   : > { %v11324_v31 = vadd.f32 %v15208_v28, %v5359_v46  ;;  %v11091_v46 = vpack.c.bf16 %v6487_v50, %v6486_v38 }
 0x602   : > { %v10331_v12 = vpop.f32.mrb[208].mxu0  ;;  %10378 = vmatprep.mubr.msk.f32.mxu1 %vm4729_vm13, %v11324_v31  ;;  %v6488_v31 = vld [vmem:[%s16805_s14 + $0x50] sm:$0xff] }
 0x603   : > { %v5369_v18 = vpop.f32.mrb[209].mxu0  ;;  %10379 = vmatmul.mubr.msk.f32.gmra.mrb[246].mxu1 %vm4729_vm13, %v11323_v10  ;;  %v11325_v49 = vadd.f32 %v10331_v12, %v15208_v28  ;;  %v6489_v10 = vld [vmem:[%s16805_s14 + $0x58] sm:$0xff] }
 0x604   : > { %v11326_v32 = vadd.f32 %v15208_v28, %v5369_v18  ;;  %v11095_v12 = vpack.c.bf16 %v6489_v10, %v6488_v31  ;;  %v6490_v18 = vld [vmem:[%s16805_s14 + $0x60] sm:$0xff] }
 0x606   : > { %v10334_v52 = vpop.f32.mrb[210].mxu0  ;;  %10381 = vmatprep.mubr.msk.f32.mxu1 %vm4729_vm13, %v11326_v32  ;;  %v6491_v32 = vld [vmem:[%s16805_s14 + $0x68] sm:$0xff] }
 0x607   : > { %v5379_v24 = vpop.f32.mrb[211].mxu0  ;;  %10382 = vmatmul.mubr.msk.f32.gmra.mrb[248].mxu1 %vm4729_vm13, %v11325_v49  ;;  %v11327_v37 = vadd.f32 %v10334_v52, %v15208_v28  ;;  %v11099_v49 = vpack.c.bf16 %v6491_v32, %v6490_v18  ;;  %v6492_v52 = vld [vmem:[%s16805_s14 + $0x70] sm:$0xff] }
 0x608   : > { %v11328_v43 = vadd.f32 %v15208_v28, %v5379_v24  ;;  %v6493_v24 = vld [vmem:[%s16805_s14 + $0x78] sm:$0xff] }
 0x60a   : > { %v10337_v21 = vpop.f32.mrb[212].mxu0  ;;  %10384 = vmatprep.mubr.msk.f32.mxu1 %vm4729_vm13, %v11328_v43  ;;  %v11103_v43 = vpack.c.bf16 %v6493_v24, %v6492_v52 }
 0x60b   : > { %v5389_v15 = vpop.f32.mrb[213].mxu0  ;;  %10385 = vmatmul.mubr.msk.f32.gmra.mrb[250].mxu1 %vm4729_vm13, %v11327_v37  ;;  %v11329_v11 = vadd.f32 %v10337_v21, %v15208_v28  ;;  %v15336_v37 = vld [vmem:[%s16807_s8] ss:$0 sm:$0xff] }
 0x60c   : > { %v11330_v57 = vadd.f32 %v15208_v28, %v5389_v15 }
 0x60e   : > { %10387 = vmatprep.mubr.msk.f32.mxu1 %vm4729_vm13, %v11330_v57 }
 0x60f   : > { %10388 = vmatmul.mubr.msk.f32.gmra.mrb[252].mxu1 %vm4729_vm13, %v11329_v11 }
 0x610   : > { %10390 = vmatprep.mubr.msk.f32.mxu1 %vm4729_vm13, %v15214_v34  ;;  %v11348_v34 = vadd.f32 %v15208_v28, %v5205_v40  ;;  %v6479_v40 = vld [vmem:[%s16805_s14 + $0x8] sm:$0xff] }
 0x613   : > { %10391 = vmatmul.mubr.msk.f32.gmra.mrb[254].mxu1 %vm4729_vm13, %v15212_v5  ;;  %v11347_v5 = vadd.f32 %v15234_v30, %v15208_v28  ;;  %v6478_v30 = vld [vmem:[%s16805_s14] sm:$0xff] }
 0x614   : > { %10393 = vmatprep.mubr.msk.f32.mxu1 %vm4729_vm13, %v15220_v26  ;;  %v11349_v26 = vadd.f32 %v15236_v20, %v15208_v28  ;;  %v11075_v20 = vpack.c.bf16 %v6479_v40, %v6478_v30 }
 0x616   : > { %11076 = vmatprep.subr.bf16.mxu1 %v11075_v20 }
 0x617   : > { %10394 = vmatmul.mubr.msk.f32.gmra.mrb[0].mxu1 %vm4729_vm13, %v15218_v39  ;;  %v11350_v39 = vadd.f32 %v15208_v28, %v15238_v2  ;;  %v6480_v2 = vld [vmem:[%s16805_s14 + $0x10] sm:$0xff] }
 0x618   : > { %10396 = vmatprep.mubr.msk.f32.mxu1 %vm4729_vm13, %v15226_v23  ;;  %v11351_v23 = vadd.f32 %v15240_v7, %v15208_v28  ;;  %11078 = vmatpush3.bf16.msra.mxu1 %v11075_v20  ;;  %v6481_v7 = vld [vmem:[%s16805_s14 + $0x18] sm:$0xff] }
 0x61b   : > { %10397 = vmatmul.mubr.msk.f32.gmra.mrb[2].mxu1 %vm4729_vm13, %v15224_v16  ;;  %v11352_v16 = vadd.f32 %v15208_v28, %v15242_v59  ;;  %v11079_v59 = vpack.c.bf16 %v6481_v7, %v6480_v2 }
 0x61c   : > { %10399 = vmatprep.mubr.msk.f32.mxu1 %vm4729_vm13, %v15232_v51  ;;  %v11353_v51 = vadd.f32 %v15244_v47, %v15208_v28 }
 0x61d   : > { %11080 = vmatprep.subr.bf16.mxu1 %v11079_v59 }
 0x61e   : > { %11082 = vmatpush3.bf16.msra.mxu1 %v11079_v59 }
 0x61f   : > { %10400 = vmatmul.mubr.msk.f32.gmra.mrb[4].mxu1 %vm4729_vm13, %v15230_v36  ;;  %v11354_v36 = vadd.f32 %v15208_v28, %v15246_v25  ;;  %v6482_v25 = vld [vmem:[%s16805_s14 + $0x20] sm:$0xff]  ;;  %v6483_v28 = vld [vmem:[%s16805_s14 + $0x28] sm:$0xff] }
 0x620   : > { %10402 = vmatprep.mubr.msk.f32.mxu1 %vm4729_vm13, %v11348_v34  ;;  %v11083_v47 = vpack.c.bf16 %v6483_v28, %v6482_v25 }
 0x622   : > { %11084 = vmatprep.subr.bf16.mxu1 %v11083_v47 }
 0x623   : > { %10403 = vmatmul.mubr.msk.f32.gmra.mrb[6].mxu1 %vm4729_vm13, %v11347_v5 }
 0x624   : > { %10405 = vmatprep.mubr.msk.f32.mxu1 %vm4729_vm13, %v11350_v39  ;;  %11086 = vmatpush3.bf16.msra.mxu1 %v11083_v47 }
 0x625   : > { %11088 = vmatprep.subr.bf16.mxu1 %v11087_v13 }
 0x627   : > { %10406 = vmatmul.mubr.msk.f32.gmra.mrb[8].mxu1 %vm4729_vm13, %v11349_v26 }
 0x628   : > { %10408 = vmatprep.mubr.msk.f32.mxu1 %vm4729_vm13, %v11352_v16  ;;  %11090 = vmatpush3.bf16.msra.mxu1 %v11087_v13 }
 0x629   : > { %11092 = vmatprep.subr.bf16.mxu1 %v11091_v46 }
 0x62b   : > { %10409 = vmatmul.mubr.msk.f32.gmra.mrb[10].mxu1 %vm4729_vm13, %v11351_v23 }
 0x62c   : > { %10411 = vmatprep.mubr.msk.f32.mxu1 %vm4729_vm13, %v11354_v36  ;;  %11094 = vmatpush3.bf16.msra.mxu1 %v11091_v46 }
 0x62d   : > { %11096 = vmatprep.subr.bf16.mxu1 %v11095_v12 }
 0x62f   : > { %10412 = vmatmul.mubr.msk.f32.gmra.mrb[12].mxu1 %vm4729_vm13, %v11353_v51 }
 0x630   : > { %11098 = vmatpush3.bf16.msra.mxu1 %v11095_v12 }
 0x631   : > { %11100 = vmatprep.subr.bf16.mxu1 %v11099_v49 }
 0x634   : > { %11102 = vmatpush3.bf16.msra.mxu1 %v11099_v49 }
 0x635   : > { %11104 = vmatprep.subr.bf16.mxu1 %v11103_v43 }
 0x638   : > { %11106 = vmatpush3.bf16.msra.mxu1 %v11103_v43 }
 0x6c6   : > { %v10368_v21 = vpop.f32.mrb[238].mxu1 }
 0x6c7   : > { %v5685_v15 = vadd.f32 %v10368_v21, %v15336_v37  ;;  %v5679_v57 = vpop.f32.mrb[239].mxu1 }
 0x6c8   : > { %v5680_v11 = vadd.f32 %v15336_v37, %v5679_v57 }
 0x6c9   : > { %v5839_v34 = vadd.f32 %v5685_v15, %v14662_v56 }
 0x6ca   : > { %v5838_v5 = vadd.f32 %v5680_v11, %v14645_v27  ;;  %v10371_v39 = vpop.f32.mrb[240].mxu1 }
 0x6cb   : > { %v5903_v26 = vcombine.high %v5839_v34, %v5839_v34  ;;  %v5980_v16 = vsel %vm4136_vm6, %v5839_v34, -inf  ;;  %v5695_v23 = vadd.f32 %v10371_v39, %v15336_v37  ;;  %v5689_v36 = vpop.f32.mrb[241].mxu1 }
 0x6cc   : > { %v5981_v51 = vrot.slane %v5980_v16, 4  ;;  %v5902_v30 = vcombine.high %v5838_v5, %v5838_v5  ;;  %v5966_v40 = vsel %vm4136_vm6, %v5838_v5, -inf  ;;  %v5690_v20 = vadd.f32 %v15336_v37, %v5689_v36 }
 0x6cd   : > { %v5987_v2 = vsel %vm4136_vm6, %v5903_v26, -inf  ;;  %v5967_v7 = vrot.slane %v5966_v40, 4  ;;  %v5841_v56 = vadd.f32 %v5695_v23, %v14692_v54 }
 0x6ce   : > { %v5982_v59 = vmax.f32 %v5980_v16, %v5981_v51  ;;  %v5988_v27 = vrot.slane %v5987_v2, 4  ;;  %v5973_v25 = vsel %vm4136_vm6, %v5902_v30, -inf  ;;  %v5840_v28 = vadd.f32 %v5690_v20, %v14677_v62  ;;  %v10374_v47 = vpop.f32.mrb[242].mxu1 }
 0x6cf   : > { %v5968_v55 = vmax.f32 %v5966_v40, %v5967_v7  ;;  %v5974_v48 = vrot.slane %v5973_v25, 4  ;;  %v5905_v13 = vcombine.high %v5841_v56, %v5841_v56  ;;  %v6008_v38 = vsel %vm4136_vm6, %v5841_v56, -inf  ;;  %v5699_v50 = vpop.f32.mrb[243].mxu1 }
 0x6d0   : > { %v5983_v46 = vrot.slane %v5982_v59, 2  ;;  %v5989_v31 = vmax.f32 %v5987_v2, %v5988_v27  ;;  %v6009_v10 = vrot.slane %v6008_v38, 4  ;;  %v5904_v12 = vcombine.high %v5840_v28, %v5840_v28 }
 0x6d1   : > { %v5969_v18 = vrot.slane %v5968_v55, 2  ;;  %v5975_v32 = vmax.f32 %v5973_v25, %v5974_v48  ;;  %v6015_v54 = vsel %vm4136_vm6, %v5905_v13, -inf  ;;  %v5994_v49 = vsel %vm4136_vm6, %v5840_v28, -inf }
 0x6d2   : > { %v5984_v52 = vmax.f32 %v5982_v59, %v5983_v46  ;;  %v5990_v24 = vrot.slane %v5989_v31, 2  ;;  %v6010_v62 = vmax.f32 %v6008_v38, %v6009_v10  ;;  %v6016_v43 = vrot.slane %v6015_v54, 4  ;;  %v10377_v21 = vpop.f32.mrb[244].mxu1 }
 0x6d3   : > { %v5970_v15 = vmax.f32 %v5968_v55, %v5969_v18  ;;  %v5976_v57 = vrot.slane %v5975_v32, 2  ;;  %v5995_v11 = vrot.slane %v5994_v49, 4  ;;  %v6001_v34 = vsel %vm4136_vm6, %v5904_v12, -inf  ;;  %v5709_v5 = vpop.f32.mrb[245].mxu1 }
 0x6d4   : > { %v5985_v39 = vrot.slane %v5984_v52, 1  ;;  %v5991_v26 = vmax.f32 %v5989_v31, %v5990_v24  ;;  %v6011_v16 = vrot.slane %v6010_v62, 2  ;;  %v15354_v23 = vmax.f32 %v6015_v54, %v6016_v43 }
 0x6d5   : > { %v5971_v36 = vrot.slane %v5970_v15, 1  ;;  %v5977_v51 = vmax.f32 %v5975_v32, %v5976_v57  ;;  %v5996_v30 = vmax.f32 %v5994_v49, %v5995_v11  ;;  %v6002_v40 = vrot.slane %v6001_v34, 4 }
 0x6d6   : > { %v15356_v20 = vmax.f32 %v5984_v52, %v5985_v39  ;;  %v5992_v2 = vrot.slane %v5991_v26, 1  ;;  %v15358_v7 = vmax.f32 %v6010_v62, %v6011_v16  ;;  %v15361_v59 = vpop.f32.mrb[246].mxu1  ;;  %v5705_v31 = vadd.f32 %v10374_v47, %v15336_v37 }
 0x6d7   : > { %v15363_v27 = vmax.f32 %v5970_v15, %v5971_v36  ;;  %v5978_v25 = vrot.slane %v5977_v51, 1  ;;  %v5997_v28 = vrot.slane %v5996_v30, 2  ;;  %v6003_v55 = vmax.f32 %v6001_v34, %v6002_v40  ;;  %v15365_v48 = vpop.f32.mrb[247].mxu1 }
 0x6d8   : > { %v15367_v13 = vmax.f32 %v5991_v26, %v5992_v2  ;;  %v5843_v49 = vadd.f32 %v5705_v31, %v14722_v1  ;;  %v5700_v52 = vadd.f32 %v15336_v37, %v5699_v50  ;;  %v5715_v24 = vadd.f32 %v10377_v21, %v15336_v37 }
 0x6d9   : > { %16848 = vst [vmem:[#allocation33_spill] sm:$0xff] %v15363_v27  ;;  %v15372_v10 = vmax.f32 %v5977_v51, %v5978_v25  ;;  %v16685_v12 = vmax.f32 %v15363_v27, 0.0  ;;  %v5998_v18 = vmax.f32 %v5996_v30, %v5997_v28  ;;  %v6004_v32 = vrot.slane %v6003_v55, 2 }
 0x6da   : > { %v15379_v62 = vpop.f32.mrb[248].mxu1  ;;  %v5710_v57 = vadd.f32 %v15336_v37, %v5709_v5  ;;  %v5907_v34 = vcombine.high %v5843_v49, %v5843_v49  ;;  %v6036_v39 = vsel %vm4136_vm6, %v5843_v49, -inf  ;;  %v5842_v1 = vadd.f32 %v5700_v52, %v14707_v53 }
 0x6db   : > { %16849 = vst [vmem:[#allocation34_spill] sm:$0xff] %v15372_v10  ;;  %v16684_v43 = vmax.f32 %v15372_v10, 0.0  ;;  %v5999_v15 = vrot.slane %v5998_v18, 1  ;;  %v15382_v47 = vmax.f32 %v6003_v55, %v6004_v32  ;;  %v15385_v11 = vpop.f32.mrb[249].mxu1  ;;  %v5845_v50 = vadd.f32 %v5715_v24, %v14752_v14 }
 0x6dc   : > { %v6037_v16 = vrot.slane %v6036_v39, 4  ;;  %v6043_v36 = vsel %vm4136_vm6, %v5907_v34, -inf  ;;  %v5906_v51 = vcombine.high %v5842_v1, %v5842_v1  ;;  %v6022_v30 = vsel %vm4136_vm6, %v5842_v1, -inf }
 0x6dd   : > { %v15395_v21 = vsel %vm6565_vm14, %v16684_v43, %v16685_v12  ;;  %v15397_v26 = vmax.f32 %v5998_v18, %v5999_v15  ;;  %v5909_v53 = vcombine.high %v5845_v50, %v5845_v50  ;;  %v6044_v25 = vrot.slane %v6043_v36, 4 }
 0x6de   : > { %v15402_v40 = vpop.f32.mrb[250].mxu1  ;;  %v6038_v2 = vmax.f32 %v6036_v39, %v6037_v16  ;;  %v6023_v28 = vrot.slane %v6022_v30, 4  ;;  %v6029_v31 = vsel %vm4136_vm6, %v5906_v51, -inf  ;;  %v6064_v18 = vsel %vm4136_vm6, %v5845_v50, -inf }
 0x6df   : > { %v15405_v55 = vpop.f32.mrb[251].mxu1  ;;  %v6071_v32 = vsel %vm4136_vm6, %v5909_v53, -inf  ;;  %v5844_v49 = vadd.f32 %v5710_v57, %v14737_v0  ;;  %v6045_v24 = vmax.f32 %v6043_v36, %v6044_v25  ;;  %v6030_v34 = vrot.slane %v6029_v31, 4 }
 0x6e0   : > { %v6039_v52 = vrot.slane %v6038_v2, 2  ;;  %v6024_v15 = vmax.f32 %v6022_v30, %v6023_v28  ;;  %v6065_v1 = vrot.slane %v6064_v18, 4  ;;  %v6072_v43 = vrot.slane %v6071_v32, 4 }
 0x6e1   : > { %v5908_v12 = vcombine.high %v5844_v49, %v5844_v49  ;;  %v6050_v39 = vsel %vm4136_vm6, %v5844_v49, -inf  ;;  %v6046_v54 = vrot.slane %v6045_v24, 2  ;;  %v6031_v38 = vmax.f32 %v6029_v31, %v6030_v34 }
 0x6e2   : > { %v15412_v16 = vpop.f32.mrb[252].mxu1  ;;  %v6040_v14 = vmax.f32 %v6038_v2, %v6039_v52  ;;  %v6025_v51 = vrot.slane %v6024_v15, 2  ;;  %v6066_v53 = vmax.f32 %v6064_v18, %v6065_v1  ;;  %v6073_v56 = vmax.f32 %v6071_v32, %v6072_v43 }
 0x6e3   : > { %v15414_v50 = vpop.f32.mrb[253].mxu1  ;;  %v6051_v0 = vrot.slane %v6050_v39, 4  ;;  %v6057_v57 = vsel %vm4136_vm6, %v5908_v12, -inf  ;;  %v6047_v30 = vmax.f32 %v6045_v24, %v6046_v54  ;;  %v6032_v28 = vrot.slane %v6031_v38, 2 }
 0x6e4   : > { %v6041_v36 = vrot.slane %v6040_v14, 1  ;;  %v6026_v25 = vmax.f32 %v6024_v15, %v6025_v51  ;;  %v6067_v46 = vrot.slane %v6066_v53, 2  ;;  %v6074_v5 = vrot.slane %v6073_v56, 2 }
 0x6e5   : > { %v6052_v49 = vmax.f32 %v6050_v39, %v6051_v0  ;;  %v6058_v10 = vrot.slane %v6057_v57, 4  ;;  %v6048_v31 = vrot.slane %v6047_v30, 1  ;;  %v6033_v34 = vmax.f32 %v6031_v38, %v6032_v28 }
 0x6e6   : > { %v15417_v27 = vpop.f32.mrb[254].mxu1  ;;  %v15419_v2 = vmax.f32 %v6040_v14, %v6041_v36  ;;  %v6027_v52 = vrot.slane %v6026_v25, 1  ;;  %v6068_v18 = vmax.f32 %v6066_v53, %v6067_v46  ;;  %v6075_v12 = vmax.f32 %v6073_v56, %v6074_v5 }
 0x6e7   : > { %v15421_v43 = vpop.f32.mrb[255].mxu1  ;;  %v6053_v32 = vrot.slane %v6052_v49, 2  ;;  %v6059_v54 = vmax.f32 %v6057_v57, %v6058_v10  ;;  %v15423_v24 = vmax.f32 %v6047_v30, %v6048_v31  ;;  %v6034_v39 = vrot.slane %v6033_v34, 1 }
 0x6e8   : > { %16850 = vst [vmem:[#allocation35_spill] sm:$0xff] %v15419_v2  ;;  %v16689_v15 = vmax.f32 %v15419_v2, 0.0  ;;  %v15426_v1 = vmax.f32 %v6026_v25, %v6027_v52  ;;  %v6069_v14 = vrot.slane %v6068_v18, 1  ;;  %v6076_v51 = vrot.slane %v6075_v12, 1 }
 0x6e9   : > { %16851 = vst [vmem:[#allocation36_spill] sm:$0xff] %v15423_v24  ;;  %v6054_v0 = vmax.f32 %v6052_v49, %v6053_v32  ;;  %v6060_v38 = vrot.slane %v6059_v54, 2  ;;  %v16691_v46 = vmax.f32 %v15423_v24, 0.0  ;;  %v15431_v56 = vmax.f32 %v6033_v34, %v6034_v39 }
 0x6ea   : > { %16852 = vst [vmem:[#allocation37_spill] sm:$0xff] %v15426_v1  ;;  %v15428_v36 = vpop.f32.mrb[0].mxu1  ;;  %v16690_v10 = vmax.f32 %v15426_v1, 0.0  ;;  %v5725_v5 = vadd.f32 %v15361_v59, %v15336_v37  ;;  %v15438_v57 = vmax.f32 %v6068_v18, %v6069_v14  ;;  %v15440_v30 = vmax.f32 %v6075_v12, %v6076_v51 }
 0x6eb   : > { %16853 = vst [vmem:[#allocation38_spill] sm:$0xff] %v15431_v56  ;;  %v15436_v53 = vpop.f32.mrb[1].mxu1  ;;  %v6055_v25 = vrot.slane %v6054_v0, 1  ;;  %v6061_v28 = vmax.f32 %v6059_v54, %v6060_v38  ;;  %v16688_v49 = vmax.f32 %v15431_v56, 0.0  ;;  %v5720_v52 = vadd.f32 %v15336_v37, %v15365_v48 }
 0x6ec   : > { %v5847_v31 = vadd.f32 %v5725_v5, %v14782_v60  ;;  %v5735_v34 = vadd.f32 %v15379_v62, %v15336_v37 }
 0x6ed   : > { %v15450_v18 = vmax.f32 %v6054_v0, %v6055_v25  ;;  %v6062_v12 = vrot.slane %v6061_v28, 1  ;;  %v6579_v60 = vsel %vm6565_vm14, %v16688_v49, %v16690_v10  ;;  %v5846_v62 = vadd.f32 %v5720_v52, %v14767_v58 }
 0x6ee   : > { %v15452_v39 = vpop.f32.mrb[2].mxu1  ;;  %v5911_v54 = vcombine.high %v5847_v31, %v5847_v31  ;;  %v6092_v48 = vsel %vm4136_vm6, %v5847_v31, -inf  ;;  %v6580_v51 = vsel %vm6567_vm15, %v16689_v15, %v6579_v60 }
 0x6ef   : > { %16854 = vst [vmem:[#allocation39_spill] sm:$0xff] %v15450_v18  ;;  %v15461_v14 = vpop.f32.mrb[3].mxu1  ;;  %v15466_v0 = vmax.f32 %v6061_v28, %v6062_v12  ;;  %v16692_v38 = vmax.f32 %v15450_v18, 0.0  ;;  %v6093_v5 = vrot.slane %v6092_v48, 4  ;;  %v6581_v25 = vsel %vm6569_vm2, %v16691_v46, %v6580_v51 }
 0x6f0   : > { %v6099_v49 = vsel %vm4136_vm6, %v5911_v54, -inf  ;;  %v5910_v31 = vcombine.high %v5846_v62, %v5846_v62  ;;  %v6078_v58 = vsel %vm4136_vm6, %v5846_v62, -inf  ;;  %v5849_v51 = vadd.f32 %v5735_v34, %v14810_v6 }
 0x6f1   : > { %v15478_v60 = vsel %vm6571_vm3, %v16692_v38, %v6581_v25  ;;  %v6094_v28 = vmax.f32 %v6092_v48, %v6093_v5  ;;  %v6100_v12 = vrot.slane %v6099_v49, 4  ;;  %v6079_v10 = vrot.slane %v6078_v58, 4 }
 0x6f2   : > { %v15480_v15 = vpop.f32.mrb[4].mxu1  ;;  %v6085_v32 = vsel %vm4136_vm6, %v5910_v31, -inf  ;;  %v5730_v54 = vadd.f32 %v15336_v37, %v15385_v11  ;;  %v5745_v25 = vadd.f32 %v15402_v40, %v15336_v37  ;;  %v5913_v5 = vcombine.high %v5849_v51, %v5849_v51 }
 0x6f3   : > { %v15486_v62 = vpop.f32.mrb[5].mxu1  ;;  %v6095_v46 = vrot.slane %v6094_v28, 2  ;;  %v6101_v59 = vmax.f32 %v6099_v49, %v6100_v12  ;;  %v6086_v52 = vrot.slane %v6085_v32, 4  ;;  %v6080_v48 = vmax.f32 %v6078_v58, %v6079_v10 }
 0x6f4   : > { %v6120_v38 = vsel %vm4136_vm6, %v5849_v51, -inf  ;;  %v5848_v18 = vadd.f32 %v5730_v54, %v14797_v63  ;;  %v6127_v56 = vsel %vm4136_vm6, %v5913_v5, -inf }
 0x6f5   : > { %v6096_v31 = vmax.f32 %v6094_v28, %v6095_v46  ;;  %v6102_v24 = vrot.slane %v6101_v59, 2  ;;  %v6087_v6 = vmax.f32 %v6085_v32, %v6086_v52  ;;  %v6121_v34 = vrot.slane %v6120_v38, 4 }
 0x6f6   : > { %v15492_v2 = vpop.f32.mrb[6].mxu1  ;;  %v6081_v11 = vrot.slane %v6080_v48, 2  ;;  %v5912_v49 = vcombine.high %v5848_v18, %v5848_v18  ;;  %v6106_v12 = vsel %vm4136_vm6, %v5848_v18, -inf  ;;  %v6128_v63 = vrot.slane %v6127_v56, 4 }
 0x6f7   : > { %16855 = vst [vmem:[#allocation40_spill] sm:$0xff] %v15492_v2  ;;  %v15496_v1 = vpop.f32.mrb[7].mxu1  ;;  %v6097_v40 = vrot.slane %v6096_v31, 1  ;;  %v6103_v10 = vmax.f32 %v6101_v59, %v6102_v24  ;;  %v6088_v58 = vrot.slane %v6087_v6, 2  ;;  %v6122_v51 = vmax.f32 %v6120_v38, %v6121_v34 }
 0x6f8   : > { %16856 = vst [vmem:[#allocation41_spill] sm:$0xff] %v15496_v1  ;;  %v6082_v9 = vmax.f32 %v6080_v48, %v6081_v11  ;;  %v6107_v46 = vrot.slane %v6106_v12, 4  ;;  %v6113_v32 = vsel %vm4136_vm6, %v5912_v49, -inf  ;;  %v15503_v18 = vmax.f32 %v6127_v56, %v6128_v63 }
 0x6f9   : > { %v15499_v52 = vmax.f32 %v6096_v31, %v6097_v40  ;;  %v6104_v28 = vrot.slane %v6103_v10, 1  ;;  %v6089_v54 = vmax.f32 %v6087_v6, %v6088_v58  ;;  %v6123_v4 = vrot.slane %v6122_v51, 2 }
 0x6fa   : > { %v15501_v5 = vpop.f32.mrb[8].mxu1  ;;  %v6083_v35 = vrot.slane %v6082_v9, 1  ;;  %v6108_v1 = vmax.f32 %v6106_v12, %v6107_v46  ;;  %v6114_v2 = vrot.slane %v6113_v32, 4 }
 0x6fb   : > { %16857 = vst [vmem:[#allocation42_spill] sm:$0xff] %v15501_v5  ;;  %v15505_v24 = vpop.f32.mrb[9].mxu1  ;;  %v15507_v59 = vmax.f32 %v6103_v10, %v6104_v28  ;;  %v6090_v48 = vrot.slane %v6089_v54, 1  ;;  %v15510_v34 = vmax.f32 %v6122_v51, %v6123_v4  ;;  %v5851_v10 = vadd.f32 %v5745_v25, %v14830_v8 }
 0x6fc   : > { %16858 = vst [vmem:[#allocation43_spill] sm:$0xff] %v15505_v24  ;;  %v15512_v31 = vmax.f32 %v6082_v9, %v6083_v35  ;;  %v6109_v11 = vrot.slane %v6108_v1, 2  ;;  %v6115_v49 = vmax.f32 %v6113_v32, %v6114_v2  ;;  %v5740_v35 = vadd.f32 %v15336_v37, %v15405_v55 }
 0x6fd   : > { %v15516_v40 = vmax.f32 %v6089_v54, %v6090_v48  ;;  %v5915_v46 = vcombine.high %v5851_v10, %v5851_v10  ;;  %v6148_v32 = vsel %vm4136_vm6, %v5851_v10, -inf  ;;  %v5755_v28 = vadd.f32 %v15412_v16, %v15336_v37 }
 0x6fe   : > { %16859 = vst [vmem:[#allocation44_spill] sm:$0xff] %v15512_v31  ;;  %v15520_v58 = vpop.f32.mrb[10].mxu1  ;;  %v16702_v63 = vmax.f32 %v15512_v31, 0.0  ;;  %v6110_v4 = vmax.f32 %v6108_v1, %v6109_v11  ;;  %v6116_v51 = vrot.slane %v6115_v49, 2  ;;  %v6149_v54 = vrot.slane %v6148_v32, 4 }
 0x6ff   : > { %16860 = vst [vmem:[#allocation45_spill] sm:$0xff] %v15516_v40  ;;  %16861 = vst [vmem:[#allocation46_spill] sm:$0xff] %v15520_v58  ;;  %v15525_v9 = vpop.f32.mrb[11].mxu1  ;;  %v16701_v2 = vmax.f32 %v15516_v40, 0.0  ;;  %v5850_v1 = vadd.f32 %v5740_v35, %v14822_v22  ;;  %v6155_v48 = vsel %vm4136_vm6, %v5915_v46, -inf  ;;  %v5853_v11 = vadd.f32 %v5755_v28, %v14844_v44 }
 0x700   : > { %16862 = vst [vmem:[#allocation47_spill] sm:$0xff] %v15525_v9  ;;  %v6111_v8 = vrot.slane %v6110_v4, 1  ;;  %v15531_v25 = vmax.f32 %v6115_v49, %v6116_v51  ;;  %v5750_v16 = vadd.f32 %v15336_v37, %v15414_v50  ;;  %v6150_v51 = vmax.f32 %v6148_v32, %v6149_v54 }
 0x701   : > { %v15539_v55 = vsel %vm6565_vm14, %v16701_v2, %v16702_v63  ;;  %v6156_v35 = vrot.slane %v6155_v48, 4  ;;  %v5914_v38 = vcombine.high %v5850_v1, %v5850_v1  ;;  %v6134_v2 = vsel %vm4136_vm6, %v5850_v1, -inf }
 0x702   : > { %v15545_v10 = vpop.f32.mrb[12].mxu1  ;;  %v15547_v49 = vmax.f32 %v6110_v4, %v6111_v8  ;;  %v5917_v63 = vcombine.high %v5853_v11, %v5853_v11  ;;  %v6176_v46 = vsel %vm4136_vm6, %v5853_v11, -inf  ;;  %v6151_v28 = vrot.slane %v6150_v51, 2 }
 0x703   : > { %16863 = vst [vmem:[#allocation48_spill] sm:$0xff] %v15545_v10  ;;  %v15550_v56 = vpop.f32.mrb[13].mxu1  ;;  %v6157_v50 = vmax.f32 %v6155_v48, %v6156_v35  ;;  %v6135_v6 = vrot.slane %v6134_v2, 4  ;;  %v6141_v4 = vsel %vm4136_vm6, %v5914_v38, -inf  ;;  %v6177_v8 = vrot.slane %v6176_v46, 4 }
 0x704   : > { %16864 = vst [vmem:[#allocation49_spill] sm:$0xff] %v15550_v56  ;;  %v6183_v12 = vsel %vm4136_vm6, %v5917_v63, -inf  ;;  %v5852_v32 = vadd.f32 %v5750_v16, %v14838_v42  ;;  %v6152_v54 = vmax.f32 %v6150_v51, %v6151_v28  ;;  %v6142_v31 = vrot.slane %v6141_v4, 4 }
 0x705   : > { %v6158_v22 = vrot.slane %v6157_v50, 2  ;;  %v6136_v40 = vmax.f32 %v6134_v2, %v6135_v6  ;;  %v6178_v1 = vmax.f32 %v6176_v46, %v6177_v8  ;;  %v6184_v56 = vrot.slane %v6183_v12, 4 }
 0x706   : > { %v5916_v10 = vcombine.high %v5852_v32, %v5852_v32  ;;  %v6162_v11 = vsel %vm4136_vm6, %v5852_v32, -inf  ;;  %v6153_v44 = vrot.slane %v6152_v54, 1  ;;  %v6143_v35 = vmax.f32 %v6141_v4, %v6142_v31 }
 0x707   : > { %v6159_v9 = vmax.f32 %v6157_v50, %v6158_v22  ;;  %v6137_v48 = vrot.slane %v6136_v40, 2  ;;  %v6179_v58 = vrot.slane %v6178_v1, 2  ;;  %v6185_v38 = vmax.f32 %v6183_v12, %v6184_v56 }
 0x708   : > { %v6163_v24 = vrot.slane %v6162_v11, 4  ;;  %v6169_v63 = vsel %vm4136_vm6, %v5916_v10, -inf  ;;  %v15560_v5 = vmax.f32 %v6152_v54, %v6153_v44  ;;  %v6144_v6 = vrot.slane %v6143_v35, 2 }
 0x709   : > { %v6160_v42 = vrot.slane %v6159_v9, 1  ;;  %v6138_v16 = vmax.f32 %v6136_v40, %v6137_v48  ;;  %v6180_v2 = vmax.f32 %v6178_v1, %v6179_v58  ;;  %v6186_v51 = vrot.slane %v6185_v38, 2 }
 0x70a   : > { %16865 = vst [vmem:[#allocation50_spill] sm:$0xff] %v15560_v5  ;;  %v6164_v46 = vmax.f32 %v6162_v11, %v6163_v24  ;;  %v6170_v28 = vrot.slane %v6169_v63, 4  ;;  %v16705_v31 = vmax.f32 %v15560_v5, 0.0  ;;  %v6145_v56 = vmax.f32 %v6143_v35, %v6144_v6 }
 0x70b   : > { %v15562_v8 = vmax.f32 %v6159_v9, %v6160_v42  ;;  %v6139_v22 = vrot.slane %v6138_v16, 1  ;;  %v6181_v12 = vrot.slane %v6180_v2, 1  ;;  %v15565_v50 = vmax.f32 %v6185_v38, %v6186_v51 }
 0x70c   : > { %v6165_v10 = vrot.slane %v6164_v46, 2  ;;  %v6171_v44 = vmax.f32 %v6169_v63, %v6170_v28  ;;  %v6146_v58 = vrot.slane %v6145_v56, 1  ;;  %v16868_v24 = vrot.slane %v15382_v47, 1 }
 0x70d   : > { %16866 = vst [vmem:[#allocation51_spill] sm:$0xff] %v15562_v8  ;;  %v15568_v4 = vmax.f32 %v6138_v16, %v6139_v22  ;;  %v15575_v32 = vmax.f32 %v6180_v2, %v6181_v12  ;;  %v16871_v38 = vrot.slane %v15358_v7, 1  ;;  %v16872_v42 = vrot.slane %v15354_v23, 2 }
 0x70e   : > { %v15573_v9 = vmax.f32 %v15382_v47, %v16868_v24  ;;  %v6166_v1 = vmax.f32 %v6164_v46, %v6165_v10  ;;  %v6172_v11 = vrot.slane %v6171_v44, 2  ;;  %v15578_v48 = vmax.f32 %v6145_v56, %v6146_v58 }
 0x70f   : > { %16867 = vst [vmem:[#allocation52_spill] sm:$0xff] %v15568_v4  ;;  %16869 = vst [vmem:[#allocation53_spill] sm:$0xff] %v15575_v32  ;;  %v16707_v35 = vmax.f32 %v15568_v4, 0.0  ;;  %v15584_v63 = vmax.f32 %v15358_v7, %v16871_v38  ;;  %v6019_v47 = vmax.f32 %v15354_v23, %v16872_v42  ;;  %v16873_v56 = vmax.f32 %v15356_v20, 0.0 }
 0x710   : > { %16870 = vst [vmem:[#allocation54_spill] sm:$0xff] %v15578_v48  ;;  %v6167_v6 = vrot.slane %v6166_v1, 1  ;;  %v6173_v2 = vmax.f32 %v6171_v44, %v6172_v11  ;;  %v16710_v51 = vmax.f32 %v15573_v9, 0.0  ;;  %v16706_v46 = vmax.f32 %v15578_v48, 0.0 }
 0x711   : > { %v6020_v28 = vrot.slane %v6019_v47, 1  ;;  %v16709_v22 = vmax.f32 %v15584_v63, 0.0  ;;  %v6568_v7 = vsel %vm6567_vm15, %v16873_v56, %v15395_v21  ;;  %v16875_v23 = vmax.f32 %v15367_v13, 0.0 }
 0x712   : > { %v15597_v12 = vmax.f32 %v6166_v1, %v6167_v6  ;;  %v6174_v10 = vrot.slane %v6173_v2, 1  ;;  %v5765_v44 = vadd.f32 %v15417_v27, %v15336_v37  ;;  %v6593_v24 = vsel %vm6565_vm14, %v16706_v46, %v16707_v35 }
 0x713   : > { %v6570_v58 = vsel %vm6569_vm2, %v16875_v23, %v6568_v7  ;;  %v15609_v11 = vmax.f32 %v6019_v47, %v6020_v28  ;;  %v16876_v21 = vmax.f32 %v15397_v26, 0.0  ;;  %v5760_v38 = vadd.f32 %v15336_v37, %v15421_v43 }
 0x714   : > { %16874 = vst [vmem:[#allocation55_spill] sm:$0xff] %v15597_v12  ;;  %v15619_v42 = vsel %vm6567_vm15, %v16705_v31, %v6593_v24  ;;  %v15621_v27 = vmax.f32 %v6173_v2, %v6174_v10  ;;  %v5855_v43 = vadd.f32 %v5765_v44, %v14856_v45  ;;  %v5775_v2 = vadd.f32 %v15428_v36, %v15336_v37 }
 0x715   : > { %v6572_v1 = vsel %vm6571_vm3, %v16876_v21, %v6570_v58  ;;  %v16708_v28 = vmax.f32 %v15609_v11, 0.0  ;;  %v5854_v7 = vadd.f32 %v5760_v38, %v14850_v61  ;;  %v5770_v10 = vadd.f32 %v15336_v37, %v15436_v53 }
 0x716   : > { %16877 = vst [vmem:[#allocation56_spill] sm:$0xff] %v15621_v27  ;;  %v6574_v47 = vsel %vm6573_vm4, %v16710_v51, %v6572_v1  ;;  %v16878_v58 = vmax.f32 %v15466_v0, 0.0  ;;  %v5919_v45 = vcombine.high %v5855_v43, %v5855_v43  ;;  %v6204_v61 = vsel %vm4136_vm6, %v5855_v43, -inf }
 0x717   : > { %v6576_v56 = vsel %vm6575_vm7, %v16709_v22, %v6574_v47  ;;  %v5918_v44 = vcombine.high %v5854_v7, %v5854_v7  ;;  %v6205_v1 = vrot.slane %v6204_v61, 4  ;;  %v6190_v36 = vsel %vm4136_vm6, %v5854_v7, -inf }
 0x718   : > { %v6583_v24 = vsel %vm6573_vm4, %v16878_v58, %v15478_v60  ;;  %v6578_v21 = vsel %vm6577_vm5, %v16708_v28, %v6576_v56  ;;  %v5857_v38 = vadd.f32 %v5775_v2, %v14868_v33  ;;  %v5856_v53 = vadd.f32 %v5770_v10, %v14862_v41 }
 0x719   : > { %10446 = vmatprep.mubr.f32.mxu1 %v6578_v21  ;;  %v6211_v47 = vsel %vm4136_vm6, %v5919_v45, -inf  ;;  %v6191_v31 = vrot.slane %v6190_v36, 4  ;;  %v6197_v60 = vsel %vm4136_vm6, %v5918_v44, -inf  ;;  %v16879_v58 = vmax.f32 %v15438_v57, 0.0 }
 0x71a   : > { %v6206_v46 = vmax.f32 %v6204_v61, %v6205_v1  ;;  %v6212_v43 = vrot.slane %v6211_v47, 4  ;;  %v6198_v35 = vrot.slane %v6197_v60, 4  ;;  %v5921_v21 = vcombine.high %v5857_v38, %v5857_v38 }
 0x71b   : > { %v6584_v56 = vsel %vm6575_vm7, %v16879_v58, %v6583_v24  ;;  %v6192_v28 = vmax.f32 %v6190_v36, %v6191_v31  ;;  %v6232_v7 = vsel %vm4136_vm6, %v5857_v38, -inf  ;;  %v5920_v22 = vcombine.high %v5856_v53, %v5856_v53 }
 0x71c   : > { %v6218_v33 = vsel %vm4136_vm6, %v5856_v53, -inf  ;;  %v6207_v41 = vrot.slane %v6206_v46, 2  ;;  %v6213_v2 = vmax.f32 %v6211_v47, %v6212_v43  ;;  %v6199_v10 = vmax.f32 %v6197_v60, %v6198_v35 }
 0x71d   : > { %v6233_v45 = vrot.slane %v6232_v7, 4  ;;  %v6193_v51 = vrot.slane %v6192_v28, 2  ;;  %v6239_v44 = vsel %vm4136_vm6, %v5921_v21, -inf  ;;  %v6219_v16 = vrot.slane %v6218_v33, 4 }
 0x71e   : > { %v6225_v24 = vsel %vm4136_vm6, %v5920_v22, -inf  ;;  %v6208_v61 = vmax.f32 %v6206_v46, %v6207_v41  ;;  %v6214_v1 = vrot.slane %v6213_v2, 2  ;;  %v6200_v58 = vrot.slane %v6199_v10, 2 }
 0x71f   : > { %v6234_v23 = vmax.f32 %v6232_v7, %v6233_v45  ;;  %v6194_v31 = vmax.f32 %v6192_v28, %v6193_v51  ;;  %v6240_v36 = vrot.slane %v6239_v44, 4  ;;  %v6220_v38 = vmax.f32 %v6218_v33, %v6219_v16 }
 0x720   : > { %v6226_v6 = vrot.slane %v6225_v24, 4  ;;  %v6209_v40 = vrot.slane %v6208_v61, 1  ;;  %v6215_v53 = vmax.f32 %v6213_v2, %v6214_v1  ;;  %v6201_v54 = vmax.f32 %v6199_v10, %v6200_v58 }
 0x721   : > { %v6235_v47 = vrot.slane %v6234_v23, 2  ;;  %v6195_v35 = vrot.slane %v6194_v31, 1  ;;  %v15658_v60 = vmax.f32 %v6239_v44, %v6240_v36  ;;  %v6221_v43 = vrot.slane %v6220_v38, 2 }
 0x722   : > { %v6227_v21 = vmax.f32 %v6225_v24, %v6226_v6  ;;  %v15660_v5 = vmax.f32 %v6208_v61, %v6209_v40  ;;  %v6216_v22 = vrot.slane %v6215_v53, 1  ;;  %v6202_v46 = vrot.slane %v6201_v54, 1 }
 0x723   : > { %v15662_v41 = vmax.f32 %v6234_v23, %v6235_v47  ;;  %v15664_v7 = vmax.f32 %v6194_v31, %v6195_v35  ;;  %v6222_v51 = vmax.f32 %v6220_v38, %v6221_v43  ;;  %v16883_v23 = vmax.f32 %v15440_v30, 0.0 }
 0x724   : > { %v6228_v28 = vrot.slane %v6227_v21, 2  ;;  %v15667_v33 = vmax.f32 %v6215_v53, %v6216_v22  ;;  %v15670_v10 = vmax.f32 %v6201_v54, %v6202_v46  ;;  %v5785_v54 = vadd.f32 %v15452_v39, %v15336_v37 }
 0x725   : > { %16880 = vst [vmem:[#allocation57_spill] sm:$0xff] %v15664_v7  ;;  %v16713_v40 = vmax.f32 %v15664_v7, 0.0  ;;  %v6223_v45 = vrot.slane %v6222_v51, 1  ;;  %v6585_v24 = vsel %vm6577_vm5, %v16883_v23, %v6584_v56  ;;  %v5780_v58 = vadd.f32 %v15336_v37, %v15461_v14 }
 0x726   : > { %16881 = vst [vmem:[#allocation58_spill] sm:$0xff] %v15667_v33  ;;  %16882 = vst [vmem:[#allocation59_spill] sm:$0xff] %v15670_v10  ;;  %v15674_v44 = vmax.f32 %v6227_v21, %v6228_v28  ;;  %v16712_v1 = vmax.f32 %v15670_v10, 0.0  ;;  %10447 = vmatmul.mubr.f32.vlgmr.msra.gmra.mrb[14].mxu1 %v6585_v24  ;;  %v5795_v38 = vadd.f32 %v15480_v15, %v15336_v37  ;;  %v16885_v47 = vrot.slane %v15531_v25, 1 }
 0x727   : > { %v15685_v31 = vmax.f32 %v6222_v51, %v6223_v45  ;;  %v5790_v56 = vadd.f32 %v15336_v37, %v15486_v62  ;;  %v5859_v39 = vadd.f32 %v5785_v54, %v14880_v19  ;;  %v5858_v14 = vadd.f32 %v5780_v58, %v14874_v17 }
 0x728   : > { %v15697_v53 = vsel %vm6565_vm14, %v16712_v1, %v16713_v40  ;;  %v15704_v35 = vmax.f32 %v15531_v25, %v16885_v47  ;;  %v5861_v62 = vadd.f32 %v5795_v38, %v14894_v29  ;;  %v16886_v21 = vrot.slane %v15510_v34, 1 }
 0x729   : > { %16884 = vst [vmem:[#allocation60_spill] sm:$0xff] %v15685_v31  ;;  %v5860_v43 = vadd.f32 %v5790_v56, %v14888_v3  ;;  %v5923_v46 = vcombine.high %v5859_v39, %v5859_v39  ;;  %v6260_v19 = vsel %vm4136_vm6, %v5859_v39, -inf  ;;  %v5922_v17 = vcombine.high %v5858_v14, %v5858_v14 }
 0x72a   : > { %v15712_v22 = vmax.f32 %v15510_v34, %v16886_v21  ;;  %v6246_v51 = vsel %vm4136_vm6, %v5858_v14, -inf  ;;  %v6261_v28 = vrot.slane %v6260_v19, 4  ;;  %v5925_v45 = vcombine.high %v5861_v62, %v5861_v62 }
 0x72b   : > { %v6247_v25 = vrot.slane %v6246_v51, 4  ;;  %v6288_v23 = vsel %vm4136_vm6, %v5861_v62, -inf  ;;  %v6267_v29 = vsel %vm4136_vm6, %v5923_v46, -inf  ;;  %v6253_v3 = vsel %vm4136_vm6, %v5922_v17, -inf }
 0x72c   : > { %16887 = vst [vmem:[#allocation61_spill] sm:$0xff] %v15712_v22  ;;  %v6289_v24 = vrot.slane %v6288_v23, 4  ;;  %v5924_v54 = vcombine.high %v5860_v43, %v5860_v43  ;;  %v6262_v58 = vmax.f32 %v6260_v19, %v6261_v28  ;;  %v6268_v34 = vrot.slane %v6267_v29, 4 }
 0x72d   : > { %v6248_v38 = vmax.f32 %v6246_v51, %v6247_v25  ;;  %v6254_v56 = vrot.slane %v6253_v3, 4  ;;  %v6295_v39 = vsel %vm4136_vm6, %v5925_v45, -inf  ;;  %v6274_v14 = vsel %vm4136_vm6, %v5860_v43, -inf }
 0x72e   : > { %v6290_v47 = vmax.f32 %v6288_v23, %v6289_v24  ;;  %v6281_v21 = vsel %vm4136_vm6, %v5924_v54, -inf  ;;  %v6263_v1 = vrot.slane %v6262_v58, 2  ;;  %v6269_v40 = vmax.f32 %v6267_v29, %v6268_v34 }
 0x72f   : > { %v6249_v62 = vrot.slane %v6248_v38, 2  ;;  %v6255_v15 = vmax.f32 %v6253_v3, %v6254_v56  ;;  %v6296_v61 = vrot.slane %v6295_v39, 4  ;;  %v6275_v17 = vrot.slane %v6274_v14, 4 }
 0x730   : > { %v6291_v46 = vrot.slane %v6290_v47, 2  ;;  %v6282_v2 = vrot.slane %v6281_v21, 4  ;;  %v6264_v16 = vmax.f32 %v6262_v58, %v6263_v1  ;;  %v6270_v19 = vrot.slane %v6269_v40, 2 }
 0x731   : > { %v6250_v28 = vmax.f32 %v6248_v38, %v6249_v62  ;;  %v6256_v51 = vrot.slane %v6255_v15, 2  ;;  %v6297_v23 = vmax.f32 %v6295_v39, %v6296_v61  ;;  %v6276_v24 = vmax.f32 %v6274_v14, %v6275_v17 }
 0x732   : > { %v6292_v25 = vmax.f32 %v6290_v47, %v6291_v46  ;;  %v6283_v45 = vmax.f32 %v6281_v21, %v6282_v2  ;;  %v6265_v6 = vrot.slane %v6264_v16, 1  ;;  %v6271_v43 = vmax.f32 %v6269_v40, %v6270_v19 }
 0x733   : > { %v6251_v36 = vrot.slane %v6250_v28, 1  ;;  %v6257_v54 = vmax.f32 %v6255_v15, %v6256_v51  ;;  %v6298_v29 = vrot.slane %v6297_v23, 2  ;;  %v6277_v34 = vrot.slane %v6276_v24, 2 }
 0x734   : > { %v6293_v10 = vrot.slane %v6292_v25, 1  ;;  %v6284_v3 = vrot.slane %v6283_v45, 2  ;;  %v15722_v56 = vmax.f32 %v6264_v16, %v6265_v6  ;;  %v6272_v7 = vrot.slane %v6271_v43, 1 }
 0x735   : > { %v15724_v48 = vmax.f32 %v6250_v28, %v6251_v36  ;;  %v6258_v1 = vrot.slane %v6257_v54, 1  ;;  %v15728_v38 = vmax.f32 %v6297_v23, %v6298_v29  ;;  %v6278_v61 = vmax.f32 %v6276_v24, %v6277_v34 }
 0x736   : > { %16888 = vst [vmem:[#allocation62_spill] sm:$0xff] %v15722_v56  ;;  %v15726_v58 = vmax.f32 %v6292_v25, %v6293_v10  ;;  %v6285_v2 = vmax.f32 %v6283_v45, %v6284_v3  ;;  %v15730_v47 = vmax.f32 %v6271_v43, %v6272_v7  ;;  %v16717_v40 = vmax.f32 %v15722_v56, 0.0  ;;  %v16898_v43 = vld [vmem:[#allocation40_spill] sm:$0xff] }
 0x737   : > { %16889 = vst [vmem:[#allocation63_spill] sm:$0xff] %v15724_v48  ;;  %v15733_v15 = vmax.f32 %v6257_v54, %v6258_v1  ;;  %v16719_v39 = vmax.f32 %v15724_v48, 0.0  ;;  %v6279_v36 = vrot.slane %v6278_v61, 1  ;;  %v16893_v62 = vrot.slane %v15503_v18, 2 }
 0x738   : > { %16890 = vst [vmem:[#allocation64_spill] sm:$0xff] %v15726_v58  ;;  %16891 = vst [vmem:[#allocation65_spill] sm:$0xff] %v15730_v47  ;;  %v6286_v14 = vrot.slane %v6285_v2, 1  ;;  %v16721_v46 = vmax.f32 %v15704_v35, 0.0  ;;  %v16720_v28 = vmax.f32 %v15712_v22, 0.0  ;;  %v16896_v51 = vmax.f32 %v15499_v52, 0.0 }
 0x739   : > { %16892 = vst [vmem:[#allocation66_spill] sm:$0xff] %v15733_v15  ;;  %v16718_v21 = vmax.f32 %v15733_v15, 0.0  ;;  %v6131_v7 = vmax.f32 %v15503_v18, %v16893_v62  ;;  %v15744_v17 = vmax.f32 %v6278_v61, %v6279_v36  ;;  %v16897_v24 = vmax.f32 %v15507_v59, 0.0  ;;  %v16901_v36 = vld [vmem:[#allocation26_spill] sm:$0xff]  ;;  %v16902_v62 = vld [vmem:[#allocation41_spill] sm:$0xff] }
 0x73a   : > { %v15746_v19 = vmax.f32 %v6285_v2, %v6286_v14  ;;  %v6587_v25 = vsel %vm6567_vm15, %v16896_v51, %v15539_v55  ;;  %v5805_v54 = vadd.f32 %v16898_v43, %v15336_v37  ;;  %v16899_v3 = vmax.f32 %v15547_v49, 0.0 }
 0x73b   : > { %16894 = vst [vmem:[#allocation67_spill] sm:$0xff] %v15744_v17  ;;  %v6607_v18 = vsel %vm6565_vm14, %v16718_v21, %v16719_v39  ;;  %v6132_v23 = vrot.slane %v6131_v7, 1  ;;  %v6588_v45 = vsel %vm6569_vm2, %v16897_v24, %v6587_v25  ;;  %v5800_v51 = vadd.f32 %v15336_v37, %v16902_v62  ;;  %v16903_v24 = vld [vmem:[#allocation42_spill] sm:$0xff]  ;;  %v16909_v39 = vld [vmem:[#allocation32_spill] sm:$0xff] }
 0x73c   : > { %16895 = vst [vmem:[#allocation68_spill] sm:$0xff] %v15746_v19  ;;  %v15766_v29 = vsel %vm6567_vm15, %v16717_v40, %v6607_v18  ;;  %v6589_v1 = vsel %vm6571_vm3, %v16899_v3, %v6588_v45  ;;  %v5863_v14 = vadd.f32 %v5805_v54, %v16901_v36  ;;  %v15785_v18 = vld [vmem:[%s16807_s8] ss:$0 sm:$0xff]  ;;  %v16905_v43 = vrot.slane %v15565_v50, 1  ;;  %v16907_v36 = vld [vmem:[#allocation25_spill] sm:$0xff]  ;;  %v16908_v40 = vld [vmem:[#allocation27_spill] sm:$0xff] }
 0x73d   : > { %v15773_v61 = vmax.f32 %v6131_v7, %v6132_v23  ;;  %v6590_v2 = vsel %vm6573_vm4, %v16721_v46, %v6589_v1  ;;  %v5815_v45 = vadd.f32 %v15785_v18, %v16903_v24  ;;  %v16904_v7 = vld [vmem:[#allocation43_spill] sm:$0xff] }
 0x73e   : > { %v6591_v25 = vsel %vm6575_vm7, %v16720_v28, %v6590_v2  ;;  %v5810_v23 = vadd.f32 %v15785_v18, %v16904_v7  ;;  %v15794_v3 = vmax.f32 %v15565_v50, %v16905_v43  ;;  %v5927_v37 = vcombine.high %v5863_v14, %v5863_v14 }
 0x73f   : > { %16900 = vst [vmem:[#allocation40_spill] sm:$0xff] %v15773_v61  ;;  %v16722_v54 = vmax.f32 %v15773_v61, 0.0  ;;  %v6316_v1 = vsel %vm4136_vm6, %v5863_v14, -inf  ;;  %v5862_v2 = vadd.f32 %v5800_v51, %v16907_v36  ;;  %v5865_v21 = vadd.f32 %v5815_v45, %v16908_v40 }
 0x740   : > { %16906 = vst [vmem:[#allocation26_spill] sm:$0xff] %v15794_v3  ;;  %v6317_v62 = vrot.slane %v6316_v1, 4  ;;  %v5864_v24 = vadd.f32 %v5810_v23, %v16909_v39  ;;  %v6323_v50 = vsel %vm4136_vm6, %v5927_v37, -inf }
 0x741   : > { %v6592_v7 = vsel %vm6577_vm5, %v16722_v54, %v6591_v25  ;;  %v5926_v43 = vcombine.high %v5862_v2, %v5862_v2  ;;  %v6302_v46 = vsel %vm4136_vm6, %v5862_v2, -inf  ;;  %v6324_v6 = vrot.slane %v6323_v50, 4 }
 0x742   : > { %10449 = vmatprep.mubr.f32.mxu1 %v6592_v7  ;;  %v6318_v14 = vmax.f32 %v6316_v1, %v6317_v62  ;;  %v6303_v51 = vrot.slane %v6302_v46, 4  ;;  %v5929_v36 = vcombine.high %v5865_v21, %v5865_v21  ;;  %v6344_v39 = vsel %vm4136_vm6, %v5865_v21, -inf }
 0x743   : > { %v6309_v40 = vsel %vm4136_vm6, %v5926_v43, -inf  ;;  %v5928_v45 = vcombine.high %v5864_v24, %v5864_v24  ;;  %v6330_v23 = vsel %vm4136_vm6, %v5864_v24, -inf  ;;  %v6325_v55 = vmax.f32 %v6323_v50, %v6324_v6 }
 0x744   : > { %v6319_v34 = vrot.slane %v6318_v14, 2  ;;  %v6304_v25 = vmax.f32 %v6302_v46, %v6303_v51  ;;  %v6310_v54 = vrot.slane %v6309_v40, 4  ;;  %v6345_v37 = vrot.slane %v6344_v39, 4 }
 0x745   : > { %v6351_v10 = vsel %vm4136_vm6, %v5929_v36, -inf  ;;  %v6331_v2 = vrot.slane %v6330_v23, 4  ;;  %v6337_v1 = vsel %vm4136_vm6, %v5928_v45, -inf  ;;  %v6326_v7 = vrot.slane %v6325_v55, 2 }
 0x746   : > { %v6320_v62 = vmax.f32 %v6318_v14, %v6319_v34  ;;  %v6305_v16 = vrot.slane %v6304_v25, 2  ;;  %v6311_v28 = vmax.f32 %v6309_v40, %v6310_v54  ;;  %v6346_v43 = vmax.f32 %v6344_v39, %v6345_v37 }
 0x747   : > { %v6352_v56 = vrot.slane %v6351_v10, 4  ;;  %v6332_v21 = vmax.f32 %v6330_v23, %v6331_v2  ;;  %v6338_v15 = vrot.slane %v6337_v1, 4  ;;  %v6327_v24 = vmax.f32 %v6325_v55, %v6326_v7 }
 0x748   : > { %v6321_v48 = vrot.slane %v6320_v62, 1  ;;  %v6306_v4 = vmax.f32 %v6304_v25, %v6305_v16  ;;  %v6312_v6 = vrot.slane %v6311_v28, 2  ;;  %v6347_v46 = vrot.slane %v6346_v43, 2 }
 0x749   : > { %v15812_v50 = vmax.f32 %v6351_v10, %v6352_v56  ;;  %v6333_v51 = vrot.slane %v6332_v21, 2  ;;  %v6339_v36 = vmax.f32 %v6337_v1, %v6338_v15  ;;  %v6328_v45 = vrot.slane %v6327_v24, 1 }
 0x74a   : > { %v15814_v61 = vmax.f32 %v6320_v62, %v6321_v48  ;;  %v6307_v34 = vrot.slane %v6306_v4, 1  ;;  %v6313_v14 = vmax.f32 %v6311_v28, %v6312_v6  ;;  %v15816_v22 = vmax.f32 %v6346_v43, %v6347_v46  ;;  %v16918_v6 = vld [vmem:[#allocation46_spill] sm:$0xff] }
 0x74b   : > { %v6334_v40 = vmax.f32 %v6332_v21, %v6333_v51  ;;  %v6340_v39 = vrot.slane %v6339_v36, 2  ;;  %v15819_v23 = vmax.f32 %v6327_v24, %v6328_v45  ;;  %v16913_v28 = vmax.f32 %v15562_v8, 0.0  ;;  %v16920_v45 = vld [vmem:[#allocation47_spill] sm:$0xff] }
 0x74c   : > { %16910 = vst [vmem:[#allocation41_spill] sm:$0xff] %v15814_v61  ;;  %v15822_v55 = vmax.f32 %v6306_v4, %v6307_v34  ;;  %v6314_v56 = vrot.slane %v6313_v14, 1  ;;  %v16915_v4 = vmax.f32 %v15597_v12, 0.0  ;;  %v16917_v21 = vmax.f32 %v15621_v27, 0.0 }
 0x74d   : > { %16911 = vst [vmem:[#allocation42_spill] sm:$0xff] %v15819_v23  ;;  %v6335_v48 = vrot.slane %v6334_v40, 1  ;;  %v15825_v10 = vmax.f32 %v6339_v36, %v6340_v39  ;;  %v6595_v25 = vsel %vm6569_vm2, %v16913_v28, %v15619_v42  ;;  %v5825_v42 = vadd.f32 %v15785_v18, %v16918_v6  ;;  %v16923_v28 = vld [vmem:[#allocation29_spill] sm:$0xff] }
 0x74e   : > { %16912 = vst [vmem:[#allocation43_spill] sm:$0xff] %v15822_v55  ;;  %v15832_v2 = vmax.f32 %v6313_v14, %v6314_v56  ;;  %v16730_v1 = vmax.f32 %v15822_v55, 0.0  ;;  %v6596_v62 = vsel %vm6571_vm3, %v16915_v4, %v6595_v25  ;;  %v16919_v51 = vmax.f32 %v15575_v32, 0.0  ;;  %v16921_v14 = vld [vmem:[#allocation48_spill] sm:$0xff]  ;;  %v16924_v4 = vld [vmem:[#allocation49_spill] sm:$0xff] }
 0x74f   : > { %v15838_v7 = vmax.f32 %v6334_v40, %v6335_v48  ;;  %v6597_v24 = vsel %vm6573_vm4, %v16917_v21, %v6596_v62  ;;  %v5820_v34 = vadd.f32 %v15785_v18, %v16920_v45  ;;  %v5835_v40 = vadd.f32 %v15785_v18, %v16921_v14 }
 0x750   : > { %16914 = vst [vmem:[#allocation25_spill] sm:$0xff] %v15832_v2  ;;  %v16729_v46 = vmax.f32 %v15832_v2, 0.0  ;;  %v6598_v36 = vsel %vm6575_vm7, %v16919_v51, %v6597_v24  ;;  %v16922_v56 = vmax.f32 %v15794_v3, 0.0  ;;  %v5867_v25 = vadd.f32 %v5825_v42, %v16923_v28  ;;  %v16925_v24 = vld [vmem:[#allocation28_spill] sm:$0xff]  ;;  %v16926_v51 = vld [vmem:[#allocation31_spill] sm:$0xff] }
 0x751   : > { %16916 = vst [vmem:[#allocation27_spill] sm:$0xff] %v15838_v7  ;;  %v5830_v62 = vadd.f32 %v15785_v18, %v16924_v4  ;;  %v5866_v6 = vadd.f32 %v5820_v34, %v16925_v24  ;;  %v5869_v45 = vadd.f32 %v5835_v40, %v16926_v51  ;;  %v16927_v14 = vrot.slane %v15674_v44, 1 }
 0x752   : > { %v6599_v48 = vsel %vm6577_vm5, %v16922_v56, %v6598_v36  ;;  %v15866_v21 = vsel %vm6565_vm14, %v16729_v46, %v16730_v1  ;;  %v5931_v42 = vcombine.high %v5867_v25, %v5867_v25  ;;  %v6372_v18 = vsel %vm4136_vm6, %v5867_v25, -inf  ;;  %v16929_v56 = vld [vmem:[#allocation30_spill] sm:$0xff] }
 0x753   : > { %10450 = vmatmul.mubr.f32.gmra.mrb[16].mxu1 %v6599_v48  ;;  %v15873_v36 = vmax.f32 %v15674_v44, %v16927_v14  ;;  %v5868_v28 = vadd.f32 %v5830_v62, %v16929_v56  ;;  %v16930_v4 = vrot.slane %v15662_v41, 1  ;;  %v6373_v48 = vrot.slane %v6372_v18, 4 }
 0x754   : > { %v5930_v1 = vcombine.high %v5866_v6, %v5866_v6  ;;  %v6358_v34 = vsel %vm4136_vm6, %v5866_v6, -inf  ;;  %v5933_v40 = vcombine.high %v5869_v45, %v5869_v45  ;;  %v6379_v24 = vsel %vm4136_vm6, %v5931_v42, -inf }
 0x755   : > { %16928 = vst [vmem:[#allocation32_spill] sm:$0xff] %v15873_v36  ;;  %v15880_v46 = vmax.f32 %v15662_v41, %v16930_v4  ;;  %v6359_v51 = vrot.slane %v6358_v34, 4  ;;  %v6400_v44 = vsel %vm4136_vm6, %v5869_v45, -inf  ;;  %v5932_v14 = vcombine.high %v5868_v28, %v5868_v28 }
 0x756   : > { %v6374_v39 = vmax.f32 %v6372_v18, %v6373_v48  ;;  %v6380_v25 = vrot.slane %v6379_v24, 4  ;;  %v6365_v62 = vsel %vm4136_vm6, %v5930_v1, -inf  ;;  %v6401_v56 = vrot.slane %v6400_v44, 4 }
 0x757   : > { %16931 = vst [vmem:[#allocation46_spill] sm:$0xff] %v15880_v46  ;;  %v6360_v37 = vmax.f32 %v6358_v34, %v6359_v51  ;;  %v6366_v16 = vrot.slane %v6365_v62, 4  ;;  %v6407_v41 = vsel %vm4136_vm6, %v5933_v40, -inf  ;;  %v6386_v4 = vsel %vm4136_vm6, %v5868_v28, -inf }
 0x758   : > { %v6375_v54 = vrot.slane %v6374_v39, 2  ;;  %v6381_v6 = vmax.f32 %v6379_v24, %v6380_v25  ;;  %v6402_v15 = vmax.f32 %v6400_v44, %v6401_v56  ;;  %v6408_v43 = vrot.slane %v6407_v41, 4 }
 0x759   : > { %v6361_v42 = vrot.slane %v6360_v37, 2  ;;  %v6367_v2 = vmax.f32 %v6365_v62, %v6366_v16  ;;  %v6387_v55 = vrot.slane %v6386_v4, 4  ;;  %v6393_v45 = vsel %vm4136_vm6, %v5932_v14, -inf }
 0x75a   : > { %v6376_v18 = vmax.f32 %v6374_v39, %v6375_v54  ;;  %v6382_v48 = vrot.slane %v6381_v6, 2  ;;  %v6403_v3 = vrot.slane %v6402_v15, 2  ;;  %v6409_v1 = vmax.f32 %v6407_v41, %v6408_v43 }
 0x75b   : > { %v6362_v32 = vmax.f32 %v6360_v37, %v6361_v42  ;;  %v6368_v34 = vrot.slane %v6367_v2, 2  ;;  %v6388_v51 = vmax.f32 %v6386_v4, %v6387_v55  ;;  %v6394_v27 = vrot.slane %v6393_v45, 4 }
 0x75c   : > { %v6377_v40 = vrot.slane %v6376_v18, 1  ;;  %v6383_v12 = vmax.f32 %v6381_v6, %v6382_v48  ;;  %v6404_v28 = vmax.f32 %v6402_v15, %v6403_v3  ;;  %v6410_v8 = vrot.slane %v6409_v1, 2 }
 0x75d   : > { %v6363_v24 = vrot.slane %v6362_v32, 1  ;;  %v6369_v44 = vmax.f32 %v6367_v2, %v6368_v34  ;;  %v6389_v25 = vrot.slane %v6388_v51, 2  ;;  %v6395_v56 = vmax.f32 %v6393_v45, %v6394_v27 }
 0x75e   : > { %v15889_v16 = vmax.f32 %v6376_v18, %v6377_v40  ;;  %v6384_v62 = vrot.slane %v6383_v12, 1  ;;  %v6405_v14 = vrot.slane %v6404_v28, 1  ;;  %v6411_v54 = vmax.f32 %v6409_v1, %v6410_v8 }
 0x75f   : > { %v15891_v39 = vmax.f32 %v6362_v32, %v6363_v24  ;;  %v6370_v43 = vrot.slane %v6369_v44, 1  ;;  %v6390_v37 = vmax.f32 %v6388_v51, %v6389_v25  ;;  %v6396_v41 = vrot.slane %v6395_v56, 2 }
 0x760   : > { %16932 = vst [vmem:[#allocation47_spill] sm:$0xff] %v15889_v16  ;;  %v15893_v55 = vmax.f32 %v6383_v12, %v6384_v62  ;;  %v16738_v4 = vmax.f32 %v15889_v16, 0.0  ;;  %v15896_v3 = vmax.f32 %v6404_v28, %v6405_v14  ;;  %v6412_v15 = vrot.slane %v6411_v54, 1 }
 0x761   : > { %16933 = vst [vmem:[#allocation48_spill] sm:$0xff] %v15891_v39  ;;  %v15898_v2 = vmax.f32 %v6369_v44, %v6370_v43  ;;  %v16740_v27 = vmax.f32 %v15891_v39, 0.0  ;;  %v6391_v6 = vrot.slane %v6390_v37, 1  ;;  %v6397_v42 = vmax.f32 %v6395_v56, %v6396_v41 }
 0x762   : > { %16934 = vst [vmem:[#allocation29_spill] sm:$0xff] %v15893_v55  ;;  %16935 = vst [vmem:[#allocation49_spill] sm:$0xff] %v15896_v3  ;;  %v16747_v8 = vmax.f32 %v15893_v55, 0.0  ;;  %v16744_v32 = vmax.f32 %v15896_v3, 0.0  ;;  %v16937_v45 = vrot.slane %v15658_v60, 2  ;;  %v16752_v18 = vmax.f32 %v15873_v36, 0.0 }
 0x763   : > { %16936 = vst [vmem:[#allocation28_spill] sm:$0xff] %v15898_v2  ;;  %v16739_v48 = vmax.f32 %v15898_v2, 0.0  ;;  %v15908_v1 = vmax.f32 %v6390_v37, %v6391_v6  ;;  %v6398_v34 = vrot.slane %v6397_v42, 1  ;;  %v16741_v51 = vmax.f32 %v15880_v46, 0.0 }
 0x764   : > { %v6243_v12 = vmax.f32 %v15658_v60, %v16937_v45  ;;  %v16939_v28 = vmax.f32 %v15660_v5, 0.0  ;;  %v16940_v44 = vrot.slane %v15728_v38, 1  ;;  %v16942_v60 = vmax.f32 %v15730_v47, 0.0 }
 0x765   : > { %16938 = vst [vmem:[#allocation31_spill] sm:$0xff] %v15908_v1  ;;  %v6621_v62 = vsel %vm6565_vm14, %v16739_v48, %v16740_v27  ;;  %v15929_v14 = vmax.f32 %v6397_v42, %v6398_v34  ;;  %v16944_v43 = vmax.f32 %v15667_v33, 0.0  ;;  %v16946_v41 = vmax.f32 %v15685_v31, 0.0  ;;  %v8994_v48 = vld [vmem:[%s12108_s24 + $0x50] sm:$0xff] }
 0x766   : > { %v6244_v40 = vrot.slane %v6243_v12, 1  ;;  %v6601_v24 = vsel %vm6567_vm15, %v16939_v28, %v15697_v53  ;;  %v15918_v25 = vmax.f32 %v15728_v38, %v16940_v44  ;;  %v6609_v56 = vsel %vm6569_vm2, %v16942_v60, %v15766_v29 }
 0x767   : > { %16943 = vst [vmem:[#allocation69_spill] sm:$0xff] %v15929_v14  ;;  %v16746_v53 = vmax.f32 %v15908_v1, 0.0  ;;  %v6602_v38 = vsel %vm6569_vm2, %v16944_v43, %v6601_v24  ;;  %v6622_v37 = vsel %vm6567_vm15, %v16738_v4, %v6621_v62  ;;  %v16745_v45 = vmax.f32 %v15929_v14, 0.0 }
 0x768   : > { %16941 = vst [vmem:[#allocation30_spill] sm:$0xff] %v15918_v25  ;;  %v15938_v29 = vmax.f32 %v6243_v12, %v6244_v40  ;;  %v6603_v6 = vsel %vm6571_vm3, %v16946_v41, %v6602_v38  ;;  %v16742_v42 = vmax.f32 %v15918_v25, 0.0  ;;  %v16947_v28 = vmax.f32 %v15744_v17, 0.0 }
 0x769   : > { %v6604_v34 = vsel %vm6573_vm4, %v16752_v18, %v6603_v6  ;;  %v16948_v40 = vrot.slane %v15825_v10, 1  ;;  %v16950_v62 = vmax.f32 %v15746_v19, 0.0  ;;  %v16951_v38 = vrot.slane %v15816_v22, 1 }
 0x76a   : > { %16945 = vst [vmem:[#allocation70_spill] sm:$0xff] %v15938_v29  ;;  %v6610_v12 = vsel %vm6571_vm3, %v16947_v28, %v6609_v56  ;;  %v16751_v44 = vmax.f32 %v15938_v29, 0.0  ;;  %v6605_v60 = vsel %vm6575_vm7, %v16741_v51, %v6604_v34  ;;  %v8992_v56 = vld [vmem:[%s12108_s24 + $0x40] sm:$0xff]  ;;  %v16953_v6 = vmax.f32 %v15726_v58, 0.0 }
 0x76b   : > { %v15954_v24 = vmax.f32 %v15825_v10, %v16948_v40  ;;  %v6611_v43 = vsel %vm6573_vm4, %v16950_v62, %v6610_v12  ;;  %v15966_v41 = vmax.f32 %v15816_v22, %v16951_v38  ;;  %v16954_v28 = vrot.slane %v15812_v50, 2  ;;  %v8993_v62 = vld [vmem:[%s12108_s24 + $0x48] sm:$0xff]  ;;  %v8995_v22 = vld [vmem:[%s12108_s24 + $0x58] sm:$0xff] }
 0x76c   : > { %v6612_v10 = vsel %vm6575_vm7, %v16953_v6, %v6611_v43  ;;  %v16955_v4 = vmax.f32 %v15814_v61, 0.0  ;;  %v6606_v38 = vsel %vm6577_vm5, %v16751_v44, %v6605_v60  ;;  %v16956_v6 = vmax.f32 %v15819_v23, 0.0  ;;  %v16964_v23 = vld [vmem:[#allocation33_spill] sm:$0xff] }
 0x76d   : > { %16949 = vst [vmem:[#allocation71_spill] sm:$0xff] %v15954_v24  ;;  %16952 = vst [vmem:[#allocation72_spill] sm:$0xff] %v15966_v41  ;;  %v6355_v40 = vmax.f32 %v15812_v50, %v16954_v28  ;;  %v16750_v34 = vmax.f32 %v15954_v24, 0.0  ;;  %v6613_v43 = vsel %vm6577_vm5, %v16742_v42, %v6612_v10  ;;  %v16749_v50 = vmax.f32 %v15966_v41, 0.0  ;;  %10452 = vmatprep.mubr.f32.mxu1 %v6606_v38 }
 0x76e   : > { %v6615_v12 = vsel %vm6567_vm15, %v16955_v4, %v15866_v21  ;;  %v16957_v4 = vmax.f32 %v15838_v7, 0.0  ;;  %v15996_v51 = vmax.f32 %v6411_v54, %v6412_v15  ;;  %v6623_v60 = vsel %vm6569_vm2, %v16747_v8, %v6622_v37  ;;  %10453 = vmatmul.mubr.f32.gmra.mrb[18].mxu1 %v6613_v43 }
 0x76f   : > { %v6616_v28 = vsel %vm6569_vm2, %v16956_v6, %v6615_v12  ;;  %v6356_v21 = vrot.slane %v6355_v40, 1  ;;  %v6624_v12 = vsel %vm6571_vm3, %v16746_v53, %v6623_v60  ;;  %v11107_v38 = vpack.c.bf16 %v8993_v62, %v8992_v56  ;;  %v8997_v56 = vld [vmem:[%s12108_s24 + $0x68] sm:$0xff]  ;;  %v6886_v60 = vld [vmem:[%s12108_s24] sm:$0xff] }
 0x770   : > { %v6617_v27 = vsel %vm6571_vm3, %v16957_v4, %v6616_v28  ;;  %16958 = vst [vmem:[#allocation73_spill] sm:$0xff] %v15996_v51  ;;  %v11111_v6 = vpack.c.bf16 %v8995_v22, %v8994_v48  ;;  %v6625_v54 = vsel %vm6573_vm4, %v16745_v45, %v6624_v12  ;;  %v16743_v37 = vmax.f32 %v15996_v51, 0.0  ;;  %v8996_v48 = vld [vmem:[%s12108_s24 + $0x60] sm:$0xff]  ;;  %v8998_v28 = vld [vmem:[%s12108_s24 + $0x70] sm:$0xff] }
 0x771   : > { %v6618_v10 = vsel %vm6573_vm4, %v16750_v34, %v6617_v27  ;;  %v16007_v42 = vmax.f32 %v6355_v40, %v6356_v21  ;;  %v6626_v27 = vsel %vm6575_vm7, %v16744_v32, %v6625_v54  ;;  %11108 = vmatprep.subr.bf16.mxu1 %v11107_v38  ;;  %v11115_v43 = vpack.c.bf16 %v8997_v56, %v8996_v48  ;;  %v8999_v21 = vld [vmem:[%s12108_s24 + $0x78] sm:$0xff] }
 0x772   : > { %v6619_v15 = vsel %vm6575_vm7, %v16749_v50, %v6618_v10  ;;  %11110 = vmatpush3.bf16.msra.mxu1 %v11107_v38  ;;  %v6627_v62 = vsel %vm6577_vm5, %v16743_v37, %v6626_v27  ;;  %v11119_v4 = vpack.c.bf16 %v8999_v21, %v8998_v28  ;;  %v6887_v10 = vld [vmem:[%s12108_s24 + $0x8] sm:$0xff]  ;;  %v8991_v38 = vld [vmem:[%s12103_s19] ss:$0 sm:$0xff]  ;;  %v6889_v27 = vld [vmem:[%s12108_s24 + $0x18] sm:$0xff]  ;;  %v16965_v61 = vmax.f32 %v16964_v23, 0.0 }
 0x773   : > { %16959 = vst [vmem:[#allocation74_spill] sm:$0xff] %v16007_v42  ;;  %v16748_v40 = vmax.f32 %v16007_v42, 0.0  ;;  %11112 = vmatprep.subr.bf16.mxu1 %v11111_v6  ;;  %v11123_v12 = vpack.c.bf16 %v6887_v10, %v6886_v60  ;;  %v6892_v21 = vld [vmem:[%s12108_s24 + $0x30] sm:$0xff]  ;;  %v9013_v10 = vld [vmem:[%s12108_s24 + $0x80] sm:$0xff]  ;;  %v9014_v37 = vld [vmem:[%s12108_s24 + $0x88] sm:$0xff]  ;;  %v16968_v29 = vmax.f32 %v15356_v20, 0.0 }
 0x774   : > { %v16970_v58 = vmax.f32 %v15397_v26, 0.0  ;;  %v16972_v20 = vmax.f32 %v15584_v63, 0.0 }
 0x775   : > { %v6620_v22 = vsel %vm6577_vm5, %v16748_v40, %v6619_v15  ;;  %v6888_v15 = vld [vmem:[%s12108_s24 + $0x10] sm:$0xff] }
 0x776   : > { %10455 = vmatprep.mubr.f32.mxu1 %v6620_v22  ;;  %11114 = vmatpush3.bf16.msra.mxu1 %v11111_v6  ;;  %v6890_v22 = vld [vmem:[%s12108_s24 + $0x20] sm:$0xff] }
 0x777   : > { %10456 = vmatmul.mubr.f32.gmra.mrb[20].mxu1 %v6627_v62  ;;  %11116 = vmatprep.subr.bf16.mxu1 %v11115_v43  ;;  %v11127_v62 = vpack.c.bf16 %v6889_v27, %v6888_v15 }
 0x77a   : > { %11118 = vmatpush3.bf16.msra.mxu1 %v11115_v43  ;;  %v6891_v43 = vld [vmem:[%s12108_s24 + $0x28] sm:$0xff] }
 0x77b   : > { %11120 = vmatprep.subr.bf16.mxu1 %v11119_v4  ;;  %v11131_v28 = vpack.c.bf16 %v6891_v43, %v6890_v22 }
 0x77e   : > { %11122 = vmatpush3.bf16.msra.mxu1 %v11119_v4  ;;  %v6893_v4 = vld [vmem:[%s12108_s24 + $0x38] sm:$0xff] }
 0x77f   : > { %11124 = vmatprep.subr.bf16.mxu1 %v11123_v12  ;;  %v11135_v60 = vpack.c.bf16 %v6893_v4, %v6892_v21 }
 0x7f9   : > { %v10448_v54 = vpop.f32.mrb[14].mxu1 }
 0x7fa   : > { %v6702_v6 = vpop.f32.mrb[15].mxu1  ;;  %v6708_v56 = vadd.f32 %v10448_v54, %v8991_v38  ;;  %v11139_v54 = vpack.c.bf16 %v9014_v37, %v9013_v10  ;;  %v9015_v10 = vld [vmem:[%s12108_s24 + $0x90] sm:$0xff] }
 0x7fb   : > { %v6703_v48 = vadd.f32 %v8991_v38, %v6702_v6 }
 0x7fd   : > { %10474 = vmatprep.mubr.msk.f32.mxu1 %vm4729_vm13, %v6703_v48 }
 0x7fe   : > { %10475 = vmatmul.mubr.msk.f32.vlgmr.msra.gmra.mrb[22].mxu1 %vm4729_vm13, %v6708_v56 }
 0x7ff   : > { %11126 = vmatpush3.bf16.msra.mxu1 %v11123_v12 }
 0x800   : > { %11128 = vmatprep.subr.bf16.mxu1 %v11127_v62 }
 0x803   : > { %11130 = vmatpush3.bf16.msra.mxu1 %v11127_v62 }
 0x804   : > { %11132 = vmatprep.subr.bf16.mxu1 %v11131_v28 }
 0x807   : > { %11134 = vmatpush3.bf16.msra.mxu1 %v11131_v28 }
 0x808   : > { %11136 = vmatprep.subr.bf16.mxu1 %v11135_v60 }
 0x80b   : > { %11138 = vmatpush3.bf16.msra.mxu1 %v11135_v60 }
 0x80c   : > { %11140 = vmatprep.subr.bf16.mxu1 %v11139_v54 }
 0x826   : > { %v10451_v15 = vpop.f32.mrb[16].mxu1 }
 0x827   : > { %v6712_v27 = vpop.f32.mrb[17].mxu1  ;;  %v6718_v12 = vadd.f32 %v10451_v15, %v8991_v38  ;;  %v9016_v15 = vld [vmem:[%s12108_s24 + $0x98] sm:$0xff] }
 0x828   : > { %v6713_v6 = vadd.f32 %v8991_v38, %v6712_v27  ;;  %v11143_v27 = vpack.c.bf16 %v9016_v15, %v9015_v10  ;;  %v7092_v10 = vld [vmem:[%s16808_s6 + $0x18] sm:$0xff]  ;;  %v7093_v15 = vld [vmem:[%s16808_s6 + $0x20] sm:$0xff] }
 0x82a   : > { %10477 = vmatprep.mubr.msk.f32.mxu1 %vm4729_vm13, %v6713_v6 }
 0x82b   : > { %10478 = vmatmul.mubr.msk.f32.gmra.mrb[24].mxu1 %vm4729_vm13, %v6718_v12 }
 0x841   : > { %v10454_v62 = vpop.f32.mrb[18].mxu1 }
 0x842   : > { %v6722_v22 = vpop.f32.mrb[19].mxu1  ;;  %v6728_v28 = vadd.f32 %v10454_v62, %v8991_v38  ;;  %v9017_v62 = vld [vmem:[%s12108_s24 + $0xa0] sm:$0xff] }
 0x843   : > { %v6723_v43 = vadd.f32 %v8991_v38, %v6722_v22  ;;  %v9018_v22 = vld [vmem:[%s12108_s24 + $0xa8] sm:$0xff] }
 0x845   : > { %10480 = vmatprep.mubr.msk.f32.mxu1 %vm4729_vm13, %v6723_v43 }
 0x846   : > { %10481 = vmatmul.mubr.msk.f32.gmra.mrb[26].mxu1 %vm4729_vm13, %v6728_v28 }
 0x84a   : > { %v10457_v37 = vpop.f32.mrb[20].mxu1 }
 0x84b   : > { %v6732_v21 = vpop.f32.mrb[21].mxu1  ;;  %v6738_v60 = vadd.f32 %v10457_v37, %v8991_v38  ;;  %v9019_v37 = vld [vmem:[%s12108_s24 + $0xb0] sm:$0xff] }
 0x84c   : > { %v6733_v4 = vadd.f32 %v8991_v38, %v6732_v21  ;;  %v11147_v38 = vpack.c.bf16 %v9018_v22, %v9017_v62  ;;  %v9020_v21 = vld [vmem:[%s12108_s24 + $0xb8] sm:$0xff] }
 0x84e   : > { %10483 = vmatprep.mubr.msk.f32.mxu1 %vm4729_vm13, %v6733_v4 }
 0x84f   : > { %10484 = vmatmul.mubr.msk.f32.gmra.mrb[28].mxu1 %vm4729_vm13, %v6738_v60 }
 0x850   : > { %10502 = vmatprep.mubr.msk.f32.mxu1 %vm4729_vm13, %v6703_v48  ;;  %v11151_v48 = vpack.c.bf16 %v9020_v21, %v9019_v37 }
 0x853   : > { %10503 = vmatmul.mubr.msk.f32.vlgmr.msra.gmra.mrb[26].mxu1 %vm4729_vm13, %v6708_v56  ;;  %v7089_v56 = vld [vmem:[%s16808_s6] sm:$0xff] }
 0x854   : > { %11142 = vmatpush3.bf16.msra.mxu1 %v11139_v54  ;;  %10505 = vmatprep.mubr.msk.f32.mxu1 %vm4729_vm13, %v6713_v6  ;;  %v7090_v54 = vld [vmem:[%s16808_s6 + $0x8] sm:$0xff] }
 0x855   : > { %11144 = vmatprep.subr.bf16.mxu1 %v11143_v27  ;;  %v11155_v6 = vpack.c.bf16 %v7090_v54, %v7089_v56  ;;  %v9000_v56 = vld [vmem:[%s12113_s30] ss:$0 sm:$0xff] }
 0x857   : > { %10506 = vmatmul.mubr.msk.f32.gmra.mrb[28].mxu1 %vm4729_vm13, %v6718_v12  ;;  %v7091_v12 = vld [vmem:[%s16808_s6 + $0x10] sm:$0xff] }
 0x858   : > { %11146 = vmatpush3.bf16.msra.mxu1 %v11143_v27  ;;  %10524 = vmatprep.mubr.msk.f32.mxu1 %vm4729_vm13, %v6723_v43  ;;  %v11159_v43 = vpack.c.bf16 %v7092_v10, %v7091_v12  ;;  %v7094_v27 = vld [vmem:[%s16808_s6 + $0x28] sm:$0xff] }
 0x859   : > { %11148 = vmatprep.subr.bf16.mxu1 %v11147_v38  ;;  %v11163_v62 = vpack.c.bf16 %v7094_v27, %v7093_v15 }
 0x85c   : > { %11150 = vmatpush3.bf16.msra.mxu1 %v11147_v38 }
 0x85d   : > { %11152 = vmatprep.subr.bf16.mxu1 %v11151_v48 }
 0x860   : > { %11154 = vmatpush3.bf16.msra.mxu1 %v11151_v48 }
 0x861   : > { %11156 = vmatprep.subr.bf16.mxu1 %v11155_v6 }
 0x863   : > { %10525 = vmatmul.mubr.msk.f32.vlgmr.msra.gmra.mrb[22].mxu1 %vm4729_vm13, %v6728_v28  ;;  %v7095_v28 = vld [vmem:[%s16808_s6 + $0x30] sm:$0xff] }
 0x864   : > { %10527 = vmatprep.mubr.msk.f32.mxu1 %vm4729_vm13, %v6733_v4  ;;  %11158 = vmatpush3.bf16.msra.mxu1 %v11155_v6  ;;  %v7096_v4 = vld [vmem:[%s16808_s6 + $0x38] sm:$0xff] }
 0x865   : > { %11160 = vmatprep.subr.bf16.mxu1 %v11159_v43 }
 0x867   : > { %10528 = vmatmul.mubr.msk.f32.gmra.mrb[24].mxu1 %vm4729_vm13, %v6738_v60  ;;  %v11167_v60 = vpack.c.bf16 %v7096_v4, %v7095_v28 }
 0x868   : > { %11162 = vmatpush3.bf16.msra.mxu1 %v11159_v43 }
 0x869   : > { %11164 = vmatprep.subr.bf16.mxu1 %v11163_v62 }
 0x86c   : > { %11166 = vmatpush3.bf16.msra.mxu1 %v11163_v62 }
 0x86d   : > { %11168 = vmatprep.subr.bf16.mxu1 %v11167_v60 }
 0x870   : > { %11170 = vmatpush3.bf16.msra.mxu1 %v11167_v60 }
 0x926   : > { %v10504_v22 = vpop.f32.mrb[26].mxu1 }
 0x927   : > { %v6960_v38 = vpop.f32.mrb[27].mxu1  ;;  %v11359_v28 = vadd.f32 %v10504_v22, %v9000_v56  ;;  %v7555_v22 = vld [vmem:[%s16960_s23 + $0x10] sm:$0xff] }
 0x928   : > { %v11360_v62 = vadd.f32 %v9000_v56, %v6960_v38  ;;  %v7553_v38 = vld [vmem:[%s16960_s23] sm:$0xff] }
 0x92a   : > { %v10507_v37 = vpop.f32.mrb[28].mxu1 }
 0x92b   : > { %v6970_v21 = vpop.f32.mrb[29].mxu1  ;;  %v11361_v60 = vadd.f32 %v10507_v37, %v9000_v56 }
 0x92c   : > { %v11362_v4 = vadd.f32 %v9000_v56, %v6970_v21 }
 0x936   : > { %v10526_v48 = vpop.f32.mrb[22].mxu1 }
 0x937   : > { %v7054_v54 = vpop.f32.mrb[23].mxu1  ;;  %v11355_v6 = vadd.f32 %v10526_v48, %v9000_v56  ;;  %v7554_v48 = vld [vmem:[%s16960_s23 + $0x8] sm:$0xff] }
 0x938   : > { %v11356_v12 = vadd.f32 %v9000_v56, %v7054_v54  ;;  %v11171_v54 = vpack.c.bf16 %v7554_v48, %v7553_v38  ;;  %v7565_v48 = vld [vmem:[%s16960_s23 + $0x60] sm:$0xff] }
 0x93a   : > { %v10529_v10 = vpop.f32.mrb[24].mxu1  ;;  %10546 = vmatprep.mubr.msk.f32.mxu1 %vm4729_vm13, %v11356_v12  ;;  %11172 = vmatprep.subr.bf16.mxu0 %v11171_v54  ;;  %v7556_v12 = vld [vmem:[%s16960_s23 + $0x18] sm:$0xff] }
 0x93b   : > { %v7064_v43 = vpop.f32.mrb[25].mxu1  ;;  %10547 = vmatmul.mubr.msk.f32.vlgmr.msra.gmra.mrb[30].mxu1 %vm4729_vm13, %v11355_v6  ;;  %v11357_v27 = vadd.f32 %v10529_v10, %v9000_v56  ;;  %11174 = vmatpush3.bf16.msra.mxu0 %v11171_v54  ;;  %v11175_v21 = vpack.c.bf16 %v7556_v12, %v7555_v22  ;;  %v7557_v6 = vld [vmem:[%s16960_s23 + $0x20] sm:$0xff]  ;;  %v7558_v10 = vld [vmem:[%s16960_s23 + $0x28] sm:$0xff]  ;;  %v7567_v12 = vld [vmem:[%s16960_s23 + $0x70] sm:$0xff] }
 0x93c   : > { %v11358_v15 = vadd.f32 %v9000_v56, %v7064_v43  ;;  %v11179_v37 = vpack.c.bf16 %v7558_v10, %v7557_v6  ;;  %v7559_v56 = vld [vmem:[%s16960_s23 + $0x30] sm:$0xff]  ;;  %v7560_v43 = vld [vmem:[%s16960_s23 + $0x38] sm:$0xff]  ;;  %v7566_v54 = vld [vmem:[%s16960_s23 + $0x68] sm:$0xff]  ;;  %v16962_v10 = vmov 0.0|0.0  }
 0x93d   : > { %11176 = vmatprep.subr.bf16.mxu0 %v11175_v21  ;;  %v11195_v22 = vpack.c.bf16 %v7566_v54, %v7565_v48 }
 0x93e   : > { %10549 = vmatprep.mubr.msk.f32.mxu1 %vm4729_vm13, %v11358_v15  ;;  %v7561_v15 = vld [vmem:[%s16960_s23 + $0x40] sm:$0xff] }
 0x93f   : > { %10550 = vmatmul.mubr.msk.f32.gmra.mrb[32].mxu1 %vm4729_vm13, %v11357_v27  ;;  %11178 = vmatpush3.bf16.msra.mxu0 %v11175_v21  ;;  %v11183_v27 = vpack.c.bf16 %v7560_v43, %v7559_v56  ;;  %v7568_v21 = vld [vmem:[%s16960_s23 + $0x78] sm:$0xff]  ;;  %v9036_v56 = vld [vmem:[%s16961_s2 + $0x48] sm:$0xff]  ;;  %v9037_v43 = vld [vmem:[%s16961_s2 + $0x50] sm:$0xff] }
 0x940   : > { %10552 = vmatprep.mubr.msk.f32.mxu1 %vm4729_vm13, %v11360_v62  ;;  %11180 = vmatprep.subr.bf16.mxu0 %v11179_v37  ;;  %v7562_v62 = vld [vmem:[%s16960_s23 + $0x48] sm:$0xff]  ;;  %v11199_v6 = vpack.c.bf16 %v7568_v21, %v7567_v12 }
 0x943   : > { %10553 = vmatmul.mubr.msk.f32.gmra.mrb[34].mxu1 %vm4729_vm13, %v11359_v28  ;;  %11182 = vmatpush3.bf16.msra.mxu0 %v11179_v37  ;;  %v11187_v28 = vpack.c.bf16 %v7562_v62, %v7561_v15  ;;  %v9035_v37 = vld [vmem:[%s16961_s2 + $0x40] sm:$0xff] }
 0x944   : > { %10555 = vmatprep.mubr.msk.f32.mxu1 %vm4729_vm13, %v11362_v4  ;;  %11184 = vmatprep.subr.bf16.mxu0 %v11183_v27  ;;  %v7563_v4 = vld [vmem:[%s16960_s23 + $0x50] sm:$0xff]  ;;  %v11203_v15 = vpack.c.bf16 %v9036_v56, %v9035_v37 }
 0x946   : > { %11204 = vmatprep.subr.bf16.mxu1 %v11203_v15 }
 0x947   : > { %10556 = vmatmul.mubr.msk.f32.gmra.mrb[36].mxu1 %vm4729_vm13, %v11361_v60  ;;  %v7564_v60 = vld [vmem:[%s16960_s23 + $0x58] sm:$0xff]  ;;  %11186 = vmatpush3.bf16.msra.mxu0 %v11183_v27 }
 0x948   : > { %11188 = vmatprep.subr.bf16.mxu0 %v11187_v28  ;;  %v11191_v38 = vpack.c.bf16 %v7564_v60, %v7563_v4  ;;  %v9038_v27 = vld [vmem:[%s16961_s2 + $0x58] sm:$0xff]  ;;  %v9040_v4 = vld [vmem:[%s16961_s2 + $0x68] sm:$0xff]  ;;  %11206 = vmatpush3.bf16.msra.mxu1 %v11203_v15 }
 0x949   : > { %v11207_v62 = vpack.c.bf16 %v9038_v27, %v9037_v43 }
 0x94b   : > { %11190 = vmatpush3.bf16.msra.mxu0 %v11187_v28  ;;  %v9039_v28 = vld [vmem:[%s16961_s2 + $0x60] sm:$0xff]  ;;  %11208 = vmatprep.subr.bf16.mxu1 %v11207_v62 }
 0x94c   : > { %11192 = vmatprep.subr.bf16.mxu0 %v11191_v38  ;;  %v11211_v60 = vpack.c.bf16 %v9040_v4, %v9039_v28  ;;  %11210 = vmatpush3.bf16.msra.mxu1 %v11207_v62 }
 0x94e   : > { %11212 = vmatprep.subr.bf16.mxu1 %v11211_v60 }
 0x94f   : > { %11194 = vmatpush3.bf16.msra.mxu0 %v11191_v38  ;;  %v9025_v38 = vld [vmem:[%s16963_s16] ss:$0 sm:$0xff]  ;;  %s17084_s16 = sld [smem:[#allocation14_spill]] }
 0x950   : > { %11196 = vmatprep.subr.bf16.mxu0 %v11195_v22  ;;  %11214 = vmatpush3.bf16.msra.mxu1 %v11211_v60 }
 0x953   : > { %11198 = vmatpush3.bf16.msra.mxu0 %v11195_v22 }
 0x954   : > { %11200 = vmatprep.subr.bf16.mxu0 %v11199_v6 }
 0x957   : > { %11202 = vmatpush3.bf16.msra.mxu0 %v11199_v6 }
 0x958   : > { %11235 = vmatprep.subr.bf16.mxu0 %v16962_v10 }
 0xa0e   : > { %v10548_v48 = vpop.f32.mrb[30].mxu1 }
 0xa0f   : > { %v16104_v54 = vadd.f32 %v10548_v48, %v9025_v38  ;;  %v7194_v22 = vpop.f32.mrb[31].mxu1 }
 0xa10   : > { %v7195_v12 = vadd.f32 %v9025_v38, %v7194_v22 }
 0xa11   : > { %v7248_v21 = vrot.slane %v16104_v54, 1  ;;  %v7249_v6 = vrot.slane %v16104_v54, 2  ;;  %v7250_v15 = vrot.slane %v16104_v54, 3  ;;  %v7251_v27 = vrot.slane %v16104_v54, 4 }
 0xa12   : > { %v10551_v37 = vpop.f32.mrb[32].mxu1  ;;  %v7241_v56 = vrot.slane %v7195_v12, 1  ;;  %v7242_v43 = vrot.slane %v7195_v12, 2  ;;  %v7243_v4 = vrot.slane %v7195_v12, 3  ;;  %v7244_v60 = vrot.slane %v7195_v12, 4 }
 0xa13   : > { %v16110_v62 = vadd.f32 %v10551_v37, %v9025_v38  ;;  %v7204_v28 = vpop.f32.mrb[33].mxu1  ;;  %v7245_v48 = vrot.slane %v7195_v12, 5  ;;  %v7246_v45 = vrot.slane %v7195_v12, 6  ;;  %v7247_v22 = vrot.slane %v7195_v12, 7 }
 0xa14   : > { %v7205_v32 = vadd.f32 %v9025_v38, %v7204_v28  ;;  %v7252_v53 = vrot.slane %v16104_v54, 5  ;;  %v7253_v8 = vrot.slane %v16104_v54, 6  ;;  %v7254_v40 = vrot.slane %v16104_v54, 7 }
 0xa15   : > { %v7262_v50 = vrot.slane %v16110_v62, 1  ;;  %v7263_v34 = vrot.slane %v16110_v62, 2  ;;  %v7264_v10 = vrot.slane %v16110_v62, 3  ;;  %v7265_v51 = vrot.slane %v16110_v62, 4 }
 0xa16   : > { %v10554_v44 = vpop.f32.mrb[34].mxu1  ;;  %v7255_v37 = vrot.slane %v7205_v32, 1  ;;  %v7256_v18 = vrot.slane %v7205_v32, 2  ;;  %v7257_v14 = vrot.slane %v7205_v32, 3  ;;  %v7258_v1 = vrot.slane %v7205_v32, 4 }
 0xa17   : > { %v16119_v28 = vadd.f32 %v10554_v44, %v9025_v38  ;;  %v7214_v3 = vpop.f32.mrb[35].mxu1  ;;  %v7259_v55 = vrot.slane %v7205_v32, 5  ;;  %v7260_v2 = vrot.slane %v7205_v32, 6  ;;  %v7261_v39 = vrot.slane %v7205_v32, 7 }
 0xa18   : > { %v16121_v16 = vadd.f32 %v9025_v38, %v7214_v3  ;;  %v7266_v42 = vrot.slane %v16110_v62, 5  ;;  %v7267_v24 = vrot.slane %v16110_v62, 6  ;;  %v7268_v7 = vrot.slane %v16110_v62, 7  ;;  %v16966_v3 = vld [vmem:[#allocation34_spill] sm:$0xff] }
 0xa19   : > { %v7361_v44 = vadd.f32 %v7195_v12, %v16965_v61  ;;  %v16967_v17 = vmax.f32 %v16966_v3, 0.0  ;;  %v7363_v46 = vadd.f32 %v7242_v43, %v16968_v29  ;;  %v16969_v61 = vmax.f32 %v15367_v13, 0.0  ;;  %v16976_v13 = vld [vmem:[#allocation38_spill] sm:$0xff] }
 0xa1a   : > { %v10557_v19 = vpop.f32.mrb[36].mxu1  ;;  %v7365_v25 = vadd.f32 %v7244_v60, %v16970_v58  ;;  %v7367_v29 = vadd.f32 %v7246_v45, %v16972_v20  ;;  %v16973_v43 = vmax.f32 %v15609_v11, 0.0  ;;  %v16980_v58 = vld [vmem:[#allocation36_spill] sm:$0xff]  ;;  %v16984_v45 = vmax.f32 %v15466_v0, 0.0 }
 0xa1b   : > { %v7362_v47 = vadd.f32 %v7241_v56, %v16967_v17  ;;  %v16137_v31 = vadd.f32 %v10557_v19, %v9025_v38  ;;  %v7224_v33 = vpop.f32.mrb[37].mxu1  ;;  %v7364_v23 = vadd.f32 %v7243_v4, %v16969_v61  ;;  %v16971_v17 = vmax.f32 %v15573_v9, 0.0  ;;  %v16974_v19 = vld [vmem:[#allocation37_spill] sm:$0xff] }
 0xa1c   : > { %v16141_v12 = vadd.f32 %v9025_v38, %v7224_v33  ;;  %v7368_v3 = vadd.f32 %v7247_v22, %v16973_v43  ;;  %v16975_v36 = vmax.f32 %v16974_v19, 0.0  ;;  %v16977_v4 = vmax.f32 %v16976_v13, 0.0  ;;  %v16978_v38 = vld [vmem:[#allocation35_spill] sm:$0xff]  ;;  %v16987_v43 = vld [vmem:[#allocation44_spill] sm:$0xff]  ;;  %v16989_v13 = vld [vmem:[#allocation45_spill] sm:$0xff] }
 0xa1d   : > { %v7366_v56 = vadd.f32 %v7245_v48, %v16971_v17  ;;  %v16979_v61 = vmax.f32 %v16978_v38, 0.0  ;;  %v16981_v60 = vmax.f32 %v16980_v58, 0.0  ;;  %v16982_v48 = vld [vmem:[#allocation39_spill] sm:$0xff]  ;;  %v7374_v11 = vadd.f32 %v7252_v53, %v16984_v45 }
 0xa1e   : > { %v7369_v41 = vadd.f32 %v16104_v54, %v16975_v36  ;;  %v7370_v33 = vadd.f32 %v7248_v21, %v16977_v4  ;;  %v16983_v17 = vmax.f32 %v16982_v48, 0.0  ;;  %v16985_v22 = vmax.f32 %v15438_v57, 0.0 }
 0xa1f   : > { %v7371_v26 = vadd.f32 %v7249_v6, %v16979_v61  ;;  %v7372_v9 = vadd.f32 %v7250_v15, %v16981_v60  ;;  %v16986_v36 = vmax.f32 %v15440_v30, 0.0  ;;  %v16988_v21 = vmax.f32 %v16987_v43, 0.0  ;;  %v16995_v30 = vld [vmem:[#allocation61_spill] sm:$0xff]  ;;  %v16997_v60 = vld [vmem:[#allocation40_spill] sm:$0xff] }
 0xa20   : > { %v7373_v63 = vadd.f32 %v7251_v27, %v16983_v17  ;;  %v7375_v20 = vadd.f32 %v7253_v8, %v16985_v22  ;;  %v16990_v6 = vmax.f32 %v16989_v13, 0.0  ;;  %v16991_v15 = vmax.f32 %v15499_v52, 0.0  ;;  %v16999_v17 = vld [vmem:[#allocation52_spill] sm:$0xff] }
 0xa21   : > { %v7376_v54 = vadd.f32 %v7254_v40, %v16986_v36  ;;  %v7377_v19 = vadd.f32 %v7205_v32, %v16988_v21  ;;  %v16992_v27 = vmax.f32 %v15507_v59, 0.0  ;;  %v16993_v0 = vmax.f32 %v15547_v49, 0.0 }
 0xa22   : > { %v7378_v4 = vadd.f32 %v7255_v37, %v16990_v6  ;;  %v7379_v38 = vadd.f32 %v7256_v18, %v16991_v15  ;;  %v16994_v57 = vmax.f32 %v15704_v35, 0.0  ;;  %v16996_v40 = vmax.f32 %v16995_v30, 0.0  ;;  %v17001_v18 = vld [vmem:[#allocation54_spill] sm:$0xff] }
 0xa23   : > { %v7380_v61 = vadd.f32 %v7257_v14, %v16992_v27  ;;  %v7381_v53 = vadd.f32 %v7258_v1, %v16993_v0  ;;  %v16998_v32 = vmax.f32 %v16997_v60, 0.0  ;;  %v17000_v37 = vmax.f32 %v16999_v17, 0.0  ;;  %v17003_v14 = vld [vmem:[#allocation50_spill] sm:$0xff]  ;;  %v17005_v1 = vld [vmem:[#allocation51_spill] sm:$0xff] }
 0xa24   : > { %v7382_v8 = vadd.f32 %v7259_v55, %v16994_v57  ;;  %v7383_v58 = vadd.f32 %v7260_v2, %v16996_v40  ;;  %v17002_v45 = vmax.f32 %v17001_v18, 0.0  ;;  %v17004_v22 = vmax.f32 %v17003_v14, 0.0  ;;  %v17007_v55 = vld [vmem:[#allocation55_spill] sm:$0xff]  ;;  %v17009_v2 = vld [vmem:[#allocation56_spill] sm:$0xff]  ;;  %v17013_v0 = vld [vmem:[#allocation26_spill] sm:$0xff] }
 0xa25   : > { %v7384_v48 = vadd.f32 %v7261_v39, %v16998_v32  ;;  %v7385_v52 = vadd.f32 %v16110_v62, %v17000_v37  ;;  %v17006_v36 = vmax.f32 %v17005_v1, 0.0  ;;  %v17008_v43 = vmax.f32 %v17007_v55, 0.0  ;;  %v17011_v39 = vld [vmem:[#allocation53_spill] sm:$0xff] }
 0xa26   : > { %v7386_v59 = vadd.f32 %v7262_v50, %v17002_v45  ;;  %v7387_v49 = vadd.f32 %v7263_v34, %v17004_v22  ;;  %v17010_v13 = vmax.f32 %v17009_v2, 0.0  ;;  %v17012_v15 = vmax.f32 %v17011_v39, 0.0 }
 0xa27   : > { %v7388_v35 = vadd.f32 %v7264_v10, %v17006_v36  ;;  %v7389_v21 = vadd.f32 %v7265_v51, %v17008_v43  ;;  %v17014_v62 = vmax.f32 %v17013_v0, 0.0  ;;  %v7425_v50 = vsel %vm1132_vm0, %v7361_v44, -inf }
 0xa28   : > { %v7390_v6 = vadd.f32 %v7266_v42, %v17010_v13  ;;  %v7391_v27 = vadd.f32 %v7267_v24, %v17012_v15  ;;  %v7426_v30 = vsel %vm1132_vm0, %v7362_v47, -inf  ;;  %v7432_v34 = vsel %vm1132_vm0, %v7365_v25, -inf }
 0xa29   : > { %v7392_v57 = vadd.f32 %v7268_v7, %v17014_v62  ;;  %v7427_v40 = vmax.f32 %v7425_v50, %v7426_v30  ;;  %v7428_v10 = vsel %vm1132_vm0, %v7363_v46, -inf  ;;  %v7430_v51 = vsel %vm1132_vm0, %v7364_v23, -inf }
 0xa2a   : > { %v7433_v60 = vsel %vm1132_vm0, %v7366_v56, -inf  ;;  %v7435_v32 = vsel %vm1132_vm0, %v7367_v29, -inf  ;;  %v7439_v24 = vsel %vm1132_vm0, %v7369_v41, -inf  ;;  %v7440_v7 = vsel %vm1132_vm0, %v7370_v33, -inf }
 0xa2b   : > { %v7434_v42 = vmax.f32 %v7432_v34, %v7433_v60  ;;  %v7429_v17 = vmax.f32 %v7427_v40, %v7428_v10  ;;  %v7437_v44 = vsel %vm1132_vm0, %v7368_v3, -inf  ;;  %v7441_v47 = vmax.f32 %v7439_v24, %v7440_v7 }
 0xa2c   : > { %v7446_v25 = vsel %vm1132_vm0, %v7373_v63, -inf  ;;  %v7442_v46 = vsel %vm1132_vm0, %v7371_v26, -inf  ;;  %v7444_v23 = vsel %vm1132_vm0, %v7372_v9, -inf  ;;  %v7447_v56 = vsel %vm1132_vm0, %v7374_v11, -inf }
 0xa2d   : > { %v7436_v37 = vmax.f32 %v7434_v42, %v7435_v32  ;;  %v7443_v18 = vmax.f32 %v7441_v47, %v7442_v46  ;;  %v7448_v45 = vmax.f32 %v7446_v25, %v7447_v56  ;;  %v7449_v29 = vsel %vm1132_vm0, %v7375_v20, -inf }
 0xa2e   : > { %v7451_v41 = vsel %vm1132_vm0, %v7376_v54, -inf  ;;  %v7431_v33 = vmax.f32 %v7429_v17, %v7430_v51  ;;  %v7453_v3 = vsel %vm1132_vm0, %v7377_v19, -inf  ;;  %v7454_v22 = vsel %vm1132_vm0, %v7378_v4, -inf }
 0xa2f   : > { %v7438_v14 = vmax.f32 %v7436_v37, %v7437_v44  ;;  %v7450_v63 = vmax.f32 %v7448_v45, %v7449_v29  ;;  %v7455_v1 = vmax.f32 %v7453_v3, %v7454_v22  ;;  %v7456_v26 = vsel %vm1132_vm0, %v7379_v38, -inf }
 0xa30   : > { %v7460_v9 = vsel %vm1132_vm0, %v7381_v53, -inf  ;;  %v7445_v36 = vmax.f32 %v7443_v18, %v7444_v23  ;;  %v7458_v11 = vsel %vm1132_vm0, %v7380_v61, -inf  ;;  %v7461_v55 = vsel %vm1132_vm0, %v7382_v8, -inf }
 0xa31   : > { %v7467_v20 = vsel %vm1132_vm0, %v7385_v52, -inf  ;;  %v7452_v54 = vmax.f32 %v7450_v63, %v7451_v41  ;;  %v7457_v43 = vmax.f32 %v7455_v1, %v7456_v26  ;;  %v7462_v2 = vmax.f32 %v7460_v9, %v7461_v55 }
 0xa32   : > { %v7468_v19 = vsel %vm1132_vm0, %v7386_v59, -inf  ;;  %v7463_v4 = vsel %vm1132_vm0, %v7383_v58, -inf  ;;  %v7465_v13 = vsel %vm1132_vm0, %v7384_v48, -inf  ;;  %v7474_v38 = vsel %vm1132_vm0, %v7389_v21, -inf }
 0xa33   : > { %v7469_v39 = vmax.f32 %v7467_v20, %v7468_v19  ;;  %v7459_v53 = vmax.f32 %v7457_v43, %v7458_v11  ;;  %v7464_v15 = vmax.f32 %v7462_v2, %v7463_v4  ;;  %v7470_v61 = vsel %vm1132_vm0, %v7387_v49, -inf }
 0xa34   : > { %v7475_v8 = vsel %vm1132_vm0, %v7390_v6, -inf  ;;  %v7472_v52 = vsel %vm1132_vm0, %v7388_v35, -inf  ;;  %v7477_v50 = vsel %vm1132_vm0, %v7391_v27, -inf  ;;  %v16232_v30 = vmax.f32 %v7438_v14, 0.0 }
 0xa35   : > { %v7471_v0 = vmax.f32 %v7469_v39, %v7470_v61  ;;  %v7476_v62 = vmax.f32 %v7474_v38, %v7475_v8  ;;  %v7466_v59 = vmax.f32 %v7464_v15, %v7465_v13  ;;  %v16234_v58 = vmax.f32 %v7445_v36, 0.0  ;;  %v17015_v38 = vld [vmem:[#allocation57_spill] sm:$0xff]  ;;  %v17017_v61 = vld [vmem:[#allocation59_spill] sm:$0xff] }
 0xa36   : > { %v16236_v48 = vmax.f32 %v7452_v54, 0.0  ;;  %v7479_v40 = vsel %vm1132_vm0, %v7392_v57, -inf  ;;  %v16239_v49 = vmax.f32 %v7459_v53, 0.0  ;;  %v16241_v6 = vmax.f32 %v7431_v33, 0.0 }
 0xa37   : > { %v7473_v21 = vmax.f32 %v7471_v0, %v7472_v52  ;;  %v7478_v34 = vmax.f32 %v7476_v62, %v7477_v50  ;;  %v16243_v10 = vmax.f32 %v7466_v59, 0.0  ;;  %v7592_v35 = vrot.slane %v16232_v30, 7  ;;  %v17021_v59 = vld [vmem:[#allocation58_spill] sm:$0xff] }
 0xa38   : > { %v7270_v27 = vrot.slane %v16121_v16, 2  ;;  %v7594_v42 = vrot.slane %v16234_v58, 6  ;;  %v7598_v32 = vrot.slane %v16239_v49, 4  ;;  %v7596_v24 = vrot.slane %v16236_v48, 5 }
 0xa39   : > { %v7480_v51 = vmax.f32 %v7478_v34, %v7479_v40  ;;  %v16247_v60 = vmax.f32 %v7473_v21, 0.0  ;;  %v7593_v57 = vsel %vm6565_vm14, %v7592_v35, %v16241_v6  ;;  %v7600_v7 = vrot.slane %v16243_v10, 3  ;;  %v17023_v40 = vld [vmem:[#allocation60_spill] sm:$0xff] }
 0xa3a   : > { %v7271_v17 = vrot.slane %v16121_v16, 3  ;;  %v7595_v47 = vsel %vm6567_vm15, %v7594_v42, %v7593_v57  ;;  %v7275_v25 = vrot.slane %v16121_v16, 7  ;;  %v7277_v37 = vrot.slane %v16119_v28, 2 }
 0xa3b   : > { %v16256_v44 = vmax.f32 %v7480_v51, 0.0  ;;  %v7597_v46 = vsel %vm6569_vm2, %v7596_v24, %v7595_v47  ;;  %v7602_v23 = vrot.slane %v16247_v60, 2  ;;  %v7278_v56 = vrot.slane %v16119_v28, 3  ;;  %v17029_v47 = vld [vmem:[#allocation46_spill] sm:$0xff] }
 0xa3c   : > { %v7279_v18 = vrot.slane %v16119_v28, 4  ;;  %v7599_v45 = vsel %vm6571_vm3, %v7598_v32, %v7597_v46  ;;  %v7280_v41 = vrot.slane %v16119_v28, 5  ;;  %v7281_v33 = vrot.slane %v16119_v28, 6  ;;  %v17026_v32 = vld [vmem:[#allocation32_spill] sm:$0xff] }
 0xa3d   : > { %v7604_v29 = vrot.slane %v16256_v44, 1  ;;  %v7601_v14 = vsel %vm6573_vm4, %v7600_v7, %v7599_v45  ;;  %v7282_v3 = vrot.slane %v16119_v28, 7  ;;  %v7283_v22 = vrot.slane %v16141_v12, 1 }
 0xa3e   : > { %v7284_v63 = vrot.slane %v16141_v12, 2  ;;  %v7603_v1 = vsel %vm6575_vm7, %v7602_v23, %v7601_v14  ;;  %v7285_v26 = vrot.slane %v16141_v12, 3  ;;  %v7286_v9 = vrot.slane %v16141_v12, 4  ;;  %v17034_v14 = vld [vmem:[#allocation63_spill] sm:$0xff] }
 0xa3f   : > { %v7287_v36 = vrot.slane %v16141_v12, 5  ;;  %v7605_v11 = vsel %vm6577_vm5, %v7604_v29, %v7603_v1  ;;  %v7288_v55 = vrot.slane %v16141_v12, 6  ;;  %v7289_v20 = vrot.slane %v16141_v12, 7 }
 0xa40   : > { %v7290_v54 = vrot.slane %v16137_v31, 1  ;;  %10590 = vmatprep.mubr.f32.mxu0 %v7605_v11  ;;  %v7291_v43 = vrot.slane %v16137_v31, 2  ;;  %v7292_v2 = vrot.slane %v16137_v31, 3  ;;  %v7293_v19 = vrot.slane %v16137_v31, 4  ;;  %v17036_v11 = vld [vmem:[#allocation66_spill] sm:$0xff] }
 0xa41   : > { %v7294_v4 = vrot.slane %v16137_v31, 5  ;;  %v7295_v13 = vrot.slane %v16137_v31, 6  ;;  %v7296_v39 = vrot.slane %v16137_v31, 7  ;;  %v17016_v53 = vmax.f32 %v17015_v38, 0.0 }
 0xa42   : > { %v17018_v8 = vmax.f32 %v17017_v61, 0.0  ;;  %v17019_v0 = vrot.slane %v16121_v16, 1  ;;  %v17020_v62 = vmax.f32 %v15660_v5, 0.0  ;;  %v17022_v21 = vmax.f32 %v17021_v59, 0.0  ;;  %v17032_v5 = vld [vmem:[#allocation70_spill] sm:$0xff]  ;;  %v17041_v59 = vld [vmem:[#allocation65_spill] sm:$0xff] }
 0xa43   : > { %v7393_v15 = vadd.f32 %v16121_v16, %v17016_v53  ;;  %v17024_v35 = vmax.f32 %v17023_v40, 0.0  ;;  %v17025_v51 = vrot.slane %v16121_v16, 4  ;;  %v17027_v57 = vmax.f32 %v17026_v32, 0.0  ;;  %v17045_v32 = vld [vmem:[#allocation68_spill] sm:$0xff] }
 0xa44   : > { %v7394_v52 = vadd.f32 %v17019_v0, %v17018_v8  ;;  %v7395_v50 = vadd.f32 %v7270_v27, %v17020_v62  ;;  %v7396_v34 = vadd.f32 %v7271_v17, %v17022_v21  ;;  %v17028_v24 = vrot.slane %v16121_v16, 5  ;;  %v17039_v8 = vld [vmem:[#allocation62_spill] sm:$0xff] }
 0xa45   : > { %v7397_v42 = vadd.f32 %v17025_v51, %v17024_v35  ;;  %v17030_v46 = vmax.f32 %v17029_v47, 0.0  ;;  %v17031_v23 = vrot.slane %v16121_v16, 6  ;;  %v17033_v27 = vmax.f32 %v17032_v5, 0.0  ;;  %v17043_v16 = vld [vmem:[#allocation67_spill] sm:$0xff] }
 0xa46   : > { %v7398_v7 = vadd.f32 %v17028_v24, %v17027_v57  ;;  %v17035_v17 = vmax.f32 %v17034_v14, 0.0  ;;  %v17037_v38 = vmax.f32 %v17036_v11, 0.0  ;;  %v17038_v53 = vrot.slane %v16119_v28, 1  ;;  %v17047_v24 = vld [vmem:[#allocation64_spill] sm:$0xff] }
 0xa47   : > { %v7399_v45 = vadd.f32 %v17031_v23, %v17030_v46  ;;  %v7400_v29 = vadd.f32 %v7275_v25, %v17033_v27  ;;  %v17040_v0 = vmax.f32 %v17039_v8, 0.0  ;;  %v17042_v21 = vmax.f32 %v17041_v59, 0.0  ;;  %v17049_v23 = vld [vmem:[#allocation30_spill] sm:$0xff] }
 0xa48   : > { %v7401_v1 = vadd.f32 %v16119_v28, %v17035_v17  ;;  %v7402_v61 = vadd.f32 %v17038_v53, %v17037_v38  ;;  %v17044_v35 = vmax.f32 %v17043_v16, 0.0  ;;  %v17046_v25 = vmax.f32 %v17045_v32, 0.0  ;;  %v17051_v28 = vld [vmem:[#allocation43_spill] sm:$0xff] }
 0xa49   : > { %v7403_v62 = vadd.f32 %v7277_v37, %v17040_v0  ;;  %v7404_v40 = vadd.f32 %v7278_v56, %v17042_v21  ;;  %v17048_v47 = vmax.f32 %v17047_v24, 0.0  ;;  %v17050_v5 = vmax.f32 %v17049_v23, 0.0  ;;  %v17053_v37 = vld [vmem:[#allocation25_spill] sm:$0xff] }
 0xa4a   : > { %v7405_v51 = vadd.f32 %v7279_v18, %v17044_v35  ;;  %v7406_v57 = vadd.f32 %v7280_v41, %v17046_v25  ;;  %v17052_v14 = vmax.f32 %v17051_v28, 0.0  ;;  %v17054_v11 = vmax.f32 %v17053_v37, 0.0  ;;  %v17055_v56 = vld [vmem:[#allocation41_spill] sm:$0xff]  ;;  %v17057_v18 = vld [vmem:[#allocation42_spill] sm:$0xff]  ;;  %v17059_v41 = vld [vmem:[#allocation27_spill] sm:$0xff] }
 0xa4b   : > { %v7407_v46 = vadd.f32 %v7281_v33, %v17048_v47  ;;  %v7408_v27 = vadd.f32 %v7282_v3, %v17050_v5  ;;  %v17056_v53 = vmax.f32 %v17055_v56, 0.0  ;;  %v17058_v0 = vmax.f32 %v17057_v18, 0.0  ;;  %v17061_v33 = vld [vmem:[#allocation71_spill] sm:$0xff]  ;;  %v17063_v3 = vld [vmem:[#allocation72_spill] sm:$0xff]  ;;  %v17065_v47 = vld [vmem:[#allocation74_spill] sm:$0xff] }
 0xa4c   : > { %v7409_v17 = vadd.f32 %v16141_v12, %v17052_v14  ;;  %v7410_v38 = vadd.f32 %v7283_v22, %v17054_v11  ;;  %v17060_v21 = vmax.f32 %v17059_v41, 0.0  ;;  %v17062_v35 = vmax.f32 %v17061_v33, 0.0  ;;  %v17067_v5 = vld [vmem:[#allocation48_spill] sm:$0xff] }
 0xa4d   : > { %v7411_v8 = vadd.f32 %v7284_v63, %v17056_v53  ;;  %v7412_v59 = vadd.f32 %v7285_v26, %v17058_v0  ;;  %v17064_v25 = vmax.f32 %v17063_v3, 0.0  ;;  %v17066_v12 = vmax.f32 %v17065_v47, 0.0  ;;  %v17069_v63 = vld [vmem:[#allocation28_spill] sm:$0xff]  ;;  %v17071_v26 = vld [vmem:[#allocation47_spill] sm:$0xff] }
 0xa4e   : > { %v7413_v16 = vadd.f32 %v7286_v9, %v17060_v21  ;;  %v7414_v32 = vadd.f32 %v7287_v36, %v17062_v35  ;;  %v17068_v22 = vmax.f32 %v17067_v5, 0.0  ;;  %v17070_v14 = vmax.f32 %v17069_v63, 0.0  ;;  %v17073_v9 = vld [vmem:[#allocation29_spill] sm:$0xff]  ;;  %v17075_v36 = vld [vmem:[#allocation31_spill] sm:$0xff] }
 0xa4f   : > { %v7415_v24 = vadd.f32 %v7288_v55, %v17064_v25  ;;  %v7416_v23 = vadd.f32 %v7289_v20, %v17066_v12  ;;  %v17072_v11 = vmax.f32 %v17071_v26, 0.0  ;;  %v17074_v53 = vmax.f32 %v17073_v9, 0.0  ;;  %v17077_v55 = vld [vmem:[#allocation69_spill] sm:$0xff] }
 0xa50   : > { %v7417_v28 = vadd.f32 %v16137_v31, %v17068_v22  ;;  %v7418_v37 = vadd.f32 %v7290_v54, %v17070_v14  ;;  %v17076_v0 = vmax.f32 %v17075_v36, 0.0  ;;  %v17078_v21 = vmax.f32 %v17077_v55, 0.0  ;;  %v17079_v20 = vld [vmem:[#allocation49_spill] sm:$0xff] }
 0xa51   : > { %v7419_v56 = vadd.f32 %v7291_v43, %v17072_v11  ;;  %v7420_v18 = vadd.f32 %v7292_v2, %v17074_v53  ;;  %v17080_v35 = vmax.f32 %v17079_v20, 0.0  ;;  %v17081_v25 = vld [vmem:[#allocation73_spill] sm:$0xff]  ;;  %v7481_v54 = vsel %vm1132_vm0, %v7393_v15, -inf }
 0xa52   : > { %v7421_v41 = vadd.f32 %v7293_v19, %v17076_v0  ;;  %v7422_v33 = vadd.f32 %v7294_v4, %v17078_v21  ;;  %v17082_v31 = vmax.f32 %v17081_v25, 0.0  ;;  %v7482_v12 = vsel %vm1132_vm0, %v7394_v52, -inf }
 0xa53   : > { %v7423_v3 = vadd.f32 %v7295_v13, %v17080_v35  ;;  %v7483_v43 = vmax.f32 %v7481_v54, %v7482_v12  ;;  %v7484_v5 = vsel %vm1132_vm0, %v7395_v50, -inf  ;;  %v7488_v2 = vsel %vm1132_vm0, %v7397_v42, -inf }
 0xa54   : > { %v7424_v47 = vadd.f32 %v7296_v39, %v17082_v31  ;;  %v7489_v19 = vsel %vm1132_vm0, %v7398_v7, -inf  ;;  %v7486_v22 = vsel %vm1132_vm0, %v7396_v34, -inf  ;;  %v7495_v63 = vsel %vm1132_vm0, %v7401_v1, -inf }
 0xa55   : > { %v7490_v4 = vmax.f32 %v7488_v2, %v7489_v19  ;;  %v7496_v13 = vsel %vm1132_vm0, %v7402_v61, -inf  ;;  %v7485_v14 = vmax.f32 %v7483_v43, %v7484_v5  ;;  %v7491_v39 = vsel %vm1132_vm0, %v7399_v45, -inf }
 0xa56   : > { %v7493_v15 = vsel %vm1132_vm0, %v7400_v29, -inf  ;;  %v7497_v52 = vmax.f32 %v7495_v63, %v7496_v13  ;;  %v7498_v50 = vsel %vm1132_vm0, %v7403_v62, -inf  ;;  %v7502_v42 = vsel %vm1132_vm0, %v7405_v51, -inf }
 0xa57   : > { %v7492_v26 = vmax.f32 %v7490_v4, %v7491_v39  ;;  %v7503_v7 = vsel %vm1132_vm0, %v7406_v57, -inf  ;;  %v7500_v34 = vsel %vm1132_vm0, %v7404_v40, -inf  ;;  %v7505_v1 = vsel %vm1132_vm0, %v7407_v46, -inf }
 0xa58   : > { %v7499_v11 = vmax.f32 %v7497_v52, %v7498_v50  ;;  %v7504_v9 = vmax.f32 %v7502_v42, %v7503_v7  ;;  %v7487_v61 = vmax.f32 %v7485_v14, %v7486_v22  ;;  %v7507_v53 = vsel %vm1132_vm0, %v7408_v27, -inf }
 0xa59   : > { %v7509_v45 = vsel %vm1132_vm0, %v7409_v17, -inf  ;;  %v7510_v29 = vsel %vm1132_vm0, %v7410_v38, -inf  ;;  %v7494_v36 = vmax.f32 %v7492_v26, %v7493_v15  ;;  %v7512_v51 = vsel %vm1132_vm0, %v7411_v8, -inf }
 0xa5a   : > { %v7506_v0 = vmax.f32 %v7504_v9, %v7505_v1  ;;  %v7511_v62 = vmax.f32 %v7509_v45, %v7510_v29  ;;  %v7501_v55 = vmax.f32 %v7499_v11, %v7500_v34  ;;  %v7514_v57 = vsel %vm1132_vm0, %v7412_v59, -inf  ;;  %v9042_v45 = vld [vmem:[%s16961_s2 + $0x78] sm:$0xff] }
 0xa5b   : > { %v7516_v40 = vsel %vm1132_vm0, %v7413_v16, -inf  ;;  %v7517_v21 = vsel %vm1132_vm0, %v7414_v32, -inf  ;;  %v7519_v27 = vsel %vm1132_vm0, %v7415_v24, -inf  ;;  %v7521_v17 = vsel %vm1132_vm0, %v7416_v23, -inf }
 0xa5c   : > { %v7513_v46 = vmax.f32 %v7511_v62, %v7512_v51  ;;  %v7518_v20 = vmax.f32 %v7516_v40, %v7517_v21  ;;  %v7508_v35 = vmax.f32 %v7506_v0, %v7507_v53  ;;  %v7523_v38 = vsel %vm1132_vm0, %v7417_v28, -inf  ;;  %v9041_v53 = vld [vmem:[%s16961_s2 + $0x70] sm:$0xff]  ;;  %v7795_v0 = vld [vmem:[%s17083_s22 + $0x8] sm:$0xff]  ;;  %v9034_v51 = vld [vmem:[%s17084_s16] ss:$0 sm:$0xff]  ;;  %s17087_s16 = sld [smem:[#allocation16_spill]] }
 0xa5d   : > { %v7524_v25 = vsel %vm1132_vm0, %v7418_v37, -inf  ;;  %v7530_v8 = vsel %vm1132_vm0, %v7421_v41, -inf  ;;  %v7531_v16 = vsel %vm1132_vm0, %v7422_v33, -inf  ;;  %v7526_v32 = vsel %vm1132_vm0, %v7419_v56, -inf  ;;  %v7797_v40 = vld [vmem:[%s17083_s22 + $0x18] sm:$0xff]  ;;  %s17090_s2 = sld [smem:[#allocation18_spill]] }
 0xa5e   : > { %v7515_v31 = vmax.f32 %v7513_v46, %v7514_v57  ;;  %v7520_v54 = vmax.f32 %v7518_v20, %v7519_v27  ;;  %v7525_v59 = vmax.f32 %v7523_v38, %v7524_v25  ;;  %v7528_v12 = vsel %vm1132_vm0, %v7420_v18, -inf  ;;  %v7796_v57 = vld [vmem:[%s17083_s22 + $0x10] sm:$0xff] }
 0xa5f   : > { %v7532_v43 = vmax.f32 %v7530_v8, %v7531_v16  ;;  %v7533_v24 = vsel %vm1132_vm0, %v7423_v3, -inf  ;;  %v16396_v2 = vmax.f32 %v7494_v36, 0.0  ;;  %v16398_v28 = vmax.f32 %v7501_v55, 0.0  ;;  %v7794_v36 = vld [vmem:[%s17083_s22] sm:$0xff]  ;;  %v7800_v25 = vld [vmem:[%s17083_s22 + $0x30] sm:$0xff]  ;;  %v7801_v8 = vld [vmem:[%s17083_s22 + $0x38] sm:$0xff] }
 0xa60   : > { %v7522_v23 = vmax.f32 %v7520_v54, %v7521_v17  ;;  %v7527_v5 = vmax.f32 %v7525_v59, %v7526_v32  ;;  %v7535_v41 = vsel %vm1132_vm0, %v7424_v47, -inf  ;;  %v16401_v19 = vmax.f32 %v7508_v35, 0.0  ;;  %v7798_v17 = vld [vmem:[%s17083_s22 + $0x20] sm:$0xff]  ;;  %v7799_v35 = vld [vmem:[%s17083_s22 + $0x28] sm:$0xff]  ;;  %v7972_v16 = vld [vmem:[%s17086_s3 + $0x10] sm:$0xff] }
 0xa61   : > { %v7534_v37 = vmax.f32 %v7532_v43, %v7533_v24  ;;  %v16403_v22 = vmax.f32 %v7515_v31, 0.0  ;;  %v16405_v56 = vmax.f32 %v7487_v61, 0.0  ;;  %v7606_v3 = vrot.slane %v16396_v2, 7  ;;  %v7970_v54 = vld [vmem:[%s17086_s3] sm:$0xff]  ;;  %v7971_v59 = vld [vmem:[%s17086_s3 + $0x8] sm:$0xff] }
 0xa62   : > { %v7529_v33 = vmax.f32 %v7527_v5, %v7528_v12  ;;  %v16407_v18 = vmax.f32 %v7522_v23, 0.0  ;;  %v7608_v63 = vrot.slane %v16398_v28, 6  ;;  %v7610_v39 = vrot.slane %v16401_v19, 5  ;;  %v7973_v12 = vld [vmem:[%s17086_s3 + $0x18] sm:$0xff]  ;;  %v7974_v23 = vld [vmem:[%s17086_s3 + $0x20] sm:$0xff]  ;;  %v7975_v5 = vld [vmem:[%s17086_s3 + $0x28] sm:$0xff] }
 0xa63   : > { %v7536_v4 = vmax.f32 %v7534_v37, %v7535_v41  ;;  %v7612_v13 = vrot.slane %v16403_v22, 4  ;;  %v7607_v47 = vsel %vm6565_vm14, %v7606_v3, %v16405_v56  ;;  %v17085_v61 = vmov 0.0   ;;  %v9043_v41 = vld [vmem:[%s17087_s16] ss:$0 sm:$0xff]  ;;  %s17089_s16 = sld [smem:[#allocation21_spill]] }
 0xa64   : > { %v16412_v14 = vmax.f32 %v7529_v33, 0.0  ;;  %v7614_v15 = vrot.slane %v16407_v18, 3  ;;  %v7609_v26 = vsel %vm6567_vm15, %v7608_v63, %v7607_v47  ;;  %v11215_v29 = vpack.c.bf16 %v9042_v45, %v9041_v53  ;;  %v7977_v47 = vld [vmem:[%s17086_s3 + $0x38] sm:$0xff]  ;;  %v7984_v53 = vld [vmem:[%s17086_s3 + $0x70] sm:$0xff] }
 0xa65   : > { %v16418_v52 = vmax.f32 %v7536_v4, 0.0  ;;  %v7611_v50 = vsel %vm6569_vm2, %v7610_v39, %v7609_v26  ;;  %v11219_v62 = vpack.c.bf16 %v7795_v0, %v7794_v36  ;;  %v11223_v27 = vpack.c.bf16 %v7797_v40, %v7796_v57  ;;  %v7978_v39 = vld [vmem:[%s17086_s3 + $0x40] sm:$0xff]  ;;  %v7979_v26 = vld [vmem:[%s17086_s3 + $0x48] sm:$0xff]  ;;  %v7985_v45 = vld [vmem:[%s17086_s3 + $0x78] sm:$0xff] }
 0xa66   : > { %v7613_v42 = vsel %vm6571_vm3, %v7612_v13, %v7611_v50  ;;  %v7616_v7 = vrot.slane %v16412_v14, 2  ;;  %11216 = vmatprep.subr.bf16.mxu1 %v11215_v29  ;;  %v11227_v38 = vpack.c.bf16 %v7799_v35, %v7798_v17  ;;  %v11231_v31 = vpack.c.bf16 %v7801_v8, %v7800_v25  ;;  %v7976_v13 = vld [vmem:[%s17086_s3 + $0x30] sm:$0xff] }
 0xa67   : > { %v7615_v11 = vsel %vm6573_vm4, %v7614_v15, %v7613_v42  ;;  %v7618_v34 = vrot.slane %v16418_v52, 1  ;;  %11218 = vmatpush3.bf16.msra.mxu1 %v11215_v29  ;;  %v11236_v32 = vpack.c.bf16 %v7971_v59, %v7970_v54  ;;  %v17088_v43 = vmov 0.0|0.0   ;;  %v7980_v42 = vld [vmem:[%s17086_s3 + $0x50] sm:$0xff] }
 0xa68   : > { %v7617_v9 = vsel %vm6575_vm7, %v7616_v7, %v7615_v11  ;;  %11220 = vmatprep.subr.bf16.mxu1 %v11219_v62  ;;  %v11239_v24 = vpack.c.bf16 %v7973_v12, %v7972_v16  ;;  %v11242_v37 = vpack.c.bf16 %v7975_v5, %v7974_v23  ;;  %v11245_v15 = vpack.c.bf16 %v7977_v47, %v7976_v13  ;;  %v7981_v7 = vld [vmem:[%s17086_s3 + $0x58] sm:$0xff] }
 0xa69   : > { %v7619_v1 = vsel %vm6577_vm5, %v7618_v34, %v7617_v9  ;;  %v11248_v50 = vpack.c.bf16 %v7979_v26, %v7978_v39  ;;  %v11251_v11 = vpack.c.bf16 %v7981_v7, %v7980_v42  ;;  %v7982_v34 = vld [vmem:[%s17086_s3 + $0x60] sm:$0xff]  ;;  %v7983_v9 = vld [vmem:[%s17086_s3 + $0x68] sm:$0xff]  ;;  %v11257_v29 = vpack.c.bf16 %v7985_v45, %v7984_v53  ;;  %s17092_s3 = sld [smem:[#allocation20_spill]] }
 0xa6a   : > { %10591 = vmatmul.mubr.f32.vlgmr.msra.gmra.mrb[230].mxu0 %v7619_v1  ;;  %v11254_v1 = vpack.c.bf16 %v7983_v9, %v7982_v34  ;;  %v9050_v36 = vld [vmem:[%s17089_s16 + $0x40] sm:$0xff]  ;;  %v9051_v0 = vld [vmem:[%s17089_s16 + $0x48] sm:$0xff] }
 0xa6b   : > { %10663 = vmatprep.mubr.msk.f32.mxu0 %vm12043_vm1, %v17085_v61  ;;  %11237 = vmatpush3.bf16.msra.mxu0 %v11236_v32  ;;  %v9054_v40 = vld [vmem:[%s17089_s16 + $0x60] sm:$0xff] }
 0xa6c   : > { %11238 = vmatprep.subr.bf16.mxu0 %v17088_v43 }
 0xa6f   : > { %11240 = vmatpush3.bf16.msra.mxu0 %v11239_v24 }
 0xa70   : > { %11241 = vmatprep.subr.bf16.mxu0 %v17088_v43 }
 0xa73   : > { %11243 = vmatpush3.bf16.msra.mxu0 %v11242_v37 }
 0xa74   : > { %11244 = vmatprep.subr.bf16.mxu0 %v17088_v43 }
 0xa77   : > { %11246 = vmatpush3.bf16.msra.mxu0 %v11245_v15 }
 0xa78   : > { %11247 = vmatprep.subr.bf16.mxu0 %v17088_v43 }
 0xa7b   : > { %11249 = vmatpush3.bf16.msra.mxu0 %v11248_v50 }
 0xa7c   : > { %11250 = vmatprep.subr.bf16.mxu0 %v17088_v43 }
 0xa7f   : > { %11252 = vmatpush3.bf16.msra.mxu0 %v11251_v11 }
 0xa80   : > { %11253 = vmatprep.subr.bf16.mxu0 %v17088_v43 }
 0xa83   : > { %11255 = vmatpush3.bf16.msra.mxu0 %v11254_v1 }
 0xa84   : > { %11256 = vmatprep.subr.bf16.mxu0 %v17088_v43 }
 0xa87   : > { %11258 = vmatpush3.bf16.msra.mxu0 %v11257_v29 }
 0xa88   : > { %11283 = vmatprep.subr.bf16.mxu0 %v17088_v43 }
 0xb3d   : > { %v10592_v55 = vpop.f32.mrb[230].mxu0 }
 0xb3e   : > { %v7688_v21 = vpop.f32.mrb[231].mxu0  ;;  %v7694_v20 = vadd.f32 %v10592_v55, %v9034_v51  ;;  %v9053_v55 = vld [vmem:[%s17089_s16 + $0x58] sm:$0xff] }
 0xb3f   : > { %v7689_v46 = vadd.f32 %v9034_v51, %v7688_v21  ;;  %v11260_v51 = vpack.c.bf16 %v9051_v0, %v9050_v36  ;;  %v9055_v21 = vld [vmem:[%s17089_s16 + $0x68] sm:$0xff] }
 0xb41   : > { %10609 = vmatprep.mubr.msk.f32.mxu1 %vm4729_vm13, %v7689_v46  ;;  %v11266_v46 = vpack.c.bf16 %v9055_v21, %v9054_v40 }
 0xb42   : > { %10610 = vmatmul.mubr.msk.f32.vlgmr.msra.gmra.mrb[38].mxu1 %vm4729_vm13, %v7694_v20  ;;  %v9046_v20 = vld [vmem:[%s17090_s2] ss:$0 sm:$0xff]  ;;  %s17091_s2 = sld [smem:[#allocation23_spill]] }
 0xb43   : > { %11222 = vmatpush3.bf16.msra.mxu1 %v11219_v62  ;;  %v9052_v62 = vld [vmem:[%s17089_s16 + $0x50] sm:$0xff] }
 0xb44   : > { %11224 = vmatprep.subr.bf16.mxu1 %v11223_v27  ;;  %v11263_v57 = vpack.c.bf16 %v9053_v55, %v9052_v62 }
 0xb47   : > { %11226 = vmatpush3.bf16.msra.mxu1 %v11223_v27 }
 0xb48   : > { %11228 = vmatprep.subr.bf16.mxu1 %v11227_v38 }
 0xb4b   : > { %11230 = vmatpush3.bf16.msra.mxu1 %v11227_v38 }
 0xb4c   : > { %11232 = vmatprep.subr.bf16.mxu1 %v11231_v31 }
 0xb4f   : > { %11234 = vmatpush3.bf16.msra.mxu1 %v11231_v31 }
 0xb50   : > { %11259 = vmatprep.subr.bf16.mxu1 %v17088_v43 }
 0xc15   : > { %v10611_v33 = vpop.f32.mrb[38].mxu1 }
 0xc16   : > { %v7785_v3 = vpop.f32.mrb[39].mxu1  ;;  %v7791_v63 = vadd.f32 %v10611_v33, %v9043_v41 }
 0xc17   : > { %v7786_v4 = vadd.f32 %v9043_v41, %v7785_v3 }
 0xc19   : > { %10628 = vmatprep.mubr.msk.f32.mxu1 %vm4729_vm13, %v7786_v4 }
 0xc1a   : > { %10629 = vmatmul.mubr.msk.f32.vlgmr.msra.gmra.mrb[40].mxu1 %vm4729_vm13, %v7791_v63 }
 0xc1b   : > { %10682 = vmatprep.mubr.msk.f32.mxu1 %vm12043_vm1, %v17085_v61  ;;  %11261 = vmatpush3.bf16.msra.mxu1 %v11260_v51 }
 0xc1c   : > { %11262 = vmatprep.subr.bf16.mxu1 %v17088_v43 }
 0xc1f   : > { %11264 = vmatpush3.bf16.msra.mxu1 %v11263_v57 }
 0xc20   : > { %11265 = vmatprep.subr.bf16.mxu1 %v17088_v43 }
 0xc23   : > { %11267 = vmatpush3.bf16.msra.mxu1 %v11266_v46 }
 0xc24   : > { %11268 = vmatprep.subr.bf16.mxu1 %v17088_v43 }
 0xced   : > { %v10630_v27 = vpop.f32.mrb[40].mxu1 }
 0xcee   : > { %v7887_v17 = vadd.f32 %v10630_v27, %v9046_v20  ;;  %v7881_v35 = vpop.f32.mrb[41].mxu1 }
 0xcef   : > { %v7882_v38 = vadd.f32 %v9046_v20, %v7881_v35 }
 0xcf0   : > { %v7899_v25 = vrot.slane %v7887_v17, 1  ;;  %v7900_v8 = vrot.slane %v7887_v17, 2  ;;  %v7901_v31 = vrot.slane %v7887_v17, 3  ;;  %v7902_v54 = vrot.slane %v7887_v17, 4 }
 0xcf1   : > { %v7892_v59 = vrot.slane %v7882_v38, 1  ;;  %v7893_v16 = vrot.slane %v7882_v38, 2  ;;  %v7894_v32 = vrot.slane %v7882_v38, 3  ;;  %v7895_v12 = vrot.slane %v7882_v38, 4 }
 0xcf2   : > { %v7896_v24 = vrot.slane %v7882_v38, 5  ;;  %v7897_v23 = vrot.slane %v7882_v38, 6  ;;  %v7898_v5 = vrot.slane %v7882_v38, 7  ;;  %v7903_v37 = vrot.slane %v7887_v17, 5 }
 0xcf3   : > { %v7904_v41 = vrot.slane %v7887_v17, 6  ;;  %v7905_v33 = vrot.slane %v7887_v17, 7  ;;  %v7922_v3 = vadd.f32 %v7882_v38, %v16241_v6  ;;  %v7923_v4 = vadd.f32 %v7892_v59, %v16232_v30 }
 0xcf4   : > { %v7924_v63 = vadd.f32 %v7893_v16, %v16234_v58  ;;  %v7925_v13 = vadd.f32 %v7894_v32, %v16236_v48  ;;  %v7926_v47 = vadd.f32 %v7895_v12, %v16239_v49  ;;  %v7927_v39 = vadd.f32 %v7896_v24, %v16243_v10 }
 0xcf5   : > { %v7928_v15 = vadd.f32 %v7897_v23, %v16247_v60  ;;  %v7929_v26 = vadd.f32 %v7898_v5, %v16256_v44  ;;  %v7930_v50 = vadd.f32 %v7887_v17, %v16405_v56  ;;  %v7931_v42 = vadd.f32 %v7899_v25, %v16396_v2 }
 0xcf6   : > { %v7932_v6 = vadd.f32 %v7900_v8, %v16398_v28  ;;  %v7933_v30 = vadd.f32 %v7901_v31, %v16401_v19  ;;  %v7934_v58 = vadd.f32 %v7902_v54, %v16403_v22  ;;  %v7935_v48 = vadd.f32 %v7903_v37, %v16407_v18 }
 0xcf7   : > { %v7936_v49 = vadd.f32 %v7904_v41, %v16412_v14  ;;  %v7937_v10 = vadd.f32 %v7905_v33, %v16418_v52  ;;  %v7938_v60 = vsel %vm1132_vm0, %v7922_v3, -inf  ;;  %v7939_v44 = vsel %vm1132_vm0, %v7923_v4, -inf  ;;  %v9056_v3 = vld [vmem:[%s17089_s16 + $0x70] sm:$0xff]  ;;  %v9057_v4 = vld [vmem:[%s17089_s16 + $0x78] sm:$0xff] }
 0xcf8   : > { %v7940_v7 = vmax.f32 %v7938_v60, %v7939_v44  ;;  %v7941_v56 = vsel %vm1132_vm0, %v7924_v63, -inf  ;;  %v7942_v2 = vsel %vm1132_vm0, %v7925_v13, -inf  ;;  %v7944_v28 = vsel %vm1132_vm0, %v7926_v47, -inf  ;;  %v8175_v13 = vld [vmem:[%s17091_s2] sm:$0xff]  ;;  %v8176_v47 = vld [vmem:[%s17091_s2 + $0x8] sm:$0xff]  ;;  %v8181_v60 = vld [vmem:[%s17091_s2 + $0x30] sm:$0xff] }
 0xcf9   : > { %v7943_v19 = vmax.f32 %v7941_v56, %v7942_v2  ;;  %v7945_v22 = vsel %vm1132_vm0, %v7927_v39, -inf  ;;  %v7947_v18 = vsel %vm1132_vm0, %v7928_v15, -inf  ;;  %v7948_v14 = vsel %vm1132_vm0, %v7929_v26, -inf  ;;  %v9049_v39 = vld [vmem:[%s17092_s3] ss:$0 sm:$0xff]  ;;  %v8182_v44 = vld [vmem:[%s17091_s2 + $0x38] sm:$0xff] }
 0xcfa   : > { %v7946_v11 = vmax.f32 %v7944_v28, %v7945_v22  ;;  %v7949_v52 = vmax.f32 %v7947_v18, %v7948_v14  ;;  %v7950_v34 = vsel %vm1132_vm0, %v7930_v50, -inf  ;;  %v7951_v9 = vsel %vm1132_vm0, %v7931_v42, -inf  ;;  %v8324_v22 = vld [vmem:[%s12188_s20 + $0x8] sm:$0xff]  ;;  %v8325_v18 = vld [vmem:[%s12188_s20 + $0x10] sm:$0xff]  ;;  %s9062_s3 = sshll.u32 %s12221_s0, 4  ;;  %s12044_s0 = smov [#allocation2]  }
 0xcfb   : > { %v7952_v1 = vmax.f32 %v7950_v34, %v7951_v9  ;;  %v7953_v53 = vsel %vm1132_vm0, %v7932_v6, -inf  ;;  %v7954_v45 = vsel %vm1132_vm0, %v7933_v30, -inf  ;;  %v7956_v29 = vsel %vm1132_vm0, %v7934_v58, -inf  ;;  %v8177_v6 = vld [vmem:[%s17091_s2 + $0x10] sm:$0xff]  ;;  %v8178_v30 = vld [vmem:[%s17091_s2 + $0x18] sm:$0xff]  ;;  %v8327_v34 = vld [vmem:[%s12188_s20 + $0x20] sm:$0xff]  ;;  %s16618_s8 = scalar_lea.hbm %s12198_s4, %s9062_s3 }
 0xcfc   : > { %v7955_v36 = vmax.f32 %v7953_v53, %v7954_v45  ;;  %v7957_v0 = vsel %vm1132_vm0, %v7935_v48, -inf  ;;  %v7959_v62 = vsel %vm1132_vm0, %v7936_v49, -inf  ;;  %v7960_v51 = vsel %vm1132_vm0, %v7937_v10, -inf  ;;  %v8179_v48 = vld [vmem:[%s17091_s2 + $0x20] sm:$0xff]  ;;  %v8180_v49 = vld [vmem:[%s17091_s2 + $0x28] sm:$0xff]  ;;  %v8329_v53 = vld [vmem:[%s12188_s20 + $0x30] sm:$0xff] }
 0xcfd   : > { %v7958_v55 = vmax.f32 %v7956_v29, %v7957_v0  ;;  %v7961_v57 = vmax.f32 %v7959_v62, %v7960_v51  ;;  %v16515_v40 = vmax.f32 %v7943_v19, 0.0  ;;  %v16517_v21 = vmax.f32 %v7946_v11, 0.0  ;;  %v8323_v19 = vld [vmem:[%s12188_s20] sm:$0xff]  ;;  %v8326_v11 = vld [vmem:[%s12188_s20 + $0x18] sm:$0xff]  ;;  %v8328_v9 = vld [vmem:[%s12188_s20 + $0x28] sm:$0xff]  ;;  %s11952_s13 = sshll.u32 %s12044_s0, 4  ;;  %s11953_s13 = int_to_ptr.vmem [resolvable:$false] %s11952_s13 }
 0xcfe   : > { %v16519_v46 = vmax.f32 %v7949_v52, 0.0  ;;  %v16521_v20 = vmax.f32 %v7952_v1, 0.0  ;;  %v16523_v27 = vmax.f32 %v7940_v7, 0.0  ;;  %v16525_v17 = vmax.f32 %v7955_v36, 0.0  ;;  %v8330_v45 = vld [vmem:[%s12188_s20 + $0x38] sm:$0xff]  ;;  %v8331_v36 = vld [vmem:[%s12188_s20 + $0x40] sm:$0xff] }
 0xcff   : > { %v8001_v35 = vrot.slane %v16515_v40, 7  ;;  %v16528_v38 = vmax.f32 %v7958_v55, 0.0  ;;  %v8003_v25 = vrot.slane %v16517_v21, 6  ;;  %v16531_v8 = vmax.f32 %v7961_v57, 0.0  ;;  %v8332_v0 = vld [vmem:[%s12188_s20 + $0x48] sm:$0xff]  ;;  %v8333_v51 = vld [vmem:[%s12188_s20 + $0x50] sm:$0xff] }
 0xd00   : > { %v8005_v54 = vrot.slane %v16519_v46, 5  ;;  %v8007_v16 = vrot.slane %v16521_v20, 4  ;;  %v8009_v12 = vrot.slane %v16525_v17, 3  ;;  %v11269_v63 = vpack.c.bf16 %v9057_v4, %v9056_v3  ;;  %v8334_v55 = vld [vmem:[%s12188_s20 + $0x58] sm:$0xff]  ;;  %s11954_s14 = scalar_lea.vmem %s11953_s13, 32 }
 0xd01   : > { %v8002_v31 = vsel %vm6565_vm14, %v8001_v35, %v16523_v27  ;;  %v8011_v23 = vrot.slane %v16528_v38, 2  ;;  %v8013_v37 = vrot.slane %v16531_v8, 1  ;;  %v11272_v26 = vpack.c.bf16 %v8176_v47, %v8175_v13  ;;  %v8335_v35 = vld [vmem:[%s12188_s20 + $0x60] sm:$0xff] }
 0xd02   : > { %v8004_v59 = vsel %vm6567_vm15, %v8003_v25, %v8002_v31  ;;  %11270 = vmatpush3.bf16.msra.mxu1 %v11269_v63  ;;  %v11275_v58 = vpack.c.bf16 %v8178_v30, %v8177_v6  ;;  %v11278_v10 = vpack.c.bf16 %v8180_v49, %v8179_v48  ;;  %v11281_v7 = vpack.c.bf16 %v8182_v44, %v8181_v60  ;;  %v8336_v25 = vld [vmem:[%s12188_s20 + $0x68] sm:$0xff] }
 0xd03   : > { %v8006_v32 = vsel %vm6569_vm2, %v8005_v54, %v8004_v59  ;;  %11271 = vmatprep.subr.bf16.mxu1 %v17088_v43  ;;  %v11284_v14 = vpack.c.bf16 %v8324_v22, %v8323_v19  ;;  %v11287_v52 = vpack.c.bf16 %v8326_v11, %v8325_v18  ;;  %v11290_v1 = vpack.c.bf16 %v8328_v9, %v8327_v34  ;;  %v8337_v54 = vld [vmem:[%s12188_s20 + $0x70] sm:$0xff]  ;;  %v8338_v59 = vld [vmem:[%s12188_s20 + $0x78] sm:$0xff] }
 0xd04   : > { %v8008_v24 = vsel %vm6571_vm3, %v8007_v16, %v8006_v32  ;;  %v11293_v29 = vpack.c.bf16 %v8330_v45, %v8329_v53  ;;  %v11296_v62 = vpack.c.bf16 %v8332_v0, %v8331_v36  ;;  %v11299_v57 = vpack.c.bf16 %v8334_v55, %v8333_v51  ;;  %v9060_v32 = vld [vmem:[%s17094_s12] ss:$0 sm:$0xff] }
 0xd05   : > { %v8010_v5 = vsel %vm6573_vm4, %v8009_v12, %v8008_v24  ;;  %v11302_v31 = vpack.c.bf16 %v8336_v25, %v8335_v35  ;;  %v11305_v16 = vpack.c.bf16 %v8338_v59, %v8337_v54  ;;  %v8339_v53 = vld [vmem:[%s12193_s27] sm:$0x1] }
 0xd06   : > { %v8012_v41 = vsel %vm6575_vm7, %v8011_v23, %v8010_v5 }
 0xd07   : > { %v8014_v33 = vsel %vm6577_vm5, %v8013_v37, %v8012_v41 }
 0xd08   : > { %10664 = vmatmul.mubr.f32.vlgmr.msra.gmra.mrb[232].mxu0 %v8014_v33 }
 0xd09   : > { %10736 = vmatprep.mubr.msk.f32.mxu0 %vm12043_vm1, %v17085_v61  ;;  %11285 = vmatpush3.bf16.msra.mxu0 %v11284_v14 }
 0xd0a   : > { %11286 = vmatprep.subr.bf16.mxu0 %v17088_v43 }
 0xd0d   : > { %11288 = vmatpush3.bf16.msra.mxu0 %v11287_v52 }
 0xd0e   : > { %11289 = vmatprep.subr.bf16.mxu0 %v17088_v43 }
 0xd11   : > { %11291 = vmatpush3.bf16.msra.mxu0 %v11290_v1 }
 0xd12   : > { %11292 = vmatprep.subr.bf16.mxu0 %v17088_v43 }
 0xd15   : > { %11294 = vmatpush3.bf16.msra.mxu0 %v11293_v29 }
 0xd16   : > { %11295 = vmatprep.subr.bf16.mxu0 %v17088_v43 }
 0xd19   : > { %11297 = vmatpush3.bf16.msra.mxu0 %v11296_v62 }
 0xd1a   : > { %11298 = vmatprep.subr.bf16.mxu0 %v17088_v43 }
 0xd1d   : > { %11300 = vmatpush3.bf16.msra.mxu0 %v11299_v57 }
 0xd1e   : > { %11301 = vmatprep.subr.bf16.mxu0 %v17088_v43 }
 0xd21   : > { %11303 = vmatpush3.bf16.msra.mxu0 %v11302_v31 }
 0xd22   : > { %11304 = vmatprep.subr.bf16.mxu0 %v17088_v43 }
 0xd25   : > { %11306 = vmatpush3.bf16.msra.mxu0 %v11305_v16 }
 0xddb   : > { %v8082_v15 = vpop.f32.mrb[232].mxu0 }
 0xddc   : > { %v8083_v50 = vadd.f32 %v9049_v39, %v8082_v15  ;;  %v10665_v42 = vpop.f32.mrb[233].mxu0 }
 0xdde   : > { %10683 = vmatmul.mubr.msk.f32.vlgmr.msra.gmra.mrb[42].mxu1 %vm4729_vm13, %v8083_v50 }
 0xddf   : > { %11273 = vmatpush3.bf16.msra.mxu1 %v11272_v26  ;;  %10701 = vmatprep.mubr.msk.f32.mxu1 %vm12043_vm1, %v17085_v61  ;;  %v9058_v61 = vld [vmem:[%s17093_s5] ss:$0 sm:$0xff]  ;;  %s893_s5 = sand.u32 1, %s12002_s10  }
 0xde0   : > { %11274 = vmatprep.subr.bf16.mxu1 %v17088_v43  ;;  %s894_s2 = scalar_lea.vmem [#allocation2], %s893_s5  ;;  %s8424_s9 = scalar_lea.sflag [#allocation3], %s893_s5 }
 0xde1   : > { %s8436_s6 = sshll.u32 %s894_s2, 4  ;;  %s16620_s6 = int_to_ptr.vmem [resolvable:$true] %s8436_s6 }
 0xde2   : > { %s11948_s12 = scalar_lea.vmem %s16620_s6, 16  ;;  %p11955_p0 = scmp.lt.s32.totalorder %s16620_s6, %s11953_s13 }
 0xde3   : > { %11276 = vmatpush3.bf16.msra.mxu1 %v11275_v58  ;;  %p11949_p11 = scmp.ne.s32.totalorder %s16620_s6, %s11948_s12  ;;  %p11956_p1 = scmp.lt.s32.totalorder %s11954_s14, %s11948_s12 }
 0xde4   : > { %11277 = vmatprep.subr.bf16.mxu1 %v17088_v43 }
 0xde5   : > { %p11950_p12 = pnand %p11949_p11, %p12238_p5  ;;  %p11957_p2 = por %p11956_p1, %p11955_p0 }
 0xde7   : > { %11279 = vmatpush3.bf16.msra.mxu1 %v11278_v10  ;;  %p11951_p13 = pneg %p11950_p12 }
 0xde8   : > { %11280 = vmatprep.subr.bf16.mxu1 %v17088_v43 }
 0xde9   : > { %p11958_p3 = pnand %p11957_p2, %p11951_p13 }
 0xdeb   : > { %11282 = vmatpush3.bf16.msra.mxu1 %v11281_v7 }
 0xeb1   : > { %v8171_v56 = vpop.f32.mrb[42].mxu1 }
 0xeb2   : > { %v8172_v2 = vadd.f32 %v9058_v61, %v8171_v56  ;;  %v10684_v28 = vpop.f32.mrb[43].mxu1 }
 0xeb4   : > { %10702 = vmatmul.mubr.msk.f32.vlgmr.msra.gmra.mrb[44].mxu1 %vm4729_vm13, %v8172_v2 }
 0xf87   : > { %v8259_v12 = vpop.f32.mrb[44].mxu1 }
 0xf88   : > { %v8260_v24 = vadd.f32 %v9060_v32, %v8259_v12  ;;  %v10703_v23 = vpop.f32.mrb[45].mxu1 }
 0xf8a   : > { %v8264_v5 = vrot.slane %v8260_v24, 1  ;;  %v8265_v37 = vrot.slane %v8260_v24, 2  ;;  %v8266_v41 = vrot.slane %v8260_v24, 3  ;;  %v8267_v33 = vrot.slane %v8260_v24, 4 }
 0xf8b   : > { %v8268_v3 = vrot.slane %v8260_v24, 5  ;;  %v8269_v4 = vrot.slane %v8260_v24, 6  ;;  %v8270_v63 = vrot.slane %v8260_v24, 7  ;;  %v8279_v13 = vadd.f32 %v8260_v24, %v16523_v27 }
 0xf8c   : > { %v8280_v47 = vadd.f32 %v8264_v5, %v16515_v40  ;;  %v8281_v39 = vadd.f32 %v8265_v37, %v16517_v21  ;;  %v8282_v43 = vadd.f32 %v8266_v41, %v16519_v46  ;;  %v8283_v15 = vadd.f32 %v8267_v33, %v16521_v20 }
 0xf8d   : > { %v8284_v26 = vadd.f32 %v8268_v3, %v16525_v17  ;;  %v8285_v50 = vadd.f32 %v8269_v4, %v16528_v38  ;;  %v8286_v42 = vadd.f32 %v8270_v63, %v16531_v8  ;;  %v8287_v6 = vsel %vm1132_vm0, %v8279_v13, -inf }
 0xf8e   : > { %v8288_v30 = vsel %vm1132_vm0, %v8280_v47, -inf  ;;  %v8290_v27 = vsel %vm1132_vm0, %v8281_v39, -inf  ;;  %v8291_v40 = vsel %vm1132_vm0, %v8282_v43, -inf  ;;  %v8293_v21 = vsel %vm1132_vm0, %v8283_v15, -inf }
 0xf8f   : > { %v8289_v58 = vmax.f32 %v8287_v6, %v8288_v30  ;;  %v8292_v46 = vmax.f32 %v8290_v27, %v8291_v40  ;;  %v8294_v20 = vsel %vm1132_vm0, %v8284_v26, -inf  ;;  %v8296_v17 = vsel %vm1132_vm0, %v8285_v50, -inf }
 0xf90   : > { %v8295_v48 = vmax.f32 %v8293_v21, %v8294_v20  ;;  %v8297_v38 = vsel %vm1132_vm0, %v8286_v42, -inf  ;;  %vm8410_vm0 = vcmask 155648  }
 0xf91   : > { %v8298_v8 = vmax.f32 %v8296_v17, %v8297_v38  ;;  %v8300_v49 = vmax.f32 %v8292_v46, 0.0  ;;  %v8299_v60 = vmax.f32 %v8289_v58, 0.0 }
 0xf92   : > { %v8301_v10 = vmax.f32 %v8295_v48, 0.0 }
 0xf93   : > { %v8302_v44 = vmax.f32 %v8298_v8, 0.0  ;;  %v8307_v7 = vrot.slane %v8300_v49, 7 }
 0xf94   : > { %v8309_v61 = vrot.slane %v8301_v10, 6 }
 0xf95   : > { %v8308_v56 = vsel %vm6565_vm14, %v8307_v7, %v8299_v60  ;;  %v8311_v2 = vrot.slane %v8302_v44, 5 }
 0xf96   : > { %v8310_v28 = vsel %vm6567_vm15, %v8309_v61, %v8308_v56 }
 0xf97   : > { %v8312_v19 = vsel %vm6569_vm2, %v8311_v2, %v8310_v28 }
 0xf98   : > { %v8314_v22 = vsel %vm4136_vm6, %v8312_v19, 0.0 }
 0xf99   : > { %v8315_v18 = vrot.slane %v8314_v22, 4 }
 0xf9b   : > { %v8316_v14 = vadd.f32 %v8315_v18, %v8314_v22 }
 0xf9d   : > { %v8317_v11 = vrot.slane %v8316_v14, 2 }
 0xf9f   : > { %v8318_v52 = vadd.f32 %v8317_v11, %v8316_v14 }
 0xfa1   : > { %v8319_v34 = vrot.slane %v8318_v52, 1 }
 0xfa3   : > { %v8320_v9 = vadd.f32 %v8319_v34, %v8318_v52 }
 0xfa5   : > { %v8322_v1 = vmul.f32 0.25, %v8320_v9 }
 0xfa7   : > { %10737 = vmatmul.mubr.f32.vlgmr.msra.gmra.mrb[234].mxu0 %v8322_v1 }
0x107a   : > { %v8406_v45 = vpop.f32.mrb[234].mxu0 }
0x107b   : > { %v8407_v29 = vadd.f32 %v8406_v45, %v8339_v53  ;;  %v10738_v36 = vpop.f32.mrb[235].mxu0 }
0x107d   : > { %v8411_v0 = vsel %vm8410_vm0, %v8407_v29, -inf }
0x107e   : > { %8412 = vmax.xlane.f32.xlu0 %v8411_v0 }
0x110b   : > { %v8413_v62 = vpop.xlane.xlu0 %8412 }
0x110c   : > { %v8414_v51 = vsub.f32 %v8407_v29, %v8413_v62 }
0x110e   : > { %v8415_v55 = vmul.f32 1.442695, %v8414_v51 }
0x1110   : > { %11811 = vpow2.f32 %v8415_v55 }
0x111a   : > { %v11812_v57 = vpop.eup %11811 }
0x111b   : > { %v8417_v35 = vsel %vm8410_vm0, %v11812_v57, 0.0 }
0x111c   : > { %8418 = vadd.xlane.f32.xlu0 %v8417_v35 }
0x11a9   : > { %v8419_v25 = vpop.xlane.xlu0 %8418 }
0x11aa   : > { %11813 = vrcp.f32 %v8419_v25 }
0x11b4   : > { %v11814_v31 = vpop.eup %11813 }
0x11b5   : > { %v8421_v54 = vmul.f32 %v11814_v31, %v11812_v57 }
0x11b7   : > { %8422 = vst.msk [vmem:[%s894_s2] sm:$0x1] %vm8410_vm0, %v8421_v54 }
0x11b8   : > { %11961 = shalt.err (!%p11958_p3)
}
0x11b9   : > { %s11962_s2 = scalar_lea.hbm %s16618_s8, 16  ;;  %s11966_s5 = scalar_lea.hbm %s12198_s4, 32 }
0x11ba   : > { %p11963_p4 = scmp.ne.s32.totalorder %s16618_s8, %s11962_s2  ;;  %p11967_p9 = scmp.lt.u32.totalorder %s16618_s8, %s12198_s4 }
0x11bb   : > { %p11968_p10 = scmp.lt.u32.totalorder %s11966_s5, %s11962_s2  ;;  %p11970_p12 = scmp.lt.u32.totalorder %s11962_s2, %s16618_s8 }
0x11bc   : > { %p11964_p7 = pnand %p11963_p4, %p12238_p5 }
0x11bd   : > { %p11969_p11 = por %p11968_p10, %p11967_p9 }
0x11be   : > { %p11965_p8 = pneg %p11964_p7 }
0x11bf   : > { %p11971_p0 = por %p11970_p12, %p11969_p11 }
0x11c1   : > { %p11972_p13 = pnand %p11971_p0, %p11965_p8 }
0x11c3   : > { %11975 = shalt.err (!%p11972_p13)
}
0x11c4   : > { %11676 = dma.vmem_to_hbm [thread:$0]  (%p12238_p5), %s16620_s6, 16, %s16618_s8, %s8424_s9  }
0x11c5 PF: > { %p11682_p1 = scmp.ge.s32.totalorder %s12010_s15, 2  ;;  %s8448_s13 = sand.u32 1, %s11998_s7  }
0x11c6   : > { %s8449_s14 = scalar_lea.sflag [#allocation3], %s8448_s13 }
0x11c7   : > { %p11679_p2 = pnand %p11682_p1, %p12242_p6 }
0x11c9   : > { %11993 = dma.done.wait (!%p11679_p2), %s8449_s14, 16  }
0x11ca   : > { %11995 = vsyncadd (!%p11679_p2), %s8449_s14, 4294967280  ;;  %p69_p3 = scmp.ge.s32.totalorder %s12225_s18, 4   ;;  %s17095_s7 = smov %s12002_s10 }
0x11cb   : > { %s17096_s10 = smov %s12006_s11  ;;  %s17097_s11 = smov %s12236_s26 }
0x11cc   : > { %s17098_s15 = smov %s12225_s18  ;;  %71 = sbr.rel (!%p69_p3) target bundleno = 61 (0x3d), region = 210 }
0x11d3   :  { %8453 = vsyncpa [#allocation3], 1 }
0x11d4   :  { %8455 = vsyncpa [#allocation3 + $0x1], 1 }

</bundles_post_ra>
